<compile_context>
chip_gen: v7x
topology: tpu7x:2x2x1
jax: 0.10.0
libtpu: 0.0.40
codegen_flags: <defaults>
</compile_context>

<pallas_src>
from collections import namedtuple

import numpy as np
import jax
import jax.numpy as jnp
from jax.experimental import pallas as pl
from jax.experimental.pallas import tpu as pltpu

Genotype = namedtuple("Genotype", "normal normal_concat")

# op_name -> (kernel_size, dilation, has_internal_residual)
OP_DEFS = {
    "conv_1x1": (1, 1, False), "conv_3x3": (3, 1, False),
    "conv_5x5": (5, 1, False), "conv_7x7": (7, 1, False),
    "dilconv_3x3": (3, 2, False), "dilconv_5x5": (5, 2, False),
    "dilconv_7x7": (7, 2, False),
    "resconv_1x1": (1, 1, True), "resconv_3x3": (3, 1, True),
    "resconv_5x5": (5, 1, True), "resconv_7x7": (7, 1, True),
    "resdilconv_3x3": (3, 2, True), "resdilconv_5x5": (5, 2, True),
    "resdilconv_7x7": (7, 2, True),
}

GENOTYPE = Genotype(
    normal=[("conv_3x3", 0), ("resconv_3x3", 1), ("dilconv_3x3", 2),
            ("resconv_1x1", 3), ("conv_5x5", 4), ("resdilconv_3x3", 5),
            ("conv_1x1", 6)],
    normal_concat=None,
)

ALPHA = 0.05  # LeakyReLU negative slope


# ---------------------- pltpu.roll availability / sign --------------------- #
_ROLL_SIGN_CACHE = {}


def _roll_sign_or_none(C, S):
    """Probe pltpu.roll once on hardware for this shape.

    Returns +1 if pltpu.roll(x, s) == jnp.roll(x, s), -1 if the shift sign is
    opposite, or None if roll is unusable (kernel then falls back to the
    pad+slice tap path, which is correct but materializes copies)."""
    key = (C, S)
    if key in _ROLL_SIGN_CACHE:
        return _ROLL_SIGN_CACHE[key]

    def probe_kernel(x_ref, o_ref):
        o_ref[...] = pltpu.roll(x_ref[...], 1, 1)

    sign = None
    try:
        ramp = jnp.tile(jnp.arange(S, dtype=jnp.float32)[None, :], (C, 1))
        y = pl.pallas_call(
            probe_kernel,
            out_shape=jax.ShapeDtypeStruct((C, S), jnp.float32))(ramp)
        v = float(jax.device_get(y)[0, 0])
        if v == float(S - 1):
            sign = 1
        elif v == 1.0:
            sign = -1
    except Exception:  # pragma: no cover - safety fallback only
        sign = None
    _ROLL_SIGN_CACHE[key] = sign
    return sign


def _layer_offsets(K, dil):
    cen = (K - 1) // 2
    return [((dy - cen) * dil, (dx - cen) * dil)
            for dy in range(K) for dx in range(K)]


# --------------------------------- builder --------------------------------- #
def build_search_block(op_names, N, C, H, W, images_per_step=None):
    """Builds a jitted forward(params, x_nchw) for a fixed genotype/shape."""
    assert len(op_names) == 7

    # Static per-layer config.  forward() adds the input once for r-branches
    # (layers 1/3/5); ResBlock adds it once more internally.
    layer_cfg = []
    for i, name in enumerate(op_names):
        K, dil, is_res = OP_DEFS[name]
        scale = (1.0 if i in (1, 3, 5) else 0.0) + (1.0 if is_res else 0.0)
        layer_cfg.append(dict(K=K, dil=dil, scale=scale,
                              offsets=_layer_offsets(K, dil)))

    # One fused "unit" per stage: the d/r pair shares the input, so both are
    # computed in one pass with stacked output channels (cout = 2C -> full
    # 8 sublanes per accumulator vreg) over the union of their tap offsets.
    units = []
    for s in range(3):
        ids = (2 * s, 2 * s + 1)
        offs = []
        for lid in ids:
            for o in layer_cfg[lid]["offsets"]:
                if o not in offs:
                    offs.append(o)
        units.append(dict(ids=ids, offsets=tuple(offs)))
    units.append(dict(ids=(6,), offsets=tuple(layer_cfg[6]["offsets"])))

    # Batch packing along the lane axis.  Review rule: keep >= 2 grid steps so
    # v7x's two TensorCores stay busy; only pack when the batch allows it.
    if images_per_step is None:
        images_per_step = 2 if (N % 2 == 0 and N >= 4) else 1
    assert N % images_per_step == 0
    n_steps = N // images_per_step
    P = H * W
    S = images_per_step * P  # lane extent per grid step (multiple of 128 here)

    # Boundary masks, one per distinct non-zero tap offset, stored lane-dense
    # 2-D (n_off, S); tiled per packed image so circular rolls across the
    # image seam are zeroed exactly where the pixel is out of its own image.
    all_offs = []
    for u in units:
        for o in u["offsets"]:
            if o != (0, 0) and o not in all_offs:
                all_offs.append(o)
    off_index = {o: i for i, o in enumerate(all_offs)}
    n_off = max(len(all_offs), 1)
    yy, xx = np.divmod(np.arange(P), W)
    masks_np = np.zeros((n_off, P), np.float32)
    for o, idx in off_index.items():
        dyp, dxp = o
        ok = ((yy + dyp >= 0) & (yy + dyp < H) &
              (xx + dxp >= 0) & (xx + dxp < W))
        masks_np[idx] = ok.astype(np.float32)
    masks = jnp.asarray(np.tile(masks_np, (1, images_per_step)))  # (n_off, S)

    roll_sign = _roll_sign_or_none(C, S)

    # ------------------------------- kernel -------------------------------- #
    def kernel(*refs):
        # refs = (masks, x, [w_unit, b_unit] * 4, w_c5, b_c5, out)
        masks_ref, x_ref = refs[0], refs[1]
        o_ref = refs[-1]
        wb = refs[2:-1]

        x = x_ref[0]                                        # (C, S) float32
        mask_cache = {}

        def tap_mask(off):
            if off not in mask_cache:
                idx = off_index[off]
                mask_cache[off] = masks_ref[idx:idx + 1, :]  # (1, S)
            return mask_cache[off]

        def conv_unit(act, w_ref, b_ref, offsets):
            # Weights are one lane-dense (cout, T*Cin) array, loaded ONCE per
            # unit; (cout, 1) columns are sliced in-register (review item).
            Wu = w_ref[...]
            cout = Wu.shape[0]
            if roll_sign is None:                           # fallback path only
                pad_f = max(abs(dy * W + dx) for (dy, dx) in offsets)
                if pad_f:
                    z = jnp.zeros((act.shape[0], pad_f), jnp.float32)
                    padded = jnp.concatenate([z, act, z], axis=1)
            acc = jnp.zeros((cout, S), jnp.float32)
            for t, (dyp, dxp) in enumerate(offsets):
                sft = dyp * W + dxp                         # flattened shift
                if sft == 0:
                    rows = act
                elif roll_sign is not None:
                    # XLU circular roll; mask zeroes every wrapped /
                    # out-of-image / cross-image-seam position exactly.
                    rows = pltpu.roll(act, (-sft * roll_sign) % S, 1)
                    rows = rows * tap_mask((dyp, dxp))
                else:
                    rows = padded[:, pad_f + sft:pad_f + sft + S]
                    rows = rows * tap_mask((dyp, dxp))
                for ci in range(C):
                    col = t * C + ci
                    # (cout,1) x (1,S) broadcast MAC on the VPU, exact fp32.
                    acc = acc + Wu[:, col:col + 1] * rows[ci:ci + 1, :]
            return acc + b_ref[...]                         # bias (cout, 1)

        def leaky(v):
            return jnp.where(v >= 0, v, ALPHA * v)

        outputs = {}
        cur = x
        for ui, u in enumerate(units):
            w_ref, b_ref = wb[2 * ui], wb[2 * ui + 1]
            res = conv_unit(cur, w_ref, b_ref, u["offsets"])
            for j, lid in enumerate(u["ids"]):
                v = res[j * C:(j + 1) * C, :]
                scale = layer_cfg[lid]["scale"]             # residual bookkeeping
                if scale != 0.0:
                    v = v + scale * cur
                outputs[lid] = leaky(v)
            cur = outputs[u["ids"][-1]]

        # c5: 1x1 conv over concat([d1, d2, d3, r4]) -- accumulate directly
        # from the four source activations (no materialized concat).
        w5 = wb[-2][...]                                    # (C, 4C) lane-dense
        b5 = wb[-1][...]                                    # (C, 1)
        acc = jnp.zeros((C, S), jnp.float32)
        g = 0
        for src_id in (0, 2, 4, 6):
            src = outputs[src_id]
            for ci in range(C):
                acc = acc + w5[:, g:g + 1] * src[ci:ci + 1, :]
                g += 1
        o_ref[0] = (acc + b5).astype(o_ref.dtype)           # (C, S) lane-dense

    # ------------------------------ pallas_call ----------------------------- #
    in_specs = [
        pl.BlockSpec((n_off, S), lambda n: (0, 0)),         # boundary masks
        pl.BlockSpec((1, C, S), lambda n: (n, 0, 0)),       # images of step n
    ]
    for u in units:
        T = len(u["offsets"])
        cout = C * len(u["ids"])
        in_specs.append(pl.BlockSpec((cout, T * C), lambda n: (0, 0)))
        in_specs.append(pl.BlockSpec((cout, 1), lambda n: (0, 0)))
    in_specs.append(pl.BlockSpec((C, 4 * C), lambda n: (0, 0)))   # c5 weight
    in_specs.append(pl.BlockSpec((C, 1), lambda n: (0, 0)))       # c5 bias

    call = pl.pallas_call(
        kernel,
        out_shape=jax.ShapeDtypeStruct((n_steps, C, S), jnp.float32),
        grid_spec=pltpu.PrefetchScalarGridSpec(
            num_scalar_prefetch=0,
            grid=(n_steps,),
            in_specs=in_specs,
            out_specs=pl.BlockSpec((1, C, S), lambda n: (n, 0, 0)),
        ),
        compiler_params=pltpu.CompilerParams(
            dimension_semantics=("parallel",)),
    )

    # ---------------------- host-side weight assembly ----------------------- #
    def assemble_unit_weights(params, u):
        ids, offsets = u["ids"], u["offsets"]
        row_blocks = []
        for lid in ids:
            cfg = layer_cfg[lid]
            K, dil = cfg["K"], cfg["dil"]
            cen = (K - 1) // 2
            w = params[f"w{lid}"]                           # (K, K, Cin, Cout)
            own = {((dy - cen) * dil, (dx - cen) * dil): (dy, dx)
                   for dy in range(K) for dx in range(K)}
            blocks = []
            for o in offsets:
                if o in own:
                    dy, dx = own[o]
                    blocks.append(jnp.transpose(w[dy, dx]))  # (Cout, Cin)
                else:
                    blocks.append(jnp.zeros((C, C), jnp.float32))
            row_blocks.append(jnp.concatenate(blocks, axis=1))   # (C, T*C)
        Wu = jnp.concatenate(row_blocks, axis=0).astype(jnp.float32)
        bu = jnp.concatenate([params[f"b{lid}"] for lid in ids])
        return Wu, bu.reshape(-1, 1).astype(jnp.float32)

    def forward(params, x_nchw):
        xs = x_nchw.astype(jnp.float32).reshape(n_steps, images_per_step, C, P)
        xs = jnp.transpose(xs, (0, 2, 1, 3)).reshape(n_steps, C, S)
        args = [masks, xs]
        for u in units:
            Wu, bu = assemble_unit_weights(params, u)
            args += [Wu, bu]
        args.append(jnp.transpose(params["wc5"][0, 0]).astype(jnp.float32))
        args.append(params["bc5"].reshape(-1, 1).astype(jnp.float32))
        out = call(*args)
        out = out.reshape(n_steps, C, images_per_step, P)
        out = jnp.transpose(out, (0, 2, 1, 3)).reshape(N, C, H, W)
        return out

    return jax.jit(forward)


# ------------------------------ parameters --------------------------------- #
def init_params(key, channel, op_names):
    params = {}
    keys = jax.random.split(key, 2 * len(op_names) + 2)
    for i, name in enumerate(op_names):
        K, _, _ = OP_DEFS[name]
        params[f"w{i}"] = 0.1 * jax.random.normal(
            keys[2 * i], (K, K, channel, channel), jnp.float32)   # HWIO
        params[f"b{i}"] = 0.05 * jax.random.normal(
            keys[2 * i + 1], (channel,), jnp.float32)
    params["wc5"] = 0.1 * jax.random.normal(
        keys[-2], (1, 1, 4 * channel, channel), jnp.float32)
    params["bc5"] = 0.05 * jax.random.normal(keys[-1], (channel,), jnp.float32)
    return params


# ----------------------- pure-JAX reference check ------------------------- #
def _ref_conv(x, w_hwio, b, dil):
    K = w_hwio.shape[0]
    pad = (K - 1) // 2 * dil
    y = jax.lax.conv_general_dilated(
        x, w_hwio, window_strides=(1, 1),
        padding=((pad, pad), (pad, pad)), rhs_dilation=(dil, dil),
        dimension_numbers=("NHWC", "HWIO", "NHWC"),
        precision=jax.lax.Precision.HIGHEST)
    return y + b.reshape(1, 1, 1, -1)


def reference_forward(params, x_nchw, op_names):
    x = jnp.transpose(x_nchw, (0, 2, 3, 1)).astype(jnp.float32)
    act = lambda v: jnp.where(v >= 0, v, ALPHA * v)

    def op(idx, inp):
        _, dil, is_res = OP_DEFS[op_names[idx]]
        y = _ref_conv(inp, params[f"w{idx}"], params[f"b{idx}"], dil)
        return y + inp if is_res else y

    d1 = act(op(0, x))
    r1 = act(op(1, x) + x)
    d2 = act(op(2, r1))
    r2 = act(op(3, r1) + r1)
    d3 = act(op(4, r2))
    r3 = act(op(5, r2) + r2)
    r4 = act(op(6, r3))
    cat = jnp.concatenate([d1, d2, d3, r4], axis=-1)
    out = _ref_conv(cat, params["wc5"], params["bc5"], 1)
    return jnp.transpose(out, (0, 3, 1, 2))


if __name__ == "__main__":
    batch, channel, H, W = 2, 4, 16, 16
    op_names = tuple(n for n, _ in GENOTYPE.normal)

    key = jax.random.PRNGKey(0)
    kp, kx = jax.random.split(key)
    params = init_params(kp, channel, op_names)
    x = jax.random.normal(kx, (batch, channel, H, W), jnp.float32)   # NCHW

    fwd = build_search_block(op_names, batch, channel, H, W)
    out = jax.block_until_ready(fwd(params, x))
    ref = jax.block_until_ready(reference_forward(params, x, op_names))
    assert out.shape == (batch, channel, H, W)
    np.testing.assert_allclose(np.asarray(out), np.asarray(ref),
                               rtol=2e-3, atol=2e-3)

    # Also exercise the lane-packed path (2 images / grid step, N >= 4) that
    # the review asked for, and check it against the same reference.
    x4 = jax.random.normal(jax.random.PRNGKey(1),
                           (4, channel, H, W), jnp.float32)
    fwd4 = build_search_block(op_names, 4, channel, H, W)  # images_per_step=2
    out4 = jax.block_until_ready(fwd4(params, x4))
    ref4 = jax.block_until_ready(reference_forward(params, x4, op_names))
    np.testing.assert_allclose(np.asarray(out4), np.asarray(ref4),
                               rtol=2e-3, atol=2e-3)

    print("KERNEL_OK")
</pallas_src>

<mosaic_0001>
module attributes {stable_mosaic.version = 11 : i64} {
  func.func @probe_kernel(%arg0: memref<4x256xf32, #tpu.memory_space<vmem>>, %arg1: memref<4x256xf32, #tpu.memory_space<vmem>>) attributes {dimension_semantics = [], scalar_prefetch = 0 : i64, scratch_operands = 0 : i64, tpu.core_type = #tpu.core_type<tc>} {
    %c0 = arith.constant 0 : index
    %c0_0 = arith.constant 0 : index
    %0 = vector.load %arg0[%c0, %c0_0] : memref<4x256xf32, #tpu.memory_space<vmem>>, vector<4x256xf32>
    %c1_i32 = arith.constant 1 : i32
    %1 = tpu.dynamic_rotate %0 by %c1_i32 dim 1 : vector<4x256xf32>, i32 -> vector<4x256xf32>
    %c0_1 = arith.constant 0 : index
    %c0_2 = arith.constant 0 : index
    %2 = vector.load %arg1[%c0_1, %c0_2] : memref<4x256xf32, #tpu.memory_space<vmem>>, vector<4x256xf32>
    tpu.vector_store %arg1[%c0_1, %c0_2], %1 {strides = array<i32>} : memref<4x256xf32, #tpu.memory_space<vmem>>, vector<4x256xf32>,
    return
  }
}

module attributes {stable_mosaic.version = 11 : i64} {
  func.func @kernel(%arg0: i32, %arg1: memref<24x256xf32, #tpu.memory_space<vmem>>, %arg2: memref<1x4x256xf32, #tpu.memory_space<vmem>>, %arg3: memref<8x36xf32, #tpu.memory_space<vmem>>, %arg4: memref<8x1xf32, #tpu.memory_space<vmem>>, %arg5: memref<8x36xf32, #tpu.memory_space<vmem>>, %arg6: memref<8x1xf32, #tpu.memory_space<vmem>>, %arg7: memref<8x100xf32, #tpu.memory_space<vmem>>, %arg8: memref<8x1xf32, #tpu.memory_space<vmem>>, %arg9: memref<4x4xf32, #tpu.memory_space<vmem>>, %arg10: memref<4x1xf32, #tpu.memory_space<vmem>>, %arg11: memref<4x16xf32, #tpu.memory_space<vmem>>, %arg12: memref<4x1xf32, #tpu.memory_space<vmem>>, %arg13: memref<1x4x256xf32, #tpu.memory_space<vmem>>) attributes {dimension_semantics = [#tpu.dimension_semantics<parallel>], iteration_bounds = array<i64: 2>, scalar_prefetch = 0 : i64, scratch_operands = 0 : i64, tpu.core_type = #tpu.core_type<tc>, window_params = [{pipeline_mode = #tpu.pipeline_mode<synchronous>, transform_indices = @transform_0, window_bounds = array<i64: 24, 256>}, {transform_indices = @transform_1, window_bounds = array<i64: 1, 4, 256>}, {pipeline_mode = #tpu.pipeline_mode<synchronous>, transform_indices = @transform_2, window_bounds = array<i64: 8, 36>}, {pipeline_mode = #tpu.pipeline_mode<synchronous>, transform_indices = @transform_3, window_bounds = array<i64: 8, 1>}, {pipeline_mode = #tpu.pipeline_mode<synchronous>, transform_indices = @transform_4, window_bounds = array<i64: 8, 36>}, {pipeline_mode = #tpu.pipeline_mode<synchronous>, transform_indices = @transform_5, window_bounds = array<i64: 8, 1>}, {pipeline_mode = #tpu.pipeline_mode<synchronous>, transform_indices = @transform_6, window_bounds = array<i64: 8, 100>}, {pipeline_mode = #tpu.pipeline_mode<synchronous>, transform_indices = @transform_7, window_bounds = array<i64: 8, 1>}, {pipeline_mode = #tpu.pipeline_mode<synchronous>, transform_indices = @transform_8, window_bounds = array<i64: 4, 4>}, {pipeline_mode = #tpu.pipeline_mode<synchronous>, transform_indices = @transform_9, window_bounds = array<i64: 4, 1>}, {pipeline_mode = #tpu.pipeline_mode<synchronous>, transform_indices = @transform_10, window_bounds = array<i64: 4, 16>}, {pipeline_mode = #tpu.pipeline_mode<synchronous>, transform_indices = @transform_11, window_bounds = array<i64: 4, 1>}, {transform_indices = @transform_12, window_bounds = array<i64: 1, 4, 256>}]} {
    %c0 = arith.constant 0 : index
    %c0_0 = arith.constant 0 : index
    %c0_1 = arith.constant 0 : index
    %0 = vector.load %arg2[%c0, %c0_0, %c0_1] : memref<1x4x256xf32, #tpu.memory_space<vmem>>, vector<1x4x256xf32>
    %1 = vector.shape_cast %0 : vector<1x4x256xf32> to vector<4x256xf32>
    %c0_2 = arith.constant 0 : index
    %c0_3 = arith.constant 0 : index
    %2 = vector.load %arg3[%c0_2, %c0_3] : memref<8x36xf32, #tpu.memory_space<vmem>>, vector<8x36xf32>
    %cst = arith.constant 0.000000e+00 : f32
    %3 = vector.broadcast %cst : f32 to vector<4x17xf32>
    %4 = tpu.concatenate %3, %1, %3 in 1 : vector<4x17xf32>, vector<4x256xf32>, vector<4x17xf32> -> vector<4x290xf32>
    %cst_4 = arith.constant 0.000000e+00 : f32
    %5 = vector.broadcast %cst_4 : f32 to vector<8x256xf32>
    %6 = vector.extract_strided_slice %4 {offsets = [0, 0], sizes = [4, 256], strides = [1, 1]} : vector<4x290xf32> to vector<4x256xf32>
    %c0_5 = arith.constant 0 : index
    %c0_6 = arith.constant 0 : index
    %7 = vector.load %arg1[%c0_5, %c0_6] : memref<24x256xf32, #tpu.memory_space<vmem>>, vector<1x256xf32>
    %8 = vector.broadcast %7 : vector<1x256xf32> to vector<4x256xf32>
    %9 = arith.mulf %6, %8 : vector<4x256xf32>
    %10 = vector.extract_strided_slice %2 {offsets = [0, 0], sizes = [8, 1], strides = [1, 1]} : vector<8x36xf32> to vector<8x1xf32>
    %11 = vector.extract_strided_slice %9 {offsets = [0, 0], sizes = [1, 256], strides = [1, 1]} : vector<4x256xf32> to vector<1x256xf32>
    %12 = vector.broadcast %10 : vector<8x1xf32> to vector<8x256xf32>
    %13 = vector.broadcast %11 : vector<1x256xf32> to vector<8x256xf32>
    %14 = arith.mulf %12, %13 : vector<8x256xf32>
    %15 = arith.addf %5, %14 : vector<8x256xf32>
    %16 = vector.extract_strided_slice %2 {offsets = [0, 1], sizes = [8, 1], strides = [1, 1]} : vector<8x36xf32> to vector<8x1xf32>
    %17 = vector.extract_strided_slice %9 {offsets = [1, 0], sizes = [1, 256], strides = [1, 1]} : vector<4x256xf32> to vector<1x256xf32>
    %18 = vector.broadcast %16 : vector<8x1xf32> to vector<8x256xf32>
    %19 = vector.broadcast %17 : vector<1x256xf32> to vector<8x256xf32>
    %20 = arith.mulf %18, %19 : vector<8x256xf32>
    %21 = arith.addf %15, %20 : vector<8x256xf32>
    %22 = vector.extract_strided_slice %2 {offsets = [0, 2], sizes = [8, 1], strides = [1, 1]} : vector<8x36xf32> to vector<8x1xf32>
    %23 = vector.extract_strided_slice %9 {offsets = [2, 0], sizes = [1, 256], strides = [1, 1]} : vector<4x256xf32> to vector<1x256xf32>
    %24 = vector.broadcast %22 : vector<8x1xf32> to vector<8x256xf32>
    %25 = vector.broadcast %23 : vector<1x256xf32> to vector<8x256xf32>
    %26 = arith.mulf %24, %25 : vector<8x256xf32>
    %27 = arith.addf %21, %26 : vector<8x256xf32>
    %28 = vector.extract_strided_slice %2 {offsets = [0, 3], sizes = [8, 1], strides = [1, 1]} : vector<8x36xf32> to vector<8x1xf32>
    %29 = vector.extract_strided_slice %9 {offsets = [3, 0], sizes = [1, 256], strides = [1, 1]} : vector<4x256xf32> to vector<1x256xf32>
    %30 = vector.broadcast %28 : vector<8x1xf32> to vector<8x256xf32>
    %31 = vector.broadcast %29 : vector<1x256xf32> to vector<8x256xf32>
    %32 = arith.mulf %30, %31 : vector<8x256xf32>
    %33 = arith.addf %27, %32 : vector<8x256xf32>
    %34 = vector.extract_strided_slice %4 {offsets = [0, 1], sizes = [4, 256], strides = [1, 1]} : vector<4x290xf32> to vector<4x256xf32>
    %c1 = arith.constant 1 : index
    %c0_7 = arith.constant 0 : index
    %35 = vector.load %arg1[%c1, %c0_7] : memref<24x256xf32, #tpu.memory_space<vmem>>, vector<1x256xf32>
    %36 = vector.broadcast %35 : vector<1x256xf32> to vector<4x256xf32>
    %37 = arith.mulf %34, %36 : vector<4x256xf32>
    %38 = vector.extract_strided_slice %2 {offsets = [0, 4], sizes = [8, 1], strides = [1, 1]} : vector<8x36xf32> to vector<8x1xf32>
    %39 = vector.extract_strided_slice %37 {offsets = [0, 0], sizes = [1, 256], strides = [1, 1]} : vector<4x256xf32> to vector<1x256xf32>
    %40 = vector.broadcast %38 : vector<8x1xf32> to vector<8x256xf32>
    %41 = vector.broadcast %39 : vector<1x256xf32> to vector<8x256xf32>
    %42 = arith.mulf %40, %41 : vector<8x256xf32>
    %43 = arith.addf %33, %42 : vector<8x256xf32>
    %44 = vector.extract_strided_slice %2 {offsets = [0, 5], sizes = [8, 1], strides = [1, 1]} : vector<8x36xf32> to vector<8x1xf32>
    %45 = vector.extract_strided_slice %37 {offsets = [1, 0], sizes = [1, 256], strides = [1, 1]} : vector<4x256xf32> to vector<1x256xf32>
    %46 = vector.broadcast %44 : vector<8x1xf32> to vector<8x256xf32>
    %47 = vector.broadcast %45 : vector<1x256xf32> to vector<8x256xf32>
    %48 = arith.mulf %46, %47 : vector<8x256xf32>
    %49 = arith.addf %43, %48 : vector<8x256xf32>
    %50 = vector.extract_strided_slice %2 {offsets = [0, 6], sizes = [8, 1], strides = [1, 1]} : vector<8x36xf32> to vector<8x1xf32>
    %51 = vector.extract_strided_slice %37 {offsets = [2, 0], sizes = [1, 256], strides = [1, 1]} : vector<4x256xf32> to vector<1x256xf32>
    %52 = vector.broadcast %50 : vector<8x1xf32> to vector<8x256xf32>
    %53 = vector.broadcast %51 : vector<1x256xf32> to vector<8x256xf32>
    %54 = arith.mulf %52, %53 : vector<8x256xf32>
    %55 = arith.addf %49, %54 : vector<8x256xf32>
    %56 = vector.extract_strided_slice %2 {offsets = [0, 7], sizes = [8, 1], strides = [1, 1]} : vector<8x36xf32> to vector<8x1xf32>
    %57 = vector.extract_strided_slice %37 {offsets = [3, 0], sizes = [1, 256], strides = [1, 1]} : vector<4x256xf32> to vector<1x256xf32>
    %58 = vector.broadcast %56 : vector<8x1xf32> to vector<8x256xf32>
    %59 = vector.broadcast %57 : vector<1x256xf32> to vector<8x256xf32>
    %60 = arith.mulf %58, %59 : vector<8x256xf32>
    %61 = arith.addf %55, %60 : vector<8x256xf32>
    %62 = vector.extract_strided_slice %4 {offsets = [0, 2], sizes = [4, 256], strides = [1, 1]} : vector<4x290xf32> to vector<4x256xf32>
    %c2 = arith.constant 2 : index
    %c0_8 = arith.constant 0 : index
    %63 = vector.load %arg1[%c2, %c0_8] : memref<24x256xf32, #tpu.memory_space<vmem>>, vector<1x256xf32>
    %64 = vector.broadcast %63 : vector<1x256xf32> to vector<4x256xf32>
    %65 = arith.mulf %62, %64 : vector<4x256xf32>
    %66 = vector.extract_strided_slice %2 {offsets = [0, 8], sizes = [8, 1], strides = [1, 1]} : vector<8x36xf32> to vector<8x1xf32>
    %67 = vector.extract_strided_slice %65 {offsets = [0, 0], sizes = [1, 256], strides = [1, 1]} : vector<4x256xf32> to vector<1x256xf32>
    %68 = vector.broadcast %66 : vector<8x1xf32> to vector<8x256xf32>
    %69 = vector.broadcast %67 : vector<1x256xf32> to vector<8x256xf32>
    %70 = arith.mulf %68, %69 : vector<8x256xf32>
    %71 = arith.addf %61, %70 : vector<8x256xf32>
    %72 = vector.extract_strided_slice %2 {offsets = [0, 9], sizes = [8, 1], strides = [1, 1]} : vector<8x36xf32> to vector<8x1xf32>
    %73 = vector.extract_strided_slice %65 {offsets = [1, 0], sizes = [1, 256], strides = [1, 1]} : vector<4x256xf32> to vector<1x256xf32>
    %74 = vector.broadcast %72 : vector<8x1xf32> to vector<8x256xf32>
    %75 = vector.broadcast %73 : vector<1x256xf32> to vector<8x256xf32>
    %76 = arith.mulf %74, %75 : vector<8x256xf32>
    %77 = arith.addf %71, %76 : vector<8x256xf32>
    %78 = vector.extract_strided_slice %2 {offsets = [0, 10], sizes = [8, 1], strides = [1, 1]} : vector<8x36xf32> to vector<8x1xf32>
    %79 = vector.extract_strided_slice %65 {offsets = [2, 0], sizes = [1, 256], strides = [1, 1]} : vector<4x256xf32> to vector<1x256xf32>
    %80 = vector.broadcast %78 : vector<8x1xf32> to vector<8x256xf32>
    %81 = vector.broadcast %79 : vector<1x256xf32> to vector<8x256xf32>
    %82 = arith.mulf %80, %81 : vector<8x256xf32>
    %83 = arith.addf %77, %82 : vector<8x256xf32>
    %84 = vector.extract_strided_slice %2 {offsets = [0, 11], sizes = [8, 1], strides = [1, 1]} : vector<8x36xf32> to vector<8x1xf32>
    %85 = vector.extract_strided_slice %65 {offsets = [3, 0], sizes = [1, 256], strides = [1, 1]} : vector<4x256xf32> to vector<1x256xf32>
    %86 = vector.broadcast %84 : vector<8x1xf32> to vector<8x256xf32>
    %87 = vector.broadcast %85 : vector<1x256xf32> to vector<8x256xf32>
    %88 = arith.mulf %86, %87 : vector<8x256xf32>
    %89 = arith.addf %83, %88 : vector<8x256xf32>
    %90 = vector.extract_strided_slice %4 {offsets = [0, 16], sizes = [4, 256], strides = [1, 1]} : vector<4x290xf32> to vector<4x256xf32>
    %c3 = arith.constant 3 : index
    %c0_9 = arith.constant 0 : index
    %91 = vector.load %arg1[%c3, %c0_9] : memref<24x256xf32, #tpu.memory_space<vmem>>, vector<1x256xf32>
    %92 = vector.broadcast %91 : vector<1x256xf32> to vector<4x256xf32>
    %93 = arith.mulf %90, %92 : vector<4x256xf32>
    %94 = vector.extract_strided_slice %2 {offsets = [0, 12], sizes = [8, 1], strides = [1, 1]} : vector<8x36xf32> to vector<8x1xf32>
    %95 = vector.extract_strided_slice %93 {offsets = [0, 0], sizes = [1, 256], strides = [1, 1]} : vector<4x256xf32> to vector<1x256xf32>
    %96 = vector.broadcast %94 : vector<8x1xf32> to vector<8x256xf32>
    %97 = vector.broadcast %95 : vector<1x256xf32> to vector<8x256xf32>
    %98 = arith.mulf %96, %97 : vector<8x256xf32>
    %99 = arith.addf %89, %98 : vector<8x256xf32>
    %100 = vector.extract_strided_slice %2 {offsets = [0, 13], sizes = [8, 1], strides = [1, 1]} : vector<8x36xf32> to vector<8x1xf32>
    %101 = vector.extract_strided_slice %93 {offsets = [1, 0], sizes = [1, 256], strides = [1, 1]} : vector<4x256xf32> to vector<1x256xf32>
    %102 = vector.broadcast %100 : vector<8x1xf32> to vector<8x256xf32>
    %103 = vector.broadcast %101 : vector<1x256xf32> to vector<8x256xf32>
    %104 = arith.mulf %102, %103 : vector<8x256xf32>
    %105 = arith.addf %99, %104 : vector<8x256xf32>
    %106 = vector.extract_strided_slice %2 {offsets = [0, 14], sizes = [8, 1], strides = [1, 1]} : vector<8x36xf32> to vector<8x1xf32>
    %107 = vector.extract_strided_slice %93 {offsets = [2, 0], sizes = [1, 256], strides = [1, 1]} : vector<4x256xf32> to vector<1x256xf32>
    %108 = vector.broadcast %106 : vector<8x1xf32> to vector<8x256xf32>
    %109 = vector.broadcast %107 : vector<1x256xf32> to vector<8x256xf32>
    %110 = arith.mulf %108, %109 : vector<8x256xf32>
    %111 = arith.addf %105, %110 : vector<8x256xf32>
    %112 = vector.extract_strided_slice %2 {offsets = [0, 15], sizes = [8, 1], strides = [1, 1]} : vector<8x36xf32> to vector<8x1xf32>
    %113 = vector.extract_strided_slice %93 {offsets = [3, 0], sizes = [1, 256], strides = [1, 1]} : vector<4x256xf32> to vector<1x256xf32>
    %114 = vector.broadcast %112 : vector<8x1xf32> to vector<8x256xf32>
    %115 = vector.broadcast %113 : vector<1x256xf32> to vector<8x256xf32>
    %116 = arith.mulf %114, %115 : vector<8x256xf32>
    %117 = arith.addf %111, %116 : vector<8x256xf32>
    %118 = vector.extract_strided_slice %2 {offsets = [0, 16], sizes = [8, 1], strides = [1, 1]} : vector<8x36xf32> to vector<8x1xf32>
    %119 = vector.extract_strided_slice %1 {offsets = [0, 0], sizes = [1, 256], strides = [1, 1]} : vector<4x256xf32> to vector<1x256xf32>
    %120 = vector.broadcast %118 : vector<8x1xf32> to vector<8x256xf32>
    %121 = vector.broadcast %119 : vector<1x256xf32> to vector<8x256xf32>
    %122 = arith.mulf %120, %121 : vector<8x256xf32>
    %123 = arith.addf %117, %122 : vector<8x256xf32>
    %124 = vector.extract_strided_slice %2 {offsets = [0, 17], sizes = [8, 1], strides = [1, 1]} : vector<8x36xf32> to vector<8x1xf32>
    %125 = vector.extract_strided_slice %1 {offsets = [1, 0], sizes = [1, 256], strides = [1, 1]} : vector<4x256xf32> to vector<1x256xf32>
    %126 = vector.broadcast %124 : vector<8x1xf32> to vector<8x256xf32>
    %127 = vector.broadcast %125 : vector<1x256xf32> to vector<8x256xf32>
    %128 = arith.mulf %126, %127 : vector<8x256xf32>
    %129 = arith.addf %123, %128 : vector<8x256xf32>
    %130 = vector.extract_strided_slice %2 {offsets = [0, 18], sizes = [8, 1], strides = [1, 1]} : vector<8x36xf32> to vector<8x1xf32>
    %131 = vector.extract_strided_slice %1 {offsets = [2, 0], sizes = [1, 256], strides = [1, 1]} : vector<4x256xf32> to vector<1x256xf32>
    %132 = vector.broadcast %130 : vector<8x1xf32> to vector<8x256xf32>
    %133 = vector.broadcast %131 : vector<1x256xf32> to vector<8x256xf32>
    %134 = arith.mulf %132, %133 : vector<8x256xf32>
    %135 = arith.addf %129, %134 : vector<8x256xf32>
    %136 = vector.extract_strided_slice %2 {offsets = [0, 19], sizes = [8, 1], strides = [1, 1]} : vector<8x36xf32> to vector<8x1xf32>
    %137 = vector.extract_strided_slice %1 {offsets = [3, 0], sizes = [1, 256], strides = [1, 1]} : vector<4x256xf32> to vector<1x256xf32>
    %138 = vector.broadcast %136 : vector<8x1xf32> to vector<8x256xf32>
    %139 = vector.broadcast %137 : vector<1x256xf32> to vector<8x256xf32>
    %140 = arith.mulf %138, %139 : vector<8x256xf32>
    %141 = arith.addf %135, %140 : vector<8x256xf32>
    %142 = vector.extract_strided_slice %4 {offsets = [0, 18], sizes = [4, 256], strides = [1, 1]} : vector<4x290xf32> to vector<4x256xf32>
    %c4 = arith.constant 4 : index
    %c0_10 = arith.constant 0 : index
    %143 = vector.load %arg1[%c4, %c0_10] : memref<24x256xf32, #tpu.memory_space<vmem>>, vector<1x256xf32>
    %144 = vector.broadcast %143 : vector<1x256xf32> to vector<4x256xf32>
    %145 = arith.mulf %142, %144 : vector<4x256xf32>
    %146 = vector.extract_strided_slice %2 {offsets = [0, 20], sizes = [8, 1], strides = [1, 1]} : vector<8x36xf32> to vector<8x1xf32>
    %147 = vector.extract_strided_slice %145 {offsets = [0, 0], sizes = [1, 256], strides = [1, 1]} : vector<4x256xf32> to vector<1x256xf32>
    %148 = vector.broadcast %146 : vector<8x1xf32> to vector<8x256xf32>
    %149 = vector.broadcast %147 : vector<1x256xf32> to vector<8x256xf32>
    %150 = arith.mulf %148, %149 : vector<8x256xf32>
    %151 = arith.addf %141, %150 : vector<8x256xf32>
    %152 = vector.extract_strided_slice %2 {offsets = [0, 21], sizes = [8, 1], strides = [1, 1]} : vector<8x36xf32> to vector<8x1xf32>
    %153 = vector.extract_strided_slice %145 {offsets = [1, 0], sizes = [1, 256], strides = [1, 1]} : vector<4x256xf32> to vector<1x256xf32>
    %154 = vector.broadcast %152 : vector<8x1xf32> to vector<8x256xf32>
    %155 = vector.broadcast %153 : vector<1x256xf32> to vector<8x256xf32>
    %156 = arith.mulf %154, %155 : vector<8x256xf32>
    %157 = arith.addf %151, %156 : vector<8x256xf32>
    %158 = vector.extract_strided_slice %2 {offsets = [0, 22], sizes = [8, 1], strides = [1, 1]} : vector<8x36xf32> to vector<8x1xf32>
    %159 = vector.extract_strided_slice %145 {offsets = [2, 0], sizes = [1, 256], strides = [1, 1]} : vector<4x256xf32> to vector<1x256xf32>
    %160 = vector.broadcast %158 : vector<8x1xf32> to vector<8x256xf32>
    %161 = vector.broadcast %159 : vector<1x256xf32> to vector<8x256xf32>
    %162 = arith.mulf %160, %161 : vector<8x256xf32>
    %163 = arith.addf %157, %162 : vector<8x256xf32>
    %164 = vector.extract_strided_slice %2 {offsets = [0, 23], sizes = [8, 1], strides = [1, 1]} : vector<8x36xf32> to vector<8x1xf32>
    %165 = vector.extract_strided_slice %145 {offsets = [3, 0], sizes = [1, 256], strides = [1, 1]} : vector<4x256xf32> to vector<1x256xf32>
    %166 = vector.broadcast %164 : vector<8x1xf32> to vector<8x256xf32>
    %167 = vector.broadcast %165 : vector<1x256xf32> to vector<8x256xf32>
    %168 = arith.mulf %166, %167 : vector<8x256xf32>
    %169 = arith.addf %163, %168 : vector<8x256xf32>
    %170 = vector.extract_strided_slice %4 {offsets = [0, 32], sizes = [4, 256], strides = [1, 1]} : vector<4x290xf32> to vector<4x256xf32>
    %c5 = arith.constant 5 : index
    %c0_11 = arith.constant 0 : index
    %171 = vector.load %arg1[%c5, %c0_11] : memref<24x256xf32, #tpu.memory_space<vmem>>, vector<1x256xf32>
    %172 = vector.broadcast %171 : vector<1x256xf32> to vector<4x256xf32>
    %173 = arith.mulf %170, %172 : vector<4x256xf32>
    %174 = vector.extract_strided_slice %2 {offsets = [0, 24], sizes = [8, 1], strides = [1, 1]} : vector<8x36xf32> to vector<8x1xf32>
    %175 = vector.extract_strided_slice %173 {offsets = [0, 0], sizes = [1, 256], strides = [1, 1]} : vector<4x256xf32> to vector<1x256xf32>
    %176 = vector.broadcast %174 : vector<8x1xf32> to vector<8x256xf32>
    %177 = vector.broadcast %175 : vector<1x256xf32> to vector<8x256xf32>
    %178 = arith.mulf %176, %177 : vector<8x256xf32>
    %179 = arith.addf %169, %178 : vector<8x256xf32>
    %180 = vector.extract_strided_slice %2 {offsets = [0, 25], sizes = [8, 1], strides = [1, 1]} : vector<8x36xf32> to vector<8x1xf32>
    %181 = vector.extract_strided_slice %173 {offsets = [1, 0], sizes = [1, 256], strides = [1, 1]} : vector<4x256xf32> to vector<1x256xf32>
    %182 = vector.broadcast %180 : vector<8x1xf32> to vector<8x256xf32>
    %183 = vector.broadcast %181 : vector<1x256xf32> to vector<8x256xf32>
    %184 = arith.mulf %182, %183 : vector<8x256xf32>
    %185 = arith.addf %179, %184 : vector<8x256xf32>
    %186 = vector.extract_strided_slice %2 {offsets = [0, 26], sizes = [8, 1], strides = [1, 1]} : vector<8x36xf32> to vector<8x1xf32>
    %187 = vector.extract_strided_slice %173 {offsets = [2, 0], sizes = [1, 256], strides = [1, 1]} : vector<4x256xf32> to vector<1x256xf32>
    %188 = vector.broadcast %186 : vector<8x1xf32> to vector<8x256xf32>
    %189 = vector.broadcast %187 : vector<1x256xf32> to vector<8x256xf32>
    %190 = arith.mulf %188, %189 : vector<8x256xf32>
    %191 = arith.addf %185, %190 : vector<8x256xf32>
    %192 = vector.extract_strided_slice %2 {offsets = [0, 27], sizes = [8, 1], strides = [1, 1]} : vector<8x36xf32> to vector<8x1xf32>
    %193 = vector.extract_strided_slice %173 {offsets = [3, 0], sizes = [1, 256], strides = [1, 1]} : vector<4x256xf32> to vector<1x256xf32>
    %194 = vector.broadcast %192 : vector<8x1xf32> to vector<8x256xf32>
    %195 = vector.broadcast %193 : vector<1x256xf32> to vector<8x256xf32>
    %196 = arith.mulf %194, %195 : vector<8x256xf32>
    %197 = arith.addf %191, %196 : vector<8x256xf32>
    %198 = vector.extract_strided_slice %4 {offsets = [0, 33], sizes = [4, 256], strides = [1, 1]} : vector<4x290xf32> to vector<4x256xf32>
    %c6 = arith.constant 6 : index
    %c0_12 = arith.constant 0 : index
    %199 = vector.load %arg1[%c6, %c0_12] : memref<24x256xf32, #tpu.memory_space<vmem>>, vector<1x256xf32>
    %200 = vector.broadcast %199 : vector<1x256xf32> to vector<4x256xf32>
    %201 = arith.mulf %198, %200 : vector<4x256xf32>
    %202 = vector.extract_strided_slice %2 {offsets = [0, 28], sizes = [8, 1], strides = [1, 1]} : vector<8x36xf32> to vector<8x1xf32>
    %203 = vector.extract_strided_slice %201 {offsets = [0, 0], sizes = [1, 256], strides = [1, 1]} : vector<4x256xf32> to vector<1x256xf32>
    %204 = vector.broadcast %202 : vector<8x1xf32> to vector<8x256xf32>
    %205 = vector.broadcast %203 : vector<1x256xf32> to vector<8x256xf32>
    %206 = arith.mulf %204, %205 : vector<8x256xf32>
    %207 = arith.addf %197, %206 : vector<8x256xf32>
    %208 = vector.extract_strided_slice %2 {offsets = [0, 29], sizes = [8, 1], strides = [1, 1]} : vector<8x36xf32> to vector<8x1xf32>
    %209 = vector.extract_strided_slice %201 {offsets = [1, 0], sizes = [1, 256], strides = [1, 1]} : vector<4x256xf32> to vector<1x256xf32>
    %210 = vector.broadcast %208 : vector<8x1xf32> to vector<8x256xf32>
    %211 = vector.broadcast %209 : vector<1x256xf32> to vector<8x256xf32>
    %212 = arith.mulf %210, %211 : vector<8x256xf32>
    %213 = arith.addf %207, %212 : vector<8x256xf32>
    %214 = vector.extract_strided_slice %2 {offsets = [0, 30], sizes = [8, 1], strides = [1, 1]} : vector<8x36xf32> to vector<8x1xf32>
    %215 = vector.extract_strided_slice %201 {offsets = [2, 0], sizes = [1, 256], strides = [1, 1]} : vector<4x256xf32> to vector<1x256xf32>
    %216 = vector.broadcast %214 : vector<8x1xf32> to vector<8x256xf32>
    %217 = vector.broadcast %215 : vector<1x256xf32> to vector<8x256xf32>
    %218 = arith.mulf %216, %217 : vector<8x256xf32>
    %219 = arith.addf %213, %218 : vector<8x256xf32>
    %220 = vector.extract_strided_slice %2 {offsets = [0, 31], sizes = [8, 1], strides = [1, 1]} : vector<8x36xf32> to vector<8x1xf32>
    %221 = vector.extract_strided_slice %201 {offsets = [3, 0], sizes = [1, 256], strides = [1, 1]} : vector<4x256xf32> to vector<1x256xf32>
    %222 = vector.broadcast %220 : vector<8x1xf32> to vector<8x256xf32>
    %223 = vector.broadcast %221 : vector<1x256xf32> to vector<8x256xf32>
    %224 = arith.mulf %222, %223 : vector<8x256xf32>
    %225 = arith.addf %219, %224 : vector<8x256xf32>
    %226 = vector.extract_strided_slice %4 {offsets = [0, 34], sizes = [4, 256], strides = [1, 1]} : vector<4x290xf32> to vector<4x256xf32>
    %c7 = arith.constant 7 : index
    %c0_13 = arith.constant 0 : index
    %227 = vector.load %arg1[%c7, %c0_13] : memref<24x256xf32, #tpu.memory_space<vmem>>, vector<1x256xf32>
    %228 = vector.broadcast %227 : vector<1x256xf32> to vector<4x256xf32>
    %229 = arith.mulf %226, %228 : vector<4x256xf32>
    %230 = vector.extract_strided_slice %2 {offsets = [0, 32], sizes = [8, 1], strides = [1, 1]} : vector<8x36xf32> to vector<8x1xf32>
    %231 = vector.extract_strided_slice %229 {offsets = [0, 0], sizes = [1, 256], strides = [1, 1]} : vector<4x256xf32> to vector<1x256xf32>
    %232 = vector.broadcast %230 : vector<8x1xf32> to vector<8x256xf32>
    %233 = vector.broadcast %231 : vector<1x256xf32> to vector<8x256xf32>
    %234 = arith.mulf %232, %233 : vector<8x256xf32>
    %235 = arith.addf %225, %234 : vector<8x256xf32>
    %236 = vector.extract_strided_slice %2 {offsets = [0, 33], sizes = [8, 1], strides = [1, 1]} : vector<8x36xf32> to vector<8x1xf32>
    %237 = vector.extract_strided_slice %229 {offsets = [1, 0], sizes = [1, 256], strides = [1, 1]} : vector<4x256xf32> to vector<1x256xf32>
    %238 = vector.broadcast %236 : vector<8x1xf32> to vector<8x256xf32>
    %239 = vector.broadcast %237 : vector<1x256xf32> to vector<8x256xf32>
    %240 = arith.mulf %238, %239 : vector<8x256xf32>
    %241 = arith.addf %235, %240 : vector<8x256xf32>
    %242 = vector.extract_strided_slice %2 {offsets = [0, 34], sizes = [8, 1], strides = [1, 1]} : vector<8x36xf32> to vector<8x1xf32>
    %243 = vector.extract_strided_slice %229 {offsets = [2, 0], sizes = [1, 256], strides = [1, 1]} : vector<4x256xf32> to vector<1x256xf32>
    %244 = vector.broadcast %242 : vector<8x1xf32> to vector<8x256xf32>
    %245 = vector.broadcast %243 : vector<1x256xf32> to vector<8x256xf32>
    %246 = arith.mulf %244, %245 : vector<8x256xf32>
    %247 = arith.addf %241, %246 : vector<8x256xf32>
    %248 = vector.extract_strided_slice %2 {offsets = [0, 35], sizes = [8, 1], strides = [1, 1]} : vector<8x36xf32> to vector<8x1xf32>
    %249 = vector.extract_strided_slice %229 {offsets = [3, 0], sizes = [1, 256], strides = [1, 1]} : vector<4x256xf32> to vector<1x256xf32>
    %250 = vector.broadcast %248 : vector<8x1xf32> to vector<8x256xf32>
    %251 = vector.broadcast %249 : vector<1x256xf32> to vector<8x256xf32>
    %252 = arith.mulf %250, %251 : vector<8x256xf32>
    %253 = arith.addf %247, %252 : vector<8x256xf32>
    %c0_14 = arith.constant 0 : index
    %c0_15 = arith.constant 0 : index
    %254 = vector.load %arg4[%c0_14, %c0_15] : memref<8x1xf32, #tpu.memory_space<vmem>>, vector<8x1xf32>
    %255 = vector.broadcast %254 : vector<8x1xf32> to vector<8x256xf32>
    %256 = arith.addf %253, %255 : vector<8x256xf32>
    %257 = vector.extract_strided_slice %256 {offsets = [0, 0], sizes = [4, 256], strides = [1, 1]} : vector<8x256xf32> to vector<4x256xf32>
    %cst_16 = arith.constant 0.000000e+00 : f32
    %258 = vector.broadcast %cst_16 : f32 to vector<4x256xf32>
    %259 = arith.cmpf oge, %257, %258 : vector<4x256xf32>
    %cst_17 = arith.constant 5.000000e-02 : f32
    %260 = vector.broadcast %cst_17 : f32 to vector<4x256xf32>
    %261 = arith.mulf %260, %257 : vector<4x256xf32>
    %262 = arith.select %259, %257, %261 : vector<4x256xi1>, vector<4x256xf32>
    %263 = vector.extract_strided_slice %256 {offsets = [4, 0], sizes = [4, 256], strides = [1, 1]} : vector<8x256xf32> to vector<4x256xf32>
    %cst_18 = arith.constant 2.000000e+00 : f32
    %264 = vector.broadcast %cst_18 : f32 to vector<4x256xf32>
    %265 = arith.mulf %264, %1 : vector<4x256xf32>
    %266 = arith.addf %263, %265 : vector<4x256xf32>
    %cst_19 = arith.constant 0.000000e+00 : f32
    %267 = vector.broadcast %cst_19 : f32 to vector<4x256xf32>
    %268 = arith.cmpf oge, %266, %267 : vector<4x256xf32>
    %cst_20 = arith.constant 5.000000e-02 : f32
    %269 = vector.broadcast %cst_20 : f32 to vector<4x256xf32>
    %270 = arith.mulf %269, %266 : vector<4x256xf32>
    %271 = arith.select %268, %266, %270 : vector<4x256xi1>, vector<4x256xf32>
    %c0_21 = arith.constant 0 : index
    %c0_22 = arith.constant 0 : index
    %272 = vector.load %arg5[%c0_21, %c0_22] : memref<8x36xf32, #tpu.memory_space<vmem>>, vector<8x36xf32>
    %cst_23 = arith.constant 0.000000e+00 : f32
    %273 = vector.broadcast %cst_23 : f32 to vector<4x34xf32>
    %274 = tpu.concatenate %273, %271, %273 in 1 : vector<4x34xf32>, vector<4x256xf32>, vector<4x34xf32> -> vector<4x324xf32>
    %cst_24 = arith.constant 0.000000e+00 : f32
    %275 = vector.broadcast %cst_24 : f32 to vector<8x256xf32>
    %276 = vector.extract_strided_slice %274 {offsets = [0, 0], sizes = [4, 256], strides = [1, 1]} : vector<4x324xf32> to vector<4x256xf32>
    %c8 = arith.constant 8 : index
    %c0_25 = arith.constant 0 : index
    %277 = vector.load %arg1[%c8, %c0_25] : memref<24x256xf32, #tpu.memory_space<vmem>>, vector<1x256xf32>
    %278 = vector.broadcast %277 : vector<1x256xf32> to vector<4x256xf32>
    %279 = arith.mulf %276, %278 : vector<4x256xf32>
    %280 = vector.extract_strided_slice %272 {offsets = [0, 0], sizes = [8, 1], strides = [1, 1]} : vector<8x36xf32> to vector<8x1xf32>
    %281 = vector.extract_strided_slice %279 {offsets = [0, 0], sizes = [1, 256], strides = [1, 1]} : vector<4x256xf32> to vector<1x256xf32>
    %282 = vector.broadcast %280 : vector<8x1xf32> to vector<8x256xf32>
    %283 = vector.broadcast %281 : vector<1x256xf32> to vector<8x256xf32>
    %284 = arith.mulf %282, %283 : vector<8x256xf32>
    %285 = arith.addf %275, %284 : vector<8x256xf32>
    %286 = vector.extract_strided_slice %272 {offsets = [0, 1], sizes = [8, 1], strides = [1, 1]} : vector<8x36xf32> to vector<8x1xf32>
    %287 = vector.extract_strided_slice %279 {offsets = [1, 0], sizes = [1, 256], strides = [1, 1]} : vector<4x256xf32> to vector<1x256xf32>
    %288 = vector.broadcast %286 : vector<8x1xf32> to vector<8x256xf32>
    %289 = vector.broadcast %287 : vector<1x256xf32> to vector<8x256xf32>
    %290 = arith.mulf %288, %289 : vector<8x256xf32>
    %291 = arith.addf %285, %290 : vector<8x256xf32>
    %292 = vector.extract_strided_slice %272 {offsets = [0, 2], sizes = [8, 1], strides = [1, 1]} : vector<8x36xf32> to vector<8x1xf32>
    %293 = vector.extract_strided_slice %279 {offsets = [2, 0], sizes = [1, 256], strides = [1, 1]} : vector<4x256xf32> to vector<1x256xf32>
    %294 = vector.broadcast %292 : vector<8x1xf32> to vector<8x256xf32>
    %295 = vector.broadcast %293 : vector<1x256xf32> to vector<8x256xf32>
    %296 = arith.mulf %294, %295 : vector<8x256xf32>
    %297 = arith.addf %291, %296 : vector<8x256xf32>
    %298 = vector.extract_strided_slice %272 {offsets = [0, 3], sizes = [8, 1], strides = [1, 1]} : vector<8x36xf32> to vector<8x1xf32>
    %299 = vector.extract_strided_slice %279 {offsets = [3, 0], sizes = [1, 256], strides = [1, 1]} : vector<4x256xf32> to vector<1x256xf32>
    %300 = vector.broadcast %298 : vector<8x1xf32> to vector<8x256xf32>
    %301 = vector.broadcast %299 : vector<1x256xf32> to vector<8x256xf32>
    %302 = arith.mulf %300, %301 : vector<8x256xf32>
    %303 = arith.addf %297, %302 : vector<8x256xf32>
    %304 = vector.extract_strided_slice %274 {offsets = [0, 2], sizes = [4, 256], strides = [1, 1]} : vector<4x324xf32> to vector<4x256xf32>
    %c9 = arith.constant 9 : index
    %c0_26 = arith.constant 0 : index
    %305 = vector.load %arg1[%c9, %c0_26] : memref<24x256xf32, #tpu.memory_space<vmem>>, vector<1x256xf32>
    %306 = vector.broadcast %305 : vector<1x256xf32> to vector<4x256xf32>
    %307 = arith.mulf %304, %306 : vector<4x256xf32>
    %308 = vector.extract_strided_slice %272 {offsets = [0, 4], sizes = [8, 1], strides = [1, 1]} : vector<8x36xf32> to vector<8x1xf32>
    %309 = vector.extract_strided_slice %307 {offsets = [0, 0], sizes = [1, 256], strides = [1, 1]} : vector<4x256xf32> to vector<1x256xf32>
    %310 = vector.broadcast %308 : vector<8x1xf32> to vector<8x256xf32>
    %311 = vector.broadcast %309 : vector<1x256xf32> to vector<8x256xf32>
    %312 = arith.mulf %310, %311 : vector<8x256xf32>
    %313 = arith.addf %303, %312 : vector<8x256xf32>
    %314 = vector.extract_strided_slice %272 {offsets = [0, 5], sizes = [8, 1], strides = [1, 1]} : vector<8x36xf32> to vector<8x1xf32>
    %315 = vector.extract_strided_slice %307 {offsets = [1, 0], sizes = [1, 256], strides = [1, 1]} : vector<4x256xf32> to vector<1x256xf32>
    %316 = vector.broadcast %314 : vector<8x1xf32> to vector<8x256xf32>
    %317 = vector.broadcast %315 : vector<1x256xf32> to vector<8x256xf32>
    %318 = arith.mulf %316, %317 : vector<8x256xf32>
    %319 = arith.addf %313, %318 : vector<8x256xf32>
    %320 = vector.extract_strided_slice %272 {offsets = [0, 6], sizes = [8, 1], strides = [1, 1]} : vector<8x36xf32> to vector<8x1xf32>
    %321 = vector.extract_strided_slice %307 {offsets = [2, 0], sizes = [1, 256], strides = [1, 1]} : vector<4x256xf32> to vector<1x256xf32>
    %322 = vector.broadcast %320 : vector<8x1xf32> to vector<8x256xf32>
    %323 = vector.broadcast %321 : vector<1x256xf32> to vector<8x256xf32>
    %324 = arith.mulf %322, %323 : vector<8x256xf32>
    %325 = arith.addf %319, %324 : vector<8x256xf32>
    %326 = vector.extract_strided_slice %272 {offsets = [0, 7], sizes = [8, 1], strides = [1, 1]} : vector<8x36xf32> to vector<8x1xf32>
    %327 = vector.extract_strided_slice %307 {offsets = [3, 0], sizes = [1, 256], strides = [1, 1]} : vector<4x256xf32> to vector<1x256xf32>
    %328 = vector.broadcast %326 : vector<8x1xf32> to vector<8x256xf32>
    %329 = vector.broadcast %327 : vector<1x256xf32> to vector<8x256xf32>
    %330 = arith.mulf %328, %329 : vector<8x256xf32>
    %331 = arith.addf %325, %330 : vector<8x256xf32>
    %332 = vector.extract_strided_slice %274 {offsets = [0, 4], sizes = [4, 256], strides = [1, 1]} : vector<4x324xf32> to vector<4x256xf32>
    %c10 = arith.constant 10 : index
    %c0_27 = arith.constant 0 : index
    %333 = vector.load %arg1[%c10, %c0_27] : memref<24x256xf32, #tpu.memory_space<vmem>>, vector<1x256xf32>
    %334 = vector.broadcast %333 : vector<1x256xf32> to vector<4x256xf32>
    %335 = arith.mulf %332, %334 : vector<4x256xf32>
    %336 = vector.extract_strided_slice %272 {offsets = [0, 8], sizes = [8, 1], strides = [1, 1]} : vector<8x36xf32> to vector<8x1xf32>
    %337 = vector.extract_strided_slice %335 {offsets = [0, 0], sizes = [1, 256], strides = [1, 1]} : vector<4x256xf32> to vector<1x256xf32>
    %338 = vector.broadcast %336 : vector<8x1xf32> to vector<8x256xf32>
    %339 = vector.broadcast %337 : vector<1x256xf32> to vector<8x256xf32>
    %340 = arith.mulf %338, %339 : vector<8x256xf32>
    %341 = arith.addf %331, %340 : vector<8x256xf32>
    %342 = vector.extract_strided_slice %272 {offsets = [0, 9], sizes = [8, 1], strides = [1, 1]} : vector<8x36xf32> to vector<8x1xf32>
    %343 = vector.extract_strided_slice %335 {offsets = [1, 0], sizes = [1, 256], strides = [1, 1]} : vector<4x256xf32> to vector<1x256xf32>
    %344 = vector.broadcast %342 : vector<8x1xf32> to vector<8x256xf32>
    %345 = vector.broadcast %343 : vector<1x256xf32> to vector<8x256xf32>
    %346 = arith.mulf %344, %345 : vector<8x256xf32>
    %347 = arith.addf %341, %346 : vector<8x256xf32>
    %348 = vector.extract_strided_slice %272 {offsets = [0, 10], sizes = [8, 1], strides = [1, 1]} : vector<8x36xf32> to vector<8x1xf32>
    %349 = vector.extract_strided_slice %335 {offsets = [2, 0], sizes = [1, 256], strides = [1, 1]} : vector<4x256xf32> to vector<1x256xf32>
    %350 = vector.broadcast %348 : vector<8x1xf32> to vector<8x256xf32>
    %351 = vector.broadcast %349 : vector<1x256xf32> to vector<8x256xf32>
    %352 = arith.mulf %350, %351 : vector<8x256xf32>
    %353 = arith.addf %347, %352 : vector<8x256xf32>
    %354 = vector.extract_strided_slice %272 {offsets = [0, 11], sizes = [8, 1], strides = [1, 1]} : vector<8x36xf32> to vector<8x1xf32>
    %355 = vector.extract_strided_slice %335 {offsets = [3, 0], sizes = [1, 256], strides = [1, 1]} : vector<4x256xf32> to vector<1x256xf32>
    %356 = vector.broadcast %354 : vector<8x1xf32> to vector<8x256xf32>
    %357 = vector.broadcast %355 : vector<1x256xf32> to vector<8x256xf32>
    %358 = arith.mulf %356, %357 : vector<8x256xf32>
    %359 = arith.addf %353, %358 : vector<8x256xf32>
    %360 = vector.extract_strided_slice %274 {offsets = [0, 32], sizes = [4, 256], strides = [1, 1]} : vector<4x324xf32> to vector<4x256xf32>
    %c11 = arith.constant 11 : index
    %c0_28 = arith.constant 0 : index
    %361 = vector.load %arg1[%c11, %c0_28] : memref<24x256xf32, #tpu.memory_space<vmem>>, vector<1x256xf32>
    %362 = vector.broadcast %361 : vector<1x256xf32> to vector<4x256xf32>
    %363 = arith.mulf %360, %362 : vector<4x256xf32>
    %364 = vector.extract_strided_slice %272 {offsets = [0, 12], sizes = [8, 1], strides = [1, 1]} : vector<8x36xf32> to vector<8x1xf32>
    %365 = vector.extract_strided_slice %363 {offsets = [0, 0], sizes = [1, 256], strides = [1, 1]} : vector<4x256xf32> to vector<1x256xf32>
    %366 = vector.broadcast %364 : vector<8x1xf32> to vector<8x256xf32>
    %367 = vector.broadcast %365 : vector<1x256xf32> to vector<8x256xf32>
    %368 = arith.mulf %366, %367 : vector<8x256xf32>
    %369 = arith.addf %359, %368 : vector<8x256xf32>
    %370 = vector.extract_strided_slice %272 {offsets = [0, 13], sizes = [8, 1], strides = [1, 1]} : vector<8x36xf32> to vector<8x1xf32>
    %371 = vector.extract_strided_slice %363 {offsets = [1, 0], sizes = [1, 256], strides = [1, 1]} : vector<4x256xf32> to vector<1x256xf32>
    %372 = vector.broadcast %370 : vector<8x1xf32> to vector<8x256xf32>
    %373 = vector.broadcast %371 : vector<1x256xf32> to vector<8x256xf32>
    %374 = arith.mulf %372, %373 : vector<8x256xf32>
    %375 = arith.addf %369, %374 : vector<8x256xf32>
    %376 = vector.extract_strided_slice %272 {offsets = [0, 14], sizes = [8, 1], strides = [1, 1]} : vector<8x36xf32> to vector<8x1xf32>
    %377 = vector.extract_strided_slice %363 {offsets = [2, 0], sizes = [1, 256], strides = [1, 1]} : vector<4x256xf32> to vector<1x256xf32>
    %378 = vector.broadcast %376 : vector<8x1xf32> to vector<8x256xf32>
    %379 = vector.broadcast %377 : vector<1x256xf32> to vector<8x256xf32>
    %380 = arith.mulf %378, %379 : vector<8x256xf32>
    %381 = arith.addf %375, %380 : vector<8x256xf32>
    %382 = vector.extract_strided_slice %272 {offsets = [0, 15], sizes = [8, 1], strides = [1, 1]} : vector<8x36xf32> to vector<8x1xf32>
    %383 = vector.extract_strided_slice %363 {offsets = [3, 0], sizes = [1, 256], strides = [1, 1]} : vector<4x256xf32> to vector<1x256xf32>
    %384 = vector.broadcast %382 : vector<8x1xf32> to vector<8x256xf32>
    %385 = vector.broadcast %383 : vector<1x256xf32> to vector<8x256xf32>
    %386 = arith.mulf %384, %385 : vector<8x256xf32>
    %387 = arith.addf %381, %386 : vector<8x256xf32>
    %388 = vector.extract_strided_slice %272 {offsets = [0, 16], sizes = [8, 1], strides = [1, 1]} : vector<8x36xf32> to vector<8x1xf32>
    %389 = vector.extract_strided_slice %271 {offsets = [0, 0], sizes = [1, 256], strides = [1, 1]} : vector<4x256xf32> to vector<1x256xf32>
    %390 = vector.broadcast %388 : vector<8x1xf32> to vector<8x256xf32>
    %391 = vector.broadcast %389 : vector<1x256xf32> to vector<8x256xf32>
    %392 = arith.mulf %390, %391 : vector<8x256xf32>
    %393 = arith.addf %387, %392 : vector<8x256xf32>
    %394 = vector.extract_strided_slice %272 {offsets = [0, 17], sizes = [8, 1], strides = [1, 1]} : vector<8x36xf32> to vector<8x1xf32>
    %395 = vector.extract_strided_slice %271 {offsets = [1, 0], sizes = [1, 256], strides = [1, 1]} : vector<4x256xf32> to vector<1x256xf32>
    %396 = vector.broadcast %394 : vector<8x1xf32> to vector<8x256xf32>
    %397 = vector.broadcast %395 : vector<1x256xf32> to vector<8x256xf32>
    %398 = arith.mulf %396, %397 : vector<8x256xf32>
    %399 = arith.addf %393, %398 : vector<8x256xf32>
    %400 = vector.extract_strided_slice %272 {offsets = [0, 18], sizes = [8, 1], strides = [1, 1]} : vector<8x36xf32> to vector<8x1xf32>
    %401 = vector.extract_strided_slice %271 {offsets = [2, 0], sizes = [1, 256], strides = [1, 1]} : vector<4x256xf32> to vector<1x256xf32>
    %402 = vector.broadcast %400 : vector<8x1xf32> to vector<8x256xf32>
    %403 = vector.broadcast %401 : vector<1x256xf32> to vector<8x256xf32>
    %404 = arith.mulf %402, %403 : vector<8x256xf32>
    %405 = arith.addf %399, %404 : vector<8x256xf32>
    %406 = vector.extract_strided_slice %272 {offsets = [0, 19], sizes = [8, 1], strides = [1, 1]} : vector<8x36xf32> to vector<8x1xf32>
    %407 = vector.extract_strided_slice %271 {offsets = [3, 0], sizes = [1, 256], strides = [1, 1]} : vector<4x256xf32> to vector<1x256xf32>
    %408 = vector.broadcast %406 : vector<8x1xf32> to vector<8x256xf32>
    %409 = vector.broadcast %407 : vector<1x256xf32> to vector<8x256xf32>
    %410 = arith.mulf %408, %409 : vector<8x256xf32>
    %411 = arith.addf %405, %410 : vector<8x256xf32>
    %412 = vector.extract_strided_slice %274 {offsets = [0, 36], sizes = [4, 256], strides = [1, 1]} : vector<4x324xf32> to vector<4x256xf32>
    %c12 = arith.constant 12 : index
    %c0_29 = arith.constant 0 : index
    %413 = vector.load %arg1[%c12, %c0_29] : memref<24x256xf32, #tpu.memory_space<vmem>>, vector<1x256xf32>
    %414 = vector.broadcast %413 : vector<1x256xf32> to vector<4x256xf32>
    %415 = arith.mulf %412, %414 : vector<4x256xf32>
    %416 = vector.extract_strided_slice %272 {offsets = [0, 20], sizes = [8, 1], strides = [1, 1]} : vector<8x36xf32> to vector<8x1xf32>
    %417 = vector.extract_strided_slice %415 {offsets = [0, 0], sizes = [1, 256], strides = [1, 1]} : vector<4x256xf32> to vector<1x256xf32>
    %418 = vector.broadcast %416 : vector<8x1xf32> to vector<8x256xf32>
    %419 = vector.broadcast %417 : vector<1x256xf32> to vector<8x256xf32>
    %420 = arith.mulf %418, %419 : vector<8x256xf32>
    %421 = arith.addf %411, %420 : vector<8x256xf32>
    %422 = vector.extract_strided_slice %272 {offsets = [0, 21], sizes = [8, 1], strides = [1, 1]} : vector<8x36xf32> to vector<8x1xf32>
    %423 = vector.extract_strided_slice %415 {offsets = [1, 0], sizes = [1, 256], strides = [1, 1]} : vector<4x256xf32> to vector<1x256xf32>
    %424 = vector.broadcast %422 : vector<8x1xf32> to vector<8x256xf32>
    %425 = vector.broadcast %423 : vector<1x256xf32> to vector<8x256xf32>
    %426 = arith.mulf %424, %425 : vector<8x256xf32>
    %427 = arith.addf %421, %426 : vector<8x256xf32>
    %428 = vector.extract_strided_slice %272 {offsets = [0, 22], sizes = [8, 1], strides = [1, 1]} : vector<8x36xf32> to vector<8x1xf32>
    %429 = vector.extract_strided_slice %415 {offsets = [2, 0], sizes = [1, 256], strides = [1, 1]} : vector<4x256xf32> to vector<1x256xf32>
    %430 = vector.broadcast %428 : vector<8x1xf32> to vector<8x256xf32>
    %431 = vector.broadcast %429 : vector<1x256xf32> to vector<8x256xf32>
    %432 = arith.mulf %430, %431 : vector<8x256xf32>
    %433 = arith.addf %427, %432 : vector<8x256xf32>
    %434 = vector.extract_strided_slice %272 {offsets = [0, 23], sizes = [8, 1], strides = [1, 1]} : vector<8x36xf32> to vector<8x1xf32>
    %435 = vector.extract_strided_slice %415 {offsets = [3, 0], sizes = [1, 256], strides = [1, 1]} : vector<4x256xf32> to vector<1x256xf32>
    %436 = vector.broadcast %434 : vector<8x1xf32> to vector<8x256xf32>
    %437 = vector.broadcast %435 : vector<1x256xf32> to vector<8x256xf32>
    %438 = arith.mulf %436, %437 : vector<8x256xf32>
    %439 = arith.addf %433, %438 : vector<8x256xf32>
    %440 = vector.extract_strided_slice %274 {offsets = [0, 64], sizes = [4, 256], strides = [1, 1]} : vector<4x324xf32> to vector<4x256xf32>
    %c13 = arith.constant 13 : index
    %c0_30 = arith.constant 0 : index
    %441 = vector.load %arg1[%c13, %c0_30] : memref<24x256xf32, #tpu.memory_space<vmem>>, vector<1x256xf32>
    %442 = vector.broadcast %441 : vector<1x256xf32> to vector<4x256xf32>
    %443 = arith.mulf %440, %442 : vector<4x256xf32>
    %444 = vector.extract_strided_slice %272 {offsets = [0, 24], sizes = [8, 1], strides = [1, 1]} : vector<8x36xf32> to vector<8x1xf32>
    %445 = vector.extract_strided_slice %443 {offsets = [0, 0], sizes = [1, 256], strides = [1, 1]} : vector<4x256xf32> to vector<1x256xf32>
    %446 = vector.broadcast %444 : vector<8x1xf32> to vector<8x256xf32>
    %447 = vector.broadcast %445 : vector<1x256xf32> to vector<8x256xf32>
    %448 = arith.mulf %446, %447 : vector<8x256xf32>
    %449 = arith.addf %439, %448 : vector<8x256xf32>
    %450 = vector.extract_strided_slice %272 {offsets = [0, 25], sizes = [8, 1], strides = [1, 1]} : vector<8x36xf32> to vector<8x1xf32>
    %451 = vector.extract_strided_slice %443 {offsets = [1, 0], sizes = [1, 256], strides = [1, 1]} : vector<4x256xf32> to vector<1x256xf32>
    %452 = vector.broadcast %450 : vector<8x1xf32> to vector<8x256xf32>
    %453 = vector.broadcast %451 : vector<1x256xf32> to vector<8x256xf32>
    %454 = arith.mulf %452, %453 : vector<8x256xf32>
    %455 = arith.addf %449, %454 : vector<8x256xf32>
    %456 = vector.extract_strided_slice %272 {offsets = [0, 26], sizes = [8, 1], strides = [1, 1]} : vector<8x36xf32> to vector<8x1xf32>
    %457 = vector.extract_strided_slice %443 {offsets = [2, 0], sizes = [1, 256], strides = [1, 1]} : vector<4x256xf32> to vector<1x256xf32>
    %458 = vector.broadcast %456 : vector<8x1xf32> to vector<8x256xf32>
    %459 = vector.broadcast %457 : vector<1x256xf32> to vector<8x256xf32>
    %460 = arith.mulf %458, %459 : vector<8x256xf32>
    %461 = arith.addf %455, %460 : vector<8x256xf32>
    %462 = vector.extract_strided_slice %272 {offsets = [0, 27], sizes = [8, 1], strides = [1, 1]} : vector<8x36xf32> to vector<8x1xf32>
    %463 = vector.extract_strided_slice %443 {offsets = [3, 0], sizes = [1, 256], strides = [1, 1]} : vector<4x256xf32> to vector<1x256xf32>
    %464 = vector.broadcast %462 : vector<8x1xf32> to vector<8x256xf32>
    %465 = vector.broadcast %463 : vector<1x256xf32> to vector<8x256xf32>
    %466 = arith.mulf %464, %465 : vector<8x256xf32>
    %467 = arith.addf %461, %466 : vector<8x256xf32>
    %468 = vector.extract_strided_slice %274 {offsets = [0, 66], sizes = [4, 256], strides = [1, 1]} : vector<4x324xf32> to vector<4x256xf32>
    %c14 = arith.constant 14 : index
    %c0_31 = arith.constant 0 : index
    %469 = vector.load %arg1[%c14, %c0_31] : memref<24x256xf32, #tpu.memory_space<vmem>>, vector<1x256xf32>
    %470 = vector.broadcast %469 : vector<1x256xf32> to vector<4x256xf32>
    %471 = arith.mulf %468, %470 : vector<4x256xf32>
    %472 = vector.extract_strided_slice %272 {offsets = [0, 28], sizes = [8, 1], strides = [1, 1]} : vector<8x36xf32> to vector<8x1xf32>
    %473 = vector.extract_strided_slice %471 {offsets = [0, 0], sizes = [1, 256], strides = [1, 1]} : vector<4x256xf32> to vector<1x256xf32>
    %474 = vector.broadcast %472 : vector<8x1xf32> to vector<8x256xf32>
    %475 = vector.broadcast %473 : vector<1x256xf32> to vector<8x256xf32>
    %476 = arith.mulf %474, %475 : vector<8x256xf32>
    %477 = arith.addf %467, %476 : vector<8x256xf32>
    %478 = vector.extract_strided_slice %272 {offsets = [0, 29], sizes = [8, 1], strides = [1, 1]} : vector<8x36xf32> to vector<8x1xf32>
    %479 = vector.extract_strided_slice %471 {offsets = [1, 0], sizes = [1, 256], strides = [1, 1]} : vector<4x256xf32> to vector<1x256xf32>
    %480 = vector.broadcast %478 : vector<8x1xf32> to vector<8x256xf32>
    %481 = vector.broadcast %479 : vector<1x256xf32> to vector<8x256xf32>
    %482 = arith.mulf %480, %481 : vector<8x256xf32>
    %483 = arith.addf %477, %482 : vector<8x256xf32>
    %484 = vector.extract_strided_slice %272 {offsets = [0, 30], sizes = [8, 1], strides = [1, 1]} : vector<8x36xf32> to vector<8x1xf32>
    %485 = vector.extract_strided_slice %471 {offsets = [2, 0], sizes = [1, 256], strides = [1, 1]} : vector<4x256xf32> to vector<1x256xf32>
    %486 = vector.broadcast %484 : vector<8x1xf32> to vector<8x256xf32>
    %487 = vector.broadcast %485 : vector<1x256xf32> to vector<8x256xf32>
    %488 = arith.mulf %486, %487 : vector<8x256xf32>
    %489 = arith.addf %483, %488 : vector<8x256xf32>
    %490 = vector.extract_strided_slice %272 {offsets = [0, 31], sizes = [8, 1], strides = [1, 1]} : vector<8x36xf32> to vector<8x1xf32>
    %491 = vector.extract_strided_slice %471 {offsets = [3, 0], sizes = [1, 256], strides = [1, 1]} : vector<4x256xf32> to vector<1x256xf32>
    %492 = vector.broadcast %490 : vector<8x1xf32> to vector<8x256xf32>
    %493 = vector.broadcast %491 : vector<1x256xf32> to vector<8x256xf32>
    %494 = arith.mulf %492, %493 : vector<8x256xf32>
    %495 = arith.addf %489, %494 : vector<8x256xf32>
    %496 = vector.extract_strided_slice %274 {offsets = [0, 68], sizes = [4, 256], strides = [1, 1]} : vector<4x324xf32> to vector<4x256xf32>
    %c15 = arith.constant 15 : index
    %c0_32 = arith.constant 0 : index
    %497 = vector.load %arg1[%c15, %c0_32] : memref<24x256xf32, #tpu.memory_space<vmem>>, vector<1x256xf32>
    %498 = vector.broadcast %497 : vector<1x256xf32> to vector<4x256xf32>
    %499 = arith.mulf %496, %498 : vector<4x256xf32>
    %500 = vector.extract_strided_slice %272 {offsets = [0, 32], sizes = [8, 1], strides = [1, 1]} : vector<8x36xf32> to vector<8x1xf32>
    %501 = vector.extract_strided_slice %499 {offsets = [0, 0], sizes = [1, 256], strides = [1, 1]} : vector<4x256xf32> to vector<1x256xf32>
    %502 = vector.broadcast %500 : vector<8x1xf32> to vector<8x256xf32>
    %503 = vector.broadcast %501 : vector<1x256xf32> to vector<8x256xf32>
    %504 = arith.mulf %502, %503 : vector<8x256xf32>
    %505 = arith.addf %495, %504 : vector<8x256xf32>
    %506 = vector.extract_strided_slice %272 {offsets = [0, 33], sizes = [8, 1], strides = [1, 1]} : vector<8x36xf32> to vector<8x1xf32>
    %507 = vector.extract_strided_slice %499 {offsets = [1, 0], sizes = [1, 256], strides = [1, 1]} : vector<4x256xf32> to vector<1x256xf32>
    %508 = vector.broadcast %506 : vector<8x1xf32> to vector<8x256xf32>
    %509 = vector.broadcast %507 : vector<1x256xf32> to vector<8x256xf32>
    %510 = arith.mulf %508, %509 : vector<8x256xf32>
    %511 = arith.addf %505, %510 : vector<8x256xf32>
    %512 = vector.extract_strided_slice %272 {offsets = [0, 34], sizes = [8, 1], strides = [1, 1]} : vector<8x36xf32> to vector<8x1xf32>
    %513 = vector.extract_strided_slice %499 {offsets = [2, 0], sizes = [1, 256], strides = [1, 1]} : vector<4x256xf32> to vector<1x256xf32>
    %514 = vector.broadcast %512 : vector<8x1xf32> to vector<8x256xf32>
    %515 = vector.broadcast %513 : vector<1x256xf32> to vector<8x256xf32>
    %516 = arith.mulf %514, %515 : vector<8x256xf32>
    %517 = arith.addf %511, %516 : vector<8x256xf32>
    %518 = vector.extract_strided_slice %272 {offsets = [0, 35], sizes = [8, 1], strides = [1, 1]} : vector<8x36xf32> to vector<8x1xf32>
    %519 = vector.extract_strided_slice %499 {offsets = [3, 0], sizes = [1, 256], strides = [1, 1]} : vector<4x256xf32> to vector<1x256xf32>
    %520 = vector.broadcast %518 : vector<8x1xf32> to vector<8x256xf32>
    %521 = vector.broadcast %519 : vector<1x256xf32> to vector<8x256xf32>
    %522 = arith.mulf %520, %521 : vector<8x256xf32>
    %523 = arith.addf %517, %522 : vector<8x256xf32>
    %c0_33 = arith.constant 0 : index
    %c0_34 = arith.constant 0 : index
    %524 = vector.load %arg6[%c0_33, %c0_34] : memref<8x1xf32, #tpu.memory_space<vmem>>, vector<8x1xf32>
    %525 = vector.broadcast %524 : vector<8x1xf32> to vector<8x256xf32>
    %526 = arith.addf %523, %525 : vector<8x256xf32>
    %527 = vector.extract_strided_slice %526 {offsets = [0, 0], sizes = [4, 256], strides = [1, 1]} : vector<8x256xf32> to vector<4x256xf32>
    %cst_35 = arith.constant 0.000000e+00 : f32
    %528 = vector.broadcast %cst_35 : f32 to vector<4x256xf32>
    %529 = arith.cmpf oge, %527, %528 : vector<4x256xf32>
    %cst_36 = arith.constant 5.000000e-02 : f32
    %530 = vector.broadcast %cst_36 : f32 to vector<4x256xf32>
    %531 = arith.mulf %530, %527 : vector<4x256xf32>
    %532 = arith.select %529, %527, %531 : vector<4x256xi1>, vector<4x256xf32>
    %533 = vector.extract_strided_slice %526 {offsets = [4, 0], sizes = [4, 256], strides = [1, 1]} : vector<8x256xf32> to vector<4x256xf32>
    %cst_37 = arith.constant 2.000000e+00 : f32
    %534 = vector.broadcast %cst_37 : f32 to vector<4x256xf32>
    %535 = arith.mulf %534, %271 : vector<4x256xf32>
    %536 = arith.addf %533, %535 : vector<4x256xf32>
    %cst_38 = arith.constant 0.000000e+00 : f32
    %537 = vector.broadcast %cst_38 : f32 to vector<4x256xf32>
    %538 = arith.cmpf oge, %536, %537 : vector<4x256xf32>
    %cst_39 = arith.constant 5.000000e-02 : f32
    %539 = vector.broadcast %cst_39 : f32 to vector<4x256xf32>
    %540 = arith.mulf %539, %536 : vector<4x256xf32>
    %541 = arith.select %538, %536, %540 : vector<4x256xi1>, vector<4x256xf32>
    %c0_40 = arith.constant 0 : index
    %c0_41 = arith.constant 0 : index
    %542 = vector.load %arg7[%c0_40, %c0_41] : memref<8x100xf32, #tpu.memory_space<vmem>>, vector<8x100xf32>
    %cst_42 = arith.constant 0.000000e+00 : f32
    %543 = vector.broadcast %cst_42 : f32 to vector<4x34xf32>
    %544 = tpu.concatenate %543, %541, %543 in 1 : vector<4x34xf32>, vector<4x256xf32>, vector<4x34xf32> -> vector<4x324xf32>
    %cst_43 = arith.constant 0.000000e+00 : f32
    %545 = vector.broadcast %cst_43 : f32 to vector<8x256xf32>
    %546 = vector.extract_strided_slice %544 {offsets = [0, 0], sizes = [4, 256], strides = [1, 1]} : vector<4x324xf32> to vector<4x256xf32>
    %547 = vector.broadcast %277 : vector<1x256xf32> to vector<4x256xf32>
    %548 = arith.mulf %546, %547 : vector<4x256xf32>
    %549 = vector.extract_strided_slice %542 {offsets = [0, 0], sizes = [8, 1], strides = [1, 1]} : vector<8x100xf32> to vector<8x1xf32>
    %550 = vector.extract_strided_slice %548 {offsets = [0, 0], sizes = [1, 256], strides = [1, 1]} : vector<4x256xf32> to vector<1x256xf32>
    %551 = vector.broadcast %549 : vector<8x1xf32> to vector<8x256xf32>
    %552 = vector.broadcast %550 : vector<1x256xf32> to vector<8x256xf32>
    %553 = arith.mulf %551, %552 : vector<8x256xf32>
    %554 = arith.addf %545, %553 : vector<8x256xf32>
    %555 = vector.extract_strided_slice %542 {offsets = [0, 1], sizes = [8, 1], strides = [1, 1]} : vector<8x100xf32> to vector<8x1xf32>
    %556 = vector.extract_strided_slice %548 {offsets = [1, 0], sizes = [1, 256], strides = [1, 1]} : vector<4x256xf32> to vector<1x256xf32>
    %557 = vector.broadcast %555 : vector<8x1xf32> to vector<8x256xf32>
    %558 = vector.broadcast %556 : vector<1x256xf32> to vector<8x256xf32>
    %559 = arith.mulf %557, %558 : vector<8x256xf32>
    %560 = arith.addf %554, %559 : vector<8x256xf32>
    %561 = vector.extract_strided_slice %542 {offsets = [0, 2], sizes = [8, 1], strides = [1, 1]} : vector<8x100xf32> to vector<8x1xf32>
    %562 = vector.extract_strided_slice %548 {offsets = [2, 0], sizes = [1, 256], strides = [1, 1]} : vector<4x256xf32> to vector<1x256xf32>
    %563 = vector.broadcast %561 : vector<8x1xf32> to vector<8x256xf32>
    %564 = vector.broadcast %562 : vector<1x256xf32> to vector<8x256xf32>
    %565 = arith.mulf %563, %564 : vector<8x256xf32>
    %566 = arith.addf %560, %565 : vector<8x256xf32>
    %567 = vector.extract_strided_slice %542 {offsets = [0, 3], sizes = [8, 1], strides = [1, 1]} : vector<8x100xf32> to vector<8x1xf32>
    %568 = vector.extract_strided_slice %548 {offsets = [3, 0], sizes = [1, 256], strides = [1, 1]} : vector<4x256xf32> to vector<1x256xf32>
    %569 = vector.broadcast %567 : vector<8x1xf32> to vector<8x256xf32>
    %570 = vector.broadcast %568 : vector<1x256xf32> to vector<8x256xf32>
    %571 = arith.mulf %569, %570 : vector<8x256xf32>
    %572 = arith.addf %566, %571 : vector<8x256xf32>
    %573 = vector.extract_strided_slice %544 {offsets = [0, 1], sizes = [4, 256], strides = [1, 1]} : vector<4x324xf32> to vector<4x256xf32>
    %c16 = arith.constant 16 : index
    %c0_44 = arith.constant 0 : index
    %574 = vector.load %arg1[%c16, %c0_44] : memref<24x256xf32, #tpu.memory_space<vmem>>, vector<1x256xf32>
    %575 = vector.broadcast %574 : vector<1x256xf32> to vector<4x256xf32>
    %576 = arith.mulf %573, %575 : vector<4x256xf32>
    %577 = vector.extract_strided_slice %542 {offsets = [0, 4], sizes = [8, 1], strides = [1, 1]} : vector<8x100xf32> to vector<8x1xf32>
    %578 = vector.extract_strided_slice %576 {offsets = [0, 0], sizes = [1, 256], strides = [1, 1]} : vector<4x256xf32> to vector<1x256xf32>
    %579 = vector.broadcast %577 : vector<8x1xf32> to vector<8x256xf32>
    %580 = vector.broadcast %578 : vector<1x256xf32> to vector<8x256xf32>
    %581 = arith.mulf %579, %580 : vector<8x256xf32>
    %582 = arith.addf %572, %581 : vector<8x256xf32>
    %583 = vector.extract_strided_slice %542 {offsets = [0, 5], sizes = [8, 1], strides = [1, 1]} : vector<8x100xf32> to vector<8x1xf32>
    %584 = vector.extract_strided_slice %576 {offsets = [1, 0], sizes = [1, 256], strides = [1, 1]} : vector<4x256xf32> to vector<1x256xf32>
    %585 = vector.broadcast %583 : vector<8x1xf32> to vector<8x256xf32>
    %586 = vector.broadcast %584 : vector<1x256xf32> to vector<8x256xf32>
    %587 = arith.mulf %585, %586 : vector<8x256xf32>
    %588 = arith.addf %582, %587 : vector<8x256xf32>
    %589 = vector.extract_strided_slice %542 {offsets = [0, 6], sizes = [8, 1], strides = [1, 1]} : vector<8x100xf32> to vector<8x1xf32>
    %590 = vector.extract_strided_slice %576 {offsets = [2, 0], sizes = [1, 256], strides = [1, 1]} : vector<4x256xf32> to vector<1x256xf32>
    %591 = vector.broadcast %589 : vector<8x1xf32> to vector<8x256xf32>
    %592 = vector.broadcast %590 : vector<1x256xf32> to vector<8x256xf32>
    %593 = arith.mulf %591, %592 : vector<8x256xf32>
    %594 = arith.addf %588, %593 : vector<8x256xf32>
    %595 = vector.extract_strided_slice %542 {offsets = [0, 7], sizes = [8, 1], strides = [1, 1]} : vector<8x100xf32> to vector<8x1xf32>
    %596 = vector.extract_strided_slice %576 {offsets = [3, 0], sizes = [1, 256], strides = [1, 1]} : vector<4x256xf32> to vector<1x256xf32>
    %597 = vector.broadcast %595 : vector<8x1xf32> to vector<8x256xf32>
    %598 = vector.broadcast %596 : vector<1x256xf32> to vector<8x256xf32>
    %599 = arith.mulf %597, %598 : vector<8x256xf32>
    %600 = arith.addf %594, %599 : vector<8x256xf32>
    %601 = vector.extract_strided_slice %544 {offsets = [0, 2], sizes = [4, 256], strides = [1, 1]} : vector<4x324xf32> to vector<4x256xf32>
    %602 = vector.broadcast %305 : vector<1x256xf32> to vector<4x256xf32>
    %603 = arith.mulf %601, %602 : vector<4x256xf32>
    %604 = vector.extract_strided_slice %542 {offsets = [0, 8], sizes = [8, 1], strides = [1, 1]} : vector<8x100xf32> to vector<8x1xf32>
    %605 = vector.extract_strided_slice %603 {offsets = [0, 0], sizes = [1, 256], strides = [1, 1]} : vector<4x256xf32> to vector<1x256xf32>
    %606 = vector.broadcast %604 : vector<8x1xf32> to vector<8x256xf32>
    %607 = vector.broadcast %605 : vector<1x256xf32> to vector<8x256xf32>
    %608 = arith.mulf %606, %607 : vector<8x256xf32>
    %609 = arith.addf %600, %608 : vector<8x256xf32>
    %610 = vector.extract_strided_slice %542 {offsets = [0, 9], sizes = [8, 1], strides = [1, 1]} : vector<8x100xf32> to vector<8x1xf32>
    %611 = vector.extract_strided_slice %603 {offsets = [1, 0], sizes = [1, 256], strides = [1, 1]} : vector<4x256xf32> to vector<1x256xf32>
    %612 = vector.broadcast %610 : vector<8x1xf32> to vector<8x256xf32>
    %613 = vector.broadcast %611 : vector<1x256xf32> to vector<8x256xf32>
    %614 = arith.mulf %612, %613 : vector<8x256xf32>
    %615 = arith.addf %609, %614 : vector<8x256xf32>
    %616 = vector.extract_strided_slice %542 {offsets = [0, 10], sizes = [8, 1], strides = [1, 1]} : vector<8x100xf32> to vector<8x1xf32>
    %617 = vector.extract_strided_slice %603 {offsets = [2, 0], sizes = [1, 256], strides = [1, 1]} : vector<4x256xf32> to vector<1x256xf32>
    %618 = vector.broadcast %616 : vector<8x1xf32> to vector<8x256xf32>
    %619 = vector.broadcast %617 : vector<1x256xf32> to vector<8x256xf32>
    %620 = arith.mulf %618, %619 : vector<8x256xf32>
    %621 = arith.addf %615, %620 : vector<8x256xf32>
    %622 = vector.extract_strided_slice %542 {offsets = [0, 11], sizes = [8, 1], strides = [1, 1]} : vector<8x100xf32> to vector<8x1xf32>
    %623 = vector.extract_strided_slice %603 {offsets = [3, 0], sizes = [1, 256], strides = [1, 1]} : vector<4x256xf32> to vector<1x256xf32>
    %624 = vector.broadcast %622 : vector<8x1xf32> to vector<8x256xf32>
    %625 = vector.broadcast %623 : vector<1x256xf32> to vector<8x256xf32>
    %626 = arith.mulf %624, %625 : vector<8x256xf32>
    %627 = arith.addf %621, %626 : vector<8x256xf32>
    %628 = vector.extract_strided_slice %544 {offsets = [0, 3], sizes = [4, 256], strides = [1, 1]} : vector<4x324xf32> to vector<4x256xf32>
    %c17 = arith.constant 17 : index
    %c0_45 = arith.constant 0 : index
    %629 = vector.load %arg1[%c17, %c0_45] : memref<24x256xf32, #tpu.memory_space<vmem>>, vector<1x256xf32>
    %630 = vector.broadcast %629 : vector<1x256xf32> to vector<4x256xf32>
    %631 = arith.mulf %628, %630 : vector<4x256xf32>
    %632 = vector.extract_strided_slice %542 {offsets = [0, 12], sizes = [8, 1], strides = [1, 1]} : vector<8x100xf32> to vector<8x1xf32>
    %633 = vector.extract_strided_slice %631 {offsets = [0, 0], sizes = [1, 256], strides = [1, 1]} : vector<4x256xf32> to vector<1x256xf32>
    %634 = vector.broadcast %632 : vector<8x1xf32> to vector<8x256xf32>
    %635 = vector.broadcast %633 : vector<1x256xf32> to vector<8x256xf32>
    %636 = arith.mulf %634, %635 : vector<8x256xf32>
    %637 = arith.addf %627, %636 : vector<8x256xf32>
    %638 = vector.extract_strided_slice %542 {offsets = [0, 13], sizes = [8, 1], strides = [1, 1]} : vector<8x100xf32> to vector<8x1xf32>
    %639 = vector.extract_strided_slice %631 {offsets = [1, 0], sizes = [1, 256], strides = [1, 1]} : vector<4x256xf32> to vector<1x256xf32>
    %640 = vector.broadcast %638 : vector<8x1xf32> to vector<8x256xf32>
    %641 = vector.broadcast %639 : vector<1x256xf32> to vector<8x256xf32>
    %642 = arith.mulf %640, %641 : vector<8x256xf32>
    %643 = arith.addf %637, %642 : vector<8x256xf32>
    %644 = vector.extract_strided_slice %542 {offsets = [0, 14], sizes = [8, 1], strides = [1, 1]} : vector<8x100xf32> to vector<8x1xf32>
    %645 = vector.extract_strided_slice %631 {offsets = [2, 0], sizes = [1, 256], strides = [1, 1]} : vector<4x256xf32> to vector<1x256xf32>
    %646 = vector.broadcast %644 : vector<8x1xf32> to vector<8x256xf32>
    %647 = vector.broadcast %645 : vector<1x256xf32> to vector<8x256xf32>
    %648 = arith.mulf %646, %647 : vector<8x256xf32>
    %649 = arith.addf %643, %648 : vector<8x256xf32>
    %650 = vector.extract_strided_slice %542 {offsets = [0, 15], sizes = [8, 1], strides = [1, 1]} : vector<8x100xf32> to vector<8x1xf32>
    %651 = vector.extract_strided_slice %631 {offsets = [3, 0], sizes = [1, 256], strides = [1, 1]} : vector<4x256xf32> to vector<1x256xf32>
    %652 = vector.broadcast %650 : vector<8x1xf32> to vector<8x256xf32>
    %653 = vector.broadcast %651 : vector<1x256xf32> to vector<8x256xf32>
    %654 = arith.mulf %652, %653 : vector<8x256xf32>
    %655 = arith.addf %649, %654 : vector<8x256xf32>
    %656 = vector.extract_strided_slice %544 {offsets = [0, 4], sizes = [4, 256], strides = [1, 1]} : vector<4x324xf32> to vector<4x256xf32>
    %657 = vector.broadcast %333 : vector<1x256xf32> to vector<4x256xf32>
    %658 = arith.mulf %656, %657 : vector<4x256xf32>
    %659 = vector.extract_strided_slice %542 {offsets = [0, 16], sizes = [8, 1], strides = [1, 1]} : vector<8x100xf32> to vector<8x1xf32>
    %660 = vector.extract_strided_slice %658 {offsets = [0, 0], sizes = [1, 256], strides = [1, 1]} : vector<4x256xf32> to vector<1x256xf32>
    %661 = vector.broadcast %659 : vector<8x1xf32> to vector<8x256xf32>
    %662 = vector.broadcast %660 : vector<1x256xf32> to vector<8x256xf32>
    %663 = arith.mulf %661, %662 : vector<8x256xf32>
    %664 = arith.addf %655, %663 : vector<8x256xf32>
    %665 = vector.extract_strided_slice %542 {offsets = [0, 17], sizes = [8, 1], strides = [1, 1]} : vector<8x100xf32> to vector<8x1xf32>
    %666 = vector.extract_strided_slice %658 {offsets = [1, 0], sizes = [1, 256], strides = [1, 1]} : vector<4x256xf32> to vector<1x256xf32>
    %667 = vector.broadcast %665 : vector<8x1xf32> to vector<8x256xf32>
    %668 = vector.broadcast %666 : vector<1x256xf32> to vector<8x256xf32>
    %669 = arith.mulf %667, %668 : vector<8x256xf32>
    %670 = arith.addf %664, %669 : vector<8x256xf32>
    %671 = vector.extract_strided_slice %542 {offsets = [0, 18], sizes = [8, 1], strides = [1, 1]} : vector<8x100xf32> to vector<8x1xf32>
    %672 = vector.extract_strided_slice %658 {offsets = [2, 0], sizes = [1, 256], strides = [1, 1]} : vector<4x256xf32> to vector<1x256xf32>
    %673 = vector.broadcast %671 : vector<8x1xf32> to vector<8x256xf32>
    %674 = vector.broadcast %672 : vector<1x256xf32> to vector<8x256xf32>
    %675 = arith.mulf %673, %674 : vector<8x256xf32>
    %676 = arith.addf %670, %675 : vector<8x256xf32>
    %677 = vector.extract_strided_slice %542 {offsets = [0, 19], sizes = [8, 1], strides = [1, 1]} : vector<8x100xf32> to vector<8x1xf32>
    %678 = vector.extract_strided_slice %658 {offsets = [3, 0], sizes = [1, 256], strides = [1, 1]} : vector<4x256xf32> to vector<1x256xf32>
    %679 = vector.broadcast %677 : vector<8x1xf32> to vector<8x256xf32>
    %680 = vector.broadcast %678 : vector<1x256xf32> to vector<8x256xf32>
    %681 = arith.mulf %679, %680 : vector<8x256xf32>
    %682 = arith.addf %676, %681 : vector<8x256xf32>
    %683 = vector.extract_strided_slice %544 {offsets = [0, 16], sizes = [4, 256], strides = [1, 1]} : vector<4x324xf32> to vector<4x256xf32>
    %c18 = arith.constant 18 : index
    %c0_46 = arith.constant 0 : index
    %684 = vector.load %arg1[%c18, %c0_46] : memref<24x256xf32, #tpu.memory_space<vmem>>, vector<1x256xf32>
    %685 = vector.broadcast %684 : vector<1x256xf32> to vector<4x256xf32>
    %686 = arith.mulf %683, %685 : vector<4x256xf32>
    %687 = vector.extract_strided_slice %542 {offsets = [0, 20], sizes = [8, 1], strides = [1, 1]} : vector<8x100xf32> to vector<8x1xf32>
    %688 = vector.extract_strided_slice %686 {offsets = [0, 0], sizes = [1, 256], strides = [1, 1]} : vector<4x256xf32> to vector<1x256xf32>
    %689 = vector.broadcast %687 : vector<8x1xf32> to vector<8x256xf32>
    %690 = vector.broadcast %688 : vector<1x256xf32> to vector<8x256xf32>
    %691 = arith.mulf %689, %690 : vector<8x256xf32>
    %692 = arith.addf %682, %691 : vector<8x256xf32>
    %693 = vector.extract_strided_slice %542 {offsets = [0, 21], sizes = [8, 1], strides = [1, 1]} : vector<8x100xf32> to vector<8x1xf32>
    %694 = vector.extract_strided_slice %686 {offsets = [1, 0], sizes = [1, 256], strides = [1, 1]} : vector<4x256xf32> to vector<1x256xf32>
    %695 = vector.broadcast %693 : vector<8x1xf32> to vector<8x256xf32>
    %696 = vector.broadcast %694 : vector<1x256xf32> to vector<8x256xf32>
    %697 = arith.mulf %695, %696 : vector<8x256xf32>
    %698 = arith.addf %692, %697 : vector<8x256xf32>
    %699 = vector.extract_strided_slice %542 {offsets = [0, 22], sizes = [8, 1], strides = [1, 1]} : vector<8x100xf32> to vector<8x1xf32>
    %700 = vector.extract_strided_slice %686 {offsets = [2, 0], sizes = [1, 256], strides = [1, 1]} : vector<4x256xf32> to vector<1x256xf32>
    %701 = vector.broadcast %699 : vector<8x1xf32> to vector<8x256xf32>
    %702 = vector.broadcast %700 : vector<1x256xf32> to vector<8x256xf32>
    %703 = arith.mulf %701, %702 : vector<8x256xf32>
    %704 = arith.addf %698, %703 : vector<8x256xf32>
    %705 = vector.extract_strided_slice %542 {offsets = [0, 23], sizes = [8, 1], strides = [1, 1]} : vector<8x100xf32> to vector<8x1xf32>
    %706 = vector.extract_strided_slice %686 {offsets = [3, 0], sizes = [1, 256], strides = [1, 1]} : vector<4x256xf32> to vector<1x256xf32>
    %707 = vector.broadcast %705 : vector<8x1xf32> to vector<8x256xf32>
    %708 = vector.broadcast %706 : vector<1x256xf32> to vector<8x256xf32>
    %709 = arith.mulf %707, %708 : vector<8x256xf32>
    %710 = arith.addf %704, %709 : vector<8x256xf32>
    %711 = vector.extract_strided_slice %544 {offsets = [0, 17], sizes = [4, 256], strides = [1, 1]} : vector<4x324xf32> to vector<4x256xf32>
    %712 = vector.broadcast %7 : vector<1x256xf32> to vector<4x256xf32>
    %713 = arith.mulf %711, %712 : vector<4x256xf32>
    %714 = vector.extract_strided_slice %542 {offsets = [0, 24], sizes = [8, 1], strides = [1, 1]} : vector<8x100xf32> to vector<8x1xf32>
    %715 = vector.extract_strided_slice %713 {offsets = [0, 0], sizes = [1, 256], strides = [1, 1]} : vector<4x256xf32> to vector<1x256xf32>
    %716 = vector.broadcast %714 : vector<8x1xf32> to vector<8x256xf32>
    %717 = vector.broadcast %715 : vector<1x256xf32> to vector<8x256xf32>
    %718 = arith.mulf %716, %717 : vector<8x256xf32>
    %719 = arith.addf %710, %718 : vector<8x256xf32>
    %720 = vector.extract_strided_slice %542 {offsets = [0, 25], sizes = [8, 1], strides = [1, 1]} : vector<8x100xf32> to vector<8x1xf32>
    %721 = vector.extract_strided_slice %713 {offsets = [1, 0], sizes = [1, 256], strides = [1, 1]} : vector<4x256xf32> to vector<1x256xf32>
    %722 = vector.broadcast %720 : vector<8x1xf32> to vector<8x256xf32>
    %723 = vector.broadcast %721 : vector<1x256xf32> to vector<8x256xf32>
    %724 = arith.mulf %722, %723 : vector<8x256xf32>
    %725 = arith.addf %719, %724 : vector<8x256xf32>
    %726 = vector.extract_strided_slice %542 {offsets = [0, 26], sizes = [8, 1], strides = [1, 1]} : vector<8x100xf32> to vector<8x1xf32>
    %727 = vector.extract_strided_slice %713 {offsets = [2, 0], sizes = [1, 256], strides = [1, 1]} : vector<4x256xf32> to vector<1x256xf32>
    %728 = vector.broadcast %726 : vector<8x1xf32> to vector<8x256xf32>
    %729 = vector.broadcast %727 : vector<1x256xf32> to vector<8x256xf32>
    %730 = arith.mulf %728, %729 : vector<8x256xf32>
    %731 = arith.addf %725, %730 : vector<8x256xf32>
    %732 = vector.extract_strided_slice %542 {offsets = [0, 27], sizes = [8, 1], strides = [1, 1]} : vector<8x100xf32> to vector<8x1xf32>
    %733 = vector.extract_strided_slice %713 {offsets = [3, 0], sizes = [1, 256], strides = [1, 1]} : vector<4x256xf32> to vector<1x256xf32>
    %734 = vector.broadcast %732 : vector<8x1xf32> to vector<8x256xf32>
    %735 = vector.broadcast %733 : vector<1x256xf32> to vector<8x256xf32>
    %736 = arith.mulf %734, %735 : vector<8x256xf32>
    %737 = arith.addf %731, %736 : vector<8x256xf32>
    %738 = vector.extract_strided_slice %544 {offsets = [0, 18], sizes = [4, 256], strides = [1, 1]} : vector<4x324xf32> to vector<4x256xf32>
    %739 = vector.broadcast %35 : vector<1x256xf32> to vector<4x256xf32>
    %740 = arith.mulf %738, %739 : vector<4x256xf32>
    %741 = vector.extract_strided_slice %542 {offsets = [0, 28], sizes = [8, 1], strides = [1, 1]} : vector<8x100xf32> to vector<8x1xf32>
    %742 = vector.extract_strided_slice %740 {offsets = [0, 0], sizes = [1, 256], strides = [1, 1]} : vector<4x256xf32> to vector<1x256xf32>
    %743 = vector.broadcast %741 : vector<8x1xf32> to vector<8x256xf32>
    %744 = vector.broadcast %742 : vector<1x256xf32> to vector<8x256xf32>
    %745 = arith.mulf %743, %744 : vector<8x256xf32>
    %746 = arith.addf %737, %745 : vector<8x256xf32>
    %747 = vector.extract_strided_slice %542 {offsets = [0, 29], sizes = [8, 1], strides = [1, 1]} : vector<8x100xf32> to vector<8x1xf32>
    %748 = vector.extract_strided_slice %740 {offsets = [1, 0], sizes = [1, 256], strides = [1, 1]} : vector<4x256xf32> to vector<1x256xf32>
    %749 = vector.broadcast %747 : vector<8x1xf32> to vector<8x256xf32>
    %750 = vector.broadcast %748 : vector<1x256xf32> to vector<8x256xf32>
    %751 = arith.mulf %749, %750 : vector<8x256xf32>
    %752 = arith.addf %746, %751 : vector<8x256xf32>
    %753 = vector.extract_strided_slice %542 {offsets = [0, 30], sizes = [8, 1], strides = [1, 1]} : vector<8x100xf32> to vector<8x1xf32>
    %754 = vector.extract_strided_slice %740 {offsets = [2, 0], sizes = [1, 256], strides = [1, 1]} : vector<4x256xf32> to vector<1x256xf32>
    %755 = vector.broadcast %753 : vector<8x1xf32> to vector<8x256xf32>
    %756 = vector.broadcast %754 : vector<1x256xf32> to vector<8x256xf32>
    %757 = arith.mulf %755, %756 : vector<8x256xf32>
    %758 = arith.addf %752, %757 : vector<8x256xf32>
    %759 = vector.extract_strided_slice %542 {offsets = [0, 31], sizes = [8, 1], strides = [1, 1]} : vector<8x100xf32> to vector<8x1xf32>
    %760 = vector.extract_strided_slice %740 {offsets = [3, 0], sizes = [1, 256], strides = [1, 1]} : vector<4x256xf32> to vector<1x256xf32>
    %761 = vector.broadcast %759 : vector<8x1xf32> to vector<8x256xf32>
    %762 = vector.broadcast %760 : vector<1x256xf32> to vector<8x256xf32>
    %763 = arith.mulf %761, %762 : vector<8x256xf32>
    %764 = arith.addf %758, %763 : vector<8x256xf32>
    %765 = vector.extract_strided_slice %544 {offsets = [0, 19], sizes = [4, 256], strides = [1, 1]} : vector<4x324xf32> to vector<4x256xf32>
    %766 = vector.broadcast %63 : vector<1x256xf32> to vector<4x256xf32>
    %767 = arith.mulf %765, %766 : vector<4x256xf32>
    %768 = vector.extract_strided_slice %542 {offsets = [0, 32], sizes = [8, 1], strides = [1, 1]} : vector<8x100xf32> to vector<8x1xf32>
    %769 = vector.extract_strided_slice %767 {offsets = [0, 0], sizes = [1, 256], strides = [1, 1]} : vector<4x256xf32> to vector<1x256xf32>
    %770 = vector.broadcast %768 : vector<8x1xf32> to vector<8x256xf32>
    %771 = vector.broadcast %769 : vector<1x256xf32> to vector<8x256xf32>
    %772 = arith.mulf %770, %771 : vector<8x256xf32>
    %773 = arith.addf %764, %772 : vector<8x256xf32>
    %774 = vector.extract_strided_slice %542 {offsets = [0, 33], sizes = [8, 1], strides = [1, 1]} : vector<8x100xf32> to vector<8x1xf32>
    %775 = vector.extract_strided_slice %767 {offsets = [1, 0], sizes = [1, 256], strides = [1, 1]} : vector<4x256xf32> to vector<1x256xf32>
    %776 = vector.broadcast %774 : vector<8x1xf32> to vector<8x256xf32>
    %777 = vector.broadcast %775 : vector<1x256xf32> to vector<8x256xf32>
    %778 = arith.mulf %776, %777 : vector<8x256xf32>
    %779 = arith.addf %773, %778 : vector<8x256xf32>
    %780 = vector.extract_strided_slice %542 {offsets = [0, 34], sizes = [8, 1], strides = [1, 1]} : vector<8x100xf32> to vector<8x1xf32>
    %781 = vector.extract_strided_slice %767 {offsets = [2, 0], sizes = [1, 256], strides = [1, 1]} : vector<4x256xf32> to vector<1x256xf32>
    %782 = vector.broadcast %780 : vector<8x1xf32> to vector<8x256xf32>
    %783 = vector.broadcast %781 : vector<1x256xf32> to vector<8x256xf32>
    %784 = arith.mulf %782, %783 : vector<8x256xf32>
    %785 = arith.addf %779, %784 : vector<8x256xf32>
    %786 = vector.extract_strided_slice %542 {offsets = [0, 35], sizes = [8, 1], strides = [1, 1]} : vector<8x100xf32> to vector<8x1xf32>
    %787 = vector.extract_strided_slice %767 {offsets = [3, 0], sizes = [1, 256], strides = [1, 1]} : vector<4x256xf32> to vector<1x256xf32>
    %788 = vector.broadcast %786 : vector<8x1xf32> to vector<8x256xf32>
    %789 = vector.broadcast %787 : vector<1x256xf32> to vector<8x256xf32>
    %790 = arith.mulf %788, %789 : vector<8x256xf32>
    %791 = arith.addf %785, %790 : vector<8x256xf32>
    %792 = vector.extract_strided_slice %544 {offsets = [0, 20], sizes = [4, 256], strides = [1, 1]} : vector<4x324xf32> to vector<4x256xf32>
    %c19 = arith.constant 19 : index
    %c0_47 = arith.constant 0 : index
    %793 = vector.load %arg1[%c19, %c0_47] : memref<24x256xf32, #tpu.memory_space<vmem>>, vector<1x256xf32>
    %794 = vector.broadcast %793 : vector<1x256xf32> to vector<4x256xf32>
    %795 = arith.mulf %792, %794 : vector<4x256xf32>
    %796 = vector.extract_strided_slice %542 {offsets = [0, 36], sizes = [8, 1], strides = [1, 1]} : vector<8x100xf32> to vector<8x1xf32>
    %797 = vector.extract_strided_slice %795 {offsets = [0, 0], sizes = [1, 256], strides = [1, 1]} : vector<4x256xf32> to vector<1x256xf32>
    %798 = vector.broadcast %796 : vector<8x1xf32> to vector<8x256xf32>
    %799 = vector.broadcast %797 : vector<1x256xf32> to vector<8x256xf32>
    %800 = arith.mulf %798, %799 : vector<8x256xf32>
    %801 = arith.addf %791, %800 : vector<8x256xf32>
    %802 = vector.extract_strided_slice %542 {offsets = [0, 37], sizes = [8, 1], strides = [1, 1]} : vector<8x100xf32> to vector<8x1xf32>
    %803 = vector.extract_strided_slice %795 {offsets = [1, 0], sizes = [1, 256], strides = [1, 1]} : vector<4x256xf32> to vector<1x256xf32>
    %804 = vector.broadcast %802 : vector<8x1xf32> to vector<8x256xf32>
    %805 = vector.broadcast %803 : vector<1x256xf32> to vector<8x256xf32>
    %806 = arith.mulf %804, %805 : vector<8x256xf32>
    %807 = arith.addf %801, %806 : vector<8x256xf32>
    %808 = vector.extract_strided_slice %542 {offsets = [0, 38], sizes = [8, 1], strides = [1, 1]} : vector<8x100xf32> to vector<8x1xf32>
    %809 = vector.extract_strided_slice %795 {offsets = [2, 0], sizes = [1, 256], strides = [1, 1]} : vector<4x256xf32> to vector<1x256xf32>
    %810 = vector.broadcast %808 : vector<8x1xf32> to vector<8x256xf32>
    %811 = vector.broadcast %809 : vector<1x256xf32> to vector<8x256xf32>
    %812 = arith.mulf %810, %811 : vector<8x256xf32>
    %813 = arith.addf %807, %812 : vector<8x256xf32>
    %814 = vector.extract_strided_slice %542 {offsets = [0, 39], sizes = [8, 1], strides = [1, 1]} : vector<8x100xf32> to vector<8x1xf32>
    %815 = vector.extract_strided_slice %795 {offsets = [3, 0], sizes = [1, 256], strides = [1, 1]} : vector<4x256xf32> to vector<1x256xf32>
    %816 = vector.broadcast %814 : vector<8x1xf32> to vector<8x256xf32>
    %817 = vector.broadcast %815 : vector<1x256xf32> to vector<8x256xf32>
    %818 = arith.mulf %816, %817 : vector<8x256xf32>
    %819 = arith.addf %813, %818 : vector<8x256xf32>
    %820 = vector.extract_strided_slice %544 {offsets = [0, 32], sizes = [4, 256], strides = [1, 1]} : vector<4x324xf32> to vector<4x256xf32>
    %821 = vector.broadcast %361 : vector<1x256xf32> to vector<4x256xf32>
    %822 = arith.mulf %820, %821 : vector<4x256xf32>
    %823 = vector.extract_strided_slice %542 {offsets = [0, 40], sizes = [8, 1], strides = [1, 1]} : vector<8x100xf32> to vector<8x1xf32>
    %824 = vector.extract_strided_slice %822 {offsets = [0, 0], sizes = [1, 256], strides = [1, 1]} : vector<4x256xf32> to vector<1x256xf32>
    %825 = vector.broadcast %823 : vector<8x1xf32> to vector<8x256xf32>
    %826 = vector.broadcast %824 : vector<1x256xf32> to vector<8x256xf32>
    %827 = arith.mulf %825, %826 : vector<8x256xf32>
    %828 = arith.addf %819, %827 : vector<8x256xf32>
    %829 = vector.extract_strided_slice %542 {offsets = [0, 41], sizes = [8, 1], strides = [1, 1]} : vector<8x100xf32> to vector<8x1xf32>
    %830 = vector.extract_strided_slice %822 {offsets = [1, 0], sizes = [1, 256], strides = [1, 1]} : vector<4x256xf32> to vector<1x256xf32>
    %831 = vector.broadcast %829 : vector<8x1xf32> to vector<8x256xf32>
    %832 = vector.broadcast %830 : vector<1x256xf32> to vector<8x256xf32>
    %833 = arith.mulf %831, %832 : vector<8x256xf32>
    %834 = arith.addf %828, %833 : vector<8x256xf32>
    %835 = vector.extract_strided_slice %542 {offsets = [0, 42], sizes = [8, 1], strides = [1, 1]} : vector<8x100xf32> to vector<8x1xf32>
    %836 = vector.extract_strided_slice %822 {offsets = [2, 0], sizes = [1, 256], strides = [1, 1]} : vector<4x256xf32> to vector<1x256xf32>
    %837 = vector.broadcast %835 : vector<8x1xf32> to vector<8x256xf32>
    %838 = vector.broadcast %836 : vector<1x256xf32> to vector<8x256xf32>
    %839 = arith.mulf %837, %838 : vector<8x256xf32>
    %840 = arith.addf %834, %839 : vector<8x256xf32>
    %841 = vector.extract_strided_slice %542 {offsets = [0, 43], sizes = [8, 1], strides = [1, 1]} : vector<8x100xf32> to vector<8x1xf32>
    %842 = vector.extract_strided_slice %822 {offsets = [3, 0], sizes = [1, 256], strides = [1, 1]} : vector<4x256xf32> to vector<1x256xf32>
    %843 = vector.broadcast %841 : vector<8x1xf32> to vector<8x256xf32>
    %844 = vector.broadcast %842 : vector<1x256xf32> to vector<8x256xf32>
    %845 = arith.mulf %843, %844 : vector<8x256xf32>
    %846 = arith.addf %840, %845 : vector<8x256xf32>
    %847 = vector.extract_strided_slice %544 {offsets = [0, 33], sizes = [4, 256], strides = [1, 1]} : vector<4x324xf32> to vector<4x256xf32>
    %848 = vector.broadcast %91 : vector<1x256xf32> to vector<4x256xf32>
    %849 = arith.mulf %847, %848 : vector<4x256xf32>
    %850 = vector.extract_strided_slice %542 {offsets = [0, 44], sizes = [8, 1], strides = [1, 1]} : vector<8x100xf32> to vector<8x1xf32>
    %851 = vector.extract_strided_slice %849 {offsets = [0, 0], sizes = [1, 256], strides = [1, 1]} : vector<4x256xf32> to vector<1x256xf32>
    %852 = vector.broadcast %850 : vector<8x1xf32> to vector<8x256xf32>
    %853 = vector.broadcast %851 : vector<1x256xf32> to vector<8x256xf32>
    %854 = arith.mulf %852, %853 : vector<8x256xf32>
    %855 = arith.addf %846, %854 : vector<8x256xf32>
    %856 = vector.extract_strided_slice %542 {offsets = [0, 45], sizes = [8, 1], strides = [1, 1]} : vector<8x100xf32> to vector<8x1xf32>
    %857 = vector.extract_strided_slice %849 {offsets = [1, 0], sizes = [1, 256], strides = [1, 1]} : vector<4x256xf32> to vector<1x256xf32>
    %858 = vector.broadcast %856 : vector<8x1xf32> to vector<8x256xf32>
    %859 = vector.broadcast %857 : vector<1x256xf32> to vector<8x256xf32>
    %860 = arith.mulf %858, %859 : vector<8x256xf32>
    %861 = arith.addf %855, %860 : vector<8x256xf32>
    %862 = vector.extract_strided_slice %542 {offsets = [0, 46], sizes = [8, 1], strides = [1, 1]} : vector<8x100xf32> to vector<8x1xf32>
    %863 = vector.extract_strided_slice %849 {offsets = [2, 0], sizes = [1, 256], strides = [1, 1]} : vector<4x256xf32> to vector<1x256xf32>
    %864 = vector.broadcast %862 : vector<8x1xf32> to vector<8x256xf32>
    %865 = vector.broadcast %863 : vector<1x256xf32> to vector<8x256xf32>
    %866 = arith.mulf %864, %865 : vector<8x256xf32>
    %867 = arith.addf %861, %866 : vector<8x256xf32>
    %868 = vector.extract_strided_slice %542 {offsets = [0, 47], sizes = [8, 1], strides = [1, 1]} : vector<8x100xf32> to vector<8x1xf32>
    %869 = vector.extract_strided_slice %849 {offsets = [3, 0], sizes = [1, 256], strides = [1, 1]} : vector<4x256xf32> to vector<1x256xf32>
    %870 = vector.broadcast %868 : vector<8x1xf32> to vector<8x256xf32>
    %871 = vector.broadcast %869 : vector<1x256xf32> to vector<8x256xf32>
    %872 = arith.mulf %870, %871 : vector<8x256xf32>
    %873 = arith.addf %867, %872 : vector<8x256xf32>
    %874 = vector.extract_strided_slice %542 {offsets = [0, 48], sizes = [8, 1], strides = [1, 1]} : vector<8x100xf32> to vector<8x1xf32>
    %875 = vector.extract_strided_slice %541 {offsets = [0, 0], sizes = [1, 256], strides = [1, 1]} : vector<4x256xf32> to vector<1x256xf32>
    %876 = vector.broadcast %874 : vector<8x1xf32> to vector<8x256xf32>
    %877 = vector.broadcast %875 : vector<1x256xf32> to vector<8x256xf32>
    %878 = arith.mulf %876, %877 : vector<8x256xf32>
    %879 = arith.addf %873, %878 : vector<8x256xf32>
    %880 = vector.extract_strided_slice %542 {offsets = [0, 49], sizes = [8, 1], strides = [1, 1]} : vector<8x100xf32> to vector<8x1xf32>
    %881 = vector.extract_strided_slice %541 {offsets = [1, 0], sizes = [1, 256], strides = [1, 1]} : vector<4x256xf32> to vector<1x256xf32>
    %882 = vector.broadcast %880 : vector<8x1xf32> to vector<8x256xf32>
    %883 = vector.broadcast %881 : vector<1x256xf32> to vector<8x256xf32>
    %884 = arith.mulf %882, %883 : vector<8x256xf32>
    %885 = arith.addf %879, %884 : vector<8x256xf32>
    %886 = vector.extract_strided_slice %542 {offsets = [0, 50], sizes = [8, 1], strides = [1, 1]} : vector<8x100xf32> to vector<8x1xf32>
    %887 = vector.extract_strided_slice %541 {offsets = [2, 0], sizes = [1, 256], strides = [1, 1]} : vector<4x256xf32> to vector<1x256xf32>
    %888 = vector.broadcast %886 : vector<8x1xf32> to vector<8x256xf32>
    %889 = vector.broadcast %887 : vector<1x256xf32> to vector<8x256xf32>
    %890 = arith.mulf %888, %889 : vector<8x256xf32>
    %891 = arith.addf %885, %890 : vector<8x256xf32>
    %892 = vector.extract_strided_slice %542 {offsets = [0, 51], sizes = [8, 1], strides = [1, 1]} : vector<8x100xf32> to vector<8x1xf32>
    %893 = vector.extract_strided_slice %541 {offsets = [3, 0], sizes = [1, 256], strides = [1, 1]} : vector<4x256xf32> to vector<1x256xf32>
    %894 = vector.broadcast %892 : vector<8x1xf32> to vector<8x256xf32>
    %895 = vector.broadcast %893 : vector<1x256xf32> to vector<8x256xf32>
    %896 = arith.mulf %894, %895 : vector<8x256xf32>
    %897 = arith.addf %891, %896 : vector<8x256xf32>
    %898 = vector.extract_strided_slice %544 {offsets = [0, 35], sizes = [4, 256], strides = [1, 1]} : vector<4x324xf32> to vector<4x256xf32>
    %899 = vector.broadcast %143 : vector<1x256xf32> to vector<4x256xf32>
    %900 = arith.mulf %898, %899 : vector<4x256xf32>
    %901 = vector.extract_strided_slice %542 {offsets = [0, 52], sizes = [8, 1], strides = [1, 1]} : vector<8x100xf32> to vector<8x1xf32>
    %902 = vector.extract_strided_slice %900 {offsets = [0, 0], sizes = [1, 256], strides = [1, 1]} : vector<4x256xf32> to vector<1x256xf32>
    %903 = vector.broadcast %901 : vector<8x1xf32> to vector<8x256xf32>
    %904 = vector.broadcast %902 : vector<1x256xf32> to vector<8x256xf32>
    %905 = arith.mulf %903, %904 : vector<8x256xf32>
    %906 = arith.addf %897, %905 : vector<8x256xf32>
    %907 = vector.extract_strided_slice %542 {offsets = [0, 53], sizes = [8, 1], strides = [1, 1]} : vector<8x100xf32> to vector<8x1xf32>
    %908 = vector.extract_strided_slice %900 {offsets = [1, 0], sizes = [1, 256], strides = [1, 1]} : vector<4x256xf32> to vector<1x256xf32>
    %909 = vector.broadcast %907 : vector<8x1xf32> to vector<8x256xf32>
    %910 = vector.broadcast %908 : vector<1x256xf32> to vector<8x256xf32>
    %911 = arith.mulf %909, %910 : vector<8x256xf32>
    %912 = arith.addf %906, %911 : vector<8x256xf32>
    %913 = vector.extract_strided_slice %542 {offsets = [0, 54], sizes = [8, 1], strides = [1, 1]} : vector<8x100xf32> to vector<8x1xf32>
    %914 = vector.extract_strided_slice %900 {offsets = [2, 0], sizes = [1, 256], strides = [1, 1]} : vector<4x256xf32> to vector<1x256xf32>
    %915 = vector.broadcast %913 : vector<8x1xf32> to vector<8x256xf32>
    %916 = vector.broadcast %914 : vector<1x256xf32> to vector<8x256xf32>
    %917 = arith.mulf %915, %916 : vector<8x256xf32>
    %918 = arith.addf %912, %917 : vector<8x256xf32>
    %919 = vector.extract_strided_slice %542 {offsets = [0, 55], sizes = [8, 1], strides = [1, 1]} : vector<8x100xf32> to vector<8x1xf32>
    %920 = vector.extract_strided_slice %900 {offsets = [3, 0], sizes = [1, 256], strides = [1, 1]} : vector<4x256xf32> to vector<1x256xf32>
    %921 = vector.broadcast %919 : vector<8x1xf32> to vector<8x256xf32>
    %922 = vector.broadcast %920 : vector<1x256xf32> to vector<8x256xf32>
    %923 = arith.mulf %921, %922 : vector<8x256xf32>
    %924 = arith.addf %918, %923 : vector<8x256xf32>
    %925 = vector.extract_strided_slice %544 {offsets = [0, 36], sizes = [4, 256], strides = [1, 1]} : vector<4x324xf32> to vector<4x256xf32>
    %926 = vector.broadcast %413 : vector<1x256xf32> to vector<4x256xf32>
    %927 = arith.mulf %925, %926 : vector<4x256xf32>
    %928 = vector.extract_strided_slice %542 {offsets = [0, 56], sizes = [8, 1], strides = [1, 1]} : vector<8x100xf32> to vector<8x1xf32>
    %929 = vector.extract_strided_slice %927 {offsets = [0, 0], sizes = [1, 256], strides = [1, 1]} : vector<4x256xf32> to vector<1x256xf32>
    %930 = vector.broadcast %928 : vector<8x1xf32> to vector<8x256xf32>
    %931 = vector.broadcast %929 : vector<1x256xf32> to vector<8x256xf32>
    %932 = arith.mulf %930, %931 : vector<8x256xf32>
    %933 = arith.addf %924, %932 : vector<8x256xf32>
    %934 = vector.extract_strided_slice %542 {offsets = [0, 57], sizes = [8, 1], strides = [1, 1]} : vector<8x100xf32> to vector<8x1xf32>
    %935 = vector.extract_strided_slice %927 {offsets = [1, 0], sizes = [1, 256], strides = [1, 1]} : vector<4x256xf32> to vector<1x256xf32>
    %936 = vector.broadcast %934 : vector<8x1xf32> to vector<8x256xf32>
    %937 = vector.broadcast %935 : vector<1x256xf32> to vector<8x256xf32>
    %938 = arith.mulf %936, %937 : vector<8x256xf32>
    %939 = arith.addf %933, %938 : vector<8x256xf32>
    %940 = vector.extract_strided_slice %542 {offsets = [0, 58], sizes = [8, 1], strides = [1, 1]} : vector<8x100xf32> to vector<8x1xf32>
    %941 = vector.extract_strided_slice %927 {offsets = [2, 0], sizes = [1, 256], strides = [1, 1]} : vector<4x256xf32> to vector<1x256xf32>
    %942 = vector.broadcast %940 : vector<8x1xf32> to vector<8x256xf32>
    %943 = vector.broadcast %941 : vector<1x256xf32> to vector<8x256xf32>
    %944 = arith.mulf %942, %943 : vector<8x256xf32>
    %945 = arith.addf %939, %944 : vector<8x256xf32>
    %946 = vector.extract_strided_slice %542 {offsets = [0, 59], sizes = [8, 1], strides = [1, 1]} : vector<8x100xf32> to vector<8x1xf32>
    %947 = vector.extract_strided_slice %927 {offsets = [3, 0], sizes = [1, 256], strides = [1, 1]} : vector<4x256xf32> to vector<1x256xf32>
    %948 = vector.broadcast %946 : vector<8x1xf32> to vector<8x256xf32>
    %949 = vector.broadcast %947 : vector<1x256xf32> to vector<8x256xf32>
    %950 = arith.mulf %948, %949 : vector<8x256xf32>
    %951 = arith.addf %945, %950 : vector<8x256xf32>
    %952 = vector.extract_strided_slice %544 {offsets = [0, 48], sizes = [4, 256], strides = [1, 1]} : vector<4x324xf32> to vector<4x256xf32>
    %c20 = arith.constant 20 : index
    %c0_48 = arith.constant 0 : index
    %953 = vector.load %arg1[%c20, %c0_48] : memref<24x256xf32, #tpu.memory_space<vmem>>, vector<1x256xf32>
    %954 = vector.broadcast %953 : vector<1x256xf32> to vector<4x256xf32>
    %955 = arith.mulf %952, %954 : vector<4x256xf32>
    %956 = vector.extract_strided_slice %542 {offsets = [0, 60], sizes = [8, 1], strides = [1, 1]} : vector<8x100xf32> to vector<8x1xf32>
    %957 = vector.extract_strided_slice %955 {offsets = [0, 0], sizes = [1, 256], strides = [1, 1]} : vector<4x256xf32> to vector<1x256xf32>
    %958 = vector.broadcast %956 : vector<8x1xf32> to vector<8x256xf32>
    %959 = vector.broadcast %957 : vector<1x256xf32> to vector<8x256xf32>
    %960 = arith.mulf %958, %959 : vector<8x256xf32>
    %961 = arith.addf %951, %960 : vector<8x256xf32>
    %962 = vector.extract_strided_slice %542 {offsets = [0, 61], sizes = [8, 1], strides = [1, 1]} : vector<8x100xf32> to vector<8x1xf32>
    %963 = vector.extract_strided_slice %955 {offsets = [1, 0], sizes = [1, 256], strides = [1, 1]} : vector<4x256xf32> to vector<1x256xf32>
    %964 = vector.broadcast %962 : vector<8x1xf32> to vector<8x256xf32>
    %965 = vector.broadcast %963 : vector<1x256xf32> to vector<8x256xf32>
    %966 = arith.mulf %964, %965 : vector<8x256xf32>
    %967 = arith.addf %961, %966 : vector<8x256xf32>
    %968 = vector.extract_strided_slice %542 {offsets = [0, 62], sizes = [8, 1], strides = [1, 1]} : vector<8x100xf32> to vector<8x1xf32>
    %969 = vector.extract_strided_slice %955 {offsets = [2, 0], sizes = [1, 256], strides = [1, 1]} : vector<4x256xf32> to vector<1x256xf32>
    %970 = vector.broadcast %968 : vector<8x1xf32> to vector<8x256xf32>
    %971 = vector.broadcast %969 : vector<1x256xf32> to vector<8x256xf32>
    %972 = arith.mulf %970, %971 : vector<8x256xf32>
    %973 = arith.addf %967, %972 : vector<8x256xf32>
    %974 = vector.extract_strided_slice %542 {offsets = [0, 63], sizes = [8, 1], strides = [1, 1]} : vector<8x100xf32> to vector<8x1xf32>
    %975 = vector.extract_strided_slice %955 {offsets = [3, 0], sizes = [1, 256], strides = [1, 1]} : vector<4x256xf32> to vector<1x256xf32>
    %976 = vector.broadcast %974 : vector<8x1xf32> to vector<8x256xf32>
    %977 = vector.broadcast %975 : vector<1x256xf32> to vector<8x256xf32>
    %978 = arith.mulf %976, %977 : vector<8x256xf32>
    %979 = arith.addf %973, %978 : vector<8x256xf32>
    %980 = vector.extract_strided_slice %544 {offsets = [0, 49], sizes = [4, 256], strides = [1, 1]} : vector<4x324xf32> to vector<4x256xf32>
    %981 = vector.broadcast %171 : vector<1x256xf32> to vector<4x256xf32>
    %982 = arith.mulf %980, %981 : vector<4x256xf32>
    %983 = vector.extract_strided_slice %542 {offsets = [0, 64], sizes = [8, 1], strides = [1, 1]} : vector<8x100xf32> to vector<8x1xf32>
    %984 = vector.extract_strided_slice %982 {offsets = [0, 0], sizes = [1, 256], strides = [1, 1]} : vector<4x256xf32> to vector<1x256xf32>
    %985 = vector.broadcast %983 : vector<8x1xf32> to vector<8x256xf32>
    %986 = vector.broadcast %984 : vector<1x256xf32> to vector<8x256xf32>
    %987 = arith.mulf %985, %986 : vector<8x256xf32>
    %988 = arith.addf %979, %987 : vector<8x256xf32>
    %989 = vector.extract_strided_slice %542 {offsets = [0, 65], sizes = [8, 1], strides = [1, 1]} : vector<8x100xf32> to vector<8x1xf32>
    %990 = vector.extract_strided_slice %982 {offsets = [1, 0], sizes = [1, 256], strides = [1, 1]} : vector<4x256xf32> to vector<1x256xf32>
    %991 = vector.broadcast %989 : vector<8x1xf32> to vector<8x256xf32>
    %992 = vector.broadcast %990 : vector<1x256xf32> to vector<8x256xf32>
    %993 = arith.mulf %991, %992 : vector<8x256xf32>
    %994 = arith.addf %988, %993 : vector<8x256xf32>
    %995 = vector.extract_strided_slice %542 {offsets = [0, 66], sizes = [8, 1], strides = [1, 1]} : vector<8x100xf32> to vector<8x1xf32>
    %996 = vector.extract_strided_slice %982 {offsets = [2, 0], sizes = [1, 256], strides = [1, 1]} : vector<4x256xf32> to vector<1x256xf32>
    %997 = vector.broadcast %995 : vector<8x1xf32> to vector<8x256xf32>
    %998 = vector.broadcast %996 : vector<1x256xf32> to vector<8x256xf32>
    %999 = arith.mulf %997, %998 : vector<8x256xf32>
    %1000 = arith.addf %994, %999 : vector<8x256xf32>
    %1001 = vector.extract_strided_slice %542 {offsets = [0, 67], sizes = [8, 1], strides = [1, 1]} : vector<8x100xf32> to vector<8x1xf32>
    %1002 = vector.extract_strided_slice %982 {offsets = [3, 0], sizes = [1, 256], strides = [1, 1]} : vector<4x256xf32> to vector<1x256xf32>
    %1003 = vector.broadcast %1001 : vector<8x1xf32> to vector<8x256xf32>
    %1004 = vector.broadcast %1002 : vector<1x256xf32> to vector<8x256xf32>
    %1005 = arith.mulf %1003, %1004 : vector<8x256xf32>
    %1006 = arith.addf %1000, %1005 : vector<8x256xf32>
    %1007 = vector.extract_strided_slice %544 {offsets = [0, 50], sizes = [4, 256], strides = [1, 1]} : vector<4x324xf32> to vector<4x256xf32>
    %1008 = vector.broadcast %199 : vector<1x256xf32> to vector<4x256xf32>
    %1009 = arith.mulf %1007, %1008 : vector<4x256xf32>
    %1010 = vector.extract_strided_slice %542 {offsets = [0, 68], sizes = [8, 1], strides = [1, 1]} : vector<8x100xf32> to vector<8x1xf32>
    %1011 = vector.extract_strided_slice %1009 {offsets = [0, 0], sizes = [1, 256], strides = [1, 1]} : vector<4x256xf32> to vector<1x256xf32>
    %1012 = vector.broadcast %1010 : vector<8x1xf32> to vector<8x256xf32>
    %1013 = vector.broadcast %1011 : vector<1x256xf32> to vector<8x256xf32>
    %1014 = arith.mulf %1012, %1013 : vector<8x256xf32>
    %1015 = arith.addf %1006, %1014 : vector<8x256xf32>
    %1016 = vector.extract_strided_slice %542 {offsets = [0, 69], sizes = [8, 1], strides = [1, 1]} : vector<8x100xf32> to vector<8x1xf32>
    %1017 = vector.extract_strided_slice %1009 {offsets = [1, 0], sizes = [1, 256], strides = [1, 1]} : vector<4x256xf32> to vector<1x256xf32>
    %1018 = vector.broadcast %1016 : vector<8x1xf32> to vector<8x256xf32>
    %1019 = vector.broadcast %1017 : vector<1x256xf32> to vector<8x256xf32>
    %1020 = arith.mulf %1018, %1019 : vector<8x256xf32>
    %1021 = arith.addf %1015, %1020 : vector<8x256xf32>
    %1022 = vector.extract_strided_slice %542 {offsets = [0, 70], sizes = [8, 1], strides = [1, 1]} : vector<8x100xf32> to vector<8x1xf32>
    %1023 = vector.extract_strided_slice %1009 {offsets = [2, 0], sizes = [1, 256], strides = [1, 1]} : vector<4x256xf32> to vector<1x256xf32>
    %1024 = vector.broadcast %1022 : vector<8x1xf32> to vector<8x256xf32>
    %1025 = vector.broadcast %1023 : vector<1x256xf32> to vector<8x256xf32>
    %1026 = arith.mulf %1024, %1025 : vector<8x256xf32>
    %1027 = arith.addf %1021, %1026 : vector<8x256xf32>
    %1028 = vector.extract_strided_slice %542 {offsets = [0, 71], sizes = [8, 1], strides = [1, 1]} : vector<8x100xf32> to vector<8x1xf32>
    %1029 = vector.extract_strided_slice %1009 {offsets = [3, 0], sizes = [1, 256], strides = [1, 1]} : vector<4x256xf32> to vector<1x256xf32>
    %1030 = vector.broadcast %1028 : vector<8x1xf32> to vector<8x256xf32>
    %1031 = vector.broadcast %1029 : vector<1x256xf32> to vector<8x256xf32>
    %1032 = arith.mulf %1030, %1031 : vector<8x256xf32>
    %1033 = arith.addf %1027, %1032 : vector<8x256xf32>
    %1034 = vector.extract_strided_slice %544 {offsets = [0, 51], sizes = [4, 256], strides = [1, 1]} : vector<4x324xf32> to vector<4x256xf32>
    %1035 = vector.broadcast %227 : vector<1x256xf32> to vector<4x256xf32>
    %1036 = arith.mulf %1034, %1035 : vector<4x256xf32>
    %1037 = vector.extract_strided_slice %542 {offsets = [0, 72], sizes = [8, 1], strides = [1, 1]} : vector<8x100xf32> to vector<8x1xf32>
    %1038 = vector.extract_strided_slice %1036 {offsets = [0, 0], sizes = [1, 256], strides = [1, 1]} : vector<4x256xf32> to vector<1x256xf32>
    %1039 = vector.broadcast %1037 : vector<8x1xf32> to vector<8x256xf32>
    %1040 = vector.broadcast %1038 : vector<1x256xf32> to vector<8x256xf32>
    %1041 = arith.mulf %1039, %1040 : vector<8x256xf32>
    %1042 = arith.addf %1033, %1041 : vector<8x256xf32>
    %1043 = vector.extract_strided_slice %542 {offsets = [0, 73], sizes = [8, 1], strides = [1, 1]} : vector<8x100xf32> to vector<8x1xf32>
    %1044 = vector.extract_strided_slice %1036 {offsets = [1, 0], sizes = [1, 256], strides = [1, 1]} : vector<4x256xf32> to vector<1x256xf32>
    %1045 = vector.broadcast %1043 : vector<8x1xf32> to vector<8x256xf32>
    %1046 = vector.broadcast %1044 : vector<1x256xf32> to vector<8x256xf32>
    %1047 = arith.mulf %1045, %1046 : vector<8x256xf32>
    %1048 = arith.addf %1042, %1047 : vector<8x256xf32>
    %1049 = vector.extract_strided_slice %542 {offsets = [0, 74], sizes = [8, 1], strides = [1, 1]} : vector<8x100xf32> to vector<8x1xf32>
    %1050 = vector.extract_strided_slice %1036 {offsets = [2, 0], sizes = [1, 256], strides = [1, 1]} : vector<4x256xf32> to vector<1x256xf32>
    %1051 = vector.broadcast %1049 : vector<8x1xf32> to vector<8x256xf32>
    %1052 = vector.broadcast %1050 : vector<1x256xf32> to vector<8x256xf32>
    %1053 = arith.mulf %1051, %1052 : vector<8x256xf32>
    %1054 = arith.addf %1048, %1053 : vector<8x256xf32>
    %1055 = vector.extract_strided_slice %542 {offsets = [0, 75], sizes = [8, 1], strides = [1, 1]} : vector<8x100xf32> to vector<8x1xf32>
    %1056 = vector.extract_strided_slice %1036 {offsets = [3, 0], sizes = [1, 256], strides = [1, 1]} : vector<4x256xf32> to vector<1x256xf32>
    %1057 = vector.broadcast %1055 : vector<8x1xf32> to vector<8x256xf32>
    %1058 = vector.broadcast %1056 : vector<1x256xf32> to vector<8x256xf32>
    %1059 = arith.mulf %1057, %1058 : vector<8x256xf32>
    %1060 = arith.addf %1054, %1059 : vector<8x256xf32>
    %1061 = vector.extract_strided_slice %544 {offsets = [0, 52], sizes = [4, 256], strides = [1, 1]} : vector<4x324xf32> to vector<4x256xf32>
    %c21 = arith.constant 21 : index
    %c0_49 = arith.constant 0 : index
    %1062 = vector.load %arg1[%c21, %c0_49] : memref<24x256xf32, #tpu.memory_space<vmem>>, vector<1x256xf32>
    %1063 = vector.broadcast %1062 : vector<1x256xf32> to vector<4x256xf32>
    %1064 = arith.mulf %1061, %1063 : vector<4x256xf32>
    %1065 = vector.extract_strided_slice %542 {offsets = [0, 76], sizes = [8, 1], strides = [1, 1]} : vector<8x100xf32> to vector<8x1xf32>
    %1066 = vector.extract_strided_slice %1064 {offsets = [0, 0], sizes = [1, 256], strides = [1, 1]} : vector<4x256xf32> to vector<1x256xf32>
    %1067 = vector.broadcast %1065 : vector<8x1xf32> to vector<8x256xf32>
    %1068 = vector.broadcast %1066 : vector<1x256xf32> to vector<8x256xf32>
    %1069 = arith.mulf %1067, %1068 : vector<8x256xf32>
    %1070 = arith.addf %1060, %1069 : vector<8x256xf32>
    %1071 = vector.extract_strided_slice %542 {offsets = [0, 77], sizes = [8, 1], strides = [1, 1]} : vector<8x100xf32> to vector<8x1xf32>
    %1072 = vector.extract_strided_slice %1064 {offsets = [1, 0], sizes = [1, 256], strides = [1, 1]} : vector<4x256xf32> to vector<1x256xf32>
    %1073 = vector.broadcast %1071 : vector<8x1xf32> to vector<8x256xf32>
    %1074 = vector.broadcast %1072 : vector<1x256xf32> to vector<8x256xf32>
    %1075 = arith.mulf %1073, %1074 : vector<8x256xf32>
    %1076 = arith.addf %1070, %1075 : vector<8x256xf32>
    %1077 = vector.extract_strided_slice %542 {offsets = [0, 78], sizes = [8, 1], strides = [1, 1]} : vector<8x100xf32> to vector<8x1xf32>
    %1078 = vector.extract_strided_slice %1064 {offsets = [2, 0], sizes = [1, 256], strides = [1, 1]} : vector<4x256xf32> to vector<1x256xf32>
    %1079 = vector.broadcast %1077 : vector<8x1xf32> to vector<8x256xf32>
    %1080 = vector.broadcast %1078 : vector<1x256xf32> to vector<8x256xf32>
    %1081 = arith.mulf %1079, %1080 : vector<8x256xf32>
    %1082 = arith.addf %1076, %1081 : vector<8x256xf32>
    %1083 = vector.extract_strided_slice %542 {offsets = [0, 79], sizes = [8, 1], strides = [1, 1]} : vector<8x100xf32> to vector<8x1xf32>
    %1084 = vector.extract_strided_slice %1064 {offsets = [3, 0], sizes = [1, 256], strides = [1, 1]} : vector<4x256xf32> to vector<1x256xf32>
    %1085 = vector.broadcast %1083 : vector<8x1xf32> to vector<8x256xf32>
    %1086 = vector.broadcast %1084 : vector<1x256xf32> to vector<8x256xf32>
    %1087 = arith.mulf %1085, %1086 : vector<8x256xf32>
    %1088 = arith.addf %1082, %1087 : vector<8x256xf32>
    %1089 = vector.extract_strided_slice %544 {offsets = [0, 64], sizes = [4, 256], strides = [1, 1]} : vector<4x324xf32> to vector<4x256xf32>
    %1090 = vector.broadcast %441 : vector<1x256xf32> to vector<4x256xf32>
    %1091 = arith.mulf %1089, %1090 : vector<4x256xf32>
    %1092 = vector.extract_strided_slice %542 {offsets = [0, 80], sizes = [8, 1], strides = [1, 1]} : vector<8x100xf32> to vector<8x1xf32>
    %1093 = vector.extract_strided_slice %1091 {offsets = [0, 0], sizes = [1, 256], strides = [1, 1]} : vector<4x256xf32> to vector<1x256xf32>
    %1094 = vector.broadcast %1092 : vector<8x1xf32> to vector<8x256xf32>
    %1095 = vector.broadcast %1093 : vector<1x256xf32> to vector<8x256xf32>
    %1096 = arith.mulf %1094, %1095 : vector<8x256xf32>
    %1097 = arith.addf %1088, %1096 : vector<8x256xf32>
    %1098 = vector.extract_strided_slice %542 {offsets = [0, 81], sizes = [8, 1], strides = [1, 1]} : vector<8x100xf32> to vector<8x1xf32>
    %1099 = vector.extract_strided_slice %1091 {offsets = [1, 0], sizes = [1, 256], strides = [1, 1]} : vector<4x256xf32> to vector<1x256xf32>
    %1100 = vector.broadcast %1098 : vector<8x1xf32> to vector<8x256xf32>
    %1101 = vector.broadcast %1099 : vector<1x256xf32> to vector<8x256xf32>
    %1102 = arith.mulf %1100, %1101 : vector<8x256xf32>
    %1103 = arith.addf %1097, %1102 : vector<8x256xf32>
    %1104 = vector.extract_strided_slice %542 {offsets = [0, 82], sizes = [8, 1], strides = [1, 1]} : vector<8x100xf32> to vector<8x1xf32>
    %1105 = vector.extract_strided_slice %1091 {offsets = [2, 0], sizes = [1, 256], strides = [1, 1]} : vector<4x256xf32> to vector<1x256xf32>
    %1106 = vector.broadcast %1104 : vector<8x1xf32> to vector<8x256xf32>
    %1107 = vector.broadcast %1105 : vector<1x256xf32> to vector<8x256xf32>
    %1108 = arith.mulf %1106, %1107 : vector<8x256xf32>
    %1109 = arith.addf %1103, %1108 : vector<8x256xf32>
    %1110 = vector.extract_strided_slice %542 {offsets = [0, 83], sizes = [8, 1], strides = [1, 1]} : vector<8x100xf32> to vector<8x1xf32>
    %1111 = vector.extract_strided_slice %1091 {offsets = [3, 0], sizes = [1, 256], strides = [1, 1]} : vector<4x256xf32> to vector<1x256xf32>
    %1112 = vector.broadcast %1110 : vector<8x1xf32> to vector<8x256xf32>
    %1113 = vector.broadcast %1111 : vector<1x256xf32> to vector<8x256xf32>
    %1114 = arith.mulf %1112, %1113 : vector<8x256xf32>
    %1115 = arith.addf %1109, %1114 : vector<8x256xf32>
    %1116 = vector.extract_strided_slice %544 {offsets = [0, 65], sizes = [4, 256], strides = [1, 1]} : vector<4x324xf32> to vector<4x256xf32>
    %c22 = arith.constant 22 : index
    %c0_50 = arith.constant 0 : index
    %1117 = vector.load %arg1[%c22, %c0_50] : memref<24x256xf32, #tpu.memory_space<vmem>>, vector<1x256xf32>
    %1118 = vector.broadcast %1117 : vector<1x256xf32> to vector<4x256xf32>
    %1119 = arith.mulf %1116, %1118 : vector<4x256xf32>
    %1120 = vector.extract_strided_slice %542 {offsets = [0, 84], sizes = [8, 1], strides = [1, 1]} : vector<8x100xf32> to vector<8x1xf32>
    %1121 = vector.extract_strided_slice %1119 {offsets = [0, 0], sizes = [1, 256], strides = [1, 1]} : vector<4x256xf32> to vector<1x256xf32>
    %1122 = vector.broadcast %1120 : vector<8x1xf32> to vector<8x256xf32>
    %1123 = vector.broadcast %1121 : vector<1x256xf32> to vector<8x256xf32>
    %1124 = arith.mulf %1122, %1123 : vector<8x256xf32>
    %1125 = arith.addf %1115, %1124 : vector<8x256xf32>
    %1126 = vector.extract_strided_slice %542 {offsets = [0, 85], sizes = [8, 1], strides = [1, 1]} : vector<8x100xf32> to vector<8x1xf32>
    %1127 = vector.extract_strided_slice %1119 {offsets = [1, 0], sizes = [1, 256], strides = [1, 1]} : vector<4x256xf32> to vector<1x256xf32>
    %1128 = vector.broadcast %1126 : vector<8x1xf32> to vector<8x256xf32>
    %1129 = vector.broadcast %1127 : vector<1x256xf32> to vector<8x256xf32>
    %1130 = arith.mulf %1128, %1129 : vector<8x256xf32>
    %1131 = arith.addf %1125, %1130 : vector<8x256xf32>
    %1132 = vector.extract_strided_slice %542 {offsets = [0, 86], sizes = [8, 1], strides = [1, 1]} : vector<8x100xf32> to vector<8x1xf32>
    %1133 = vector.extract_strided_slice %1119 {offsets = [2, 0], sizes = [1, 256], strides = [1, 1]} : vector<4x256xf32> to vector<1x256xf32>
    %1134 = vector.broadcast %1132 : vector<8x1xf32> to vector<8x256xf32>
    %1135 = vector.broadcast %1133 : vector<1x256xf32> to vector<8x256xf32>
    %1136 = arith.mulf %1134, %1135 : vector<8x256xf32>
    %1137 = arith.addf %1131, %1136 : vector<8x256xf32>
    %1138 = vector.extract_strided_slice %542 {offsets = [0, 87], sizes = [8, 1], strides = [1, 1]} : vector<8x100xf32> to vector<8x1xf32>
    %1139 = vector.extract_strided_slice %1119 {offsets = [3, 0], sizes = [1, 256], strides = [1, 1]} : vector<4x256xf32> to vector<1x256xf32>
    %1140 = vector.broadcast %1138 : vector<8x1xf32> to vector<8x256xf32>
    %1141 = vector.broadcast %1139 : vector<1x256xf32> to vector<8x256xf32>
    %1142 = arith.mulf %1140, %1141 : vector<8x256xf32>
    %1143 = arith.addf %1137, %1142 : vector<8x256xf32>
    %1144 = vector.extract_strided_slice %544 {offsets = [0, 66], sizes = [4, 256], strides = [1, 1]} : vector<4x324xf32> to vector<4x256xf32>
    %1145 = vector.broadcast %469 : vector<1x256xf32> to vector<4x256xf32>
    %1146 = arith.mulf %1144, %1145 : vector<4x256xf32>
    %1147 = vector.extract_strided_slice %542 {offsets = [0, 88], sizes = [8, 1], strides = [1, 1]} : vector<8x100xf32> to vector<8x1xf32>
    %1148 = vector.extract_strided_slice %1146 {offsets = [0, 0], sizes = [1, 256], strides = [1, 1]} : vector<4x256xf32> to vector<1x256xf32>
    %1149 = vector.broadcast %1147 : vector<8x1xf32> to vector<8x256xf32>
    %1150 = vector.broadcast %1148 : vector<1x256xf32> to vector<8x256xf32>
    %1151 = arith.mulf %1149, %1150 : vector<8x256xf32>
    %1152 = arith.addf %1143, %1151 : vector<8x256xf32>
    %1153 = vector.extract_strided_slice %542 {offsets = [0, 89], sizes = [8, 1], strides = [1, 1]} : vector<8x100xf32> to vector<8x1xf32>
    %1154 = vector.extract_strided_slice %1146 {offsets = [1, 0], sizes = [1, 256], strides = [1, 1]} : vector<4x256xf32> to vector<1x256xf32>
    %1155 = vector.broadcast %1153 : vector<8x1xf32> to vector<8x256xf32>
    %1156 = vector.broadcast %1154 : vector<1x256xf32> to vector<8x256xf32>
    %1157 = arith.mulf %1155, %1156 : vector<8x256xf32>
    %1158 = arith.addf %1152, %1157 : vector<8x256xf32>
    %1159 = vector.extract_strided_slice %542 {offsets = [0, 90], sizes = [8, 1], strides = [1, 1]} : vector<8x100xf32> to vector<8x1xf32>
    %1160 = vector.extract_strided_slice %1146 {offsets = [2, 0], sizes = [1, 256], strides = [1, 1]} : vector<4x256xf32> to vector<1x256xf32>
    %1161 = vector.broadcast %1159 : vector<8x1xf32> to vector<8x256xf32>
    %1162 = vector.broadcast %1160 : vector<1x256xf32> to vector<8x256xf32>
    %1163 = arith.mulf %1161, %1162 : vector<8x256xf32>
    %1164 = arith.addf %1158, %1163 : vector<8x256xf32>
    %1165 = vector.extract_strided_slice %542 {offsets = [0, 91], sizes = [8, 1], strides = [1, 1]} : vector<8x100xf32> to vector<8x1xf32>
    %1166 = vector.extract_strided_slice %1146 {offsets = [3, 0], sizes = [1, 256], strides = [1, 1]} : vector<4x256xf32> to vector<1x256xf32>
    %1167 = vector.broadcast %1165 : vector<8x1xf32> to vector<8x256xf32>
    %1168 = vector.broadcast %1166 : vector<1x256xf32> to vector<8x256xf32>
    %1169 = arith.mulf %1167, %1168 : vector<8x256xf32>
    %1170 = arith.addf %1164, %1169 : vector<8x256xf32>
    %1171 = vector.extract_strided_slice %544 {offsets = [0, 67], sizes = [4, 256], strides = [1, 1]} : vector<4x324xf32> to vector<4x256xf32>
    %c23 = arith.constant 23 : index
    %c0_51 = arith.constant 0 : index
    %1172 = vector.load %arg1[%c23, %c0_51] : memref<24x256xf32, #tpu.memory_space<vmem>>, vector<1x256xf32>
    %1173 = vector.broadcast %1172 : vector<1x256xf32> to vector<4x256xf32>
    %1174 = arith.mulf %1171, %1173 : vector<4x256xf32>
    %1175 = vector.extract_strided_slice %542 {offsets = [0, 92], sizes = [8, 1], strides = [1, 1]} : vector<8x100xf32> to vector<8x1xf32>
    %1176 = vector.extract_strided_slice %1174 {offsets = [0, 0], sizes = [1, 256], strides = [1, 1]} : vector<4x256xf32> to vector<1x256xf32>
    %1177 = vector.broadcast %1175 : vector<8x1xf32> to vector<8x256xf32>
    %1178 = vector.broadcast %1176 : vector<1x256xf32> to vector<8x256xf32>
    %1179 = arith.mulf %1177, %1178 : vector<8x256xf32>
    %1180 = arith.addf %1170, %1179 : vector<8x256xf32>
    %1181 = vector.extract_strided_slice %542 {offsets = [0, 93], sizes = [8, 1], strides = [1, 1]} : vector<8x100xf32> to vector<8x1xf32>
    %1182 = vector.extract_strided_slice %1174 {offsets = [1, 0], sizes = [1, 256], strides = [1, 1]} : vector<4x256xf32> to vector<1x256xf32>
    %1183 = vector.broadcast %1181 : vector<8x1xf32> to vector<8x256xf32>
    %1184 = vector.broadcast %1182 : vector<1x256xf32> to vector<8x256xf32>
    %1185 = arith.mulf %1183, %1184 : vector<8x256xf32>
    %1186 = arith.addf %1180, %1185 : vector<8x256xf32>
    %1187 = vector.extract_strided_slice %542 {offsets = [0, 94], sizes = [8, 1], strides = [1, 1]} : vector<8x100xf32> to vector<8x1xf32>
    %1188 = vector.extract_strided_slice %1174 {offsets = [2, 0], sizes = [1, 256], strides = [1, 1]} : vector<4x256xf32> to vector<1x256xf32>
    %1189 = vector.broadcast %1187 : vector<8x1xf32> to vector<8x256xf32>
    %1190 = vector.broadcast %1188 : vector<1x256xf32> to vector<8x256xf32>
    %1191 = arith.mulf %1189, %1190 : vector<8x256xf32>
    %1192 = arith.addf %1186, %1191 : vector<8x256xf32>
    %1193 = vector.extract_strided_slice %542 {offsets = [0, 95], sizes = [8, 1], strides = [1, 1]} : vector<8x100xf32> to vector<8x1xf32>
    %1194 = vector.extract_strided_slice %1174 {offsets = [3, 0], sizes = [1, 256], strides = [1, 1]} : vector<4x256xf32> to vector<1x256xf32>
    %1195 = vector.broadcast %1193 : vector<8x1xf32> to vector<8x256xf32>
    %1196 = vector.broadcast %1194 : vector<1x256xf32> to vector<8x256xf32>
    %1197 = arith.mulf %1195, %1196 : vector<8x256xf32>
    %1198 = arith.addf %1192, %1197 : vector<8x256xf32>
    %1199 = vector.extract_strided_slice %544 {offsets = [0, 68], sizes = [4, 256], strides = [1, 1]} : vector<4x324xf32> to vector<4x256xf32>
    %1200 = vector.broadcast %497 : vector<1x256xf32> to vector<4x256xf32>
    %1201 = arith.mulf %1199, %1200 : vector<4x256xf32>
    %1202 = vector.extract_strided_slice %542 {offsets = [0, 96], sizes = [8, 1], strides = [1, 1]} : vector<8x100xf32> to vector<8x1xf32>
    %1203 = vector.extract_strided_slice %1201 {offsets = [0, 0], sizes = [1, 256], strides = [1, 1]} : vector<4x256xf32> to vector<1x256xf32>
    %1204 = vector.broadcast %1202 : vector<8x1xf32> to vector<8x256xf32>
    %1205 = vector.broadcast %1203 : vector<1x256xf32> to vector<8x256xf32>
    %1206 = arith.mulf %1204, %1205 : vector<8x256xf32>
    %1207 = arith.addf %1198, %1206 : vector<8x256xf32>
    %1208 = vector.extract_strided_slice %542 {offsets = [0, 97], sizes = [8, 1], strides = [1, 1]} : vector<8x100xf32> to vector<8x1xf32>
    %1209 = vector.extract_strided_slice %1201 {offsets = [1, 0], sizes = [1, 256], strides = [1, 1]} : vector<4x256xf32> to vector<1x256xf32>
    %1210 = vector.broadcast %1208 : vector<8x1xf32> to vector<8x256xf32>
    %1211 = vector.broadcast %1209 : vector<1x256xf32> to vector<8x256xf32>
    %1212 = arith.mulf %1210, %1211 : vector<8x256xf32>
    %1213 = arith.addf %1207, %1212 : vector<8x256xf32>
    %1214 = vector.extract_strided_slice %542 {offsets = [0, 98], sizes = [8, 1], strides = [1, 1]} : vector<8x100xf32> to vector<8x1xf32>
    %1215 = vector.extract_strided_slice %1201 {offsets = [2, 0], sizes = [1, 256], strides = [1, 1]} : vector<4x256xf32> to vector<1x256xf32>
    %1216 = vector.broadcast %1214 : vector<8x1xf32> to vector<8x256xf32>
    %1217 = vector.broadcast %1215 : vector<1x256xf32> to vector<8x256xf32>
    %1218 = arith.mulf %1216, %1217 : vector<8x256xf32>
    %1219 = arith.addf %1213, %1218 : vector<8x256xf32>
    %1220 = vector.extract_strided_slice %542 {offsets = [0, 99], sizes = [8, 1], strides = [1, 1]} : vector<8x100xf32> to vector<8x1xf32>
    %1221 = vector.extract_strided_slice %1201 {offsets = [3, 0], sizes = [1, 256], strides = [1, 1]} : vector<4x256xf32> to vector<1x256xf32>
    %1222 = vector.broadcast %1220 : vector<8x1xf32> to vector<8x256xf32>
    %1223 = vector.broadcast %1221 : vector<1x256xf32> to vector<8x256xf32>
    %1224 = arith.mulf %1222, %1223 : vector<8x256xf32>
    %1225 = arith.addf %1219, %1224 : vector<8x256xf32>
    %c0_52 = arith.constant 0 : index
    %c0_53 = arith.constant 0 : index
    %1226 = vector.load %arg8[%c0_52, %c0_53] : memref<8x1xf32, #tpu.memory_space<vmem>>, vector<8x1xf32>
    %1227 = vector.broadcast %1226 : vector<8x1xf32> to vector<8x256xf32>
    %1228 = arith.addf %1225, %1227 : vector<8x256xf32>
    %1229 = vector.extract_strided_slice %1228 {offsets = [0, 0], sizes = [4, 256], strides = [1, 1]} : vector<8x256xf32> to vector<4x256xf32>
    %cst_54 = arith.constant 0.000000e+00 : f32
    %1230 = vector.broadcast %cst_54 : f32 to vector<4x256xf32>
    %1231 = arith.cmpf oge, %1229, %1230 : vector<4x256xf32>
    %cst_55 = arith.constant 5.000000e-02 : f32
    %1232 = vector.broadcast %cst_55 : f32 to vector<4x256xf32>
    %1233 = arith.mulf %1232, %1229 : vector<4x256xf32>
    %1234 = arith.select %1231, %1229, %1233 : vector<4x256xi1>, vector<4x256xf32>
    %1235 = vector.extract_strided_slice %1228 {offsets = [4, 0], sizes = [4, 256], strides = [1, 1]} : vector<8x256xf32> to vector<4x256xf32>
    %cst_56 = arith.constant 2.000000e+00 : f32
    %1236 = vector.broadcast %cst_56 : f32 to vector<4x256xf32>
    %1237 = arith.mulf %1236, %541 : vector<4x256xf32>
    %1238 = arith.addf %1235, %1237 : vector<4x256xf32>
    %cst_57 = arith.constant 0.000000e+00 : f32
    %1239 = vector.broadcast %cst_57 : f32 to vector<4x256xf32>
    %1240 = arith.cmpf oge, %1238, %1239 : vector<4x256xf32>
    %cst_58 = arith.constant 5.000000e-02 : f32
    %1241 = vector.broadcast %cst_58 : f32 to vector<4x256xf32>
    %1242 = arith.mulf %1241, %1238 : vector<4x256xf32>
    %1243 = arith.select %1240, %1238, %1242 : vector<4x256xi1>, vector<4x256xf32>
    %c0_59 = arith.constant 0 : index
    %c0_60 = arith.constant 0 : index
    %1244 = vector.load %arg9[%c0_59, %c0_60] : memref<4x4xf32, #tpu.memory_space<vmem>>, vector<4x4xf32>
    %cst_61 = arith.constant 0.000000e+00 : f32
    %1245 = vector.broadcast %cst_61 : f32 to vector<4x256xf32>
    %1246 = vector.extract_strided_slice %1244 {offsets = [0, 0], sizes = [4, 1], strides = [1, 1]} : vector<4x4xf32> to vector<4x1xf32>
    %1247 = vector.extract_strided_slice %1243 {offsets = [0, 0], sizes = [1, 256], strides = [1, 1]} : vector<4x256xf32> to vector<1x256xf32>
    %1248 = vector.broadcast %1246 : vector<4x1xf32> to vector<4x256xf32>
    %1249 = vector.broadcast %1247 : vector<1x256xf32> to vector<4x256xf32>
    %1250 = arith.mulf %1248, %1249 : vector<4x256xf32>
    %1251 = arith.addf %1245, %1250 : vector<4x256xf32>
    %1252 = vector.extract_strided_slice %1244 {offsets = [0, 1], sizes = [4, 1], strides = [1, 1]} : vector<4x4xf32> to vector<4x1xf32>
    %1253 = vector.extract_strided_slice %1243 {offsets = [1, 0], sizes = [1, 256], strides = [1, 1]} : vector<4x256xf32> to vector<1x256xf32>
    %1254 = vector.broadcast %1252 : vector<4x1xf32> to vector<4x256xf32>
    %1255 = vector.broadcast %1253 : vector<1x256xf32> to vector<4x256xf32>
    %1256 = arith.mulf %1254, %1255 : vector<4x256xf32>
    %1257 = arith.addf %1251, %1256 : vector<4x256xf32>
    %1258 = vector.extract_strided_slice %1244 {offsets = [0, 2], sizes = [4, 1], strides = [1, 1]} : vector<4x4xf32> to vector<4x1xf32>
    %1259 = vector.extract_strided_slice %1243 {offsets = [2, 0], sizes = [1, 256], strides = [1, 1]} : vector<4x256xf32> to vector<1x256xf32>
    %1260 = vector.broadcast %1258 : vector<4x1xf32> to vector<4x256xf32>
    %1261 = vector.broadcast %1259 : vector<1x256xf32> to vector<4x256xf32>
    %1262 = arith.mulf %1260, %1261 : vector<4x256xf32>
    %1263 = arith.addf %1257, %1262 : vector<4x256xf32>
    %1264 = vector.extract_strided_slice %1244 {offsets = [0, 3], sizes = [4, 1], strides = [1, 1]} : vector<4x4xf32> to vector<4x1xf32>
    %1265 = vector.extract_strided_slice %1243 {offsets = [3, 0], sizes = [1, 256], strides = [1, 1]} : vector<4x256xf32> to vector<1x256xf32>
    %1266 = vector.broadcast %1264 : vector<4x1xf32> to vector<4x256xf32>
    %1267 = vector.broadcast %1265 : vector<1x256xf32> to vector<4x256xf32>
    %1268 = arith.mulf %1266, %1267 : vector<4x256xf32>
    %1269 = arith.addf %1263, %1268 : vector<4x256xf32>
    %c0_62 = arith.constant 0 : index
    %c0_63 = arith.constant 0 : index
    %1270 = vector.load %arg10[%c0_62, %c0_63] : memref<4x1xf32, #tpu.memory_space<vmem>>, vector<4x1xf32>
    %1271 = vector.broadcast %1270 : vector<4x1xf32> to vector<4x256xf32>
    %1272 = arith.addf %1269, %1271 : vector<4x256xf32>
    %cst_64 = arith.constant 0.000000e+00 : f32
    %1273 = vector.broadcast %cst_64 : f32 to vector<4x256xf32>
    %1274 = arith.cmpf oge, %1272, %1273 : vector<4x256xf32>
    %cst_65 = arith.constant 5.000000e-02 : f32
    %1275 = vector.broadcast %cst_65 : f32 to vector<4x256xf32>
    %1276 = arith.mulf %1275, %1272 : vector<4x256xf32>
    %1277 = arith.select %1274, %1272, %1276 : vector<4x256xi1>, vector<4x256xf32>
    %c0_66 = arith.constant 0 : index
    %c0_67 = arith.constant 0 : index
    %1278 = vector.load %arg11[%c0_66, %c0_67] : memref<4x16xf32, #tpu.memory_space<vmem>>, vector<4x16xf32>
    %c0_68 = arith.constant 0 : index
    %c0_69 = arith.constant 0 : index
    %1279 = vector.load %arg12[%c0_68, %c0_69] : memref<4x1xf32, #tpu.memory_space<vmem>>, vector<4x1xf32>
    %cst_70 = arith.constant 0.000000e+00 : f32
    %1280 = vector.broadcast %cst_70 : f32 to vector<4x256xf32>
    %1281 = vector.extract_strided_slice %1278 {offsets = [0, 0], sizes = [4, 1], strides = [1, 1]} : vector<4x16xf32> to vector<4x1xf32>
    %1282 = vector.extract_strided_slice %262 {offsets = [0, 0], sizes = [1, 256], strides = [1, 1]} : vector<4x256xf32> to vector<1x256xf32>
    %1283 = vector.broadcast %1281 : vector<4x1xf32> to vector<4x256xf32>
    %1284 = vector.broadcast %1282 : vector<1x256xf32> to vector<4x256xf32>
    %1285 = arith.mulf %1283, %1284 : vector<4x256xf32>
    %1286 = arith.addf %1280, %1285 : vector<4x256xf32>
    %1287 = vector.extract_strided_slice %1278 {offsets = [0, 1], sizes = [4, 1], strides = [1, 1]} : vector<4x16xf32> to vector<4x1xf32>
    %1288 = vector.extract_strided_slice %262 {offsets = [1, 0], sizes = [1, 256], strides = [1, 1]} : vector<4x256xf32> to vector<1x256xf32>
    %1289 = vector.broadcast %1287 : vector<4x1xf32> to vector<4x256xf32>
    %1290 = vector.broadcast %1288 : vector<1x256xf32> to vector<4x256xf32>
    %1291 = arith.mulf %1289, %1290 : vector<4x256xf32>
    %1292 = arith.addf %1286, %1291 : vector<4x256xf32>
    %1293 = vector.extract_strided_slice %1278 {offsets = [0, 2], sizes = [4, 1], strides = [1, 1]} : vector<4x16xf32> to vector<4x1xf32>
    %1294 = vector.extract_strided_slice %262 {offsets = [2, 0], sizes = [1, 256], strides = [1, 1]} : vector<4x256xf32> to vector<1x256xf32>
    %1295 = vector.broadcast %1293 : vector<4x1xf32> to vector<4x256xf32>
    %1296 = vector.broadcast %1294 : vector<1x256xf32> to vector<4x256xf32>
    %1297 = arith.mulf %1295, %1296 : vector<4x256xf32>
    %1298 = arith.addf %1292, %1297 : vector<4x256xf32>
    %1299 = vector.extract_strided_slice %1278 {offsets = [0, 3], sizes = [4, 1], strides = [1, 1]} : vector<4x16xf32> to vector<4x1xf32>
    %1300 = vector.extract_strided_slice %262 {offsets = [3, 0], sizes = [1, 256], strides = [1, 1]} : vector<4x256xf32> to vector<1x256xf32>
    %1301 = vector.broadcast %1299 : vector<4x1xf32> to vector<4x256xf32>
    %1302 = vector.broadcast %1300 : vector<1x256xf32> to vector<4x256xf32>
    %1303 = arith.mulf %1301, %1302 : vector<4x256xf32>
    %1304 = arith.addf %1298, %1303 : vector<4x256xf32>
    %1305 = vector.extract_strided_slice %1278 {offsets = [0, 4], sizes = [4, 1], strides = [1, 1]} : vector<4x16xf32> to vector<4x1xf32>
    %1306 = vector.extract_strided_slice %532 {offsets = [0, 0], sizes = [1, 256], strides = [1, 1]} : vector<4x256xf32> to vector<1x256xf32>
    %1307 = vector.broadcast %1305 : vector<4x1xf32> to vector<4x256xf32>
    %1308 = vector.broadcast %1306 : vector<1x256xf32> to vector<4x256xf32>
    %1309 = arith.mulf %1307, %1308 : vector<4x256xf32>
    %1310 = arith.addf %1304, %1309 : vector<4x256xf32>
    %1311 = vector.extract_strided_slice %1278 {offsets = [0, 5], sizes = [4, 1], strides = [1, 1]} : vector<4x16xf32> to vector<4x1xf32>
    %1312 = vector.extract_strided_slice %532 {offsets = [1, 0], sizes = [1, 256], strides = [1, 1]} : vector<4x256xf32> to vector<1x256xf32>
    %1313 = vector.broadcast %1311 : vector<4x1xf32> to vector<4x256xf32>
    %1314 = vector.broadcast %1312 : vector<1x256xf32> to vector<4x256xf32>
    %1315 = arith.mulf %1313, %1314 : vector<4x256xf32>
    %1316 = arith.addf %1310, %1315 : vector<4x256xf32>
    %1317 = vector.extract_strided_slice %1278 {offsets = [0, 6], sizes = [4, 1], strides = [1, 1]} : vector<4x16xf32> to vector<4x1xf32>
    %1318 = vector.extract_strided_slice %532 {offsets = [2, 0], sizes = [1, 256], strides = [1, 1]} : vector<4x256xf32> to vector<1x256xf32>
    %1319 = vector.broadcast %1317 : vector<4x1xf32> to vector<4x256xf32>
    %1320 = vector.broadcast %1318 : vector<1x256xf32> to vector<4x256xf32>
    %1321 = arith.mulf %1319, %1320 : vector<4x256xf32>
    %1322 = arith.addf %1316, %1321 : vector<4x256xf32>
    %1323 = vector.extract_strided_slice %1278 {offsets = [0, 7], sizes = [4, 1], strides = [1, 1]} : vector<4x16xf32> to vector<4x1xf32>
    %1324 = vector.extract_strided_slice %532 {offsets = [3, 0], sizes = [1, 256], strides = [1, 1]} : vector<4x256xf32> to vector<1x256xf32>
    %1325 = vector.broadcast %1323 : vector<4x1xf32> to vector<4x256xf32>
    %1326 = vector.broadcast %1324 : vector<1x256xf32> to vector<4x256xf32>
    %1327 = arith.mulf %1325, %1326 : vector<4x256xf32>
    %1328 = arith.addf %1322, %1327 : vector<4x256xf32>
    %1329 = vector.extract_strided_slice %1278 {offsets = [0, 8], sizes = [4, 1], strides = [1, 1]} : vector<4x16xf32> to vector<4x1xf32>
    %1330 = vector.extract_strided_slice %1234 {offsets = [0, 0], sizes = [1, 256], strides = [1, 1]} : vector<4x256xf32> to vector<1x256xf32>
    %1331 = vector.broadcast %1329 : vector<4x1xf32> to vector<4x256xf32>
    %1332 = vector.broadcast %1330 : vector<1x256xf32> to vector<4x256xf32>
    %1333 = arith.mulf %1331, %1332 : vector<4x256xf32>
    %1334 = arith.addf %1328, %1333 : vector<4x256xf32>
    %1335 = vector.extract_strided_slice %1278 {offsets = [0, 9], sizes = [4, 1], strides = [1, 1]} : vector<4x16xf32> to vector<4x1xf32>
    %1336 = vector.extract_strided_slice %1234 {offsets = [1, 0], sizes = [1, 256], strides = [1, 1]} : vector<4x256xf32> to vector<1x256xf32>
    %1337 = vector.broadcast %1335 : vector<4x1xf32> to vector<4x256xf32>
    %1338 = vector.broadcast %1336 : vector<1x256xf32> to vector<4x256xf32>
    %1339 = arith.mulf %1337, %1338 : vector<4x256xf32>
    %1340 = arith.addf %1334, %1339 : vector<4x256xf32>
    %1341 = vector.extract_strided_slice %1278 {offsets = [0, 10], sizes = [4, 1], strides = [1, 1]} : vector<4x16xf32> to vector<4x1xf32>
    %1342 = vector.extract_strided_slice %1234 {offsets = [2, 0], sizes = [1, 256], strides = [1, 1]} : vector<4x256xf32> to vector<1x256xf32>
    %1343 = vector.broadcast %1341 : vector<4x1xf32> to vector<4x256xf32>
    %1344 = vector.broadcast %1342 : vector<1x256xf32> to vector<4x256xf32>
    %1345 = arith.mulf %1343, %1344 : vector<4x256xf32>
    %1346 = arith.addf %1340, %1345 : vector<4x256xf32>
    %1347 = vector.extract_strided_slice %1278 {offsets = [0, 11], sizes = [4, 1], strides = [1, 1]} : vector<4x16xf32> to vector<4x1xf32>
    %1348 = vector.extract_strided_slice %1234 {offsets = [3, 0], sizes = [1, 256], strides = [1, 1]} : vector<4x256xf32> to vector<1x256xf32>
    %1349 = vector.broadcast %1347 : vector<4x1xf32> to vector<4x256xf32>
    %1350 = vector.broadcast %1348 : vector<1x256xf32> to vector<4x256xf32>
    %1351 = arith.mulf %1349, %1350 : vector<4x256xf32>
    %1352 = arith.addf %1346, %1351 : vector<4x256xf32>
    %1353 = vector.extract_strided_slice %1278 {offsets = [0, 12], sizes = [4, 1], strides = [1, 1]} : vector<4x16xf32> to vector<4x1xf32>
    %1354 = vector.extract_strided_slice %1277 {offsets = [0, 0], sizes = [1, 256], strides = [1, 1]} : vector<4x256xf32> to vector<1x256xf32>
    %1355 = vector.broadcast %1353 : vector<4x1xf32> to vector<4x256xf32>
    %1356 = vector.broadcast %1354 : vector<1x256xf32> to vector<4x256xf32>
    %1357 = arith.mulf %1355, %1356 : vector<4x256xf32>
    %1358 = arith.addf %1352, %1357 : vector<4x256xf32>
    %1359 = vector.extract_strided_slice %1278 {offsets = [0, 13], sizes = [4, 1], strides = [1, 1]} : vector<4x16xf32> to vector<4x1xf32>
    %1360 = vector.extract_strided_slice %1277 {offsets = [1, 0], sizes = [1, 256], strides = [1, 1]} : vector<4x256xf32> to vector<1x256xf32>
    %1361 = vector.broadcast %1359 : vector<4x1xf32> to vector<4x256xf32>
    %1362 = vector.broadcast %1360 : vector<1x256xf32> to vector<4x256xf32>
    %1363 = arith.mulf %1361, %1362 : vector<4x256xf32>
    %1364 = arith.addf %1358, %1363 : vector<4x256xf32>
    %1365 = vector.extract_strided_slice %1278 {offsets = [0, 14], sizes = [4, 1], strides = [1, 1]} : vector<4x16xf32> to vector<4x1xf32>
    %1366 = vector.extract_strided_slice %1277 {offsets = [2, 0], sizes = [1, 256], strides = [1, 1]} : vector<4x256xf32> to vector<1x256xf32>
    %1367 = vector.broadcast %1365 : vector<4x1xf32> to vector<4x256xf32>
    %1368 = vector.broadcast %1366 : vector<1x256xf32> to vector<4x256xf32>
    %1369 = arith.mulf %1367, %1368 : vector<4x256xf32>
    %1370 = arith.addf %1364, %1369 : vector<4x256xf32>
    %1371 = vector.extract_strided_slice %1278 {offsets = [0, 15], sizes = [4, 1], strides = [1, 1]} : vector<4x16xf32> to vector<4x1xf32>
    %1372 = vector.extract_strided_slice %1277 {offsets = [3, 0], sizes = [1, 256], strides = [1, 1]} : vector<4x256xf32> to vector<1x256xf32>
    %1373 = vector.broadcast %1371 : vector<4x1xf32> to vector<4x256xf32>
    %1374 = vector.broadcast %1372 : vector<1x256xf32> to vector<4x256xf32>
    %1375 = arith.mulf %1373, %1374 : vector<4x256xf32>
    %1376 = arith.addf %1370, %1375 : vector<4x256xf32>
    %1377 = vector.broadcast %1279 : vector<4x1xf32> to vector<4x256xf32>
    %1378 = arith.addf %1376, %1377 : vector<4x256xf32>
    %c0_71 = arith.constant 0 : index
    %c0_72 = arith.constant 0 : index
    %c0_73 = arith.constant 0 : index
    %1379 = vector.load %arg13[%c0_71, %c0_72, %c0_73] : memref<1x4x256xf32, #tpu.memory_space<vmem>>, vector<1x4x256xf32>
    %1380 = vector.shape_cast %1379 : vector<1x4x256xf32> to vector<4x256xf32>
    %1381 = vector.shape_cast %1378 : vector<4x256xf32> to vector<1x4x256xf32>
    tpu.vector_store %arg13[%c0_71, %c0_72, %c0_73], %1381 {strides = array<i32>} : memref<1x4x256xf32, #tpu.memory_space<vmem>>, vector<1x4x256xf32>,
    return
  }
  func.func @transform_0(%arg0: i32) -> (i32, i32) {
    %c0_i32 = arith.constant 0 : i32
    %c0_i32_0 = arith.constant 0 : i32
    %c0_i32_1 = arith.constant 0 : i32
    return %c0_i32, %c0_i32_0 : i32, i32
  }
  func.func @transform_1(%arg0: i32) -> (i32, i32, i32) {
    %c0_i32 = arith.constant 0 : i32
    %c0_i32_0 = arith.constant 0 : i32
    %c0_i32_1 = arith.constant 0 : i32
    return %arg0, %c0_i32, %c0_i32_0 : i32, i32, i32
  }
  func.func @transform_2(%arg0: i32) -> (i32, i32) {
    %c0_i32 = arith.constant 0 : i32
    %c0_i32_0 = arith.constant 0 : i32
    %c0_i32_1 = arith.constant 0 : i32
    return %c0_i32, %c0_i32_0 : i32, i32
  }
  func.func @transform_3(%arg0: i32) -> (i32, i32) {
    %c0_i32 = arith.constant 0 : i32
    %c0_i32_0 = arith.constant 0 : i32
    %c0_i32_1 = arith.constant 0 : i32
    return %c0_i32, %c0_i32_0 : i32, i32
  }
  func.func @transform_4(%arg0: i32) -> (i32, i32) {
    %c0_i32 = arith.constant 0 : i32
    %c0_i32_0 = arith.constant 0 : i32
    %c0_i32_1 = arith.constant 0 : i32
    return %c0_i32, %c0_i32_0 : i32, i32
  }
  func.func @transform_5(%arg0: i32) -> (i32, i32) {
    %c0_i32 = arith.constant 0 : i32
    %c0_i32_0 = arith.constant 0 : i32
    %c0_i32_1 = arith.constant 0 : i32
    return %c0_i32, %c0_i32_0 : i32, i32
  }
  func.func @transform_6(%arg0: i32) -> (i32, i32) {
    %c0_i32 = arith.constant 0 : i32
    %c0_i32_0 = arith.constant 0 : i32
    %c0_i32_1 = arith.constant 0 : i32
    return %c0_i32, %c0_i32_0 : i32, i32
  }
  func.func @transform_7(%arg0: i32) -> (i32, i32) {
    %c0_i32 = arith.constant 0 : i32
    %c0_i32_0 = arith.constant 0 : i32
    %c0_i32_1 = arith.constant 0 : i32
    return %c0_i32, %c0_i32_0 : i32, i32
  }
  func.func @transform_8(%arg0: i32) -> (i32, i32) {
    %c0_i32 = arith.constant 0 : i32
    %c0_i32_0 = arith.constant 0 : i32
    %c0_i32_1 = arith.constant 0 : i32
    return %c0_i32, %c0_i32_0 : i32, i32
  }
  func.func @transform_9(%arg0: i32) -> (i32, i32) {
    %c0_i32 = arith.constant 0 : i32
    %c0_i32_0 = arith.constant 0 : i32
    %c0_i32_1 = arith.constant 0 : i32
    return %c0_i32, %c0_i32_0 : i32, i32
  }
  func.func @transform_10(%arg0: i32) -> (i32, i32) {
    %c0_i32 = arith.constant 0 : i32
    %c0_i32_0 = arith.constant 0 : i32
    %c0_i32_1 = arith.constant 0 : i32
    return %c0_i32, %c0_i32_0 : i32, i32
  }
  func.func @transform_11(%arg0: i32) -> (i32, i32) {
    %c0_i32 = arith.constant 0 : i32
    %c0_i32_0 = arith.constant 0 : i32
    %c0_i32_1 = arith.constant 0 : i32
    return %c0_i32, %c0_i32_0 : i32, i32
  }
  func.func @transform_12(%arg0: i32) -> (i32, i32, i32) {
    %c0_i32 = arith.constant 0 : i32
    %c0_i32_0 = arith.constant 0 : i32
    %c0_i32_1 = arith.constant 0 : i32
    return %arg0, %c0_i32, %c0_i32_0 : i32, i32, i32
  }
}

</mosaic_0001>

<bundles_post_ra>
// kernel: tpu_custom_call.1
= control target key start
LH: loop header
LB: loop body
LE: loop exit
PB: predicated region body
PF: predicated region fallthrough
CT: control target
= control target key end

     0   :  { %6 = vsyncpa [#allocation3], 0  ;;  %s143_s0 = inlined_call_operand.hbm [shape: f32[4,256], index: 0, kind: input, shape index: {}]   ;;  %s144_s1 = inlined_call_operand.hbm [shape: f32[4,256], index: 1, kind: output, shape index: {}]  }
   0x1   :  { %7 = vsyncpa [#allocation4], 0  ;;  %s106_s6 = smov [#allocation2]   ;;  %s58_s10 = scalar_lea.hbm %s143_s0, 128 }
   0x2   :  { %s14_s7 = sshll.u32 %s106_s6, 4  ;;  %p59_p0 = scmp.ne.s32.totalorder %s143_s0, %s58_s10  ;;  %s15_s7 = int_to_ptr.vmem [resolvable:$true] %s14_s7 }
   0x3   :  { %p62_p1 = scmp.lt.u32.totalorder %s58_s10, %s143_s0 }
   0x5   :  { %p64_p2 = pnand %p62_p1, %p59_p0 }
   0x7   :  { %67 = shalt.err (!%p64_p2)
}
   0x8   :  { %s68_s15 = scalar_lea.vmem %s15_s7, 128  ;;  %p73_p4 = scmp.lt.s32.totalorder %s15_s7, %s15_s7 }
   0x9   :  { %p69_p3 = scmp.ne.s32.totalorder %s15_s7, %s68_s15  ;;  %p74_p5 = scmp.lt.s32.totalorder %s68_s15, %s68_s15 }
   0xb   :  { %p75_p6 = por %p74_p5, %p73_p4 }
   0xd   :  { %p76_p7 = pnand %p75_p6, %p69_p3 }
   0xf   :  { %79 = shalt.err (!%p76_p7)
}
  0x10   :  { %17 = dma.hbm_to_vmem [thread:$0]  %s143_s0, 128, %s15_s7, [#allocation3]  }
  0x11   :  { %102 = dma.done.wait [#allocation3], 128  }
  0x12   :  { %103 = vsyncadd [#allocation3], 4294967168  ;;  %v21_v0 = vld [vmem:[#allocation2] sm:$0xff]  ;;  %s107_s18 = smov 1   ;;  %v29_v2 = vlaneseq  ;;  %s108_s19 = smov [#allocation5]  }
  0x13   :  { %25 = vrot.lane.b32.xlu0 %v21_v0, %s107_s18  ;;  %v23_v1 = vcombine.high %v21_v0, %v21_v0  ;;  %s45_s20 = sshll.u32 %s108_s19, 4  ;;  %s46_s20 = int_to_ptr.vmem [resolvable:$true] %s45_s20 }
  0x14   :  { %v30_v3 = vand.u32 127, %v29_v2  ;;  %s80_s0 = scalar_lea.vmem %s46_s20, 128  ;;  %p85_p9 = scmp.lt.s32.totalorder %s46_s20, %s46_s20 }
  0x15   :  { %p81_p8 = scmp.ne.s32.totalorder %s46_s20, %s80_s0  ;;  %p86_p10 = scmp.lt.s32.totalorder %s80_s0, %s80_s0 }
  0x16   :  { %vm31_vm0 = vcmp.lt.s32.totalorder %v30_v3, 1 }
  0x17   :  { %27 = vrot.lane.b32.xlu0 %v23_v1, %s107_s18  ;;  %p87_p11 = por %p86_p10, %p85_p9 }
  0x19   :  { %p88_p12 = pnand %p87_p11, %p81_p8 }
  0x85   :  { %v26_v4 = vpop.permute.xlu0 %25 }
  0x89   :  { %v28_v5 = vpop.permute.xlu0 %27 }
  0x8a   :  { %v32_v6 = vsel %vm31_vm0, %v26_v4, %v28_v5  ;;  %v33_v7 = vsel %vm31_vm0, %v28_v5, %v26_v4 }
  0x8b   :  { %v36_v8 = vcombine.low %v33_v7, %v32_v6 }
  0x8d   :  { %38 = vst [vmem:[#allocation5] sm:$0xff] %v36_v8 }
  0x8e   :  { %91 = shalt.err (!%p88_p12)
}
  0x8f   :  { %s92_s23 = scalar_lea.hbm %s144_s1, 128 }
  0x90   :  { %p93_p13 = scmp.ne.s32.totalorder %s144_s1, %s92_s23  ;;  %p96_p0 = scmp.lt.u32.totalorder %s92_s23, %s144_s1 }
  0x92   :  { %p98_p1 = pnand %p96_p0, %p93_p13 }
  0x94   :  { %101 = shalt.err (!%p98_p1)
}
  0x95   :  { %48 = dma.vmem_to_hbm [thread:$0]  %s46_s20, 128, %s144_s1, [#allocation4]  }
  0x96   :  { %104 = dma.done.wait [#allocation4], 128  }
  0x97   :  { %105 = vsyncadd [#allocation4], 4294967168 }
  0x98   :  { %52 = vsyncpa [#allocation3], 1 }
  0x99   :  { %53 = vsyncpa [#allocation4], 1 }

// kernel: forward.1
= control target key start
LH: loop header
LB: loop body
LE: loop exit
PB: predicated region body
PF: predicated region fallthrough
CT: control target
= control target key end

     0   :  { %s7679_s21 = smov 0   ;;  %s11601_s0 = inlined_call_operand.vmem [shape: f32[24,256], index: 0, kind: input, shape index: {}]   ;;  %s11602_s1 = inlined_call_operand.vmem [shape: f32[2,4,256], index: 1, kind: input, shape index: {}]   ;;  %s11603_s2 = inlined_call_operand.vmem [shape: f32[8,36], index: 2, kind: input, shape index: {}]   ;;  %s11604_s3 = inlined_call_operand.vmem [shape: f32[8,1], index: 3, kind: input, shape index: {}]   ;;  %s11605_s4 = inlined_call_operand.vmem [shape: f32[8,36], index: 4, kind: input, shape index: {}]   ;;  %s11606_s5 = inlined_call_operand.vmem [shape: f32[8,1], index: 5, kind: input, shape index: {}]   ;;  %s11607_s6 = inlined_call_operand.vmem [shape: f32[8,100], index: 6, kind: input, shape index: {}]   ;;  %s11608_s7 = inlined_call_operand.vmem [shape: f32[8,1], index: 7, kind: input, shape index: {}]   ;;  %s11609_s8 = inlined_call_operand.vmem [shape: f32[4,4], index: 8, kind: input, shape index: {}]   ;;  %s11610_s9 = inlined_call_operand.vmem [shape: f32[4,1], index: 9, kind: input, shape index: {}]   ;;  %s11611_s10 = inlined_call_operand.vmem [shape: f32[4,16], index: 10, kind: input, shape index: {}]   ;;  %s11612_s11 = inlined_call_operand.vmem [shape: f32[4,1], index: 11, kind: input, shape index: {}]   ;;  %s11613_s12 = inlined_call_operand.vmem [shape: f32[2,4,256], index: 12, kind: output, shape index: {}]  }
   0x1 LB: > { %s7068_s22 = sadd.s32 4294967295, %s7465_s21   ;;  %p7072_p0 = scmp.ge.s32.totalorder %s7465_s21, 1  ;;  %s7465_s21 = sphi %s7679_s21, %s22_s21  }
   0x2   : > { %p362_p1 = scmp.lt.s32.totalorder %s7465_s21, 3 }
   0x4   : > { %p363_p2 = pnand %p7072_p0, %p362_p1 }
   0x6   : > { %366 = sbr.rel (%p363_p2) target bundleno = 13911 (0x3657), region = 68 }
   0xd   : > { %v7690_v0 = vld [vmem:[%s11603_s2] sm:$0xff]  ;;  %p404_p3 = scmp.lt.s32.totalorder %s7068_s22, 1  ;;  %v431_v1 = vlaneseq  ;;  %v11660_v2 = vmov 0   ;;  %v11656_v3 = vmov 2   ;;  %v11658_v5 = vmov 1   ;;  %s7470_s29 = smov 17  }
   0xe   : > { %7259 = vset.pattern.permute.xlu1 %v11660_v2  ;;  %7261 = vset.pattern.permute.xlu0 %v11656_v3  ;;  %v7077_v9 = vld [vmem:[%s11601_s0 + $0x1] ss:$8 sm:$0x3]  ;;  %v11616_v10 = vmov 3   ;;  %s7472_s14 = smov 1   ;;  %v11614_v15 = vmov 4  }
   0xf   : > { %445 = vperm.xlu1 %7259, %v7690_v0   ;;  %s12724_s22 = smov (!%p404_p3, %s7068_s22), 1  ;;  %v7698_v4 = vshrl.u32 %v431_v1, 7  ;;  %v7078_v14 = vld [vmem:[%s11601_s0 + $0x2] ss:$8 sm:$0x3]  ;;  %v11640_v18 = vmov 20  }
  0x10   : > { %s11698_s25 = sshll.u32 %s12724_s22, 3  ;;  %v7079_v17 = vld [vmem:[%s11601_s0 + $0x3] ss:$8 sm:$0x3]  ;;  %s7475_s19 = smov 2   ;;  %v11654_v20 = vmov 5  }
  0x11   : > { %s7705_s28 = scalar_lea.vmem %s11602_s1, %s11698_s25  ;;  %v7712_v8 = vsub.s32 0, %v7698_v4  ;;  %v7720_v11 = vsub.s32 1, %v7698_v4  ;;  %v7080_v21 = vld [vmem:[%s11601_s0 + $0x4] ss:$8 sm:$0x3]  ;;  %s7477_s24 = smov 16  }
  0x12   : > { %v414_v6 = vld [vmem:[%s7705_s28] sm:$0xff]  ;;  %v11652_v23 = vmov 6   ;;  %s11722_s26 = smov 18   ;;  %v11650_v24 = vmov 7   ;;  %v11648_v26 = vmov 8   ;;  %v11646_v27 = vmov 9  }
  0x13   : > { %7260 = vset.pattern.permute.xlu1 %v11658_v5  ;;  %418 = vrot.lane.b32.xlu0 %v414_v6, %s7470_s29  ;;  %v417_v7 = vcombine.high %v414_v6, %v414_v6  ;;  %11890 = vst [vmem:[#allocation2_spill] sm:$0xff] %v7712_v8  ;;  %11891 = vst [vmem:[#allocation3_spill] sm:$0xff] %v7720_v11  ;;  %v7724_v12 = vrot.slane %v7077_v9, %v7712_v8  ;;  %v11644_v28 = vmov 10   ;;  %v11642_v29 = vmov 11   ;;  %s11726_s27 = smov 127   ;;  %s7494_s30 = smov 126  }
  0x14   : > { %461 = vperm.xlu1 %7260, %v7690_v0   ;;  %v7728_v13 = vrot.slane %v7077_v9, %v7720_v11  ;;  %v7739_v16 = vrot.slane %v7078_v14, %v7720_v11  ;;  %v7749_v19 = vrot.slane %v7079_v17, %v7720_v11  ;;  %v7759_v22 = vrot.slane %v7080_v21, %v7712_v8  ;;  %s11724_s13 = smov 112   ;;  %s11720_s15 = smov 110  }
  0x15   : > { %11892 = vst [vmem:[#allocation4_spill] sm:$0xff] %v7724_v12  ;;  %v7769_v25 = vrot.slane %v7078_v14, %v7712_v8  ;;  %v7783_v30 = vrot.slane %v7079_v17, %v7712_v8  ;;  %v11636_v31 = vmov 12   ;;  %v11634_v32 = vmov 13   ;;  %s7500_s18 = smov 32   ;;  %s7502_s20 = smov 96  }
  0x16   : > { %11893 = vst [vmem:[#allocation5_spill] sm:$0xff] %v7728_v13  ;;  %11894 = vst [vmem:[#allocation6_spill] sm:$0xff] %v7739_v16  ;;  %v11630_v33 = vmov 14   ;;  %v11628_v34 = vmov 15   ;;  %v11626_v35 = vmov 16   ;;  %v11624_v36 = vmov 18  }
  0x17   : > { %420 = vrot.lane.b32.xlu0 %v417_v7, %s7470_s29  ;;  %11895 = vst [vmem:[#allocation7_spill] sm:$0xff] %v7749_v19  ;;  %11896 = vst [vmem:[#allocation8_spill] sm:$0xff] %v7759_v22  ;;  %v11622_v37 = vmov 19   ;;  %v7802_v38 = vrot.slane %v7080_v21, %v7720_v11  ;;  %v11620_v39 = vmov 21   ;;  %vm422_vm0 = vcmask 138240   ;;  %s11699_s17 = smov 33  }
  0x18   : > { %7262 = vset.pattern.permute.xlu1 %v11616_v10  ;;  %11897 = vst [vmem:[#allocation9_spill] sm:$0xff] %v7769_v25  ;;  %11898 = vst [vmem:[#allocation10_spill] sm:$0xff] %v7783_v30  ;;  %vm523_vm1 = vcmask 7168   ;;  %v7837_v6 = vsub.s32 2, %v7698_v4  ;;  %vm683_vm2 = vcmask 15360   ;;  %vm843_vm3 = vcmask 130048  }
  0x19   : > { %493 = vperm.xlu1 %7262, %v7690_v0   ;;  %11899 = vst [vmem:[#allocation11_spill] sm:$0xff] %v7802_v38  ;;  %vm1107_vm4 = vcmask 146432   ;;  %vm1267_vm5 = vcmask 261120   ;;  %vm1427_vm6 = vcmask 269312   ;;  %s11718_s23 = smov 95   ;;  %vm1587_vm7 = vcmask 277504  }
  0x1a   : > { %11900 = vst [vmem:[#allocation12_spill] sm:$0xff] %v7837_v6  ;;  %s7514_s25 = smov 94   ;;  %vm559_vm8 = vcmask 1039360   ;;  %vm719_vm9 = vcmask 1031168   ;;  %vm879_vm10 = vcmask 916480   ;;  %vm1143_vm11 = vcmask 900096  }
  0x1b   : > { %477 = vperm.xlu0 %7261, %v7690_v0   ;;  %vm1303_vm12 = vcmask 785408   ;;  %vm11736_vm13 = vcmask 777216   ;;  %vm1623_vm14 = vcmask 769024   ;;  %s7527_s16 = smov 3  }
  0x1d   : > { %519 = vrot.lane.b32.xlu1 %v7724_v12, %s7472_s14 }
  0x1e   : > { %7263 = vset.pattern.permute.xlu1 %v11614_v15 }
  0x1f   : > { %521 = vrot.lane.b32.xlu0 %v7728_v13, %s7472_s14 }
  0x20   : > { %7278 = vset.pattern.permute.xlu0 %v11640_v18 }
  0x21   : > { %532 = vperm.xlu1 %7263, %v7690_v0  }
  0x23   : > { %681 = vrot.lane.b32.xlu0 %v7739_v16, %s7475_s19 }
  0x25   : > { %7264 = vset.pattern.permute.xlu1 %v11654_v20 }
  0x26   : > { %567 = vperm.xlu1 %7264, %v7690_v0  }
  0x27   : > { %841 = vrot.lane.b32.xlu0 %v7749_v19, %s7477_s24 }
  0x2a   : > { %7265 = vset.pattern.permute.xlu1 %v11652_v23 }
  0x2b   : > { %601 = vperm.xlu1 %7265, %v7690_v0   ;;  %1103 = vrot.lane.b32.xlu0 %v7759_v22, %s11722_s26 }
  0x2f   : > { %7266 = vset.pattern.permute.xlu1 %v11650_v24  ;;  %1116 = vperm.xlu0 %7278, %v7690_v0  }
  0x30   : > { %635 = vperm.xlu1 %7266, %v7690_v0  }
  0x33   : > { %7297 = vset.pattern.permute.xlu0 %v11614_v15 }
  0x34   : > { %679 = vrot.lane.b32.xlu1 %v7769_v25, %s7475_s19 }
  0x35   : > { %7267 = vset.pattern.permute.xlu1 %v11648_v26 }
  0x38   : > { %692 = vperm.xlu1 %7267, %v7690_v0  }
  0x3c   : > { %7268 = vset.pattern.permute.xlu1 %v11646_v27 }
  0x3d   : > { %727 = vperm.xlu1 %7268, %v7690_v0  }
  0x41   : > { %7269 = vset.pattern.permute.xlu1 %v11644_v28  ;;  %v7081_v28 = vld [vmem:[%s11601_s0 + $0x5] ss:$8 sm:$0x3] }
  0x42   : > { %761 = vperm.xlu1 %7269, %v7690_v0   ;;  %v8025_v23 = vrot.slane %v7081_v28, %v7712_v8 }
  0x44   : > { %11908 = vst [vmem:[#allocation20_spill] sm:$0xff] %v8025_v23 }
  0x46   : > { %7270 = vset.pattern.permute.xlu1 %v11642_v29 }
  0x47   : > { %795 = vperm.xlu1 %7270, %v7690_v0  }
  0x4b   : > { %839 = vrot.lane.b32.xlu1 %v7783_v30, %s7477_s24 }
  0x4c   : > { %7271 = vset.pattern.permute.xlu1 %v11636_v31 }
  0x4f   : > { %852 = vperm.xlu1 %7271, %v7690_v0  }
  0x53   : > { %7272 = vset.pattern.permute.xlu1 %v11634_v32 }
  0x54   : > { %887 = vperm.xlu1 %7272, %v7690_v0  }
  0x58   : > { %7273 = vset.pattern.permute.xlu1 %v11630_v33 }
  0x59   : > { %921 = vperm.xlu1 %7273, %v7690_v0  }
  0x5d   : > { %7274 = vset.pattern.permute.xlu1 %v11628_v34 }
  0x5e   : > { %955 = vperm.xlu1 %7274, %v7690_v0  }
  0x62   : > { %7275 = vset.pattern.permute.xlu1 %v11626_v35  ;;  %v11632_v35 = vmov 23  }
  0x63   : > { %989 = vperm.xlu1 %7275, %v7690_v0  }
  0x67   : > { %7276 = vset.pattern.permute.xlu1 %v11624_v36 }
  0x68   : > { %1041 = vperm.xlu1 %7276, %v7690_v0  }
  0x6c   : > { %7277 = vset.pattern.permute.xlu1 %v11622_v37 }
  0x6d   : > { %1067 = vperm.xlu1 %7277, %v7690_v0  }
  0x71   : > { %1105 = vrot.lane.b32.xlu1 %v7802_v38, %s11722_s26  ;;  %s7519_s26 = smov 36  }
  0x72   : > { %7279 = vset.pattern.permute.xlu1 %v11620_v39 }
  0x85   : > { %v419_v41 = vpop.permute.xlu0 %418 }
  0x86   : > { %v7816_v46 = vsel %vm422_vm0, 0.0, %v419_v41 }
  0x89   : > { %v421_v43 = vpop.permute.xlu0 %420 }
  0x8a   : > { %v7819_v48 = vsel %vm422_vm0, %v421_v43, 0.0  ;;  %v7824_v52 = vsel %vm422_vm0, %v419_v41, %v421_v43  ;;  %v7844_v41 = vsub.s32 3, %v7698_v4 }
  0x8e   : > { %v7807_v40 = vpop.permute.xlu1 %445 }
  0x93   : > { %v7809_v42 = vpop.permute.xlu1 %461 }
  0x98   : > { %v7811_v44 = vpop.permute.xlu1 %493 }
  0x9a   : > { %v7813_v45 = vpop.permute.xlu0 %477 }
  0x9c   : > { %v520_v47 = vpop.permute.xlu1 %519 }
  0x9d   : > { %v528_v49 = vmul.f32 %v520_v47, %v7816_v46 }
  0x9e   : > { %v522_v50 = vpop.permute.xlu0 %521 }
  0x9f   : > { %v538_v51 = vrot.slane %v528_v49, %v7712_v8  ;;  %v524_v53 = vsel %vm523_vm1, %v520_v47, %v522_v50  ;;  %v530_v54 = vmul.f32 %v522_v50, %v7819_v48  ;;  %v573_v1 = vrot.slane %v528_v49, %v7720_v11 }
  0xa0   : > { %v533_v55 = vpop.permute.xlu1 %532  ;;  %v529_v56 = vmul.f32 %v524_v53, %v7824_v52  ;;  %v607_v53 = vrot.slane %v528_v49, %v7837_v6 }
  0xa1   : > { %v547_v57 = vmul.f32 %v538_v51, %v533_v55  ;;  %v546_v58 = vrot.slane %v530_v54, %v7712_v8  ;;  %v581_v14 = vrot.slane %v530_v54, %v7720_v11 }
  0xa2   : > { %v542_v59 = vrot.slane %v529_v56, %v7712_v8  ;;  %v577_v63 = vrot.slane %v529_v56, %v7720_v11  ;;  %v611_v21 = vrot.slane %v529_v56, %v7837_v6  ;;  %v645_v50 = vrot.slane %v529_v56, %v7844_v41 }
  0xa3   : > { %553 = vrot.lane.b32.xlu0 %v547_v57, %s11726_s27  ;;  %v549_v60 = vmul.f32 %v546_v58, %v533_v55  ;;  %v615_v58 = vrot.slane %v530_v54, %v7837_v6 }
  0xa4   : > { %v548_v62 = vmul.f32 %v542_v59, %v533_v55  ;;  %v682_v59 = vpop.permute.xlu0 %681 }
  0xa5   : > { %v568_v61 = vpop.permute.xlu1 %567 }
  0xa6   : > { %555 = vrot.lane.b32.xlu1 %v548_v62, %s11726_s27  ;;  %v582_v7 = vmul.f32 %v573_v1, %v568_v61  ;;  %v583_v9 = vmul.f32 %v577_v63, %v568_v61  ;;  %v584_v43 = vmul.f32 %v581_v14, %v568_v61  ;;  %v641_v1 = vrot.slane %v528_v49, %v7844_v41 }
  0xa7   : > { %557 = vrot.lane.b32.xlu0 %v549_v60, %s11726_s27 }
  0xaa   : > { %v602_v17 = vpop.permute.xlu1 %601  ;;  %590 = vrot.lane.b32.xlu1 %v583_v9, %s11726_s27 }
  0xab   : > { %588 = vrot.lane.b32.xlu0 %v582_v7, %s11726_s27  ;;  %v617_v47 = vmul.f32 %v611_v21, %v602_v17  ;;  %v616_v57 = vmul.f32 %v607_v53, %v602_v17  ;;  %v618_v62 = vmul.f32 %v615_v58, %v602_v17 }
  0xae   : > { %624 = vrot.lane.b32.xlu1 %v617_v47, %s11726_s27 }
  0xaf   : > { %v636_v51 = vpop.permute.xlu1 %635  ;;  %592 = vrot.lane.b32.xlu0 %v584_v43, %s11726_s27  ;;  %v649_v43 = vrot.slane %v530_v54, %v7844_v41 }
  0xb0   : > { %v651_v55 = vmul.f32 %v645_v50, %v636_v51  ;;  %v650_v14 = vmul.f32 %v641_v1, %v636_v51 }
  0xb1   : > { %v652_v50 = vmul.f32 %v649_v43, %v636_v51 }
  0xb2   : > { %658 = vrot.lane.b32.xlu1 %v651_v55, %s11726_s27  ;;  %v690_v55 = vmul.f32 %v682_v59, %v7819_v48 }
  0xb3   : > { %v680_v60 = vpop.permute.xlu1 %679  ;;  %622 = vrot.lane.b32.xlu0 %v616_v57, %s11726_s27 }
  0xb4   : > { %v684_v56 = vsel %vm683_vm2, %v680_v60, %v682_v59  ;;  %v688_v9 = vmul.f32 %v680_v60, %v7816_v46  ;;  %v706_v54 = vrot.slane %v690_v55, %v7712_v8 }
  0xb5   : > { %v689_v61 = vmul.f32 %v684_v56, %v7824_v52 }
  0xb6   : > { %v698_v49 = vrot.slane %v688_v9, %v7712_v8 }
  0xb7   : > { %v693_v63 = vpop.permute.xlu1 %692  ;;  %626 = vrot.lane.b32.xlu0 %v618_v62, %s11726_s27  ;;  %v702_v7 = vrot.slane %v689_v61, %v7712_v8  ;;  %v737_v17 = vrot.slane %v689_v61, %v7720_v11  ;;  %v771_v57 = vrot.slane %v689_v61, %v7837_v6  ;;  %v805_v62 = vrot.slane %v689_v61, %v7844_v41 }
  0xb8   : > { %v707_v60 = vmul.f32 %v698_v49, %v693_v63  ;;  %v709_v51 = vmul.f32 %v706_v54, %v693_v63 }
  0xb9   : > { %v708_v21 = vmul.f32 %v702_v7, %v693_v63  ;;  %v733_v7 = vrot.slane %v688_v9, %v7720_v11  ;;  %v741_v63 = vrot.slane %v690_v55, %v7720_v11 }
  0xbb   : > { %656 = vrot.lane.b32.xlu0 %v650_v14, %s11726_s27  ;;  %715 = vrot.lane.b32.xlu1 %v708_v21, %s7494_s30  ;;  %v842_v21 = vpop.permute.xlu0 %841 }
  0xbc   : > { %v728_v47 = vpop.permute.xlu1 %727 }
  0xbd   : > { %v743_v53 = vmul.f32 %v737_v17, %v728_v47  ;;  %v742_v14 = vmul.f32 %v733_v7, %v728_v47 }
  0xbf   : > { %660 = vrot.lane.b32.xlu0 %v652_v50, %s11726_s27  ;;  %750 = vrot.lane.b32.xlu1 %v743_v53, %s7494_s30  ;;  %v744_v50 = vmul.f32 %v741_v63, %v728_v47  ;;  %v1104_v7 = vpop.permute.xlu0 %1103  ;;  %s7521_s27 = smov 92  }
  0xc1   : > { %v762_v58 = vpop.permute.xlu1 %761 }
  0xc2   : > { %v777_v56 = vmul.f32 %v771_v57, %v762_v58  ;;  %v767_v57 = vrot.slane %v688_v9, %v7837_v6 }
  0xc3   : > { %713 = vrot.lane.b32.xlu0 %v707_v60, %s7494_s30 }
  0xc4   : > { %784 = vrot.lane.b32.xlu1 %v777_v56, %s7494_s30  ;;  %v776_v56 = vmul.f32 %v767_v57, %v762_v58 }
  0xc6   : > { %v796_v1 = vpop.permute.xlu1 %795 }
  0xc7   : > { %717 = vrot.lane.b32.xlu0 %v709_v51, %s7494_s30  ;;  %v811_v59 = vmul.f32 %v805_v62, %v796_v1  ;;  %v775_v62 = vrot.slane %v690_v55, %v7837_v6 }
  0xc9   : > { %818 = vrot.lane.b32.xlu1 %v811_v59, %s7494_s30  ;;  %v778_v59 = vmul.f32 %v775_v62, %v762_v58  ;;  %v809_v58 = vrot.slane %v690_v55, %v7844_v41 }
  0xca   : > { %v840_v43 = vpop.permute.xlu1 %839 }
  0xcb   : > { %v844_v17 = vsel %vm843_vm3, %v840_v43, %v842_v21  ;;  %748 = vrot.lane.b32.xlu0 %v742_v14, %s7494_s30  ;;  %v801_v14 = vrot.slane %v688_v9, %v7844_v41  ;;  %v812_v9 = vmul.f32 %v809_v58, %v796_v1 }
  0xcc   : > { %v849_v61 = vmul.f32 %v844_v17, %v7824_v52 }
  0xce   : > { %v853_v53 = vpop.permute.xlu1 %852  ;;  %v862_v49 = vrot.slane %v849_v61, %v7712_v8  ;;  %v897_v54 = vrot.slane %v849_v61, %v7720_v11  ;;  %v931_v17 = vrot.slane %v849_v61, %v7837_v6 }
  0xcf   : > { %752 = vrot.lane.b32.xlu0 %v744_v50, %s7494_s30  ;;  %v848_v50 = vmul.f32 %v840_v43, %v7816_v46 }
  0xd0   : > { %v868_v60 = vmul.f32 %v862_v49, %v853_v53  ;;  %v810_v49 = vmul.f32 %v801_v14, %v796_v1  ;;  %v1117_v14 = vpop.permute.xlu0 %1116 }
  0xd1   : > { %v858_v62 = vrot.slane %v848_v50, %v7712_v8 }
  0xd2   : > { %875 = vrot.lane.b32.xlu1 %v868_v60, %s11724_s13  ;;  %v7892_v60 = vmul.f32 %v1104_v7, %v7816_v46 }
  0xd3   : > { %v888_v51 = vpop.permute.xlu1 %887  ;;  %782 = vrot.lane.b32.xlu0 %v776_v56, %s7494_s30  ;;  %v965_v56 = vrot.slane %v849_v61, %v7844_v41 }
  0xd4   : > { %v903_v47 = vmul.f32 %v897_v54, %v888_v51  ;;  %v1122_v43 = vrot.slane %v7892_v60, %v7712_v8  ;;  %v1157_v15 = vrot.slane %v7892_v60, %v7720_v11  ;;  %v1225_v18 = vrot.slane %v7892_v60, %v7844_v41 }
  0xd6   : > { %910 = vrot.lane.b32.xlu1 %v903_v47, %s11724_s13  ;;  %v1131_v55 = vmul.f32 %v1122_v43, %v1117_v14 }
  0xd7   : > { %786 = vrot.lane.b32.xlu0 %v778_v59, %s7494_s30  ;;  %v850_v59 = vmul.f32 %v842_v21, %v7819_v48  ;;  %v893_v21 = vrot.slane %v848_v50, %v7720_v11 }
  0xd8   : > { %v922_v63 = vpop.permute.xlu1 %921 }
  0xd9   : > { %v937_v57 = vmul.f32 %v931_v17, %v922_v63  ;;  %v867_v17 = vmul.f32 %v858_v62, %v853_v53  ;;  %v866_v1 = vrot.slane %v850_v59, %v7712_v8  ;;  %v902_v58 = vmul.f32 %v893_v21, %v888_v51 }
  0xdb   : > { %816 = vrot.lane.b32.xlu0 %v810_v49, %s7494_s30  ;;  %944 = vrot.lane.b32.xlu1 %v937_v57, %s11724_s13  ;;  %v869_v61 = vmul.f32 %v866_v1, %v853_v53  ;;  %v935_v1 = vrot.slane %v850_v59, %v7837_v6 }
  0xdd   : > { %v956_v54 = vpop.permute.xlu1 %955 }
  0xde   : > { %v971_v47 = vmul.f32 %v965_v56, %v956_v54  ;;  %v901_v56 = vrot.slane %v850_v59, %v7720_v11 }
  0xdf   : > { %820 = vrot.lane.b32.xlu0 %v812_v9, %s7494_s30 }
  0xe0   : > { %978 = vrot.lane.b32.xlu1 %v971_v47, %s11724_s13  ;;  %v904_v62 = vmul.f32 %v901_v56, %v888_v51  ;;  %v927_v47 = vrot.slane %v848_v50, %v7837_v6  ;;  %v938_v51 = vmul.f32 %v935_v1, %v922_v63 }
  0xe2   : > { %v7904_v49 = vpop.permute.xlu1 %989 }
  0xe3   : > { %11901 = vst [vmem:[#allocation13_spill] sm:$0xff] %v7904_v49  ;;  %873 = vrot.lane.b32.xlu0 %v867_v17, %s11724_s13  ;;  %v936_v17 = vmul.f32 %v927_v47, %v922_v63 }
  0xe4   : > { %1137 = vrot.lane.b32.xlu1 %v1131_v55, %s11720_s15 }
  0xe7   : > { %v7909_v57 = vpop.permute.xlu1 %1041  ;;  %877 = vrot.lane.b32.xlu0 %v869_v61, %s11724_s13 }
  0xe8   : > { %11902 = vst [vmem:[#allocation14_spill] sm:$0xff] %v7909_v57 }
  0xeb   : > { %908 = vrot.lane.b32.xlu0 %v902_v58, %s11724_s13  ;;  %v961_v58 = vrot.slane %v848_v50, %v7844_v41 }
  0xec   : > { %v7915_v9 = vpop.permute.xlu1 %1067 }
  0xed   : > { %11903 = vst [vmem:[#allocation15_spill] sm:$0xff] %v7915_v9  ;;  %v970_v56 = vmul.f32 %v961_v58, %v956_v54 }
  0xef   : > { %912 = vrot.lane.b32.xlu0 %v904_v62, %s11724_s13  ;;  %v969_v62 = vrot.slane %v850_v59, %v7844_v41 }
  0xf0   : > { %v1106_v53 = vpop.permute.xlu1 %1105 }
  0xf1   : > { %v1108_v43 = vsel %vm1107_vm4, %v1104_v7, %v1106_v53  ;;  %v7931_v7 = vmul.f32 %v1106_v53, %v7819_v48  ;;  %v972_v47 = vmul.f32 %v969_v62, %v956_v54 }
  0xf2   : > { %v7921_v55 = vmul.f32 %v1108_v43, %v7824_v52  ;;  %v11618_v43 = vmov 22  }
  0xf3   : > { %942 = vrot.lane.b32.xlu0 %v936_v17, %s11724_s13  ;;  %v1130_v63 = vrot.slane %v7931_v7, %v7712_v8  ;;  %v1165_v37 = vrot.slane %v7931_v7, %v7720_v11 }
  0xf4   : > { %v1126_v61 = vrot.slane %v7921_v55, %v7712_v8 }
  0xf5   : > { %v1133_v50 = vmul.f32 %v1130_v63, %v1117_v14 }
  0xf6   : > { %v1132_v21 = vmul.f32 %v1126_v61, %v1117_v14 }
  0xf7   : > { %946 = vrot.lane.b32.xlu0 %v938_v51, %s11724_s13 }
  0xf8   : > { %1139 = vrot.lane.b32.xlu1 %v1132_v21, %s11720_s15 }
  0xfb   : > { %976 = vrot.lane.b32.xlu0 %v970_v56, %s11724_s13 }
  0xfc   : > { %1151 = vperm.xlu1 %7279, %v7690_v0  }
  0xff   : > { %980 = vrot.lane.b32.xlu0 %v972_v47, %s11724_s13  ;;  %s7518_s13 = smov 4  }
 0x100   : > { %7280 = vset.pattern.permute.xlu1 %v11618_v43 }
 0x103   : > { %1141 = vrot.lane.b32.xlu0 %v1133_v50, %s11720_s15  ;;  %v1161_v50 = vrot.slane %v7921_v55, %v7720_v11 }
 0x118   : > { %v7941_v53 = vpop.permute.xlu1 %555 }
 0x11c   : > { %v7943_v17 = vpop.permute.xlu1 %590 }
 0x120   : > { %v7945_v1 = vpop.permute.xlu1 %624 }
 0x124   : > { %v7947_v59 = vpop.permute.xlu1 %658 }
 0x12d   : > { %v7949_v54 = vpop.permute.xlu1 %715 }
 0x131   : > { %v7951_v61 = vpop.permute.xlu1 %750 }
 0x136   : > { %v7953_v51 = vpop.permute.xlu1 %784 }
 0x13b   : > { %v7955_v21 = vpop.permute.xlu1 %818 }
 0x144   : > { %v7957_v58 = vpop.permute.xlu1 %875 }
 0x148   : > { %v7959_v14 = vpop.permute.xlu1 %910 }
 0x14d   : > { %v7961_v56 = vpop.permute.xlu1 %944 }
 0x152   : > { %v7963_v62 = vpop.permute.xlu1 %978 }
 0x156   : > { %v7965_v47 = vpop.permute.xlu1 %1137 }
 0x157   : > { %11904 = vst [vmem:[#allocation16_spill] sm:$0xff] %v7965_v47 }
 0x16a   : > { %v7967_v63 = vpop.permute.xlu1 %1139 }
 0x16b   : > { %11905 = vst [vmem:[#allocation17_spill] sm:$0xff] %v7967_v63 }
 0x17b   : > { %v1152_v10 = vpop.permute.xlu1 %1151 }
 0x17c   : > { %v1167_v43 = vmul.f32 %v1161_v50, %v1152_v10  ;;  %v1166_v39 = vmul.f32 %v1157_v15, %v1152_v10  ;;  %v1168_v36 = vmul.f32 %v1165_v37, %v1152_v10  ;;  %v1195_v15 = vrot.slane %v7921_v55, %v7837_v6 }
 0x17d   : > { %v1199_v10 = vrot.slane %v7931_v7, %v7837_v6  ;;  %v11638_v37 = vmov 24  }
 0x17e   : > { %1174 = vrot.lane.b32.xlu1 %v1167_v43, %s11720_s15  ;;  %1172 = vrot.lane.b32.xlu0 %v1166_v39, %s11720_s15  ;;  %v1191_v43 = vrot.slane %v7892_v60, %v7837_v6 }
 0x182   : > { %1185 = vperm.xlu1 %7280, %v7690_v0   ;;  %1176 = vrot.lane.b32.xlu0 %v1168_v36, %s11720_s15 }
 0x186   : > { %7281 = vset.pattern.permute.xlu1 %v11632_v35  ;;  %v7993_v35 = vpop.permute.xlu0 %553 }
 0x18a   : > { %v7995_v32 = vpop.permute.xlu0 %557 }
 0x1f0   : > { %v7980_v34 = vpop.permute.xlu1 %1174 }
 0x1f1   : > { %11906 = vst [vmem:[#allocation18_spill] sm:$0xff] %v7980_v34 }
 0x201   : > { %v1186_v39 = vpop.permute.xlu1 %1185 }
 0x202   : > { %v1201_v50 = vmul.f32 %v1195_v15, %v1186_v39  ;;  %v1200_v33 = vmul.f32 %v1191_v43, %v1186_v39  ;;  %v1202_v36 = vmul.f32 %v1199_v10, %v1186_v39  ;;  %v7997_v15 = vpop.permute.xlu0 %588 }
 0x204   : > { %1208 = vrot.lane.b32.xlu1 %v1201_v50, %s11720_s15  ;;  %1206 = vrot.lane.b32.xlu0 %v1200_v33, %s11720_s15 }
 0x206   : > { %v7999_v43 = vpop.permute.xlu0 %592 }
 0x208   : > { %1219 = vperm.xlu1 %7281, %v7690_v0   ;;  %1210 = vrot.lane.b32.xlu0 %v1202_v36, %s11720_s15 }
 0x20a   : > { %v8001_v33 = vpop.permute.xlu0 %622 }
 0x20c   : > { %7282 = vset.pattern.permute.xlu1 %v11638_v37  ;;  %v1229_v37 = vrot.slane %v7921_v55, %v7844_v41  ;;  %v1233_v55 = vrot.slane %v7931_v7, %v7844_v41 }
 0x20e   : > { %v8003_v50 = vpop.permute.xlu0 %626 }
 0x212   : > { %v8005_v39 = vpop.permute.xlu0 %656 }
 0x216   : > { %v8007_v10 = vpop.permute.xlu0 %660 }
 0x21a   : > { %v8011_v31 = vpop.permute.xlu0 %713 }
 0x21e   : > { %v8020_v24 = vpop.permute.xlu0 %717 }
 0x276   : > { %v8009_v36 = vpop.permute.xlu1 %1208 }
 0x277   : > { %11907 = vst [vmem:[#allocation19_spill] sm:$0xff] %v8009_v36 }
 0x287   : > { %v1220_v29 = vpop.permute.xlu1 %1219 }
 0x288   : > { %v1235_v27 = vmul.f32 %v1229_v37, %v1220_v29  ;;  %v1234_v26 = vmul.f32 %v1225_v18, %v1220_v29  ;;  %v1236_v60 = vmul.f32 %v1233_v55, %v1220_v29  ;;  %v8033_v18 = vrot.slane %v7081_v28, %v7720_v11  ;;  %v8035_v37 = vpop.permute.xlu0 %748 }
 0x28a   : > { %1242 = vrot.lane.b32.xlu1 %v1235_v27, %s11720_s15  ;;  %1240 = vrot.lane.b32.xlu0 %v1234_v26, %s11720_s15  ;;  %11909 = vst [vmem:[#allocation21_spill] sm:$0xff] %v8033_v18  ;;  %v11663_v27 = vmov 25  }
 0x28c   : > { %v8040_v26 = vpop.permute.xlu0 %752 }
 0x28e   : > { %1263 = vrot.lane.b32.xlu1 %v8025_v23, %s7500_s18  ;;  %1244 = vrot.lane.b32.xlu0 %v1236_v60, %s11720_s15  ;;  %s7522_s15 = smov 64  }
 0x290   : > { %v8043_v29 = vpop.permute.xlu0 %782 }
 0x292   : > { %1276 = vperm.xlu1 %7282, %v7690_v0   ;;  %1265 = vrot.lane.b32.xlu0 %v8033_v18, %s7500_s18 }
 0x294   : > { %v8045_v7 = vpop.permute.xlu0 %786 }
 0x296   : > { %7283 = vset.pattern.permute.xlu1 %v11663_v27 }
 0x298   : > { %v8047_v55 = vpop.permute.xlu0 %816 }
 0x29c   : > { %v8049_v28 = vpop.permute.xlu0 %820 }
 0x2a0   : > { %v8051_v60 = vpop.permute.xlu0 %873 }
 0x2a4   : > { %v8053_v20 = vpop.permute.xlu0 %877 }
 0x2a8   : > { %v8055_v3 = vpop.permute.xlu0 %908 }
 0x2ac   : > { %v8057_v5 = vpop.permute.xlu0 %912 }
 0x2b0   : > { %v8059_v2 = vpop.permute.xlu0 %942 }
 0x2b4   : > { %v8061_v18 = vpop.permute.xlu0 %946 }
 0x2b8   : > { %v8063_v27 = vpop.permute.xlu0 %976 }
 0x2bc   : > { %v8065_v23 = vpop.permute.xlu0 %980 }
 0x2c0   : > { %v8067_v38 = vpop.permute.xlu0 %1141 }
 0x2c1   : > { %11910 = vst [vmem:[#allocation22_spill] sm:$0xff] %v8067_v38 }
 0x2c4   : > { %v8069_v22 = vpop.permute.xlu0 %1172 }
 0x2c5   : > { %11911 = vst [vmem:[#allocation23_spill] sm:$0xff] %v8069_v22 }
 0x2c8   : > { %v8071_v19 = vpop.permute.xlu0 %1176 }
 0x2c9   : > { %11912 = vst [vmem:[#allocation24_spill] sm:$0xff] %v8071_v19 }
 0x2cc   : > { %v8073_v30 = vpop.permute.xlu0 %1206 }
 0x2cd   : > { %11913 = vst [vmem:[#allocation25_spill] sm:$0xff] %v8073_v30 }
 0x2d0   : > { %v8075_v16 = vpop.permute.xlu0 %1210 }
 0x2d1   : > { %11914 = vst [vmem:[#allocation26_spill] sm:$0xff] %v8075_v16 }
 0x2fc   : > { %v8077_v25 = vpop.permute.xlu0 %1240  ;;  %v8081_v12 = vpop.permute.xlu1 %1242 }
 0x2fd   : > { %11915 = vst [vmem:[#allocation27_spill] sm:$0xff] %v8077_v25  ;;  %11917 = vst [vmem:[#allocation29_spill] sm:$0xff] %v8081_v12 }
 0x300   : > { %v8079_v13 = vpop.permute.xlu0 %1244  ;;  %v1264_v34 = vpop.permute.xlu1 %1263 }
 0x301   : > { %11916 = vst [vmem:[#allocation28_spill] sm:$0xff] %v8079_v13  ;;  %v1272_v38 = vmul.f32 %v1264_v34, %v7816_v46 }
 0x303   : > { %v1282_v30 = vrot.slane %v1272_v38, %v7712_v8 }
 0x304   : > { %v1266_v36 = vpop.permute.xlu0 %1265 }
 0x305   : > { %v1268_v47 = vsel %vm1267_vm5, %v1264_v34, %v1266_v36  ;;  %v1274_v19 = vmul.f32 %v1266_v36, %v7819_v48  ;;  %v11680_v34 = vmov 26  }
 0x306   : > { %v1273_v22 = vmul.f32 %v1268_v47, %v7824_v52 }
 0x307   : > { %v1290_v12 = vrot.slane %v1274_v19, %v7712_v8 }
 0x308   : > { %v1286_v16 = vrot.slane %v1273_v22, %v7712_v8 }
 0x311   : > { %v1277_v25 = vpop.permute.xlu1 %1276 }
 0x312   : > { %v1291_v63 = vmul.f32 %v1282_v30, %v1277_v25  ;;  %v1292_v13 = vmul.f32 %v1286_v16, %v1277_v25  ;;  %v1293_v9 = vmul.f32 %v1290_v12, %v1277_v25  ;;  %v1321_v30 = vrot.slane %v1273_v22, %v7720_v11 }
 0x313   : > { %v1317_v16 = vrot.slane %v1272_v38, %v7720_v11  ;;  %v1325_v12 = vrot.slane %v1274_v19, %v7720_v11  ;;  %v11683_v25 = vmov 27  }
 0x314   : > { %1297 = vrot.lane.b32.xlu0 %v1291_v63, %s7502_s20  ;;  %1299 = vrot.lane.b32.xlu1 %v1292_v13, %s7502_s20 }
 0x318   : > { %1301 = vrot.lane.b32.xlu0 %v1293_v9, %s7502_s20  ;;  %1311 = vperm.xlu1 %7283, %v7690_v0  }
 0x31c   : > { %7284 = vset.pattern.permute.xlu1 %v11680_v34  ;;  %v1355_v34 = vrot.slane %v1273_v22, %v7837_v6 }
 0x386   : > { %v8095_v47 = vpop.permute.xlu1 %1299 }
 0x387   : > { %11918 = vst [vmem:[#allocation30_spill] sm:$0xff] %v8095_v47 }
 0x397   : > { %v1312_v36 = vpop.permute.xlu1 %1311 }
 0x398   : > { %v1327_v63 = vmul.f32 %v1321_v30, %v1312_v36  ;;  %v1326_v57 = vmul.f32 %v1317_v16, %v1312_v36  ;;  %v1328_v13 = vmul.f32 %v1325_v12, %v1312_v36  ;;  %v1351_v30 = vrot.slane %v1272_v38, %v7837_v6 }
 0x399   : > { %v11685_v12 = vmov 28  }
 0x39a   : > { %1334 = vrot.lane.b32.xlu1 %v1327_v63, %s7502_s20  ;;  %1332 = vrot.lane.b32.xlu0 %v1326_v57, %s7502_s20  ;;  %v1359_v57 = vrot.slane %v1274_v19, %v7837_v6 }
 0x39e   : > { %1345 = vperm.xlu1 %7284, %v7690_v0   ;;  %1336 = vrot.lane.b32.xlu0 %v1328_v13, %s7502_s20 }
 0x3a2   : > { %7285 = vset.pattern.permute.xlu1 %v11683_v25  ;;  %v1389_v25 = vrot.slane %v1273_v22, %v7844_v41 }
 0x40c   : > { %v8105_v9 = vpop.permute.xlu1 %1334 }
 0x40d   : > { %11919 = vst [vmem:[#allocation31_spill] sm:$0xff] %v8105_v9 }
 0x41d   : > { %v1346_v16 = vpop.permute.xlu1 %1345 }
 0x41e   : > { %v1361_v63 = vmul.f32 %v1355_v34, %v1346_v16  ;;  %v1360_v47 = vmul.f32 %v1351_v30, %v1346_v16  ;;  %v1362_v36 = vmul.f32 %v1359_v57, %v1346_v16  ;;  %v1385_v34 = vrot.slane %v1272_v38, %v7844_v41 }
 0x41f   : > { %v11687_v38 = vmov 29  }
 0x420   : > { %1368 = vrot.lane.b32.xlu1 %v1361_v63, %s7502_s20  ;;  %1366 = vrot.lane.b32.xlu0 %v1360_v47, %s7502_s20  ;;  %v7082_v47 = vld [vmem:[%s11601_s0 + $0x6] ss:$8 sm:$0x3] }
 0x421   : > { %v8125_v57 = vrot.slane %v7082_v47, %v7712_v8  ;;  %v8132_v22 = vrot.slane %v7082_v47, %v7720_v11 }
 0x423   : > { %11921 = vst [vmem:[#allocation33_spill] sm:$0xff] %v8125_v57  ;;  %11922 = vst [vmem:[#allocation34_spill] sm:$0xff] %v8132_v22 }
 0x424   : > { %1379 = vperm.xlu1 %7285, %v7690_v0   ;;  %1370 = vrot.lane.b32.xlu0 %v1362_v36, %s7502_s20  ;;  %v1393_v36 = vrot.slane %v1274_v19, %v7844_v41 }
 0x428   : > { %7286 = vset.pattern.permute.xlu1 %v11685_v12 }
 0x492   : > { %v8115_v13 = vpop.permute.xlu1 %1368 }
 0x493   : > { %11920 = vst [vmem:[#allocation32_spill] sm:$0xff] %v8115_v13 }
 0x4a3   : > { %v1380_v30 = vpop.permute.xlu1 %1379 }
 0x4a4   : > { %v1395_v63 = vmul.f32 %v1389_v25, %v1380_v30  ;;  %v1394_v16 = vmul.f32 %v1385_v34, %v1380_v30  ;;  %v1396_v12 = vmul.f32 %v1393_v36, %v1380_v30  ;;  %v8138_v25 = vpop.permute.xlu0 %1297 }
 0x4a5   : > { %11923 = vst [vmem:[#allocation35_spill] sm:$0xff] %v8138_v25 }
 0x4a6   : > { %1402 = vrot.lane.b32.xlu1 %v1395_v63, %s7502_s20  ;;  %1400 = vrot.lane.b32.xlu0 %v1394_v16, %s7502_s20 }
 0x4a8   : > { %v8140_v19 = vpop.permute.xlu0 %1301 }
 0x4a9   : > { %11924 = vst [vmem:[#allocation36_spill] sm:$0xff] %v8140_v19 }
 0x4aa   : > { %1423 = vrot.lane.b32.xlu1 %v8125_v57, %s11699_s17  ;;  %1404 = vrot.lane.b32.xlu0 %v1396_v12, %s7502_s20 }
 0x4ac   : > { %v8142_v34 = vpop.permute.xlu0 %1332 }
 0x4ad   : > { %11925 = vst [vmem:[#allocation37_spill] sm:$0xff] %v8142_v34 }
 0x4ae   : > { %1436 = vperm.xlu1 %7286, %v7690_v0   ;;  %1425 = vrot.lane.b32.xlu0 %v8132_v22, %s11699_s17  ;;  %s7512_s17 = smov 34  }
 0x4b0   : > { %v8144_v30 = vpop.permute.xlu0 %1336 }
 0x4b1   : > { %11926 = vst [vmem:[#allocation38_spill] sm:$0xff] %v8144_v30 }
 0x4b2   : > { %7287 = vset.pattern.permute.xlu1 %v11687_v38 }
 0x4b4   : > { %v8146_v12 = vpop.permute.xlu0 %1366 }
 0x4b5   : > { %11927 = vst [vmem:[#allocation39_spill] sm:$0xff] %v8146_v12 }
 0x4b8   : > { %v8148_v47 = vpop.permute.xlu0 %1370 }
 0x4b9   : > { %11928 = vst [vmem:[#allocation40_spill] sm:$0xff] %v8148_v47 }
 0x518   : > { %v8150_v63 = vpop.permute.xlu0 %1400  ;;  %v8154_v36 = vpop.permute.xlu1 %1402 }
 0x519   : > { %11929 = vst [vmem:[#allocation41_spill] sm:$0xff] %v8150_v63  ;;  %11931 = vst [vmem:[#allocation43_spill] sm:$0xff] %v8154_v36 }
 0x51c   : > { %v8152_v16 = vpop.permute.xlu0 %1404  ;;  %v1424_v22 = vpop.permute.xlu1 %1423 }
 0x51d   : > { %11930 = vst [vmem:[#allocation42_spill] sm:$0xff] %v8152_v16  ;;  %v1432_v13 = vmul.f32 %v1424_v22, %v7816_v46 }
 0x51f   : > { %v1442_v12 = vrot.slane %v1432_v13, %v7712_v8 }
 0x520   : > { %v1426_v38 = vpop.permute.xlu0 %1425 }
 0x521   : > { %v1428_v57 = vsel %vm1427_vm6, %v1424_v22, %v1426_v38  ;;  %v1434_v30 = vmul.f32 %v1426_v38, %v7819_v48  ;;  %v1477_v38 = vrot.slane %v1432_v13, %v7720_v11 }
 0x522   : > { %v1433_v34 = vmul.f32 %v1428_v57, %v7824_v52  ;;  %v11695_v57 = vmov 30  }
 0x523   : > { %v1450_v36 = vrot.slane %v1434_v30, %v7712_v8 }
 0x524   : > { %v1446_v47 = vrot.slane %v1433_v34, %v7712_v8 }
 0x52d   : > { %v1437_v63 = vpop.permute.xlu1 %1436 }
 0x52e   : > { %v1451_v9 = vmul.f32 %v1442_v12, %v1437_v63  ;;  %v1452_v16 = vmul.f32 %v1446_v47, %v1437_v63  ;;  %v1453_v19 = vmul.f32 %v1450_v36, %v1437_v63  ;;  %v1481_v12 = vrot.slane %v1433_v34, %v7720_v11 }
 0x52f   : > { %v11705_v63 = vmov 31   ;;  %v1511_v36 = vrot.slane %v1432_v13, %v7837_v6 }
 0x530   : > { %1457 = vrot.lane.b32.xlu0 %v1451_v9, %s11718_s23  ;;  %1459 = vrot.lane.b32.xlu1 %v1452_v16, %s11718_s23  ;;  %v1485_v9 = vrot.slane %v1434_v30, %v7720_v11 }
 0x534   : > { %1461 = vrot.lane.b32.xlu0 %v1453_v19, %s11718_s23  ;;  %1471 = vperm.xlu1 %7287, %v7690_v0  }
 0x538   : > { %7288 = vset.pattern.permute.xlu1 %v11695_v57 }
 0x5a2   : > { %v8168_v22 = vpop.permute.xlu1 %1459 }
 0x5a3   : > { %11932 = vst [vmem:[#allocation44_spill] sm:$0xff] %v8168_v22 }
 0x5b3   : > { %v1472_v47 = vpop.permute.xlu1 %1471 }
 0x5b4   : > { %v1486_v25 = vmul.f32 %v1477_v38, %v1472_v47  ;;  %v1487_v49 = vmul.f32 %v1481_v12, %v1472_v47  ;;  %v1488_v19 = vmul.f32 %v1485_v9, %v1472_v47  ;;  %v1515_v38 = vrot.slane %v1433_v34, %v7837_v6 }
 0x5b5   : > { %v11701_v47 = vmov 32  }
 0x5b6   : > { %1494 = vrot.lane.b32.xlu1 %v1487_v49, %s11718_s23  ;;  %1492 = vrot.lane.b32.xlu0 %v1486_v25, %s11718_s23  ;;  %v1519_v49 = vrot.slane %v1434_v30, %v7837_v6 }
 0x5ba   : > { %1505 = vperm.xlu1 %7288, %v7690_v0   ;;  %1496 = vrot.lane.b32.xlu0 %v1488_v19, %s11718_s23  ;;  %v1545_v19 = vrot.slane %v1432_v13, %v7844_v41 }
 0x5be   : > { %7289 = vset.pattern.permute.xlu1 %v11705_v63 }
 0x628   : > { %v8178_v16 = vpop.permute.xlu1 %1494 }
 0x629   : > { %11933 = vst [vmem:[#allocation45_spill] sm:$0xff] %v8178_v16 }
 0x639   : > { %v1506_v12 = vpop.permute.xlu1 %1505 }
 0x63a   : > { %v1520_v57 = vmul.f32 %v1511_v36, %v1506_v12  ;;  %v1521_v22 = vmul.f32 %v1515_v38, %v1506_v12  ;;  %v1522_v25 = vmul.f32 %v1519_v49, %v1506_v12  ;;  %v1549_v36 = vrot.slane %v1433_v34, %v7844_v41  ;;  %v8210_v34 = vld [vmem:[%s11603_s2] sm:$0xff] }
 0x63c   : > { %1528 = vrot.lane.b32.xlu1 %v1521_v22, %s11718_s23  ;;  %1526 = vrot.lane.b32.xlu0 %v1520_v57, %s11718_s23  ;;  %v7083_v22 = vld [vmem:[%s11601_s0 + $0x7] ss:$8 sm:$0x3] }
 0x63d   : > { %v8199_v49 = vrot.slane %v7083_v22, %v7712_v8  ;;  %v8205_v13 = vrot.slane %v7083_v22, %v7720_v11 }
 0x63f   : > { %11935 = vst [vmem:[#allocation47_spill] sm:$0xff] %v8199_v49  ;;  %11936 = vst [vmem:[#allocation48_spill] sm:$0xff] %v8205_v13 }
 0x640   : > { %1539 = vperm.xlu1 %7289, %v7690_v0   ;;  %1530 = vrot.lane.b32.xlu0 %v1522_v25, %s11718_s23  ;;  %v1553_v0 = vrot.slane %v1434_v30, %v7844_v41  ;;  %v11703_v30 = vmov 33  }
 0x644   : > { %7290 = vset.pattern.permute.xlu1 %v11701_v47 }
 0x6ae   : > { %v8188_v9 = vpop.permute.xlu1 %1528 }
 0x6af   : > { %11934 = vst [vmem:[#allocation46_spill] sm:$0xff] %v8188_v9 }
 0x6bf   : > { %v1540_v38 = vpop.permute.xlu1 %1539 }
 0x6c0   : > { %v1554_v57 = vmul.f32 %v1545_v19, %v1540_v38  ;;  %v1555_v12 = vmul.f32 %v1549_v36, %v1540_v38  ;;  %v1556_v25 = vmul.f32 %v1553_v0, %v1540_v38  ;;  %v8216_v19 = vpop.permute.xlu0 %1457 }
 0x6c1   : > { %11937 = vst [vmem:[#allocation49_spill] sm:$0xff] %v8216_v19 }
 0x6c2   : > { %1562 = vrot.lane.b32.xlu1 %v1555_v12, %s11718_s23  ;;  %1560 = vrot.lane.b32.xlu0 %v1554_v57, %s11718_s23 }
 0x6c4   : > { %v8218_v36 = vpop.permute.xlu0 %1461 }
 0x6c5   : > { %11938 = vst [vmem:[#allocation50_spill] sm:$0xff] %v8218_v36 }
 0x6c6   : > { %1583 = vrot.lane.b32.xlu1 %v8199_v49, %s7512_s17  ;;  %1564 = vrot.lane.b32.xlu0 %v1556_v25, %s11718_s23  ;;  %s7525_s23 = smov 68  }
 0x6c8   : > { %v8220_v38 = vpop.permute.xlu0 %1492 }
 0x6c9   : > { %11939 = vst [vmem:[#allocation51_spill] sm:$0xff] %v8220_v38 }
 0x6ca   : > { %1596 = vperm.xlu1 %7290, %v8210_v34   ;;  %1585 = vrot.lane.b32.xlu0 %v8205_v13, %s7512_s17 }
 0x6cc   : > { %v8222_v22 = vpop.permute.xlu0 %1496 }
 0x6cd   : > { %11940 = vst [vmem:[#allocation52_spill] sm:$0xff] %v8222_v22 }
 0x6ce   : > { %7291 = vset.pattern.permute.xlu1 %v11703_v30 }
 0x6d0   : > { %v8224_v57 = vpop.permute.xlu0 %1526 }
 0x6d1   : > { %11941 = vst [vmem:[#allocation53_spill] sm:$0xff] %v8224_v57 }
 0x6d4   : > { %v8226_v12 = vpop.permute.xlu0 %1530 }
 0x6d5   : > { %11942 = vst [vmem:[#allocation54_spill] sm:$0xff] %v8226_v12 }
 0x734   : > { %v8228_v0 = vpop.permute.xlu0 %1560  ;;  %v8232_v47 = vpop.permute.xlu1 %1562 }
 0x735   : > { %11943 = vst [vmem:[#allocation55_spill] sm:$0xff] %v8228_v0  ;;  %11945 = vst [vmem:[#allocation57_spill] sm:$0xff] %v8232_v47 }
 0x738   : > { %v8230_v25 = vpop.permute.xlu0 %1564  ;;  %v1584_v63 = vpop.permute.xlu1 %1583 }
 0x739   : > { %11944 = vst [vmem:[#allocation56_spill] sm:$0xff] %v8230_v25  ;;  %v1592_v49 = vmul.f32 %v1584_v63, %v7816_v46 }
 0x73b   : > { %v1602_v57 = vrot.slane %v1592_v49, %v7712_v8 }
 0x73c   : > { %v1586_v30 = vpop.permute.xlu0 %1585 }
 0x73d   : > { %v1588_v13 = vsel %vm1587_vm7, %v1584_v63, %v1586_v30  ;;  %v1594_v22 = vmul.f32 %v1586_v30, %v7819_v48  ;;  %v11712_v48 = vmov 34  }
 0x73e   : > { %v1593_v9 = vmul.f32 %v1588_v13, %v7824_v52  ;;  %v1637_v13 = vrot.slane %v1592_v49, %v7720_v11 }
 0x73f   : > { %v1610_v47 = vrot.slane %v1594_v22, %v7712_v8 }
 0x740   : > { %v1606_v12 = vrot.slane %v1593_v9, %v7712_v8  ;;  %v1641_v30 = vrot.slane %v1593_v9, %v7720_v11 }
 0x749   : > { %v1597_v0 = vpop.permute.xlu1 %1596 }
 0x74a   : > { %v1611_v38 = vmul.f32 %v1602_v57, %v1597_v0  ;;  %v1612_v25 = vmul.f32 %v1606_v12, %v1597_v0  ;;  %v1613_v16 = vmul.f32 %v1610_v47, %v1597_v0  ;;  %v11715_v47 = vmov 35  }
 0x74c   : > { %1617 = vrot.lane.b32.xlu0 %v1611_v38, %s7514_s25  ;;  %1619 = vrot.lane.b32.xlu1 %v1612_v25, %s7514_s25  ;;  %v1645_v38 = vrot.slane %v1594_v22, %v7720_v11  ;;  %v1671_v25 = vrot.slane %v1592_v49, %v7837_v6 }
 0x750   : > { %1621 = vrot.lane.b32.xlu0 %v1613_v16, %s7514_s25  ;;  %1631 = vperm.xlu1 %7291, %v8210_v34  }
 0x754   : > { %7292 = vset.pattern.permute.xlu1 %v11712_v48 }
 0x7be   : > { %v8246_v63 = vpop.permute.xlu1 %1619 }
 0x7bf   : > { %11946 = vst [vmem:[#allocation58_spill] sm:$0xff] %v8246_v63 }
 0x7cf   : > { %v1632_v57 = vpop.permute.xlu1 %1631 }
 0x7d0   : > { %v1646_v12 = vmul.f32 %v1637_v13, %v1632_v57  ;;  %v1647_v36 = vmul.f32 %v1641_v30, %v1632_v57  ;;  %v1648_v16 = vmul.f32 %v1645_v38, %v1632_v57  ;;  %v1675_v13 = vrot.slane %v1593_v9, %v7837_v6 }
 0x7d2   : > { %1654 = vrot.lane.b32.xlu1 %v1647_v36, %s7514_s25  ;;  %1652 = vrot.lane.b32.xlu0 %v1646_v12, %s7514_s25  ;;  %v1679_v36 = vrot.slane %v1594_v22, %v7837_v6  ;;  %v11948_v12 = vmov 0  }
 0x7d6   : > { %1665 = vperm.xlu1 %7292, %v8210_v34   ;;  %1656 = vrot.lane.b32.xlu0 %v1648_v16, %s7514_s25  ;;  %v1705_v16 = vrot.slane %v1592_v49, %v7844_v41  ;;  %v11951_v49 = vmov 1  }
 0x7da   : > { %7293 = vset.pattern.permute.xlu1 %v11715_v47 }
 0x844   : > { %v8256_v0 = vpop.permute.xlu1 %1654 }
 0x845   : > { %11947 = vst [vmem:[#allocation59_spill] sm:$0xff] %v8256_v0 }
 0x855   : > { %v1666_v30 = vpop.permute.xlu1 %1665 }
 0x856   : > { %v1680_v48 = vmul.f32 %v1671_v25, %v1666_v30  ;;  %v1681_v63 = vmul.f32 %v1675_v13, %v1666_v30  ;;  %v1682_v57 = vmul.f32 %v1679_v36, %v1666_v30  ;;  %v1709_v25 = vrot.slane %v1593_v9, %v7844_v41  ;;  %v8280_v9 = vld [vmem:[%s11605_s4] sm:$0xff] }
 0x857   : > { %11950 = vst [vmem:[#allocation61_spill] sm:$0xff] %v8280_v9 }
 0x858   : > { %1688 = vrot.lane.b32.xlu1 %v1681_v63, %s7514_s25  ;;  %1686 = vrot.lane.b32.xlu0 %v1680_v48, %s7514_s25  ;;  %v1713_v63 = vrot.slane %v1594_v22, %v7844_v41  ;;  %v1732_v48 = vld [vmem:[%s11604_s3] sm:$0xff]  ;;  %v7085_v22 = vld [vmem:[%s11601_s0 + $0x11] ss:$8 sm:$0x3] }
 0x859   : > { %v1859_v36 = vrot.slane %v7085_v22, %v7712_v8 }
 0x85c   : > { %1699 = vperm.xlu1 %7293, %v8210_v34   ;;  %1690 = vrot.lane.b32.xlu0 %v1682_v57, %s7514_s25  ;;  %v1863_v57 = vrot.slane %v7085_v22, %v7720_v11  ;;  %v11957_v22 = vmov 9  }
 0x860   : > { %7294 = vset.pattern.permute.xlu1 %v11948_v12 }
 0x8ca   : > { %v8266_v38 = vpop.permute.xlu1 %1688 }
 0x8cb   : > { %11949 = vst [vmem:[#allocation60_spill] sm:$0xff] %v8266_v38 }
 0x8db   : > { %v1700_v13 = vpop.permute.xlu1 %1699 }
 0x8dc   : > { %v1714_v47 = vmul.f32 %v1705_v16, %v1700_v13  ;;  %v1715_v0 = vmul.f32 %v1709_v25, %v1700_v13  ;;  %v1716_v30 = vmul.f32 %v1713_v63, %v1700_v13  ;;  %v11953_v16 = vmov 5  }
 0x8dd   : > { %v11954_v25 = vmov 6   ;;  %v11955_v63 = vmov 7  }
 0x8de   : > { %1722 = vrot.lane.b32.xlu1 %v1715_v0, %s7514_s25  ;;  %1720 = vrot.lane.b32.xlu0 %v1714_v47, %s7514_s25  ;;  %v11728_v47 = vmov 17   ;;  %v11952_v0 = vmov 2  }
 0x8e2   : > { %1724 = vrot.lane.b32.xlu0 %v1716_v30, %s7514_s25  ;;  %1735 = vperm.xlu1 %7294, %v1732_v48   ;;  %v11956_v30 = vmov 8   ;;  %s7526_s25 = smov 60  }
 0x8e6   : > { %1876 = vperm.xlu0 %7297, %v8280_v9   ;;  %7295 = vset.pattern.permute.xlu1 %v11951_v49 }
 0x8e7   : > { %1806 = vperm.xlu1 %7295, %v8280_v9  }
 0x8ea   : > { %7298 = vset.pattern.permute.xlu0 %v11728_v47 }
 0x8eb   : > { %1015 = vperm.xlu0 %7298, %v8210_v34   ;;  %7296 = vset.pattern.permute.xlu1 %v11952_v0  ;;  %v7086_v34 = vld [vmem:[%s11601_s0 + $0x12] ss:$8 sm:$0x3] }
 0x8ec   : > { %1822 = vperm.xlu1 %7296, %v8280_v9   ;;  %v2021_v13 = vrot.slane %v7086_v34, %v7720_v11  ;;  %v2017_v48 = vrot.slane %v7086_v34, %v7712_v8 }
 0x8ef   : > { %2024 = vrot.lane.b32.xlu0 %v2021_v13, %s7518_s13 }
 0x8f0   : > { %1864 = vrot.lane.b32.xlu1 %v1859_v36, %s7475_s19  ;;  %v11958_v36 = vmov 10  }
 0x8f1   : > { %7299 = vset.pattern.permute.xlu1 %v11953_v16 }
 0x8f4   : > { %1866 = vrot.lane.b32.xlu1 %v1863_v57, %s7475_s19  ;;  %v429_v57 = vld [vmem:[%s11601_s0] ss:$8 sm:$0x3]  ;;  %s7531_s19 = smov 109  }
 0x8f5   : > { %v8316_v13 = vrot.slane %v429_v57, %v7712_v8  ;;  %v8319_v34 = vrot.slane %v429_v57, %v7720_v11 }
 0x8f7   : > { %11959 = vst [vmem:[#allocation62_spill] sm:$0xff] %v8316_v13  ;;  %11960 = vst [vmem:[#allocation63_spill] sm:$0xff] %v8319_v34  ;;  %v441_v47 = vmul.f32 %v8316_v13, %v7816_v46 }
 0x8f8   : > { %1910 = vperm.xlu1 %7299, %v8280_v9  }
 0x8f9   : > { %v483_v16 = vrot.slane %v441_v47, %v7837_v6  ;;  %v499_v19 = vrot.slane %v441_v47, %v7844_v41 }
 0x8fb   : > { %v488_v13 = vmul.f32 %v483_v16, %v7813_v45 }
 0x8fc   : > { %7300 = vset.pattern.permute.xlu1 %v11954_v25 }
 0x8fd   : > { %1944 = vperm.xlu1 %7300, %v8280_v9  }
 0x901   : > { %7301 = vset.pattern.permute.xlu1 %v11955_v63  ;;  %v451_v63 = vrot.slane %v441_v47, %v7712_v8 }
 0x902   : > { %1978 = vperm.xlu1 %7301, %v8280_v9  }
 0x906   : > { %2022 = vrot.lane.b32.xlu1 %v2017_v48, %s7518_s13  ;;  %v8321_v48 = vpop.permute.xlu0 %1617  ;;  %s11792_s13 = smov 62  }
 0x907   : > { %7302 = vset.pattern.permute.xlu1 %v11956_v30  ;;  %11961 = vst [vmem:[#allocation64_spill] sm:$0xff] %v8321_v48 }
 0x90a   : > { %2035 = vperm.xlu1 %7302, %v8280_v9   ;;  %v8333_v0 = vpop.permute.xlu0 %1621 }
 0x90b   : > { %11962 = vst [vmem:[#allocation65_spill] sm:$0xff] %v8333_v0 }
 0x90e   : > { %7303 = vset.pattern.permute.xlu1 %v11957_v22  ;;  %v442_v22 = vmul.f32 %v8319_v34, %v7824_v52  ;;  %v456_v52 = vmul.f32 %v451_v63, %v7807_v40 }
 0x90f   : > { %2070 = vperm.xlu1 %7303, %v8280_v9   ;;  %v8341_v9 = vpop.permute.xlu0 %1652 }
 0x910   : > { %v471_v30 = vrot.slane %v442_v22, %v7720_v11  ;;  %v455_v25 = vrot.slane %v442_v22, %v7712_v8  ;;  %v487_v57 = vrot.slane %v442_v22, %v7837_v6  ;;  %v503_v0 = vrot.slane %v442_v22, %v7844_v41 }
 0x912   : > { %v473_v46 = vmul.f32 %v471_v30, %v7809_v42  ;;  %v457_v34 = vmul.f32 %v455_v25, %v7807_v40  ;;  %v489_v12 = vmul.f32 %v487_v57, %v7813_v45  ;;  %v505_v63 = vmul.f32 %v503_v0, %v7811_v44 }
 0x913   : > { %7304 = vset.pattern.permute.xlu1 %v11958_v36  ;;  %v467_v36 = vrot.slane %v441_v47, %v7720_v11  ;;  %v8347_v40 = vpop.permute.xlu0 %1656  ;;  %v560_v45 = vsel %vm559_vm8, %v7993_v35, %v7941_v53  ;;  %v628_v35 = vsel %vm559_vm8, %v8001_v33, %v7945_v1  ;;  %v720_v33 = vsel %vm719_vm9, %v8011_v31, %v7949_v54 }
 0x914   : > { %v475_v48 = vadd.f32 %v473_v46, %v457_v34  ;;  %v788_v31 = vsel %vm719_vm9, %v8043_v29, %v7953_v51 }
 0x915   : > { %v472_v49 = vmul.f32 %v467_v36, %v7809_v42  ;;  %v504_v42 = vmul.f32 %v499_v19, %v7811_v44  ;;  %v595_v44 = vsel %vm559_vm8, %v7943_v17, %v7999_v43 }
 0x916   : > { %v491_v36 = vadd.f32 %v489_v12, %v475_v48  ;;  %v594_v12 = vsel %vm559_vm8, %v7997_v15, %v7943_v17  ;;  %v662_v15 = vsel %vm559_vm8, %v8005_v39, %v7947_v59  ;;  %v663_v17 = vsel %vm559_vm8, %v7947_v59, %v8007_v10 }
 0x917   : > { %v474_v38 = vadd.f32 %v472_v49, %v456_v52  ;;  %v561_v49 = vsel %vm559_vm8, %v7941_v53, %v7995_v32  ;;  %v8361_v0 = vpop.permute.xlu0 %1686  ;;  %v629_v32 = vsel %vm559_vm8, %v7945_v1, %v8003_v50  ;;  %v721_v1 = vsel %vm719_vm9, %v7949_v54, %v8020_v24 }
 0x918   : > { %v507_v16 = vadd.f32 %v505_v63, %v491_v36  ;;  %v754_v39 = vsel %vm719_vm9, %v8035_v37, %v7951_v61  ;;  %v755_v59 = vsel %vm719_vm9, %v7951_v61, %v8040_v26  ;;  %v789_v24 = vsel %vm719_vm9, %v7953_v51, %v8045_v7 }
 0x919   : > { %v490_v6 = vadd.f32 %v488_v13, %v474_v38  ;;  %v8398_v37 = vsub.s32 4, %v7698_v4  ;;  %v822_v61 = vsel %vm719_vm9, %v8047_v55, %v7955_v21  ;;  %v823_v26 = vsel %vm719_vm9, %v7955_v21, %v8049_v28  ;;  %v8416_v55 = vld [vmem:[%s7705_s28] sm:$0xff]  ;;  %s7567_s28 = smov 49  }
 0x91a   : > { %v565_v38 = vadd.f32 %v561_v49, %v507_v16  ;;  %v880_v51 = vsel %vm879_vm10, %v8051_v60, %v7957_v58  ;;  %v881_v7 = vsel %vm879_vm10, %v7957_v58, %v8053_v20  ;;  %v8413_v36 = vsub.s32 5, %v7698_v4 }
 0x91b   : > { %v506_v47 = vadd.f32 %v504_v42, %v490_v6  ;;  %v8381_v22 = vpop.permute.xlu0 %1690  ;;  %11963 = vst [vmem:[#allocation66_spill] sm:$0xff] %v8398_v37  ;;  %v995_v21 = vrot.slane %v8416_v55, %v7712_v8  ;;  %v999_v28 = vrot.slane %v8416_v55, %v8398_v37  ;;  %v914_v60 = vsel %vm879_vm10, %v8055_v3, %v7959_v14 }
 0x91c   : > { %v599_v53 = vadd.f32 %v595_v44, %v565_v38  ;;  %11964 = vst [vmem:[#allocation67_spill] sm:$0xff] %v8413_v36  ;;  %v915_v20 = vsel %vm879_vm10, %v7959_v14, %v8057_v5  ;;  %v8429_v58 = vsub.s32 6, %v7698_v4  ;;  %v8434_v49 = vsub.s32 7, %v7698_v4 }
 0x91d   : > { %v564_v19 = vadd.f32 %v560_v45, %v506_v47  ;;  %v948_v47 = vsel %vm879_vm10, %v8059_v2, %v7961_v56  ;;  %v949_v3 = vsel %vm879_vm10, %v7961_v56, %v8061_v18  ;;  %v1021_v14 = vrot.slane %v8416_v55, %v7720_v11  ;;  %v11967_v18 = vld [vmem:[#allocation12_spill] sm:$0xff] }
 0x91e   : > { %v633_v25 = vadd.f32 %v629_v32, %v599_v53  ;;  %11965 = vst [vmem:[#allocation68_spill] sm:$0xff] %v8429_v58  ;;  %11966 = vst [vmem:[#allocation69_spill] sm:$0xff] %v8434_v49  ;;  %v1005_v44 = vrot.slane %v995_v21, %v7712_v8  ;;  %v1009_v4 = vrot.slane %v999_v28, %v7712_v8 }
 0x91f   : > { %v598_v6 = vadd.f32 %v594_v12, %v564_v19  ;;  %v1025_v12 = vrot.slane %v8416_v55, %v8413_v36  ;;  %v982_v2 = vsel %vm879_vm10, %v8063_v27, %v7963_v62  ;;  %v983_v56 = vsel %vm879_vm10, %v7963_v62, %v8065_v23 }
 0x920   : > { %v667_v30 = vadd.f32 %v663_v17, %v633_v25  ;;  %v1047_v19 = vrot.slane %v8416_v55, %v11967_v18  ;;  %v1051_v38 = vrot.slane %v8416_v55, %v8429_v58  ;;  %v1073_v53 = vrot.slane %v8416_v55, %v7844_v41 }
 0x921   : > { %v632_v43 = vadd.f32 %v628_v35, %v598_v6  ;;  %v1077_v27 = vrot.slane %v8416_v55, %v8434_v49  ;;  %v1031_v23 = vrot.slane %v1021_v14, %v7720_v11  ;;  %v1035_v62 = vrot.slane %v1025_v12, %v7720_v11  ;;  %v11975_v14 = vld [vmem:[#allocation23_spill] sm:$0xff] }
 0x922   : > { %v725_v13 = vadd.f32 %v721_v1, %v667_v30  ;;  %v1057_v1 = vrot.slane %v1047_v19, %v11967_v18  ;;  %v1083_v30 = vrot.slane %v1073_v53, %v7844_v41  ;;  %v11977_v19 = vld [vmem:[#allocation19_spill] sm:$0xff] }
 0x923   : > { %v666_v50 = vadd.f32 %v662_v15, %v632_v43  ;;  %v11968_v43 = vld [vmem:[#allocation13_spill] sm:$0xff] }
 0x924   : > { %v759_v34 = vadd.f32 %v755_v59, %v725_v13  ;;  %v1010_v25 = vmul.f32 %v1005_v44, %v11968_v43  ;;  %v11976_v44 = vld [vmem:[#allocation24_spill] sm:$0xff] }
 0x925   : > { %v724_v10 = vadd.f32 %v720_v33, %v666_v50  ;;  %v1011_v33 = vmul.f32 %v1009_v4, %v11968_v43  ;;  %v1061_v50 = vrot.slane %v1051_v38, %v11967_v18  ;;  %v11978_v38 = vld [vmem:[#allocation25_spill] sm:$0xff]  ;;  %v11982_v43 = vld [vmem:[#allocation28_spill] sm:$0xff] }
 0x926   : > { %v793_v57 = vadd.f32 %v789_v24, %v759_v34 }
 0x927   : > { %v758_v54 = vadd.f32 %v754_v39, %v724_v10  ;;  %v1087_v39 = vrot.slane %v1077_v27, %v7844_v41 }
 0x928   : > { %v827_v52 = vadd.f32 %v823_v26, %v793_v57  ;;  %v11970_v57 = vld [vmem:[#allocation15_spill] sm:$0xff] }
 0x929   : > { %v792_v29 = vadd.f32 %v788_v31, %v758_v54  ;;  %v11969_v54 = vld [vmem:[#allocation14_spill] sm:$0xff] }
 0x92a   : > { %v885_v63 = vadd.f32 %v881_v7, %v827_v52  ;;  %v1062_v34 = vmul.f32 %v1057_v1, %v11969_v54  ;;  %v1089_v7 = vmul.f32 %v1087_v39, %v11970_v57 }
 0x92b   : > { %v826_v46 = vadd.f32 %v822_v61, %v792_v29  ;;  %v1063_v61 = vmul.f32 %v1061_v50, %v11969_v54  ;;  %v11983_v50 = vld [vmem:[#allocation30_spill] sm:$0xff]  ;;  %v11987_v54 = vld [vmem:[#allocation37_spill] sm:$0xff] }
 0x92c   : > { %v919_v5 = vadd.f32 %v915_v20, %v885_v63  ;;  %v11972_v20 = vld [vmem:[#allocation16_spill] sm:$0xff]  ;;  %v11973_v63 = vld [vmem:[#allocation22_spill] sm:$0xff] }
 0x92d   : > { %v884_v42 = vadd.f32 %v880_v51, %v826_v46  ;;  %v1088_v51 = vmul.f32 %v1083_v30, %v11970_v57  ;;  %v11984_v30 = vld [vmem:[#allocation35_spill] sm:$0xff] }
 0x92e   : > { %v953_v32 = vadd.f32 %v949_v3, %v919_v5  ;;  %v11974_v5 = vld [vmem:[#allocation18_spill] sm:$0xff]  ;;  %v1304_v39 = vsel %vm1303_vm12, %v11984_v30, %v11983_v50  ;;  %v12004_v30 = vld [vmem:[#allocation57_spill] sm:$0xff] }
 0x92f   : > { %v918_v16 = vadd.f32 %v914_v60, %v884_v42  ;;  %v11971_v60 = vld [vmem:[#allocation17_spill] sm:$0xff]  ;;  %v1178_v12 = vsel %vm1143_vm11, %v11975_v14, %v11974_v5  ;;  %v1179_v4 = vsel %vm1143_vm11, %v11974_v5, %v11976_v44  ;;  %v11995_v14 = vld [vmem:[#allocation44_spill] sm:$0xff] }
 0x930   : > { %v987_v17 = vadd.f32 %v983_v56, %v953_v32  ;;  %v1144_v42 = vsel %vm1143_vm11, %v11972_v20, %v11971_v60  ;;  %v11979_v32 = vld [vmem:[#allocation26_spill] sm:$0xff]  ;;  %v11992_v20 = vld [vmem:[#allocation43_spill] sm:$0xff] }
 0x931   : > { %v952_v35 = vadd.f32 %v948_v47, %v918_v16  ;;  %v1145_v47 = vsel %vm1143_vm11, %v11971_v60, %v11973_v63  ;;  %v1213_v53 = vsel %vm1143_vm11, %v11977_v19, %v11979_v32 }
 0x932   : > { %v1013_v13 = vadd.f32 %v1011_v33, %v987_v17  ;;  %v11980_v17 = vld [vmem:[#allocation29_spill] sm:$0xff] }
 0x933   : > { %v986_v15 = vadd.f32 %v982_v2, %v952_v35  ;;  %v1212_v35 = vsel %vm1143_vm11, %v11978_v38, %v11977_v19  ;;  %v11998_v38 = vld [vmem:[#allocation45_spill] sm:$0xff] }
 0x935   : > { %v1012_v10 = vadd.f32 %v1010_v25, %v986_v15  ;;  %v1247_v25 = vsel %vm1143_vm11, %v11980_v17, %v11982_v43 }
 0x950   : > { %v8395_v48 = vpop.permute.xlu0 %1720 }
 0x954   : > { %v8431_v45 = vpop.permute.xlu0 %1724 }
 0x965   : > { %v8458_v6 = vpop.permute.xlu0 %1876 }
 0x96a   : > { %v1016_v59 = vpop.permute.xlu0 %1015 }
 0x96b   : > { %v1036_v31 = vmul.f32 %v1031_v23, %v1016_v59  ;;  %v1037_v24 = vmul.f32 %v1035_v62, %v1016_v59  ;;  %v11981_v23 = vld [vmem:[#allocation27_spill] sm:$0xff]  ;;  %v11985_v59 = vld [vmem:[#allocation36_spill] sm:$0xff] }
 0x96c   : > { %v1246_v62 = vsel %vm1143_vm11, %v11981_v23, %v11980_v17  ;;  %v12001_v23 = vld [vmem:[#allocation46_spill] sm:$0xff] }
 0x96d   : > { %v1038_v26 = vadd.f32 %v1036_v31, %v1012_v10  ;;  %v1039_v29 = vadd.f32 %v1037_v24, %v1013_v13  ;;  %v1305_v10 = vsel %vm1303_vm12, %v11983_v50, %v11985_v59  ;;  %v11986_v24 = vld [vmem:[#allocation31_spill] sm:$0xff] }
 0x96f   : > { %v1064_v46 = vadd.f32 %v1062_v34, %v1038_v26  ;;  %v1065_v52 = vadd.f32 %v1063_v61, %v1039_v29  ;;  %v1338_v34 = vsel %vm1303_vm12, %v11987_v54, %v11986_v24  ;;  %v11988_v61 = vld [vmem:[#allocation38_spill] sm:$0xff] }
 0x970   : > { %v1339_v26 = vsel %vm1303_vm12, %v11986_v24, %v11988_v61  ;;  %v12007_v54 = vld [vmem:[#allocation58_spill] sm:$0xff] }
 0x971   : > { %v1090_v21 = vadd.f32 %v1088_v51, %v1064_v46  ;;  %v1091_v28 = vadd.f32 %v1089_v7, %v1065_v52  ;;  %v11989_v51 = vld [vmem:[#allocation32_spill] sm:$0xff]  ;;  %v11990_v7 = vld [vmem:[#allocation39_spill] sm:$0xff] }
 0x972   : > { %v1372_v46 = vsel %vm1303_vm12, %v11990_v7, %v11989_v51  ;;  %v11991_v52 = vld [vmem:[#allocation40_spill] sm:$0xff]  ;;  %v12010_v7 = vld [vmem:[#allocation59_spill] sm:$0xff] }
 0x973   : > { %v1148_v3 = vadd.f32 %v1144_v42, %v1090_v21  ;;  %v1149_v16 = vadd.f32 %v1145_v47, %v1091_v28  ;;  %v1373_v21 = vsel %vm1303_vm12, %v11989_v51, %v11991_v52  ;;  %v11993_v42 = vld [vmem:[#allocation41_spill] sm:$0xff]  ;;  %v11994_v47 = vld [vmem:[#allocation42_spill] sm:$0xff]  ;;  %v1659_v52 = vsel %vm1623_vm14, %v12010_v7, %v8347_v40 }
 0x974   : > { %v1406_v63 = vsel %vm1303_vm12, %v11993_v42, %v11992_v20  ;;  %v12011_v42 = vld [vmem:[#allocation60_spill] sm:$0xff] }
 0x975   : > { %v1182_v2 = vadd.f32 %v1178_v12, %v1148_v3  ;;  %v1183_v56 = vadd.f32 %v1179_v4, %v1149_v16  ;;  %v1407_v3 = vsel %vm1303_vm12, %v11992_v20, %v11994_v47  ;;  %v11996_v12 = vld [vmem:[#allocation49_spill] sm:$0xff]  ;;  %v11997_v4 = vld [vmem:[#allocation50_spill] sm:$0xff]  ;;  %v1693_v47 = vsel %vm1623_vm14, %v12011_v42, %v8381_v22 }
 0x976   : > { %v1464_v44 = vsel %vm11736_vm13, %v11996_v12, %v11995_v14 }
 0x977   : > { %v1216_v27 = vadd.f32 %v1212_v35, %v1182_v2  ;;  %v1217_v15 = vadd.f32 %v1213_v53, %v1183_v56  ;;  %v1465_v2 = vsel %vm11736_vm13, %v11995_v14, %v11997_v4  ;;  %v11999_v35 = vld [vmem:[#allocation51_spill] sm:$0xff]  ;;  %v12000_v53 = vld [vmem:[#allocation52_spill] sm:$0xff] }
 0x978   : > { %v1498_v32 = vsel %vm11736_vm13, %v11999_v35, %v11998_v38 }
 0x979   : > { %v1250_v33 = vadd.f32 %v1246_v62, %v1216_v27  ;;  %v1251_v1 = vadd.f32 %v1247_v25, %v1217_v15  ;;  %v1499_v27 = vsel %vm11736_vm13, %v11998_v38, %v12000_v53  ;;  %v12002_v62 = vld [vmem:[#allocation53_spill] sm:$0xff]  ;;  %v12003_v25 = vld [vmem:[#allocation54_spill] sm:$0xff] }
 0x97a   : > { %v1532_v43 = vsel %vm11736_vm13, %v12002_v62, %v12001_v23  ;;  %v12016_v53 = vld [vmem:[#allocation61_spill] sm:$0xff]  ;;  %v12018_v62 = vmov 20  }
 0x97b   : > { %v1308_v13 = vadd.f32 %v1304_v39, %v1250_v33  ;;  %v1309_v31 = vadd.f32 %v1305_v10, %v1251_v1  ;;  %v1533_v33 = vsel %vm11736_vm13, %v12001_v23, %v12003_v25  ;;  %v12005_v39 = vld [vmem:[#allocation55_spill] sm:$0xff]  ;;  %v12006_v10 = vld [vmem:[#allocation56_spill] sm:$0xff]  ;;  %v12020_v25 = vmov 0  }
 0x97c   : > { %v1566_v59 = vsel %vm11736_vm13, %v12005_v39, %v12004_v30  ;;  %v12025_v39 = vmov 18  }
 0x97d   : > { %v1342_v29 = vadd.f32 %v1338_v34, %v1308_v13  ;;  %v1343_v57 = vadd.f32 %v1339_v26, %v1309_v31  ;;  %v1567_v13 = vsel %vm11736_vm13, %v12004_v30, %v12006_v10  ;;  %v12008_v34 = vld [vmem:[#allocation64_spill] sm:$0xff]  ;;  %v12009_v26 = vld [vmem:[#allocation65_spill] sm:$0xff]  ;;  %v12024_v30 = vmov 16  }
 0x97e   : > { %v1624_v61 = vsel %vm1623_vm14, %v12008_v34, %v12007_v54  ;;  %v12029_v34 = vmov 23  }
 0x97f   : > { %v1376_v28 = vadd.f32 %v1372_v46, %v1342_v29  ;;  %v1377_v60 = vadd.f32 %v1373_v21, %v1343_v57  ;;  %v1625_v29 = vsel %vm1623_vm14, %v12007_v54, %v12009_v26  ;;  %v1658_v46 = vsel %vm1623_vm14, %v8341_v9, %v12010_v7  ;;  %v1723_v21 = vpop.permute.xlu1 %1722 }
 0x980   : > { %v1726_v9 = vsel %vm1623_vm14, %v8395_v48, %v1723_v21  ;;  %v1727_v40 = vsel %vm1623_vm14, %v1723_v21, %v8431_v45  ;;  %v7087_v45 = vld [vmem:[%s11601_s0 + $0x13] ss:$8 sm:$0x3]  ;;  %v8640_v21 = vpop.permute.xlu0 %2024 }
 0x981   : > { %v1410_v16 = vadd.f32 %v1406_v63, %v1376_v28  ;;  %v1411_v5 = vadd.f32 %v1407_v3, %v1377_v60  ;;  %v1746_v28 = vmul.f32 2.0, %v8416_v55  ;;  %v1692_v63 = vsel %vm1623_vm14, %v8361_v0, %v12011_v42  ;;  %12033 = vst [vmem:[#allocation18_spill] sm:$0xff] %v8640_v21 }
 0x982   : > { %v2177_v23 = vrot.slane %v7087_v45, %v7712_v8  ;;  %vm2727_vm14 = vcmask 539648  }
 0x983   : > { %v1468_v56 = vadd.f32 %v1464_v44, %v1410_v16  ;;  %v1469_v19 = vadd.f32 %v1465_v2, %v1411_v5  ;;  %v1736_v5 = vpop.permute.xlu1 %1735  ;;  %v1748_v55 = vcombine.low %v1746_v28, %v1746_v28 }
 0x985   : > { %v1502_v15 = vadd.f32 %v1498_v32, %v1468_v56  ;;  %v1503_v17 = vadd.f32 %v1499_v27, %v1469_v19  ;;  %v2181_v32 = vrot.slane %v7087_v45, %v7720_v11  ;;  %v7088_v27 = vld [vmem:[%s11601_s0 + $0x14] ss:$8 sm:$0x3] }
 0x986   : > { %v2403_v10 = vrot.slane %v7088_v27, %v7720_v11 }
 0x987   : > { %v1536_v1 = vadd.f32 %v1532_v43, %v1502_v15  ;;  %v1537_v50 = vadd.f32 %v1533_v33, %v1503_v17  ;;  %v12017_v15 = vmov 11   ;;  %v2399_v17 = vrot.slane %v7088_v27, %v7712_v8 }
 0x988   : > { %v12019_v43 = vmov 12   ;;  %v12021_v33 = vmov 13  }
 0x989   : > { %v1570_v31 = vadd.f32 %v1566_v59, %v1536_v1  ;;  %v1571_v24 = vadd.f32 %v1567_v13, %v1537_v50  ;;  %v12022_v1 = vmov 14   ;;  %v12023_v50 = vmov 15  }
 0x98a   : > { %v12026_v59 = vmov 19   ;;  %v12027_v13 = vmov 21  }
 0x98b   : > { %v1628_v57 = vadd.f32 %v1624_v61, %v1570_v31  ;;  %v1629_v51 = vadd.f32 %v1625_v29, %v1571_v24  ;;  %v8621_v31 = vpop.permute.xlu1 %1806  ;;  %v12028_v24 = vmov 22  }
 0x98d   : > { %v1662_v60 = vadd.f32 %v1658_v46, %v1628_v57  ;;  %v1663_v20 = vadd.f32 %v1659_v52, %v1629_v51 }
 0x98f   : > { %v1696_v3 = vadd.f32 %v1692_v63, %v1662_v60  ;;  %v1697_v16 = vadd.f32 %v1693_v47, %v1663_v20  ;;  %v8625_v54 = vpop.permute.xlu1 %1822 }
 0x991   : > { %v1730_v14 = vadd.f32 %v1726_v9, %v1696_v3  ;;  %v1731_v12 = vadd.f32 %v1727_v40, %v1697_v16 }
 0x993   : > { %v8571_v44 = vadd.f32 %v1736_v5, %v1730_v14  ;;  %v8573_v4 = vadd.f32 %v1736_v5, %v1731_v12  ;;  %v8628_v61 = vpop.permute.xlu1 %1864 }
 0x994   : > { %12030 = vst [vmem:[#allocation17_spill] sm:$0xff] %v8628_v61 }
 0x995   : > { %12012 = vst [vmem:[#allocation12_spill] sm:$0xff] %v8571_v44  ;;  %12013 = vst [vmem:[#allocation13_spill] sm:$0xff] %v8573_v4  ;;  %v1750_v0 = vadd.f32 %v1748_v55, %v8571_v44  ;;  %v1751_v22 = vadd.f32 %v1746_v28, %v8573_v4 }
 0x997   : > { %vm1752_vm15 = vcmp.ge.f32.partialorder %v1750_v0, 0.0  ;;  %vm1753_vm13 = vcmp.ge.f32.partialorder %v1751_v22, 0.0  ;;  %v1754_v2 = vmul.f32 0.05, %v1750_v0  ;;  %v1755_v56 = vmul.f32 0.05, %v1751_v22  ;;  %v8630_v26 = vpop.permute.xlu1 %1866 }
 0x998   : > { %12031 = vst [vmem:[#allocation16_spill] sm:$0xff] %v8630_v26  ;;  %v8645_v20 = vsel %vm683_vm2, %v8628_v61, %v8630_v26  ;;  %vm2026_vm2 = vcmask 31744  }
 0x999   : > { %v8577_v48 = vsel %vm1752_vm15, %v1750_v0, %v1754_v2  ;;  %v8579_v19 = vsel %vm1753_vm13, %v1751_v22, %v1755_v56  ;;  %12034 = vst [vmem:[#allocation23_spill] sm:$0xff] %v8645_v20  ;;  %vm11810_vm13 = vcmask 523264   ;;  %vm2887_vm15 = vcmask 556032  }
 0x99a   : > { %12014 = vst [vmem:[#allocation14_spill] sm:$0xff] %v8577_v48  ;;  %12015 = vst [vmem:[#allocation15_spill] sm:$0xff] %v8579_v19  ;;  %v1762_v38 = vrot.slane %v8579_v19, 4  ;;  %v1761_v35 = vrot.slane %v8577_v48, 4 }
 0x99b   : > { %v1911_v29 = vpop.permute.xlu1 %1910 }
 0x99c   : > { %1765 = vrot.lane.b32.xlu1 %v1762_v38, %s7512_s17  ;;  %1763 = vrot.lane.b32.xlu0 %v1761_v35, %s7512_s17 }
 0x99f   : > { %v1945_v57 = vpop.permute.xlu1 %1944 }
 0x9a0   : > { %2104 = vperm.xlu1 %7304, %v12016_v53   ;;  %2184 = vrot.lane.b32.xlu0 %v2181_v32, %s7500_s18 }
 0x9a3   : > { %v8632_v51 = vpop.permute.xlu1 %1978 }
 0x9a4   : > { %7305 = vset.pattern.permute.xlu1 %v12017_v15  ;;  %2346 = vperm.xlu0 %7298, %v12016_v53  }
 0x9a5   : > { %2138 = vperm.xlu1 %7305, %v12016_v53  }
 0x9a7   : > { %v8634_v7 = vpop.permute.xlu1 %2022 }
 0x9a8   : > { %2404 = vrot.lane.b32.xlu0 %v2399_v17, %s7519_s26  ;;  %12032 = vst [vmem:[#allocation22_spill] sm:$0xff] %v8634_v7  ;;  %v8679_v17 = vsel %vm2026_vm2, %v8634_v7, %v8640_v21  ;;  %vm2062_vm2 = vcmask 1014784  }
 0x9a9   : > { %2182 = vrot.lane.b32.xlu1 %v2177_v23, %s7500_s18  ;;  %7313 = vset.pattern.permute.xlu0 %v12018_v62  ;;  %12035 = vst [vmem:[#allocation24_spill] sm:$0xff] %v8679_v17  ;;  %s7520_s18 = smov 124  }
 0x9aa   : > { %7306 = vset.pattern.permute.xlu1 %v12019_v43 }
 0x9ab   : > { %v8636_v46 = vpop.permute.xlu1 %2035 }
 0x9ac   : > { %2417 = vperm.xlu0 %7313, %v12016_v53  }
 0x9ad   : > { %2194 = vperm.xlu1 %7306, %v12016_v53  }
 0x9af   : > { %v8638_v52 = vpop.permute.xlu1 %2070 }
 0x9b0   : > { %7314 = vset.pattern.permute.xlu0 %v12020_v25 }
 0x9b1   : > { %7307 = vset.pattern.permute.xlu1 %v12021_v33  ;;  %1790 = vperm.xlu0 %7314, %v12016_v53  }
 0x9b2   : > { %2228 = vperm.xlu1 %7307, %v12016_v53  }
 0x9b6   : > { %7308 = vset.pattern.permute.xlu1 %v12022_v1 }
 0x9b7   : > { %2262 = vperm.xlu1 %7308, %v12016_v53  }
 0x9bb   : > { %7309 = vset.pattern.permute.xlu1 %v12023_v50 }
 0x9bc   : > { %2296 = vperm.xlu1 %7309, %v12016_v53  }
 0x9c0   : > { %7310 = vset.pattern.permute.xlu1 %v12024_v30 }
 0x9c1   : > { %2330 = vperm.xlu1 %7310, %v12016_v53  }
 0x9c5   : > { %7311 = vset.pattern.permute.xlu1 %v12025_v39 }
 0x9c6   : > { %2362 = vperm.xlu1 %7311, %v12016_v53  }
 0x9ca   : > { %7312 = vset.pattern.permute.xlu1 %v12026_v59 }
 0x9cb   : > { %2378 = vperm.xlu1 %7312, %v12016_v53  }
 0x9cf   : > { %2406 = vrot.lane.b32.xlu1 %v2403_v10, %s7519_s26  ;;  %s7523_s26 = smov 66  }
 0x9d0   : > { %7315 = vset.pattern.permute.xlu1 %v12027_v13 }
 0x9d3   : > { %2452 = vperm.xlu1 %7315, %v12016_v53  }
 0x9d7   : > { %7316 = vset.pattern.permute.xlu1 %v12028_v24  ;;  %v7089_v24 = vld [vmem:[%s11601_s0 + $0x15] ss:$8 sm:$0x3] }
 0x9d8   : > { %2486 = vperm.xlu1 %7316, %v12016_v53   ;;  %v2559_v39 = vrot.slane %v7089_v24, %v7712_v8 }
 0x9dc   : > { %7317 = vset.pattern.permute.xlu1 %v12029_v34 }
 0xa0e   : > { %v1766_v28 = vpop.permute.xlu1 %1765  ;;  %v1764_v60 = vpop.permute.xlu0 %1763 }
 0xa0f   : > { %v8648_v42 = vsel %vm1587_vm7, %v1766_v28, 0.0  ;;  %v8651_v63 = vsel %vm1587_vm7, %v1764_v60, %v1766_v28  ;;  %v8654_v47 = vsel %vm1587_vm7, 0.0, %v1764_v60 }
 0xa10   : > { %v1874_v3 = vmul.f32 %v8630_v26, %v8648_v42  ;;  %v1872_v16 = vmul.f32 %v8628_v61, %v8654_v47  ;;  %v1873_v9 = vmul.f32 %v8645_v20, %v8651_v63  ;;  %v2032_v23 = vmul.f32 %v8679_v17, %v8651_v63 }
 0xa12   : > { %v1890_v40 = vrot.slane %v1874_v3, %v7712_v8  ;;  %v1882_v5 = vrot.slane %v1872_v16, %v7712_v8  ;;  %v1916_v12 = vrot.slane %v1872_v16, %v7720_v11  ;;  %v1886_v0 = vrot.slane %v1873_v9, %v7712_v8 }
 0xa13   : > { %v1924_v56 = vrot.slane %v1874_v3, %v7720_v11  ;;  %v1920_v45 = vrot.slane %v1873_v9, %v7720_v11  ;;  %v1950_v32 = vrot.slane %v1872_v16, %v11967_v18  ;;  %v1954_v27 = vrot.slane %v1873_v9, %v11967_v18 }
 0xa14   : > { %v1893_v55 = vmul.f32 %v1890_v40, %v8458_v6  ;;  %v1891_v14 = vmul.f32 %v1882_v5, %v8458_v6  ;;  %v1925_v22 = vmul.f32 %v1916_v12, %v1911_v29  ;;  %v1892_v2 = vmul.f32 %v1886_v0, %v8458_v6 }
 0xa15   : > { %v1927_v38 = vmul.f32 %v1924_v56, %v1911_v29  ;;  %v1926_v35 = vmul.f32 %v1920_v45, %v1911_v29  ;;  %v1959_v10 = vmul.f32 %v1950_v32, %v1945_v57  ;;  %v1960_v28 = vmul.f32 %v1954_v27, %v1945_v57  ;;  %v8710_v56 = vpop.permute.xlu0 %2184 }
 0xa16   : > { %1901 = vrot.lane.b32.xlu0 %v1893_v55, %s7494_s30  ;;  %1897 = vrot.lane.b32.xlu1 %v1891_v14, %s7494_s30  ;;  %v1958_v29 = vrot.slane %v1874_v3, %v11967_v18  ;;  %v1988_v60 = vrot.slane %v1873_v9, %v7844_v41  ;;  %v1984_v14 = vrot.slane %v1872_v16, %v7844_v41 }
 0xa17   : > { %v2045_v12 = vrot.slane %v2032_v23, %v7712_v8  ;;  %v8700_v9 = vmul.f32 %v8634_v7, %v8654_v47  ;;  %v2080_v16 = vrot.slane %v2032_v23, %v7720_v11  ;;  %12037 = vst [vmem:[#allocation25_spill] sm:$0xff] %v8710_v56  ;;  %v8714_v45 = vmul.f32 %v8640_v21, %v8648_v42 }
 0xa18   : > { %v1961_v5 = vmul.f32 %v1958_v29, %v1945_v57  ;;  %v1994_v55 = vmul.f32 %v1988_v60, %v8632_v51 }
 0xa19   : > { %v2051_v57 = vmul.f32 %v2045_v12, %v8636_v46  ;;  %v2086_v32 = vmul.f32 %v2080_v16, %v8638_v52  ;;  %v2049_v60 = vrot.slane %v8714_v45, %v7712_v8 }
 0xa1a   : > { %1931 = vrot.lane.b32.xlu0 %v1925_v22, %s7494_s30  ;;  %1899 = vrot.lane.b32.xlu1 %v1892_v2, %s7494_s30  ;;  %v1993_v22 = vmul.f32 %v1984_v14, %v8632_v51  ;;  %v1992_v2 = vrot.slane %v1874_v3, %v7844_v41  ;;  %v2041_v3 = vrot.slane %v8700_v9, %v7712_v8 }
 0xa1c   : > { %v2050_v29 = vmul.f32 %v2041_v3, %v8636_v46 }
 0xa1e   : > { %1935 = vrot.lane.b32.xlu0 %v1927_v38, %s7494_s30  ;;  %1933 = vrot.lane.b32.xlu1 %v1926_v35, %s7494_s30  ;;  %v1995_v35 = vmul.f32 %v1992_v2, %v8632_v51 }
 0xa1f   : > { %v8683_v6 = vpop.permute.xlu1 %2104 }
 0xa22   : > { %1965 = vrot.lane.b32.xlu0 %v1959_v10, %s7494_s30  ;;  %1967 = vrot.lane.b32.xlu1 %v1960_v28, %s7494_s30  ;;  %v2114_v10 = vrot.slane %v2032_v23, %v11967_v18 }
 0xa24   : > { %v8691_v40 = vpop.permute.xlu1 %2138  ;;  %v2120_v28 = vmul.f32 %v2114_v10, %v8683_v6 }
 0xa26   : > { %1969 = vrot.lane.b32.xlu0 %v1961_v5, %s7494_s30  ;;  %2001 = vrot.lane.b32.xlu1 %v1994_v55, %s7494_s30  ;;  %v2148_v55 = vrot.slane %v2032_v23, %v7844_v41  ;;  %v8750_v23 = vpop.permute.xlu0 %2346 }
 0xa27   : > { %12039 = vst [vmem:[#allocation29_spill] sm:$0xff] %v8750_v23 }
 0xa28   : > { %v8702_v0 = vpop.permute.xlu1 %2182  ;;  %v2154_v14 = vmul.f32 %v2148_v55, %v8691_v40 }
 0xa29   : > { %12036 = vst [vmem:[#allocation19_spill] sm:$0xff] %v8702_v0  ;;  %v8725_v27 = vsel %vm1267_vm5, %v8702_v0, %v8710_v56  ;;  %vm2408_vm5 = vcmask 293888  }
 0xa2a   : > { %1999 = vrot.lane.b32.xlu0 %v1993_v22, %s7494_s30  ;;  %2058 = vrot.lane.b32.xlu1 %v2051_v57, %s7520_s18  ;;  %12038 = vst [vmem:[#allocation26_spill] sm:$0xff] %v8725_v27  ;;  %v2191_v51 = vmul.f32 %v8725_v27, %v8651_v63  ;;  %v2052_v22 = vmul.f32 %v2049_v60, %v8636_v46 }
 0xa2b   : > { %v2076_v57 = vrot.slane %v8700_v9, %v7720_v11  ;;  %v2110_v60 = vrot.slane %v8700_v9, %v11967_v18 }
 0xa2c   : > { %v8716_v38 = vpop.permute.xlu1 %2194  ;;  %v2204_v12 = vrot.slane %v2191_v51, %v7712_v8  ;;  %v2238_v46 = vrot.slane %v2191_v51, %v7720_v11  ;;  %v2272_v55 = vrot.slane %v2191_v51, %v11967_v18 }
 0xa2e   : > { %2003 = vrot.lane.b32.xlu0 %v1995_v35, %s7494_s30  ;;  %2093 = vrot.lane.b32.xlu1 %v2086_v32, %s7520_s18  ;;  %v2210_v16 = vmul.f32 %v2204_v12, %v8716_v38  ;;  %v2085_v35 = vmul.f32 %v2076_v57, %v8638_v52  ;;  %v2084_v32 = vrot.slane %v8714_v45, %v7720_v11 }
 0xa2f   : > { %v2118_v57 = vrot.slane %v8714_v45, %v11967_v18 }
 0xa31   : > { %v8736_v5 = vpop.permute.xlu1 %2228 }
 0xa32   : > { %2056 = vrot.lane.b32.xlu0 %v2050_v29, %s7520_s18  ;;  %2127 = vrot.lane.b32.xlu1 %v2120_v28, %s7520_s18  ;;  %v2244_v10 = vmul.f32 %v2238_v46, %v8736_v5  ;;  %v2087_v28 = vmul.f32 %v2084_v32, %v8638_v52  ;;  %v8763_v29 = vpop.permute.xlu0 %2404 }
 0xa33   : > { %12040 = vst [vmem:[#allocation27_spill] sm:$0xff] %v8763_v29  ;;  %v8773_v12 = vmul.f32 %v8763_v29, %v8654_v47 }
 0xa35   : > { %v2423_v32 = vrot.slane %v8773_v12, %v7712_v8  ;;  %v2526_v20 = vrot.slane %v8773_v12, %v7844_v41 }
 0xa36   : > { %v8746_v2 = vpop.permute.xlu1 %2262  ;;  %2060 = vrot.lane.b32.xlu0 %v2052_v22, %s7520_s18  ;;  %2161 = vrot.lane.b32.xlu1 %v2154_v14, %s7520_s18  ;;  %v2119_v14 = vmul.f32 %v2110_v60, %v8683_v6  ;;  %v2144_v60 = vrot.slane %v8700_v9, %v7844_v41 }
 0xa37   : > { %v2278_v22 = vmul.f32 %v2272_v55, %v8746_v2 }
 0xa3a   : > { %2091 = vrot.lane.b32.xlu0 %v2085_v35, %s7520_s18  ;;  %2217 = vrot.lane.b32.xlu1 %v2210_v16, %s7502_s20  ;;  %v2306_v16 = vrot.slane %v2191_v51, %v7844_v41  ;;  %v2121_v35 = vmul.f32 %v2118_v57, %v8683_v6  ;;  %v2153_v51 = vmul.f32 %v2144_v60, %v8691_v40 }
 0xa3b   : > { %v8759_v3 = vpop.permute.xlu1 %2296  ;;  %v2190_v6 = vmul.f32 %v8702_v0, %v8654_v47 }
 0xa3c   : > { %v2312_v46 = vmul.f32 %v2306_v16, %v8759_v3  ;;  %v2192_v16 = vmul.f32 %v8710_v56, %v8648_v42 }
 0xa3d   : > { %v2200_v57 = vrot.slane %v2190_v6, %v7712_v8 }
 0xa3e   : > { %2095 = vrot.lane.b32.xlu0 %v2087_v28, %s7520_s18  ;;  %2251 = vrot.lane.b32.xlu1 %v2244_v10, %s7502_s20  ;;  %v2418_v10 = vpop.permute.xlu0 %2417 }
 0xa3f   : > { %v2432_v55 = vmul.f32 %v2423_v32, %v2418_v10  ;;  %v2209_v32 = vmul.f32 %v2200_v57, %v8716_v38  ;;  %v2234_v57 = vrot.slane %v2190_v6, %v7720_v11 }
 0xa40   : > { %v8776_v52 = vpop.permute.xlu1 %2330 }
 0xa41   : > { %12041 = vst [vmem:[#allocation28_spill] sm:$0xff] %v8776_v52  ;;  %v2243_v4 = vmul.f32 %v2234_v57, %v8736_v5 }
 0xa42   : > { %2125 = vrot.lane.b32.xlu0 %v2119_v14, %s7520_s18  ;;  %2285 = vrot.lane.b32.xlu1 %v2278_v22, %s7502_s20  ;;  %v2152_v14 = vrot.slane %v8714_v45, %v7844_v41 }
 0xa44   : > { %v2155_v9 = vmul.f32 %v2152_v14, %v8691_v40  ;;  %v2208_v40 = vrot.slane %v2192_v16, %v7712_v8 }
 0xa45   : > { %v8787_v28 = vpop.permute.xlu1 %2362 }
 0xa46   : > { %12042 = vst [vmem:[#allocation30_spill] sm:$0xff] %v8787_v28  ;;  %2129 = vrot.lane.b32.xlu0 %v2121_v35, %s7520_s18  ;;  %2319 = vrot.lane.b32.xlu1 %v2312_v46, %s7502_s20 }
 0xa4a   : > { %v8798_v22 = vpop.permute.xlu1 %2378  ;;  %2159 = vrot.lane.b32.xlu0 %v2153_v51, %s7520_s18  ;;  %2438 = vrot.lane.b32.xlu1 %v2432_v55, %s7521_s27  ;;  %v2211_v55 = vmul.f32 %v2208_v40, %v8716_v38 }
 0xa4b   : > { %12043 = vst [vmem:[#allocation35_spill] sm:$0xff] %v8798_v22 }
 0xa4e   : > { %v8806_v35 = vpop.permute.xlu1 %2406  ;;  %2163 = vrot.lane.b32.xlu0 %v2155_v9, %s7520_s18 }
 0xa4f   : > { %12044 = vst [vmem:[#allocation36_spill] sm:$0xff] %v8806_v35  ;;  %v8811_v45 = vsel %vm2408_vm5, %v8763_v29, %v8806_v35  ;;  %vm2444_vm5 = vcmask 752640  }
 0xa50   : > { %12045 = vst [vmem:[#allocation31_spill] sm:$0xff] %v8811_v45  ;;  %v8816_v46 = vmul.f32 %v8811_v45, %v8651_v63  ;;  %v2242_v45 = vrot.slane %v2192_v16, %v7720_v11 }
 0xa52   : > { %2215 = vrot.lane.b32.xlu0 %v2209_v32, %s7502_s20  ;;  %v2427_v60 = vrot.slane %v8816_v46, %v7712_v8  ;;  %v2453_v51 = vpop.permute.xlu1 %2452  ;;  %v2462_v14 = vrot.slane %v8816_v46, %v7720_v11  ;;  %v2496_v29 = vrot.slane %v8816_v46, %v11967_v18  ;;  %v2245_v38 = vmul.f32 %v2242_v45, %v8736_v5 }
 0xa53   : > { %v12046_v5 = vmov 24   ;;  %v2415_v45 = vmul.f32 %v8806_v35, %v8648_v42 }
 0xa54   : > { %v2433_v9 = vmul.f32 %v2427_v60, %v2418_v10  ;;  %v2468_v44 = vmul.f32 %v2462_v14, %v2453_v51  ;;  %v2268_v60 = vrot.slane %v2190_v6, %v11967_v18  ;;  %v2276_v14 = vrot.slane %v2192_v16, %v11967_v18 }
 0xa55   : > { %v2534_v59 = vrot.slane %v2415_v45, %v7844_v41 }
 0xa56   : > { %2219 = vrot.lane.b32.xlu0 %v2211_v55, %s7502_s20  ;;  %2440 = vrot.lane.b32.xlu1 %v2433_v9, %s7521_s27  ;;  %v2277_v55 = vmul.f32 %v2268_v60, %v8746_v2  ;;  %v2310_v9 = vrot.slane %v2192_v16, %v7844_v41  ;;  %v2492_v60 = vrot.slane %v8773_v12, %v11967_v18 }
 0xa57   : > { %v2487_v32 = vpop.permute.xlu1 %2486 }
 0xa58   : > { %v2502_v40 = vmul.f32 %v2496_v29, %v2487_v32  ;;  %v2313_v57 = vmul.f32 %v2310_v9, %v8759_v3 }
 0xa5a   : > { %2249 = vrot.lane.b32.xlu0 %v2243_v4, %s7502_s20  ;;  %2475 = vrot.lane.b32.xlu1 %v2468_v44, %s7521_s27  ;;  %v2279_v4 = vmul.f32 %v2276_v14, %v8746_v2  ;;  %v2302_v44 = vrot.slane %v2190_v6, %v7844_v41  ;;  %v2458_v6 = vrot.slane %v8773_v12, %v7720_v11 }
 0xa5c   : > { %v2311_v29 = vmul.f32 %v2302_v44, %v8759_v3  ;;  %v2501_v3 = vmul.f32 %v2492_v60, %v2487_v32 }
 0xa5e   : > { %2253 = vrot.lane.b32.xlu0 %v2245_v38, %s7502_s20  ;;  %2509 = vrot.lane.b32.xlu1 %v2502_v40, %s7521_s27  ;;  %v2466_v38 = vrot.slane %v2415_v45, %v7720_v11  ;;  %v2467_v40 = vmul.f32 %v2458_v6, %v2453_v51 }
 0xa60   : > { %v2469_v16 = vmul.f32 %v2466_v38, %v2453_v51 }
 0xa62   : > { %2283 = vrot.lane.b32.xlu0 %v2277_v55, %s7502_s20  ;;  %2520 = vperm.xlu1 %7317, %v12016_v53   ;;  %v2431_v53 = vrot.slane %v2415_v45, %v7712_v8  ;;  %v2500_v55 = vrot.slane %v2415_v45, %v11967_v18 }
 0xa64   : > { %v2434_v2 = vmul.f32 %v2431_v53, %v2418_v10  ;;  %v2503_v10 = vmul.f32 %v2500_v55, %v2487_v32 }
 0xa66   : > { %2287 = vrot.lane.b32.xlu0 %v2279_v4, %s7502_s20  ;;  %7318 = vset.pattern.permute.xlu1 %v12046_v5  ;;  %v2530_v5 = vrot.slane %v8816_v46, %v7844_v41  ;;  %v2563_v46 = vrot.slane %v7089_v24, %v7720_v11 }
 0xa6a   : > { %2317 = vrot.lane.b32.xlu0 %v2311_v29, %s7502_s20 }
 0xa6e   : > { %2321 = vrot.lane.b32.xlu0 %v2313_v57, %s7502_s20 }
 0xa72   : > { %2442 = vrot.lane.b32.xlu0 %v2434_v2, %s7521_s27  ;;  %v8881_v2 = vpop.permute.xlu0 %1790 }
 0xa76   : > { %2473 = vrot.lane.b32.xlu0 %v2467_v40, %s7521_s27 }
 0xa7a   : > { %2477 = vrot.lane.b32.xlu0 %v2469_v16, %s7521_s27 }
 0xa7e   : > { %2507 = vrot.lane.b32.xlu0 %v2501_v3, %s7521_s27 }
 0xa82   : > { %2511 = vrot.lane.b32.xlu0 %v2503_v10, %s7521_s27 }
 0xa88   : > { %v8865_v14 = vpop.permute.xlu1 %1897  ;;  %v8885_v6 = vpop.permute.xlu0 %1901 }
 0xa8c   : > { %v8867_v4 = vpop.permute.xlu1 %1899  ;;  %v8889_v40 = vpop.permute.xlu0 %1931 }
 0xa90   : > { %v8869_v44 = vpop.permute.xlu1 %1933  ;;  %v8893_v60 = vpop.permute.xlu0 %1935 }
 0xa94   : > { %v8871_v51 = vpop.permute.xlu1 %1967  ;;  %v8897_v55 = vpop.permute.xlu0 %1965 }
 0xa98   : > { %v8873_v29 = vpop.permute.xlu1 %2001  ;;  %v8901_v35 = vpop.permute.xlu0 %1969 }
 0xa9c   : > { %v8875_v9 = vpop.permute.xlu1 %2058  ;;  %v8905_v27 = vpop.permute.xlu0 %1999 }
 0xaa0   : > { %v8877_v57 = vpop.permute.xlu1 %2093  ;;  %v8909_v21 = vpop.permute.xlu0 %2003 }
 0xaa4   : > { %v8879_v53 = vpop.permute.xlu1 %2127  ;;  %v8913_v17 = vpop.permute.xlu0 %2056 }
 0xaa8   : > { %v8883_v32 = vpop.permute.xlu1 %2161  ;;  %v8917_v61 = vpop.permute.xlu0 %2060 }
 0xaac   : > { %v8887_v38 = vpop.permute.xlu1 %2217 }
 0xab0   : > { %v8891_v16 = vpop.permute.xlu1 %2251 }
 0xab4   : > { %v8895_v3 = vpop.permute.xlu1 %2285 }
 0xab8   : > { %v8899_v10 = vpop.permute.xlu1 %2319 }
 0xab9   : > { %12047 = vst [vmem:[#allocation37_spill] sm:$0xff] %v8899_v10 }
 0xabc   : > { %v8903_v56 = vpop.permute.xlu1 %2438 }
 0xabd   : > { %12048 = vst [vmem:[#allocation38_spill] sm:$0xff] %v8903_v56 }
 0xac8   : > { %v8907_v0 = vpop.permute.xlu1 %2440 }
 0xac9   : > { %12049 = vst [vmem:[#allocation32_spill] sm:$0xff] %v8907_v0 }
 0xacc   : > { %v8911_v7 = vpop.permute.xlu1 %2475 }
 0xacd   : > { %12050 = vst [vmem:[#allocation39_spill] sm:$0xff] %v8911_v7 }
 0xad0   : > { %v8915_v26 = vpop.permute.xlu1 %2509 }
 0xad1   : > { %12051 = vst [vmem:[#allocation40_spill] sm:$0xff] %v8915_v26  ;;  %v8930_v26 = vpop.permute.xlu0 %2091 }
 0xae1   : > { %v2521_v34 = vpop.permute.xlu1 %2520 }
 0xae2   : > { %v2535_v13 = vmul.f32 %v2526_v20, %v2521_v34  ;;  %v2536_v62 = vmul.f32 %v2530_v5, %v2521_v34  ;;  %v2537_v12 = vmul.f32 %v2534_v59, %v2521_v34  ;;  %v8935_v20 = vpop.permute.xlu0 %2095 }
 0xae4   : > { %2543 = vrot.lane.b32.xlu1 %v2536_v62, %s7521_s27  ;;  %2541 = vrot.lane.b32.xlu0 %v2535_v13, %s7521_s27  ;;  %v8940_v62 = vld [vmem:[%s11605_s4] sm:$0xff]  ;;  %v12052_v13 = vmov 25  }
 0xae6   : > { %v8945_v59 = vpop.permute.xlu0 %2125 }
 0xae8   : > { %2564 = vrot.lane.b32.xlu1 %v2559_v39, %s7522_s15  ;;  %2545 = vrot.lane.b32.xlu0 %v2537_v12, %s7521_s27 }
 0xaea   : > { %v8947_v39 = vpop.permute.xlu0 %2129 }
 0xaec   : > { %2577 = vperm.xlu1 %7318, %v8940_v62   ;;  %2566 = vrot.lane.b32.xlu0 %v2563_v46, %s7522_s15 }
 0xaee   : > { %v8949_v34 = vpop.permute.xlu0 %2159 }
 0xaf0   : > { %7319 = vset.pattern.permute.xlu1 %v12052_v13 }
 0xaf2   : > { %v8951_v24 = vpop.permute.xlu0 %2163 }
 0xaf6   : > { %v8953_v5 = vpop.permute.xlu0 %2215 }
 0xafa   : > { %v8955_v45 = vpop.permute.xlu0 %2219 }
 0xafe   : > { %v8957_v12 = vpop.permute.xlu0 %2249 }
 0xb02   : > { %v8959_v7 = vpop.permute.xlu0 %2253 }
 0xb06   : > { %v8961_v56 = vpop.permute.xlu0 %2283 }
 0xb07   : > { %12053 = vst [vmem:[#allocation43_spill] sm:$0xff] %v8961_v56 }
 0xb0a   : > { %v8963_v46 = vpop.permute.xlu0 %2287 }
 0xb0b   : > { %12054 = vst [vmem:[#allocation41_spill] sm:$0xff] %v8963_v46 }
 0xb0e   : > { %v8965_v13 = vpop.permute.xlu0 %2317 }
 0xb0f   : > { %12055 = vst [vmem:[#allocation42_spill] sm:$0xff] %v8965_v13 }
 0xb12   : > { %v8967_v0 = vpop.permute.xlu0 %2321 }
 0xb13   : > { %12056 = vst [vmem:[#allocation44_spill] sm:$0xff] %v8967_v0 }
 0xb16   : > { %v8969_v22 = vpop.permute.xlu0 %2442 }
 0xb17   : > { %12057 = vst [vmem:[#allocation49_spill] sm:$0xff] %v8969_v22 }
 0xb1a   : > { %v8971_v28 = vpop.permute.xlu0 %2473 }
 0xb1b   : > { %12058 = vst [vmem:[#allocation50_spill] sm:$0xff] %v8971_v28 }
 0xb1e   : > { %v8973_v49 = vpop.permute.xlu0 %2477 }
 0xb1f   : > { %12059 = vst [vmem:[#allocation45_spill] sm:$0xff] %v8973_v49 }
 0xb22   : > { %v8975_v23 = vpop.permute.xlu0 %2507 }
 0xb23   : > { %12060 = vst [vmem:[#allocation51_spill] sm:$0xff] %v8975_v23 }
 0xb26   : > { %v8977_v58 = vpop.permute.xlu0 %2511 }
 0xb27   : > { %12061 = vst [vmem:[#allocation52_spill] sm:$0xff] %v8977_v58 }
 0xb56   : > { %v8979_v52 = vpop.permute.xlu0 %2541  ;;  %v8983_v36 = vpop.permute.xlu1 %2543 }
 0xb57   : > { %12062 = vst [vmem:[#allocation46_spill] sm:$0xff] %v8979_v52  ;;  %12064 = vst [vmem:[#allocation54_spill] sm:$0xff] %v8983_v36 }
 0xb5a   : > { %v8981_v10 = vpop.permute.xlu0 %2545  ;;  %v8987_v0 = vpop.permute.xlu1 %2564 }
 0xb5b   : > { %12063 = vst [vmem:[#allocation53_spill] sm:$0xff] %v8981_v10  ;;  %12066 = vst [vmem:[#allocation55_spill] sm:$0xff] %v8987_v0  ;;  %v2573_v23 = vmul.f32 %v8987_v0, %v8654_v47 }
 0xb5d   : > { %v2583_v36 = vrot.slane %v2573_v23, %v7712_v8  ;;  %v2617_v37 = vrot.slane %v2573_v23, %v7720_v11 }
 0xb5e   : > { %v8985_v13 = vpop.permute.xlu0 %2566 }
 0xb5f   : > { %12065 = vst [vmem:[#allocation57_spill] sm:$0xff] %v8985_v13  ;;  %v8992_v28 = vsel %vm11810_vm13, %v8987_v0, %v8985_v13  ;;  %v2575_v10 = vmul.f32 %v8985_v13, %v8648_v42 }
 0xb60   : > { %12067 = vst [vmem:[#allocation56_spill] sm:$0xff] %v8992_v28  ;;  %v2574_v52 = vmul.f32 %v8992_v28, %v8651_v63  ;;  %v12068_v28 = vmov 26  }
 0xb61   : > { %v2591_v19 = vrot.slane %v2575_v10, %v7712_v8 }
 0xb62   : > { %v2587_v58 = vrot.slane %v2574_v52, %v7712_v8 }
 0xb6b   : > { %v2578_v49 = vpop.permute.xlu1 %2577 }
 0xb6c   : > { %v2592_v22 = vmul.f32 %v2583_v36, %v2578_v49  ;;  %v2593_v48 = vmul.f32 %v2587_v58, %v2578_v49  ;;  %v2594_v0 = vmul.f32 %v2591_v19, %v2578_v49  ;;  %v2621_v36 = vrot.slane %v2574_v52, %v7720_v11 }
 0xb6e   : > { %2598 = vrot.lane.b32.xlu0 %v2592_v22, %s7522_s15  ;;  %2600 = vrot.lane.b32.xlu1 %v2593_v48, %s7522_s15  ;;  %v2625_v22 = vrot.slane %v2575_v10, %v7720_v11  ;;  %v12070_v48 = vmov 27  }
 0xb72   : > { %2602 = vrot.lane.b32.xlu0 %v2594_v0, %s7522_s15  ;;  %2611 = vperm.xlu1 %7319, %v8940_v62   ;;  %v2651_v0 = vrot.slane %v2573_v23, %v11967_v18 }
 0xb76   : > { %7320 = vset.pattern.permute.xlu1 %v12068_v28 }
 0xbe0   : > { %v9008_v13 = vpop.permute.xlu1 %2600 }
 0xbe1   : > { %12069 = vst [vmem:[#allocation58_spill] sm:$0xff] %v9008_v13 }
 0xbf1   : > { %v2612_v58 = vpop.permute.xlu1 %2611 }
 0xbf2   : > { %v2626_v46 = vmul.f32 %v2617_v37, %v2612_v58  ;;  %v2627_v56 = vmul.f32 %v2621_v36, %v2612_v58  ;;  %v2628_v49 = vmul.f32 %v2625_v22, %v2612_v58  ;;  %v2655_v37 = vrot.slane %v2574_v52, %v11967_v18 }
 0xbf3   : > { %v12072_v58 = vmov 28  }
 0xbf4   : > { %2634 = vrot.lane.b32.xlu1 %v2627_v56, %s7522_s15  ;;  %2632 = vrot.lane.b32.xlu0 %v2626_v46, %s7522_s15  ;;  %v2659_v56 = vrot.slane %v2575_v10, %v11967_v18 }
 0xbf8   : > { %2645 = vperm.xlu1 %7320, %v8940_v62   ;;  %2636 = vrot.lane.b32.xlu0 %v2628_v49, %s7522_s15  ;;  %v2685_v49 = vrot.slane %v2573_v23, %v7844_v41 }
 0xbfc   : > { %7321 = vset.pattern.permute.xlu1 %v12070_v48 }
 0xc66   : > { %v9018_v19 = vpop.permute.xlu1 %2634 }
 0xc67   : > { %12071 = vst [vmem:[#allocation64_spill] sm:$0xff] %v9018_v19 }
 0xc77   : > { %v2646_v36 = vpop.permute.xlu1 %2645 }
 0xc78   : > { %v2660_v28 = vmul.f32 %v2651_v0, %v2646_v36  ;;  %v2661_v13 = vmul.f32 %v2655_v37, %v2646_v36  ;;  %v2662_v46 = vmul.f32 %v2659_v56, %v2646_v36  ;;  %v2689_v0 = vrot.slane %v2574_v52, %v7844_v41 }
 0xc79   : > { %v2693_v36 = vrot.slane %v2575_v10, %v7844_v41  ;;  %v12074_v52 = vmov 29  }
 0xc7a   : > { %2668 = vrot.lane.b32.xlu1 %v2661_v13, %s7522_s15  ;;  %2666 = vrot.lane.b32.xlu0 %v2660_v28, %s7522_s15  ;;  %v7090_v13 = vld [vmem:[%s11601_s0 + $0x16] ss:$8 sm:$0x3] }
 0xc7b   : > { %v2718_v56 = vrot.slane %v7090_v13, %v7712_v8  ;;  %v2722_v23 = vrot.slane %v7090_v13, %v7720_v11 }
 0xc7e   : > { %2679 = vperm.xlu1 %7321, %v8940_v62   ;;  %2670 = vrot.lane.b32.xlu0 %v2662_v46, %s7522_s15 }
 0xc82   : > { %7322 = vset.pattern.permute.xlu1 %v12072_v58 }
 0xcec   : > { %v9028_v22 = vpop.permute.xlu1 %2668 }
 0xced   : > { %12073 = vst [vmem:[#allocation65_spill] sm:$0xff] %v9028_v22 }
 0xcfd   : > { %v2680_v37 = vpop.permute.xlu1 %2679 }
 0xcfe   : > { %v2694_v48 = vmul.f32 %v2685_v49, %v2680_v37  ;;  %v2695_v28 = vmul.f32 %v2689_v0, %v2680_v37  ;;  %v2696_v46 = vmul.f32 %v2693_v36, %v2680_v37  ;;  %v9043_v49 = vpop.permute.xlu0 %2598 }
 0xcff   : > { %12075 = vst [vmem:[#allocation59_spill] sm:$0xff] %v9043_v49 }
 0xd00   : > { %2702 = vrot.lane.b32.xlu1 %v2695_v28, %s7522_s15  ;;  %2700 = vrot.lane.b32.xlu0 %v2694_v48, %s7522_s15 }
 0xd02   : > { %v9045_v10 = vpop.permute.xlu0 %2602 }
 0xd03   : > { %12076 = vst [vmem:[#allocation60_spill] sm:$0xff] %v9045_v10 }
 0xd04   : > { %2723 = vrot.lane.b32.xlu1 %v2718_v56, %s7523_s26  ;;  %2704 = vrot.lane.b32.xlu0 %v2696_v46, %s7522_s15 }
 0xd06   : > { %v9047_v0 = vpop.permute.xlu0 %2632 }
 0xd07   : > { %12077 = vst [vmem:[#allocation61_spill] sm:$0xff] %v9047_v0 }
 0xd08   : > { %2736 = vperm.xlu1 %7322, %v8940_v62   ;;  %2725 = vrot.lane.b32.xlu0 %v2722_v23, %s7523_s26  ;;  %s7530_s26 = smov 19  }
 0xd0a   : > { %v9049_v48 = vpop.permute.xlu0 %2636 }
 0xd0b   : > { %12078 = vst [vmem:[#allocation70_spill] sm:$0xff] %v9049_v48 }
 0xd0c   : > { %7323 = vset.pattern.permute.xlu1 %v12074_v52 }
 0xd0e   : > { %v9051_v37 = vpop.permute.xlu0 %2666 }
 0xd0f   : > { %12079 = vst [vmem:[#allocation71_spill] sm:$0xff] %v9051_v37 }
 0xd12   : > { %v9053_v28 = vpop.permute.xlu0 %2670 }
 0xd13   : > { %12080 = vst [vmem:[#allocation72_spill] sm:$0xff] %v9053_v28 }
 0xd72   : > { %v9055_v36 = vpop.permute.xlu0 %2700  ;;  %v9059_v56 = vpop.permute.xlu1 %2702 }
 0xd73   : > { %12081 = vst [vmem:[#allocation73_spill] sm:$0xff] %v9055_v36  ;;  %12083 = vst [vmem:[#allocation75_spill] sm:$0xff] %v9059_v56 }
 0xd76   : > { %v9057_v13 = vpop.permute.xlu0 %2704  ;;  %v9063_v23 = vpop.permute.xlu1 %2723 }
 0xd77   : > { %12082 = vst [vmem:[#allocation74_spill] sm:$0xff] %v9057_v13  ;;  %12085 = vst [vmem:[#allocation77_spill] sm:$0xff] %v9063_v23  ;;  %v2732_v58 = vmul.f32 %v9063_v23, %v8654_v47 }
 0xd79   : > { %v2742_v36 = vrot.slane %v2732_v58, %v7712_v8  ;;  %v2777_v19 = vrot.slane %v2732_v58, %v7720_v11 }
 0xd7a   : > { %v9061_v46 = vpop.permute.xlu0 %2725 }
 0xd7b   : > { %12084 = vst [vmem:[#allocation76_spill] sm:$0xff] %v9061_v46  ;;  %v9067_v52 = vsel %vm2727_vm14, %v9063_v23, %v9061_v46  ;;  %v2734_v13 = vmul.f32 %v9061_v46, %v8648_v42  ;;  %v12087_v46 = vmov 30   ;;  %vm11809_vm14 = vcmask 506880  }
 0xd7c   : > { %12086 = vst [vmem:[#allocation78_spill] sm:$0xff] %v9067_v52  ;;  %v2733_v28 = vmul.f32 %v9067_v52, %v8651_v63 }
 0xd7d   : > { %v2750_v0 = vrot.slane %v2734_v13, %v7712_v8 }
 0xd7e   : > { %v2746_v56 = vrot.slane %v2733_v28, %v7712_v8 }
 0xd87   : > { %v2737_v37 = vpop.permute.xlu1 %2736 }
 0xd88   : > { %v2751_v22 = vmul.f32 %v2742_v36, %v2737_v37  ;;  %v2752_v48 = vmul.f32 %v2746_v56, %v2737_v37  ;;  %v2753_v23 = vmul.f32 %v2750_v0, %v2737_v37  ;;  %v2781_v36 = vrot.slane %v2733_v28, %v7720_v11 }
 0xd8a   : > { %2757 = vrot.lane.b32.xlu0 %v2751_v22, %s11792_s13  ;;  %2759 = vrot.lane.b32.xlu1 %v2752_v48, %s11792_s13  ;;  %v2785_v22 = vrot.slane %v2734_v13, %v7720_v11  ;;  %v12089_v48 = vmov 31  }
 0xd8e   : > { %2761 = vrot.lane.b32.xlu0 %v2753_v23, %s11792_s13  ;;  %2771 = vperm.xlu1 %7323, %v8940_v62   ;;  %v2811_v23 = vrot.slane %v2732_v58, %v11967_v18 }
 0xd92   : > { %7324 = vset.pattern.permute.xlu1 %v12087_v46 }
 0xdfc   : > { %v9083_v52 = vpop.permute.xlu1 %2759 }
 0xdfd   : > { %12088 = vst [vmem:[#allocation79_spill] sm:$0xff] %v9083_v52 }
 0xe0d   : > { %v2772_v56 = vpop.permute.xlu1 %2771 }
 0xe0e   : > { %v2786_v10 = vmul.f32 %v2777_v19, %v2772_v56  ;;  %v2787_v49 = vmul.f32 %v2781_v36, %v2772_v56  ;;  %v2788_v0 = vmul.f32 %v2785_v22, %v2772_v56  ;;  %v2815_v19 = vrot.slane %v2733_v28, %v11967_v18 }
 0xe0f   : > { %v12091_v56 = vmov 32  }
 0xe10   : > { %2794 = vrot.lane.b32.xlu1 %v2787_v49, %s11792_s13  ;;  %2792 = vrot.lane.b32.xlu0 %v2786_v10, %s11792_s13  ;;  %v2819_v49 = vrot.slane %v2734_v13, %v11967_v18 }
 0xe14   : > { %2805 = vperm.xlu1 %7324, %v8940_v62   ;;  %2796 = vrot.lane.b32.xlu0 %v2788_v0, %s11792_s13  ;;  %v2845_v0 = vrot.slane %v2732_v58, %v7844_v41 }
 0xe18   : > { %7325 = vset.pattern.permute.xlu1 %v12089_v48 }
 0xe82   : > { %v9093_v37 = vpop.permute.xlu1 %2794 }
 0xe83   : > { %12090 = vst [vmem:[#allocation80_spill] sm:$0xff] %v9093_v37 }
 0xe93   : > { %v2806_v36 = vpop.permute.xlu1 %2805 }
 0xe94   : > { %v2820_v46 = vmul.f32 %v2811_v23, %v2806_v36  ;;  %v2821_v52 = vmul.f32 %v2815_v19, %v2806_v36  ;;  %v2822_v10 = vmul.f32 %v2819_v49, %v2806_v36  ;;  %v2849_v23 = vrot.slane %v2733_v28, %v7844_v41 }
 0xe95   : > { %v2853_v36 = vrot.slane %v2734_v13, %v7844_v41  ;;  %v12093_v28 = vmov 33  }
 0xe96   : > { %2828 = vrot.lane.b32.xlu1 %v2821_v52, %s11792_s13  ;;  %2826 = vrot.lane.b32.xlu0 %v2820_v46, %s11792_s13  ;;  %v7091_v52 = vld [vmem:[%s11601_s0 + $0x17] ss:$8 sm:$0x3] }
 0xe97   : > { %v2878_v49 = vrot.slane %v7091_v52, %v7712_v8  ;;  %v2882_v58 = vrot.slane %v7091_v52, %v7720_v11 }
 0xe9a   : > { %2839 = vperm.xlu1 %7325, %v8940_v62   ;;  %2830 = vrot.lane.b32.xlu0 %v2822_v10, %s11792_s13 }
 0xe9e   : > { %7326 = vset.pattern.permute.xlu1 %v12091_v56 }
 0xf08   : > { %v9103_v22 = vpop.permute.xlu1 %2828 }
 0xf09   : > { %12092 = vst [vmem:[#allocation81_spill] sm:$0xff] %v9103_v22 }
 0xf19   : > { %v2840_v19 = vpop.permute.xlu1 %2839 }
 0xf1a   : > { %v2854_v48 = vmul.f32 %v2845_v0, %v2840_v19  ;;  %v2855_v46 = vmul.f32 %v2849_v23, %v2840_v19  ;;  %v2856_v10 = vmul.f32 %v2853_v36, %v2840_v19  ;;  %v9118_v0 = vpop.permute.xlu0 %2757 }
 0xf1c   : > { %2862 = vrot.lane.b32.xlu1 %v2855_v46, %s11792_s13  ;;  %2860 = vrot.lane.b32.xlu0 %v2854_v48, %s11792_s13 }
 0xf1e   : > { %v9120_v13 = vpop.permute.xlu0 %2761 }
 0xf1f   : > { %12094 = vst [vmem:[#allocation82_spill] sm:$0xff] %v9120_v13 }
 0xf20   : > { %2883 = vrot.lane.b32.xlu1 %v2878_v49, %s7525_s23  ;;  %2864 = vrot.lane.b32.xlu0 %v2856_v10, %s11792_s13  ;;  %s7585_s13 = smov 52  }
 0xf22   : > { %v9122_v23 = vpop.permute.xlu0 %2792 }
 0xf23   : > { %12095 = vst [vmem:[#allocation83_spill] sm:$0xff] %v9122_v23 }
 0xf24   : > { %2896 = vperm.xlu1 %7326, %v8940_v62   ;;  %2885 = vrot.lane.b32.xlu0 %v2882_v58, %s7525_s23  ;;  %s7569_s23 = smov 79  }
 0xf26   : > { %v9124_v48 = vpop.permute.xlu0 %2796 }
 0xf27   : > { %12096 = vst [vmem:[#allocation84_spill] sm:$0xff] %v9124_v48 }
 0xf28   : > { %7327 = vset.pattern.permute.xlu1 %v12093_v28 }
 0xf2a   : > { %v9126_v19 = vpop.permute.xlu0 %2826 }
 0xf2b   : > { %12097 = vst [vmem:[#allocation85_spill] sm:$0xff] %v9126_v19 }
 0xf2e   : > { %v9128_v46 = vpop.permute.xlu0 %2830 }
 0xf2f   : > { %12098 = vst [vmem:[#allocation86_spill] sm:$0xff] %v9128_v46 }
 0xf8e   : > { %v9130_v36 = vpop.permute.xlu0 %2860  ;;  %v9134_v49 = vpop.permute.xlu1 %2862 }
 0xf8f   : > { %12099 = vst [vmem:[#allocation87_spill] sm:$0xff] %v9130_v36  ;;  %12101 = vst [vmem:[#allocation89_spill] sm:$0xff] %v9134_v49 }
 0xf92   : > { %v9132_v52 = vpop.permute.xlu0 %2864  ;;  %v9138_v58 = vpop.permute.xlu1 %2883 }
 0xf93   : > { %12100 = vst [vmem:[#allocation88_spill] sm:$0xff] %v9132_v52  ;;  %12103 = vst [vmem:[#allocation91_spill] sm:$0xff] %v9138_v58  ;;  %v2892_v56 = vmul.f32 %v9138_v58, %v8654_v47 }
 0xf95   : > { %v2902_v36 = vrot.slane %v2892_v56, %v7712_v8 }
 0xf96   : > { %v9136_v10 = vpop.permute.xlu0 %2885 }
 0xf97   : > { %12102 = vst [vmem:[#allocation90_spill] sm:$0xff] %v9136_v10  ;;  %v9142_v28 = vsel %vm2887_vm15, %v9138_v58, %v9136_v10  ;;  %v2894_v52 = vmul.f32 %v9136_v10, %v8648_v42  ;;  %v12105_v42 = vmov 34   ;;  %vm11883_vm15 = vcmask 490496  }
 0xf98   : > { %12104 = vst [vmem:[#allocation92_spill] sm:$0xff] %v9142_v28  ;;  %v2893_v46 = vmul.f32 %v9142_v28, %v8651_v63  ;;  %v2937_v28 = vrot.slane %v2892_v56, %v7720_v11 }
 0xf99   : > { %v2910_v23 = vrot.slane %v2894_v52, %v7712_v8 }
 0xf9a   : > { %v2906_v49 = vrot.slane %v2893_v46, %v7712_v8 }
 0xfa3   : > { %v2897_v19 = vpop.permute.xlu1 %2896 }
 0xfa4   : > { %v2911_v22 = vmul.f32 %v2902_v36, %v2897_v19  ;;  %v2912_v48 = vmul.f32 %v2906_v49, %v2897_v19  ;;  %v2913_v58 = vmul.f32 %v2910_v23, %v2897_v19  ;;  %v2941_v36 = vrot.slane %v2893_v46, %v7720_v11 }
 0xfa6   : > { %2917 = vrot.lane.b32.xlu0 %v2911_v22, %s7526_s25  ;;  %2919 = vrot.lane.b32.xlu1 %v2912_v48, %s7526_s25  ;;  %v2945_v22 = vrot.slane %v2894_v52, %v7720_v11  ;;  %v12107_v48 = vmov 35  }
 0xfaa   : > { %2921 = vrot.lane.b32.xlu0 %v2913_v58, %s7526_s25  ;;  %2931 = vperm.xlu1 %7327, %v8940_v62   ;;  %v2971_v58 = vrot.slane %v2892_v56, %v11967_v18 }
 0xfae   : > { %7328 = vset.pattern.permute.xlu1 %v12105_v42 }
0x1018   : > { %v9158_v10 = vpop.permute.xlu1 %2919 }
0x1019   : > { %12106 = vst [vmem:[#allocation93_spill] sm:$0xff] %v9158_v10 }
0x1029   : > { %v2932_v49 = vpop.permute.xlu1 %2931 }
0x102a   : > { %v2946_v37 = vmul.f32 %v2937_v28, %v2932_v49  ;;  %v2947_v13 = vmul.f32 %v2941_v36, %v2932_v49  ;;  %v2948_v23 = vmul.f32 %v2945_v22, %v2932_v49  ;;  %v2975_v28 = vrot.slane %v2893_v46, %v11967_v18 }
0x102b   : > { %v3005_v22 = vrot.slane %v2892_v56, %v7844_v41  ;;  %v9192_v56 = vld [vmem:[%s11607_s6] sm:$0xff] }
0x102c   : > { %2954 = vrot.lane.b32.xlu1 %v2947_v13, %s7526_s25  ;;  %2952 = vrot.lane.b32.xlu0 %v2946_v37, %s7526_s25  ;;  %v2979_v13 = vrot.slane %v2894_v52, %v11967_v18  ;;  %12108 = vst [vmem:[#allocation94_spill] sm:$0xff] %v9192_v56 }
0x1030   : > { %2965 = vperm.xlu1 %7328, %v8940_v62   ;;  %2956 = vrot.lane.b32.xlu0 %v2948_v23, %s7526_s25  ;;  %v3009_v23 = vrot.slane %v2893_v46, %v7844_v41  ;;  %v12109_v46 = vmov 1  }
0x1034   : > { %7329 = vset.pattern.permute.xlu1 %v12107_v48 }
0x109e   : > { %v9168_v19 = vpop.permute.xlu1 %2954 }
0x10af   : > { %v2966_v36 = vpop.permute.xlu1 %2965 }
0x10b0   : > { %v2980_v42 = vmul.f32 %v2971_v58, %v2966_v36  ;;  %v2981_v10 = vmul.f32 %v2975_v28, %v2966_v36  ;;  %v2982_v37 = vmul.f32 %v2979_v13, %v2966_v36  ;;  %v12111_v13 = vmov 2  }
0x10b2   : > { %2988 = vrot.lane.b32.xlu1 %v2981_v10, %s7526_s25  ;;  %2986 = vrot.lane.b32.xlu0 %v2980_v42, %s7526_s25  ;;  %v3013_v10 = vrot.slane %v2894_v52, %v7844_v41  ;;  %v3032_v42 = vld [vmem:[%s11606_s5] sm:$0xff] }
0x10b3   : > { %v7092_v52 = vld [vmem:[%s11601_s0 + $0x20] ss:$8 sm:$0x3] }
0x10b6   : > { %2999 = vperm.xlu1 %7329, %v8940_v62   ;;  %2990 = vrot.lane.b32.xlu0 %v2982_v37, %s7526_s25  ;;  %v3144_v37 = vrot.slane %v7092_v52, %v7712_v8 }
0x10ba   : > { %7330 = vset.pattern.permute.xlu1 %v12020_v25 }
0x1124   : > { %v9178_v49 = vpop.permute.xlu1 %2988 }
0x1135   : > { %v3000_v58 = vpop.permute.xlu1 %2999 }
0x1136   : > { %v3014_v28 = vmul.f32 %v3005_v22, %v3000_v58  ;;  %v3015_v48 = vmul.f32 %v3009_v23, %v3000_v58  ;;  %v3016_v36 = vmul.f32 %v3013_v10, %v3000_v58  ;;  %v3148_v22 = vrot.slane %v7092_v52, %v7720_v11 }
0x1137   : > { %v12112_v23 = vmov 5   ;;  %v12113_v58 = vmov 4   ;;  %v12116_v10 = vmov 8  }
0x1138   : > { %3022 = vrot.lane.b32.xlu1 %v3015_v48, %s7526_s25  ;;  %3020 = vrot.lane.b32.xlu0 %v3014_v28, %s7526_s25  ;;  %v12110_v48 = vmov 3   ;;  %v12115_v28 = vmov 7  }
0x113c   : > { %3024 = vrot.lane.b32.xlu0 %v3016_v36, %s7526_s25  ;;  %3035 = vperm.xlu1 %7330, %v3032_v42   ;;  %v12117_v42 = vmov 9   ;;  %v7093_v36 = vld [vmem:[%s11601_s0 + $0x21] ss:$8 sm:$0x3] }
0x113d   : > { %v3445_v52 = vrot.slane %v7093_v36, %v7720_v11 }
0x1140   : > { %3075 = vperm.xlu0 %7314, %v9192_v56   ;;  %7332 = vset.pattern.permute.xlu1 %v12109_v46 }
0x1141   : > { %3091 = vperm.xlu1 %7332, %v9192_v56  }
0x1144   : > { %7331 = vset.pattern.permute.xlu0 %v12110_v48 }
0x1145   : > { %1838 = vperm.xlu0 %7331, %v8940_v62   ;;  %7333 = vset.pattern.permute.xlu1 %v12111_v13  ;;  %v12114_v62 = vmov 6  }
0x1146   : > { %3107 = vperm.xlu1 %7333, %v9192_v56  }
0x1149   : > { %3123 = vperm.xlu0 %7331, %v9192_v56  }
0x114a   : > { %3149 = vrot.lane.b32.xlu1 %v3144_v37, %s7472_s14  ;;  %v12118_v37 = vmov 10  }
0x114b   : > { %7335 = vset.pattern.permute.xlu1 %v12112_v23 }
0x114d   : > { %7334 = vset.pattern.permute.xlu0 %v12113_v58 }
0x114e   : > { %3151 = vrot.lane.b32.xlu1 %v3148_v22, %s7472_s14  ;;  %3161 = vperm.xlu0 %7334, %v9192_v56   ;;  %v3441_v22 = vrot.slane %v7093_v36, %v7712_v8  ;;  %v12119_v36 = vmov 17   ;;  %s12234_s14 = smov 18  }
0x1152   : > { %3195 = vperm.xlu1 %7335, %v9192_v56   ;;  %3448 = vrot.lane.b32.xlu0 %v3445_v52, %s7527_s16  ;;  %v9241_v52 = vpop.permute.xlu0 %2917 }
0x1156   : > { %7336 = vset.pattern.permute.xlu1 %v12114_v62 }
0x1157   : > { %3229 = vperm.xlu1 %7336, %v9192_v56  }
0x115b   : > { %7337 = vset.pattern.permute.xlu1 %v12115_v28 }
0x115c   : > { %3263 = vperm.xlu1 %7337, %v9192_v56  }
0x1160   : > { %7338 = vset.pattern.permute.xlu1 %v12116_v10 }
0x1161   : > { %3300 = vperm.xlu1 %7338, %v9192_v56  }
0x1165   : > { %7339 = vset.pattern.permute.xlu1 %v12117_v42 }
0x1166   : > { %3334 = vperm.xlu1 %7339, %v9192_v56  }
0x116a   : > { %7340 = vset.pattern.permute.xlu1 %v12118_v37  ;;  %v7084_v37 = vld [vmem:[%s11601_s0 + $0x10] ss:$8 sm:$0x3] }
0x116b   : > { %3368 = vperm.xlu1 %7340, %v9192_v56  }
0x116f   : > { %7341 = vset.pattern.permute.xlu1 %v12017_v15 }
0x1170   : > { %3402 = vperm.xlu1 %7341, %v9192_v56  }
0x1174   : > { %3446 = vrot.lane.b32.xlu1 %v3441_v22, %s7527_s16  ;;  %v9243_v22 = vpop.permute.xlu0 %2921  ;;  %s12247_s16 = smov 110  }
0x1175   : > { %7342 = vset.pattern.permute.xlu1 %v12019_v43 }
0x1178   : > { %3459 = vperm.xlu1 %7342, %v9192_v56  }
0x117c   : > { %7343 = vset.pattern.permute.xlu1 %v12021_v33  ;;  %v9245_v33 = vpop.permute.xlu0 %2952 }
0x117d   : > { %3494 = vperm.xlu1 %7343, %v9192_v56  }
0x1180   : > { %v9247_v15 = vpop.permute.xlu0 %2956 }
0x1181   : > { %7344 = vset.pattern.permute.xlu1 %v12022_v1 }
0x1182   : > { %3528 = vperm.xlu1 %7344, %v9192_v56  }
0x1184   : > { %v9249_v1 = vpop.permute.xlu0 %2986 }
0x1186   : > { %7345 = vset.pattern.permute.xlu1 %v12023_v50 }
0x1187   : > { %3562 = vperm.xlu1 %7345, %v9192_v56  }
0x1188   : > { %v9254_v10 = vpop.permute.xlu0 %2990 }
0x118b   : > { %7346 = vset.pattern.permute.xlu1 %v12024_v30  ;;  %v9257_v30 = vrot.slane %v7084_v37, %v7712_v8 }
0x118c   : > { %3599 = vperm.xlu1 %7346, %v9192_v56  }
0x118d   : > { %12120 = vst [vmem:[#allocation95_spill] sm:$0xff] %v9257_v30  ;;  %v1786_v62 = vmul.f32 %v9257_v30, %v8654_v47 }
0x118f   : > { %v1796_v23 = vrot.slane %v1786_v62, %v7712_v8  ;;  %v1812_v28 = vrot.slane %v1786_v62, %v7720_v11 }
0x1190   : > { %7347 = vset.pattern.permute.xlu1 %v12119_v36  ;;  %v9260_v36 = vrot.slane %v7084_v37, %v7720_v11 }
0x1191   : > { %v1801_v37 = vmul.f32 %v1796_v23, %v8881_v2  ;;  %v1817_v46 = vmul.f32 %v1812_v28, %v8621_v31  ;;  %v1844_v23 = vrot.slane %v1786_v62, %v7844_v41 }
0x1192   : > { %12121 = vst [vmem:[#allocation96_spill] sm:$0xff] %v9260_v36  ;;  %v1787_v43 = vmul.f32 %v9260_v36, %v8651_v63  ;;  %v1828_v63 = vrot.slane %v1786_v62, %v11967_v18 }
0x1193   : > { %v1819_v30 = vadd.f32 %v1817_v46, %v1801_v37  ;;  %v1903_v46 = vsel %vm719_vm9, %v8865_v14, %v8867_v4  ;;  %v1971_v14 = vsel %vm719_vm9, %v8897_v55, %v8871_v51  ;;  %v2063_v55 = vsel %vm2062_vm2, %v8913_v17, %v8875_v9 }
0x1194   : > { %v1800_v42 = vrot.slane %v1787_v43, %v7712_v8  ;;  %v1816_v58 = vrot.slane %v1787_v43, %v7720_v11  ;;  %v1832_v36 = vrot.slane %v1787_v43, %v11967_v18  ;;  %v1833_v56 = vmul.f32 %v1828_v63, %v8625_v54 }
0x1195   : > { %v2131_v17 = vsel %vm2062_vm2, %v8945_v59, %v8879_v53  ;;  %v2221_v59 = vsel %vm1303_vm12, %v8953_v5, %v8887_v38 }
0x1196   : > { %v1802_v48 = vmul.f32 %v1800_v42, %v8881_v2  ;;  %v1818_v47 = vmul.f32 %v1816_v58, %v8621_v31  ;;  %v1834_v11 = vmul.f32 %v1832_v36, %v8625_v54  ;;  %v1848_v2 = vrot.slane %v1787_v43, %v7844_v41 }
0x1197   : > { %v1835_v28 = vadd.f32 %v1833_v56, %v1819_v30  ;;  %v1937_v43 = vsel %vm719_vm9, %v8889_v40, %v8869_v44 }
0x1198   : > { %v1820_v8 = vadd.f32 %v1818_v47, %v1802_v48  ;;  %v1904_v48 = vsel %vm719_vm9, %v8867_v4, %v8885_v6  ;;  %v1972_v4 = vsel %vm719_vm9, %v8871_v51, %v8901_v35  ;;  %v2005_v6 = vsel %vm719_vm9, %v8905_v27, %v8873_v29 }
0x1199   : > { %v2064_v35 = vsel %vm2062_vm2, %v8875_v9, %v8917_v61  ;;  %v2097_v27 = vsel %vm2062_vm2, %v8930_v26, %v8877_v57  ;;  %v2132_v61 = vsel %vm2062_vm2, %v8879_v53, %v8947_v39  ;;  %v2165_v26 = vsel %vm2062_vm2, %v8949_v34, %v8883_v32 }
0x119a   : > { %v2222_v53 = vsel %vm1303_vm12, %v8887_v38, %v8955_v45  ;;  %v2255_v34 = vsel %vm1303_vm12, %v8957_v12, %v8891_v16  ;;  %v12127_v45 = vld [vmem:[#allocation66_spill] sm:$0xff] }
0x11aa   : > { %v9262_v50 = vpop.permute.xlu0 %3020 }
0x11ab   : > { %12122 = vst [vmem:[#allocation97_spill] sm:$0xff] %v9262_v50 }
0x11ae   : > { %v9272_v13 = vpop.permute.xlu0 %3024 }
0x11af   : > { %12123 = vst [vmem:[#allocation98_spill] sm:$0xff] %v9272_v13  ;;  %v1836_v13 = vadd.f32 %v1834_v11, %v1820_v8  ;;  %v1938_v8 = vsel %vm719_vm9, %v8869_v44, %v8893_v60  ;;  %v2006_v44 = vsel %vm719_vm9, %v8873_v29, %v8909_v21  ;;  %v2098_v21 = vsel %vm2062_vm2, %v8877_v57, %v8935_v20 }
0x11b0   : > { %v2166_v57 = vsel %vm2062_vm2, %v8883_v32, %v8951_v24  ;;  %v2256_v32 = vsel %vm1303_vm12, %v8891_v16, %v8959_v7 }
0x11bf   : > { %v9278_v25 = vpop.permute.xlu0 %3075 }
0x11c0   : > { %12124 = vst [vmem:[#allocation99_spill] sm:$0xff] %v9278_v25 }
0x11c4   : > { %v1839_v42 = vpop.permute.xlu0 %1838 }
0x11c5   : > { %v1849_v31 = vmul.f32 %v1844_v23, %v1839_v42  ;;  %v1850_v58 = vmul.f32 %v1848_v2, %v1839_v42  ;;  %v12125_v23 = vld [vmem:[#allocation43_spill] sm:$0xff]  ;;  %v12126_v2 = vld [vmem:[#allocation41_spill] sm:$0xff] }
0x11c6   : > { %v2289_v5 = vsel %vm1303_vm12, %v12125_v23, %v8895_v3  ;;  %v2290_v38 = vsel %vm1303_vm12, %v8895_v3, %v12126_v2  ;;  %v12128_v42 = vld [vmem:[#allocation15_spill] sm:$0xff]  ;;  %v12144_v2 = vld [vmem:[#allocation50_spill] sm:$0xff] }
0x11c7   : > { %v1851_v25 = vadd.f32 %v1849_v31, %v1835_v28  ;;  %v1852_v50 = vadd.f32 %v1850_v58, %v1836_v13  ;;  %v2340_v28 = vrot.slane %v12128_v42, %v12127_v45  ;;  %v12129_v31 = vld [vmem:[#allocation14_spill] sm:$0xff] }
0x11c8   : > { %v2336_v12 = vrot.slane %v12129_v31, %v12127_v45 }
0x11c9   : > { %v1907_v54 = vadd.f32 %v1903_v46, %v1851_v25  ;;  %v1908_v36 = vadd.f32 %v1904_v48, %v1852_v50  ;;  %v12130_v48 = vld [vmem:[#allocation67_spill] sm:$0xff] }
0x11ca   : > { %v2352_v7 = vrot.slane %v12129_v31, %v12130_v48  ;;  %v2356_v16 = vrot.slane %v12128_v42, %v12130_v48 }
0x11cb   : > { %v1941_v11 = vadd.f32 %v1937_v43, %v1907_v54  ;;  %v1942_v56 = vadd.f32 %v1938_v8, %v1908_v36  ;;  %v12131_v54 = vld [vmem:[#allocation37_spill] sm:$0xff]  ;;  %v12132_v36 = vld [vmem:[#allocation42_spill] sm:$0xff]  ;;  %v12133_v8 = vld [vmem:[#allocation44_spill] sm:$0xff] }
0x11cc   : > { %v2323_v43 = vsel %vm1303_vm12, %v12132_v36, %v12131_v54  ;;  %v2324_v3 = vsel %vm1303_vm12, %v12131_v54, %v12133_v8  ;;  %v12148_v36 = vld [vmem:[#allocation52_spill] sm:$0xff] }
0x11cd   : > { %v1975_v25 = vadd.f32 %v1971_v14, %v1941_v11  ;;  %v1976_v50 = vadd.f32 %v1972_v4, %v1942_v56  ;;  %v12134_v11 = vld [vmem:[#allocation28_spill] sm:$0xff] }
0x11ce   : > { %v2341_v56 = vmul.f32 %v2336_v12, %v12134_v11  ;;  %v2342_v14 = vmul.f32 %v2340_v28, %v12134_v11  ;;  %v12145_v28 = vld [vmem:[#allocation45_spill] sm:$0xff]  ;;  %v12149_v11 = vld [vmem:[#allocation54_spill] sm:$0xff] }
0x11cf   : > { %v2009_v40 = vadd.f32 %v2005_v6, %v1975_v25  ;;  %v2010_v60 = vadd.f32 %v2006_v44, %v1976_v50  ;;  %v12135_v50 = vld [vmem:[#allocation68_spill] sm:$0xff] }
0x11d0   : > { %v2372_v6 = vrot.slane %v12128_v42, %v12135_v50  ;;  %v2368_v44 = vrot.slane %v12129_v31, %v12135_v50 }
0x11d1   : > { %v2067_v51 = vadd.f32 %v2063_v55, %v2009_v40  ;;  %v2068_v13 = vadd.f32 %v2064_v35, %v2010_v60  ;;  %v12136_v40 = vld [vmem:[#allocation29_spill] sm:$0xff] }
0x11d2   : > { %v2357_v60 = vmul.f32 %v2352_v7, %v12136_v40  ;;  %v2358_v55 = vmul.f32 %v2356_v16, %v12136_v40  ;;  %v12146_v7 = vld [vmem:[#allocation40_spill] sm:$0xff]  ;;  %v12147_v16 = vld [vmem:[#allocation51_spill] sm:$0xff]  ;;  %v12152_v40 = vld [vmem:[#allocation58_spill] sm:$0xff] }
0x11d3   : > { %v2101_v29 = vadd.f32 %v2097_v27, %v2067_v51  ;;  %v2102_v62 = vadd.f32 %v2098_v21, %v2068_v13  ;;  %v12137_v13 = vld [vmem:[#allocation69_spill] sm:$0xff]  ;;  %v2513_v54 = vsel %vm2444_vm5, %v12147_v16, %v12146_v7  ;;  %v12166_v16 = vld [vmem:[#allocation80_spill] sm:$0xff] }
0x11d4   : > { %v2388_v27 = vrot.slane %v12128_v42, %v12137_v13  ;;  %v2384_v21 = vrot.slane %v12129_v31, %v12137_v13 }
0x11d5   : > { %v2135_v9 = vadd.f32 %v2131_v17, %v2101_v29  ;;  %v2136_v30 = vadd.f32 %v2132_v61, %v2102_v62  ;;  %v12138_v29 = vld [vmem:[#allocation30_spill] sm:$0xff] }
0x11d6   : > { %v2373_v62 = vmul.f32 %v2368_v44, %v12138_v29  ;;  %v2374_v17 = vmul.f32 %v2372_v6, %v12138_v29  ;;  %v12155_v29 = vld [vmem:[#allocation64_spill] sm:$0xff] }
0x11d7   : > { %v2169_v20 = vadd.f32 %v2165_v26, %v2135_v9  ;;  %v2170_v37 = vadd.f32 %v2166_v57, %v2136_v30  ;;  %v12139_v30 = vld [vmem:[#allocation35_spill] sm:$0xff] }
0x11d8   : > { %v2389_v26 = vmul.f32 %v2384_v21, %v12139_v30  ;;  %v2390_v57 = vmul.f32 %v2388_v27, %v12139_v30 }
0x11d9   : > { %v2225_v39 = vadd.f32 %v2221_v59, %v2169_v20  ;;  %v2226_v47 = vadd.f32 %v2222_v53, %v2170_v37 }
0x11db   : > { %v2259_v24 = vadd.f32 %v2255_v34, %v2225_v39  ;;  %v2260_v63 = vadd.f32 %v2256_v32, %v2226_v47  ;;  %v12140_v39 = vld [vmem:[#allocation32_spill] sm:$0xff]  ;;  %v12141_v47 = vld [vmem:[#allocation38_spill] sm:$0xff]  ;;  %v12142_v32 = vld [vmem:[#allocation49_spill] sm:$0xff] }
0x11dc   : > { %v2445_v34 = vsel %vm2444_vm5, %v12141_v47, %v12140_v39 }
0x11dd   : > { %v2293_v58 = vadd.f32 %v2289_v5, %v2259_v24  ;;  %v2294_v46 = vadd.f32 %v2290_v38, %v2260_v63  ;;  %v2446_v24 = vsel %vm2444_vm5, %v12140_v39, %v12142_v32  ;;  %v12143_v5 = vld [vmem:[#allocation39_spill] sm:$0xff]  ;;  %v12162_v32 = vld [vmem:[#allocation73_spill] sm:$0xff] }
0x11de   : > { %v2479_v38 = vsel %vm2444_vm5, %v12144_v2, %v12143_v5  ;;  %v2480_v12 = vsel %vm2444_vm5, %v12143_v5, %v12145_v28 }
0x11df   : > { %v2327_v4 = vadd.f32 %v2323_v43, %v2293_v58  ;;  %v2328_v25 = vadd.f32 %v2324_v3, %v2294_v46  ;;  %v2514_v43 = vsel %vm2444_vm5, %v12146_v7, %v12148_v36 }
0x11e1   : > { %v2343_v35 = vadd.f32 %v2341_v56, %v2327_v4  ;;  %v2344_v51 = vadd.f32 %v2342_v14, %v2328_v25  ;;  %v12150_v56 = vld [vmem:[#allocation46_spill] sm:$0xff]  ;;  %v12151_v4 = vld [vmem:[#allocation53_spill] sm:$0xff] }
0x11e2   : > { %v2547_v14 = vsel %vm2444_vm5, %v12150_v56, %v12149_v11  ;;  %v2548_v25 = vsel %vm2444_vm5, %v12149_v11, %v12151_v4  ;;  %v12169_v56 = vld [vmem:[#allocation81_spill] sm:$0xff]  ;;  %v12171_v4 = vld [vmem:[#allocation86_spill] sm:$0xff] }
0x11e3   : > { %v2359_v61 = vadd.f32 %v2357_v60, %v2343_v35  ;;  %v2360_v9 = vadd.f32 %v2358_v55, %v2344_v51  ;;  %v12153_v60 = vld [vmem:[#allocation59_spill] sm:$0xff]  ;;  %v12154_v35 = vld [vmem:[#allocation60_spill] sm:$0xff] }
0x11e4   : > { %v2604_v55 = vsel %vm11810_vm13, %v12153_v60, %v12152_v40  ;;  %v2605_v51 = vsel %vm11810_vm13, %v12152_v40, %v12154_v35  ;;  %v12172_v40 = vld [vmem:[#allocation89_spill] sm:$0xff]  ;;  %v12173_v60 = vld [vmem:[#allocation87_spill] sm:$0xff]  ;;  %v12174_v35 = vld [vmem:[#allocation88_spill] sm:$0xff] }
0x11e5   : > { %v2375_v20 = vadd.f32 %v2373_v62, %v2359_v61  ;;  %v2376_v37 = vadd.f32 %v2374_v17, %v2360_v9  ;;  %v12156_v62 = vld [vmem:[#allocation61_spill] sm:$0xff]  ;;  %v12157_v61 = vld [vmem:[#allocation70_spill] sm:$0xff] }
0x11e6   : > { %v2638_v17 = vsel %vm11810_vm13, %v12156_v62, %v12155_v29  ;;  %v2639_v9 = vsel %vm11810_vm13, %v12155_v29, %v12157_v61  ;;  %v12175_v29 = vld [vmem:[#allocation93_spill] sm:$0xff] }
0x11e7   : > { %v2391_v59 = vadd.f32 %v2389_v26, %v2375_v20  ;;  %v2392_v53 = vadd.f32 %v2390_v57, %v2376_v37  ;;  %v12158_v57 = vld [vmem:[#allocation65_spill] sm:$0xff]  ;;  %v12159_v20 = vld [vmem:[#allocation71_spill] sm:$0xff]  ;;  %v2924_v62 = vsel %vm11883_vm15, %v9241_v52, %v12175_v29  ;;  %v2992_v52 = vsel %vm11883_vm15, %v9249_v1, %v9178_v49 }
0x11e8   : > { %v2672_v37 = vsel %vm11810_vm13, %v12159_v20, %v12158_v57 }
0x11e9   : > { %v2449_v63 = vadd.f32 %v2445_v34, %v2391_v59  ;;  %v2450_v23 = vadd.f32 %v2446_v24, %v2392_v53  ;;  %v12160_v59 = vld [vmem:[#allocation72_spill] sm:$0xff]  ;;  %v12161_v34 = vld [vmem:[#allocation75_spill] sm:$0xff] }
0x11ea   : > { %v2673_v53 = vsel %vm11810_vm13, %v12158_v57, %v12160_v59  ;;  %v2706_v24 = vsel %vm11810_vm13, %v12162_v32, %v12161_v34  ;;  %v3023_v57 = vpop.permute.xlu1 %3022 }
0x11eb   : > { %v2483_v58 = vadd.f32 %v2479_v38, %v2449_v63  ;;  %v2484_v46 = vadd.f32 %v2480_v12, %v2450_v23  ;;  %v12163_v63 = vld [vmem:[#allocation74_spill] sm:$0xff]  ;;  %v12164_v38 = vld [vmem:[#allocation79_spill] sm:$0xff] }
0x11ec   : > { %v2707_v23 = vsel %vm11810_vm13, %v12161_v34, %v12163_v63  ;;  %v2764_v28 = vsel %vm11809_vm14, %v9118_v0, %v12164_v38  ;;  %v12165_v12 = vld [vmem:[#allocation82_spill] sm:$0xff]  ;;  %v3047_v63 = vmul.f32 2.0, %v12128_v42 }
0x11ed   : > { %v2517_v8 = vadd.f32 %v2513_v54, %v2483_v58  ;;  %v2518_v3 = vadd.f32 %v2514_v43, %v2484_v46  ;;  %v2765_v58 = vsel %vm11809_vm14, %v12164_v38, %v12165_v12  ;;  %v12167_v54 = vld [vmem:[#allocation83_spill] sm:$0xff]  ;;  %v12168_v43 = vld [vmem:[#allocation84_spill] sm:$0xff] }
0x11ee   : > { %v2798_v36 = vsel %vm11809_vm14, %v12167_v54, %v12166_v16  ;;  %v7094_v42 = vld [vmem:[%s11601_s0 + $0x22] ss:$8 sm:$0x3]  ;;  %v12185_v54 = vmov 19  }
0x11ef   : > { %v2551_v6 = vadd.f32 %v2547_v14, %v2517_v8  ;;  %v2552_v44 = vadd.f32 %v2548_v25, %v2518_v3  ;;  %v2799_v8 = vsel %vm11809_vm14, %v12166_v16, %v12168_v43  ;;  %v12170_v14 = vld [vmem:[#allocation85_spill] sm:$0xff]  ;;  %v2833_v25 = vsel %vm11809_vm14, %v12169_v56, %v12171_v4 }
0x11f0   : > { %v2832_v0 = vsel %vm11809_vm14, %v12170_v14, %v12169_v56  ;;  %v12184_v16 = vmov 18   ;;  %v12188_v56 = vmov 21  }
0x11f1   : > { %v2608_v27 = vadd.f32 %v2604_v55, %v2551_v6  ;;  %v2609_v21 = vadd.f32 %v2605_v51, %v2552_v44  ;;  %v2866_v55 = vsel %vm11809_vm14, %v12173_v60, %v12172_v40  ;;  %v2867_v51 = vsel %vm11809_vm14, %v12172_v40, %v12174_v35 }
0x11f2   : > { %v12192_v40 = vmov 24  }
0x11f3   : > { %v2642_v30 = vadd.f32 %v2638_v17, %v2608_v27  ;;  %v2643_v26 = vadd.f32 %v2639_v9, %v2609_v21  ;;  %v2925_v17 = vsel %vm11883_vm15, %v12175_v29, %v9243_v22  ;;  %v2993_v22 = vsel %vm11883_vm15, %v9178_v49, %v9254_v10 }
0x11f5   : > { %v2676_v39 = vadd.f32 %v2672_v37, %v2642_v30  ;;  %v2677_v47 = vadd.f32 %v2673_v53, %v2643_v26  ;;  %v2958_v30 = vsel %vm11883_vm15, %v9245_v33, %v9168_v19  ;;  %v2959_v26 = vsel %vm11883_vm15, %v9168_v19, %v9247_v15  ;;  %v3036_v15 = vpop.permute.xlu1 %3035 }
0x11f7   : > { %v2710_v5 = vadd.f32 %v2706_v24, %v2676_v39  ;;  %v2711_v2 = vadd.f32 %v2707_v23, %v2677_v47  ;;  %v12176_v39 = vld [vmem:[#allocation97_spill] sm:$0xff]  ;;  %v12177_v47 = vld [vmem:[#allocation98_spill] sm:$0xff]  ;;  %v3046_v24 = vmul.f32 2.0, %v12129_v31 }
0x11f8   : > { %v3026_v33 = vsel %vm11883_vm15, %v12176_v39, %v3023_v57  ;;  %v3027_v34 = vsel %vm11883_vm15, %v3023_v57, %v12177_v47  ;;  %vm11885_vm15 = vcmask 629760  }
0x11f9   : > { %v2768_v46 = vadd.f32 %v2764_v28, %v2710_v5  ;;  %v2769_v7 = vadd.f32 %v2765_v58, %v2711_v2  ;;  %v12182_v58 = vld [vmem:[#allocation3_spill] sm:$0xff] }
0x11fb   : > { %v2802_v3 = vadd.f32 %v2798_v36, %v2768_v46  ;;  %v2803_v11 = vadd.f32 %v2799_v8, %v2769_v7  ;;  %v3744_v46 = vrot.slane %v7094_v42, %v12182_v58  ;;  %v12183_v7 = vld [vmem:[#allocation94_spill] sm:$0xff]  ;;  %v9503_v8 = vpop.permute.xlu1 %3091 }
0x11fc   : > { %v12186_v36 = vld [vmem:[#allocation2_spill] sm:$0xff] }
0x11fd   : > { %v2836_v6 = vadd.f32 %v2832_v0, %v2802_v3  ;;  %v2837_v44 = vadd.f32 %v2833_v25, %v2803_v11  ;;  %v3740_v43 = vrot.slane %v7094_v42, %v12186_v36  ;;  %v12187_v3 = vmov 20  }
0x11fe   : > { %v12189_v0 = vmov 22   ;;  %v12190_v25 = vmov 23  }
0x11ff   : > { %v2870_v27 = vadd.f32 %v2866_v55, %v2836_v6  ;;  %v2871_v21 = vadd.f32 %v2867_v51, %v2837_v44  ;;  %v9508_v11 = vpop.permute.xlu1 %3107  ;;  %v12191_v44 = vld [vmem:[#allocation62_spill] sm:$0xff] }
0x1201   : > { %v2928_v61 = vadd.f32 %v2924_v62, %v2870_v27  ;;  %v2929_v9 = vadd.f32 %v2925_v17, %v2871_v21 }
0x1203   : > { %v2962_v20 = vadd.f32 %v2958_v30, %v2928_v61  ;;  %v2963_v37 = vadd.f32 %v2959_v26, %v2929_v9  ;;  %v3150_v14 = vpop.permute.xlu1 %3149  ;;  %v9537_v9 = vpop.permute.xlu0 %3123 }
0x1205   : > { %v2996_v59 = vadd.f32 %v2992_v52, %v2962_v20  ;;  %v2997_v53 = vadd.f32 %v2993_v22, %v2963_v37 }
0x1207   : > { %v3030_v19 = vadd.f32 %v3026_v33, %v2996_v59  ;;  %v3031_v32 = vadd.f32 %v3027_v34, %v2997_v53  ;;  %v3152_v4 = vpop.permute.xlu1 %3151  ;;  %v3162_v26 = vpop.permute.xlu0 %3161 }
0x1208   : > { %v3153_v39 = vsel %vm523_vm1, %v3150_v14, %v3152_v4  ;;  %vm3450_vm1 = vcmask 23552  }
0x1209   : > { %v9478_v1 = vadd.f32 %v3036_v15, %v3030_v19  ;;  %v9480_v23 = vadd.f32 %v3036_v15, %v3031_v32 }
0x120b   : > { %12178 = vst [vmem:[#allocation43_spill] sm:$0xff] %v9478_v1  ;;  %12179 = vst [vmem:[#allocation41_spill] sm:$0xff] %v9480_v23  ;;  %v3048_v49 = vadd.f32 %v3046_v24, %v9478_v1  ;;  %v3049_v10 = vadd.f32 %v3047_v63, %v9480_v23  ;;  %v3196_v6 = vpop.permute.xlu1 %3195  ;;  %v9543_v20 = vpop.permute.xlu0 %3448 }
0x120d   : > { %vm3050_vm14 = vcmp.ge.f32.partialorder %v3048_v49, 0.0  ;;  %vm3051_vm13 = vcmp.ge.f32.partialorder %v3049_v10, 0.0  ;;  %v3052_v5 = vmul.f32 0.05, %v3048_v49  ;;  %v3053_v2 = vmul.f32 0.05, %v3049_v10 }
0x120f   : > { %v9484_v38 = vsel %vm3050_vm14, %v3048_v49, %v3052_v5  ;;  %v9486_v28 = vsel %vm3051_vm13, %v3049_v10, %v3053_v2  ;;  %v3230_v60 = vpop.permute.xlu1 %3229  ;;  %vm5447_vm13 = vcmask 408576   ;;  %vm5596_vm14 = vcmask 416768  }
0x1210   : > { %12180 = vst [vmem:[#allocation15_spill] sm:$0xff] %v9484_v38  ;;  %12181 = vst [vmem:[#allocation14_spill] sm:$0xff] %v9486_v28  ;;  %v3060_v31 = vrot.slane %v9486_v28, 4  ;;  %v3059_v12 = vrot.slane %v9484_v38, 4 }
0x1212   : > { %3063 = vrot.lane.b32.xlu1 %v3060_v31, %s7512_s17  ;;  %3061 = vrot.lane.b32.xlu0 %v3059_v12, %s7512_s17  ;;  %s7528_s17 = smov 125  }
0x1213   : > { %v9519_v55 = vpop.permute.xlu1 %3263 }
0x1216   : > { %3633 = vperm.xlu1 %7347, %v12183_v7   ;;  %3747 = vrot.lane.b32.xlu0 %v3744_v46, %s7477_s24 }
0x1217   : > { %v9521_v35 = vpop.permute.xlu1 %3300 }
0x121a   : > { %7348 = vset.pattern.permute.xlu1 %v12184_v16 }
0x121b   : > { %3667 = vperm.xlu1 %7348, %v12183_v7   ;;  %v9523_v51 = vpop.permute.xlu1 %3334 }
0x121f   : > { %7349 = vset.pattern.permute.xlu1 %v12185_v54  ;;  %v9525_v27 = vpop.permute.xlu1 %3368 }
0x1220   : > { %3701 = vperm.xlu1 %7349, %v12183_v7  }
0x1223   : > { %v9527_v21 = vpop.permute.xlu1 %3402 }
0x1224   : > { %3745 = vrot.lane.b32.xlu1 %v3740_v43, %s7477_s24  ;;  %s12196_s24 = smov 127  }
0x1225   : > { %7350 = vset.pattern.permute.xlu1 %v12187_v3 }
0x1227   : > { %v9529_v29 = vpop.permute.xlu1 %3446 }
0x1228   : > { %3757 = vperm.xlu1 %7350, %v12183_v7  }
0x122b   : > { %v9531_v62 = vpop.permute.xlu1 %3459 }
0x122c   : > { %7351 = vset.pattern.permute.xlu1 %v12188_v56 }
0x122d   : > { %3791 = vperm.xlu1 %7351, %v12183_v7  }
0x122f   : > { %v9533_v17 = vpop.permute.xlu1 %3494 }
0x1231   : > { %7352 = vset.pattern.permute.xlu1 %v12189_v0 }
0x1232   : > { %3825 = vperm.xlu1 %7352, %v12183_v7  }
0x1233   : > { %v9535_v61 = vpop.permute.xlu1 %3528 }
0x1236   : > { %7353 = vset.pattern.permute.xlu1 %v12190_v25 }
0x1237   : > { %3859 = vperm.xlu1 %7353, %v12183_v7   ;;  %v9539_v30 = vpop.permute.xlu1 %3562 }
0x123b   : > { %3892 = vrot.lane.b32.xlu1 %v12191_v44, %s7470_s29  ;;  %v9541_v57 = vpop.permute.xlu1 %3599 }
0x123c   : > { %7354 = vset.pattern.permute.xlu1 %v12192_v40 }
0x1284   : > { %v3064_v37 = vpop.permute.xlu1 %3063  ;;  %v3062_v52 = vpop.permute.xlu0 %3061 }
0x1285   : > { %v9546_v22 = vsel %vm1587_vm7, %v3064_v37, 0.0  ;;  %v9549_v59 = vsel %vm1587_vm7, %v3062_v52, %v3064_v37  ;;  %v9552_v53 = vsel %vm1587_vm7, 0.0, %v3062_v52  ;;  %vm5298_vm7 = vcmask 400384  }
0x1286   : > { %12193 = vst [vmem:[#allocation37_spill] sm:$0xff] %v9546_v22  ;;  %12194 = vst [vmem:[#allocation42_spill] sm:$0xff] %v9549_v59  ;;  %v3159_v33 = vmul.f32 %v3152_v4, %v9546_v22  ;;  %v3157_v47 = vmul.f32 %v3150_v14, %v9552_v53  ;;  %v3158_v34 = vmul.f32 %v3153_v39, %v9549_v59  ;;  %v12197_v14 = vld [vmem:[#allocation23_spill] sm:$0xff]  ;;  %v12198_v39 = vld [vmem:[#allocation17_spill] sm:$0xff] }
0x1287   : > { %12195 = vst [vmem:[#allocation44_spill] sm:$0xff] %v9552_v53  ;;  %v3297_v0 = vmul.f32 %v9549_v59, %v12197_v14 }
0x1288   : > { %v3175_v15 = vrot.slane %v3159_v33, %v12186_v36  ;;  %v3167_v19 = vrot.slane %v3157_v47, %v12186_v36  ;;  %v3201_v63 = vrot.slane %v3157_v47, %v12182_v58  ;;  %v3171_v49 = vrot.slane %v3158_v34, %v12186_v36 }
0x1289   : > { %v3209_v2 = vrot.slane %v3159_v33, %v12182_v58  ;;  %v3205_v42 = vrot.slane %v3158_v34, %v12182_v58  ;;  %v3235_v31 = vrot.slane %v3157_v47, %v11967_v18  ;;  %v3239_v16 = vrot.slane %v3158_v34, %v11967_v18 }
0x128a   : > { %v3178_v32 = vmul.f32 %v3175_v15, %v3162_v26  ;;  %v3176_v24 = vmul.f32 %v3167_v19, %v3162_v26  ;;  %v3210_v10 = vmul.f32 %v3201_v63, %v3196_v6  ;;  %v3177_v5 = vmul.f32 %v3171_v49, %v3162_v26 }
0x128b   : > { %v3212_v12 = vmul.f32 %v3209_v2, %v3196_v6  ;;  %v3211_v46 = vmul.f32 %v3205_v42, %v3196_v6  ;;  %v3244_v54 = vmul.f32 %v3235_v31, %v3230_v60  ;;  %v3245_v43 = vmul.f32 %v3239_v16, %v3230_v60 }
0x128c   : > { %3186 = vrot.lane.b32.xlu0 %v3178_v32, %s12196_s24  ;;  %3182 = vrot.lane.b32.xlu1 %v3176_v24, %s12196_s24  ;;  %v3243_v3 = vrot.slane %v3159_v33, %v11967_v18  ;;  %v3273_v56 = vrot.slane %v3158_v34, %v7844_v41  ;;  %v3269_v4 = vrot.slane %v3157_v47, %v7844_v41  ;;  %v12199_v32 = vld [vmem:[#allocation16_spill] sm:$0xff] }
0x128d   : > { %v3310_v44 = vrot.slane %v3297_v0, %v12186_v36  ;;  %v3277_v37 = vrot.slane %v3159_v33, %v7844_v41  ;;  %v3344_v52 = vrot.slane %v3297_v0, %v12182_v58  ;;  %v3296_v47 = vmul.f32 %v9552_v53, %v12198_v39 }
0x128e   : > { %v3246_v25 = vmul.f32 %v3243_v3, %v3230_v60  ;;  %v3279_v6 = vmul.f32 %v3273_v56, %v9519_v55  ;;  %v3278_v40 = vmul.f32 %v3269_v4, %v9519_v55  ;;  %v3378_v60 = vrot.slane %v3297_v0, %v11967_v18 }
0x128f   : > { %v3316_v26 = vmul.f32 %v3310_v44, %v9521_v35  ;;  %v3280_v34 = vmul.f32 %v3277_v37, %v9519_v55  ;;  %v3350_v15 = vmul.f32 %v3344_v52, %v9523_v51  ;;  %v3306_v19 = vrot.slane %v3296_v47, %v12186_v36 }
0x1290   : > { %3216 = vrot.lane.b32.xlu0 %v3210_v10, %s12196_s24  ;;  %3184 = vrot.lane.b32.xlu1 %v3177_v5, %s12196_s24  ;;  %v3298_v33 = vmul.f32 %v9546_v22, %v12199_v32  ;;  %v3451_v24 = vsel %vm3450_vm1, %v9529_v29, %v9543_v20  ;;  %v3412_v63 = vrot.slane %v3297_v0, %v7844_v41  ;;  %vm5756_vm1 = vcmask 424960  }
0x1291   : > { %v3315_v49 = vmul.f32 %v3306_v19, %v9521_v35  ;;  %v3384_v55 = vmul.f32 %v3378_v60, %v9525_v27  ;;  %v3456_v5 = vmul.f32 %v3451_v24, %v9549_v59  ;;  %v3340_v31 = vrot.slane %v3296_v47, %v12182_v58 }
0x1292   : > { %v3314_v10 = vrot.slane %v3298_v33, %v12186_v36  ;;  %v3418_v42 = vmul.f32 %v3412_v63, %v9527_v21  ;;  %v3374_v14 = vrot.slane %v3296_v47, %v11967_v18  ;;  %v3408_v60 = vrot.slane %v3296_v47, %v7844_v41  ;;  %v9656_v47 = vpop.permute.xlu0 %3747 }
0x1293   : > { %v3349_v16 = vmul.f32 %v3340_v31, %v9523_v51  ;;  %v3538_v0 = vrot.slane %v3456_v5, %v11967_v18  ;;  %v3416_v32 = vrot.slane %v3298_v33, %v7844_v41  ;;  %v3455_v24 = vmul.f32 %v9529_v29, %v9552_v53 }
0x1294   : > { %3220 = vrot.lane.b32.xlu0 %v3212_v12, %s12196_s24  ;;  %3218 = vrot.lane.b32.xlu1 %v3211_v46, %s12196_s24  ;;  %v3317_v2 = vmul.f32 %v3314_v10, %v9521_v35  ;;  %v3469_v12 = vrot.slane %v3456_v5, %v12186_v36  ;;  %v3504_v35 = vrot.slane %v3456_v5, %v12182_v58 }
0x1295   : > { %v9614_v46 = vpop.permute.xlu1 %3633  ;;  %v3383_v44 = vmul.f32 %v3374_v14, %v9525_v27  ;;  %v3465_v10 = vrot.slane %v3455_v24, %v12186_v36 }
0x1296   : > { %v3510_v56 = vmul.f32 %v3504_v35, %v9533_v17  ;;  %v3500_v35 = vrot.slane %v3455_v24, %v12182_v58 }
0x1297   : > { %v3474_v31 = vmul.f32 %v3465_v10, %v9531_v62  ;;  %v12203_v10 = vld [vmem:[#allocation18_spill] sm:$0xff] }
0x1298   : > { %3250 = vrot.lane.b32.xlu0 %v3244_v54, %s12196_s24  ;;  %3252 = vrot.lane.b32.xlu1 %v3245_v43, %s12196_s24  ;;  %v3475_v54 = vmul.f32 %v3469_v12, %v9531_v62  ;;  %v3348_v43 = vrot.slane %v3298_v33, %v12182_v58  ;;  %v3509_v14 = vmul.f32 %v3500_v35, %v9533_v17 }
0x129a   : > { %v3351_v3 = vmul.f32 %v3348_v43, %v9523_v51  ;;  %v9626_v4 = vpop.permute.xlu1 %3667  ;;  %v3382_v51 = vrot.slane %v3298_v33, %v11967_v18  ;;  %v3457_v33 = vmul.f32 %v9543_v20, %v9546_v22 }
0x129c   : > { %3254 = vrot.lane.b32.xlu0 %v3246_v25, %s12196_s24  ;;  %3286 = vrot.lane.b32.xlu1 %v3279_v6, %s12196_s24  ;;  %v12200_v25 = vld [vmem:[#allocation24_spill] sm:$0xff]  ;;  %v3385_v52 = vmul.f32 %v3382_v51, %v9525_v27  ;;  %v3473_v20 = vrot.slane %v3457_v33, %v12186_v36 }
0x129d   : > { %v3596_v6 = vmul.f32 %v9549_v59, %v12200_v25 }
0x129e   : > { %v3476_v43 = vmul.f32 %v3473_v20, %v9531_v62 }
0x129f   : > { %v9638_v37 = vpop.permute.xlu1 %3701  ;;  %v3643_v63 = vrot.slane %v3596_v6, %v12182_v58  ;;  %v3711_v12 = vrot.slane %v3596_v6, %v7844_v41 }
0x12a0   : > { %3284 = vrot.lane.b32.xlu0 %v3278_v40, %s12196_s24  ;;  %3323 = vrot.lane.b32.xlu1 %v3316_v26, %s7494_s30  ;;  %v3544_v40 = vmul.f32 %v3538_v0, %v9535_v61  ;;  %v3572_v26 = vrot.slane %v3456_v5, %v7844_v41  ;;  %v3677_v5 = vrot.slane %v3596_v6, %v11967_v18 }
0x12a1   : > { %v3508_v0 = vrot.slane %v3457_v33, %v12182_v58 }
0x12a2   : > { %v3578_v39 = vmul.f32 %v3572_v26, %v9539_v30 }
0x12a3   : > { %v9651_v27 = vpop.permute.xlu1 %3745 }
0x12a4   : > { %3288 = vrot.lane.b32.xlu0 %v3280_v34, %s12196_s24  ;;  %3357 = vrot.lane.b32.xlu1 %v3350_v15, %s7494_s30  ;;  %v3609_v34 = vrot.slane %v3596_v6, %v12186_v36  ;;  %v3417_v15 = vmul.f32 %v3408_v60, %v9527_v21  ;;  %v3749_v29 = vsel %vm843_vm3, %v9651_v27, %v9656_v47  ;;  %s7533_s24 = smov 20   ;;  %vm4351_vm3 = vcmask 162816  }
0x12a6   : > { %v3615_v19 = vmul.f32 %v3609_v34, %v9541_v57 }
0x12a8   : > { %3321 = vrot.lane.b32.xlu0 %v3315_v49, %s7494_s30  ;;  %3391 = vrot.lane.b32.xlu1 %v3384_v55, %s7494_s30  ;;  %v3649_v49 = vmul.f32 %v3643_v63, %v9614_v46  ;;  %v3419_v55 = vmul.f32 %v3416_v32, %v9527_v21  ;;  %v3754_v21 = vmul.f32 %v3749_v29, %v9549_v59  ;;  %v12202_v32 = vld [vmem:[#allocation22_spill] sm:$0xff] }
0x12a9   : > { %v3595_v63 = vmul.f32 %v9552_v53, %v12202_v32 }
0x12aa   : > { %v3801_v25 = vrot.slane %v3754_v21, %v12182_v58  ;;  %v3835_v51 = vrot.slane %v3754_v21, %v11967_v18  ;;  %v3869_v34 = vrot.slane %v3754_v21, %v7844_v41 }
0x12ab   : > { %v3605_v29 = vrot.slane %v3595_v63, %v12186_v36  ;;  %v3707_v35 = vrot.slane %v3595_v63, %v7844_v41 }
0x12ac   : > { %3325 = vrot.lane.b32.xlu0 %v3317_v2, %s7494_s30  ;;  %3425 = vrot.lane.b32.xlu1 %v3418_v42, %s7494_s30  ;;  %v9669_v2 = vpop.permute.xlu1 %3757  ;;  %v3683_v42 = vmul.f32 %v3677_v5, %v9626_v4  ;;  %v12204_v5 = vmov 25  }
0x12b0   : > { %3355 = vrot.lane.b32.xlu0 %v3349_v16, %s7494_s30  ;;  %3482 = vrot.lane.b32.xlu1 %v3475_v54, %s7528_s17  ;;  %v3717_v16 = vmul.f32 %v3711_v12, %v9638_v37  ;;  %v3767_v54 = vrot.slane %v3754_v21, %v12186_v36  ;;  %v3673_v12 = vrot.slane %v3595_v63, %v11967_v18 }
0x12b4   : > { %3359 = vrot.lane.b32.xlu0 %v3351_v3, %s7494_s30  ;;  %3517 = vrot.lane.b32.xlu1 %v3510_v56, %s7528_s17  ;;  %v9682_v3 = vpop.permute.xlu1 %3791  ;;  %v3773_v56 = vmul.f32 %v3767_v54, %v9669_v2 }
0x12b5   : > { %v3807_v6 = vmul.f32 %v3801_v25, %v9682_v3 }
0x12b8   : > { %3389 = vrot.lane.b32.xlu0 %v3383_v44, %s7494_s30  ;;  %3551 = vrot.lane.b32.xlu1 %v3544_v40, %s7528_s17  ;;  %v9692_v62 = vpop.permute.xlu1 %3825  ;;  %v3511_v44 = vmul.f32 %v3508_v0, %v9533_v17  ;;  %v3534_v40 = vrot.slane %v3455_v24, %v11967_v18 }
0x12b9   : > { %v3841_v26 = vmul.f32 %v3835_v51, %v9692_v62  ;;  %v3755_v51 = vmul.f32 %v9656_v47, %v9546_v22 }
0x12bc   : > { %3393 = vrot.lane.b32.xlu0 %v3385_v52, %s7494_s30  ;;  %3585 = vrot.lane.b32.xlu1 %v3578_v39, %s7528_s17  ;;  %v3543_v52 = vmul.f32 %v3534_v40, %v9535_v61  ;;  %v3542_v39 = vrot.slane %v3457_v33, %v11967_v18  ;;  %v9703_v60 = vpop.permute.xlu1 %3859 }
0x12bd   : > { %v3875_v17 = vmul.f32 %v3869_v34, %v9703_v60 }
0x12c0   : > { %3423 = vrot.lane.b32.xlu0 %v3417_v15, %s7494_s30  ;;  %3622 = vrot.lane.b32.xlu1 %v3615_v19, %s7520_s18  ;;  %v3545_v15 = vmul.f32 %v3542_v39, %v9535_v61  ;;  %v3568_v19 = vrot.slane %v3455_v24, %v7844_v41  ;;  %v3597_v61 = vmul.f32 %v9546_v22, %v12203_v10 }
0x12c1   : > { %v3771_v39 = vrot.slane %v3755_v51, %v12186_v36 }
0x12c2   : > { %v3613_v21 = vrot.slane %v3597_v61, %v12186_v36  ;;  %v3715_v25 = vrot.slane %v3597_v61, %v7844_v41 }
0x12c4   : > { %3427 = vrot.lane.b32.xlu0 %v3419_v55, %s7494_s30  ;;  %3656 = vrot.lane.b32.xlu1 %v3649_v49, %s7520_s18  ;;  %s12201_s30 = smov 112   ;;  %v3577_v49 = vmul.f32 %v3568_v19, %v9539_v30  ;;  %v3576_v55 = vrot.slane %v3457_v33, %v7844_v41  ;;  %v3616_v33 = vmul.f32 %v3613_v21, %v9541_v57 }
0x12c6   : > { %v3579_v24 = vmul.f32 %v3576_v55, %v9539_v30 }
0x12c8   : > { %3480 = vrot.lane.b32.xlu0 %v3474_v31, %s7528_s17  ;;  %3690 = vrot.lane.b32.xlu1 %v3683_v42, %s7520_s18  ;;  %v3614_v42 = vmul.f32 %v3605_v29, %v9541_v57  ;;  %v3647_v31 = vrot.slane %v3597_v61, %v12182_v58  ;;  %v3681_v57 = vrot.slane %v3597_v61, %v11967_v18 }
0x12ca   : > { %v3650_v20 = vmul.f32 %v3647_v31, %v9614_v46  ;;  %v3684_v54 = vmul.f32 %v3681_v57, %v9626_v4 }
0x12cc   : > { %3484 = vrot.lane.b32.xlu0 %v3476_v43, %s7528_s17  ;;  %3724 = vrot.lane.b32.xlu1 %v3717_v16, %s7520_s18  ;;  %v3682_v16 = vmul.f32 %v3673_v12, %v9626_v4  ;;  %v9741_v43 = vpop.permute.xlu1 %3892  ;;  %v3718_v4 = vmul.f32 %v3715_v25, %v9638_v37 }
0x12d0   : > { %3515 = vrot.lane.b32.xlu0 %v3509_v14, %s7528_s17  ;;  %3780 = vrot.lane.b32.xlu1 %v3773_v56, %s12201_s30  ;;  %v3753_v56 = vmul.f32 %v9651_v27, %v9552_v53 }
0x12d2   : > { %v3797_v47 = vrot.slane %v3753_v56, %v12182_v58  ;;  %v3831_v10 = vrot.slane %v3753_v56, %v11967_v18 }
0x12d4   : > { %3519 = vrot.lane.b32.xlu0 %v3511_v44, %s7528_s17  ;;  %3814 = vrot.lane.b32.xlu1 %v3807_v6, %s12201_s30  ;;  %v3763_v6 = vrot.slane %v3753_v56, %v12186_v36  ;;  %v3840_v61 = vmul.f32 %v3831_v10, %v9692_v62 }
0x12d6   : > { %v3772_v27 = vmul.f32 %v3763_v6, %v9669_v2 }
0x12d8   : > { %3549 = vrot.lane.b32.xlu0 %v3543_v52, %s7528_s17  ;;  %3848 = vrot.lane.b32.xlu1 %v3841_v26, %s12201_s30 }
0x12dc   : > { %3553 = vrot.lane.b32.xlu0 %v3545_v15, %s7528_s17  ;;  %3882 = vrot.lane.b32.xlu1 %v3875_v17, %s12201_s30  ;;  %v3806_v15 = vmul.f32 %v3797_v47, %v9682_v3 }
0x12e0   : > { %3583 = vrot.lane.b32.xlu0 %v3577_v49, %s7528_s17  ;;  %3904 = vperm.xlu1 %7354, %v12183_v7   ;;  %v3639_v7 = vrot.slane %v3595_v63, %v12182_v58  ;;  %v3805_v63 = vrot.slane %v3755_v51, %v12182_v58 }
0x12e2   : > { %v3648_v30 = vmul.f32 %v3639_v7, %v9614_v46  ;;  %v3716_v46 = vmul.f32 %v3707_v35, %v9638_v37  ;;  %v3774_v37 = vmul.f32 %v3771_v39, %v9669_v2  ;;  %v3808_v2 = vmul.f32 %v3805_v63, %v9682_v3  ;;  %v12211_v35 = vld [vmem:[#allocation63_spill] sm:$0xff] }
0x12e4   : > { %3587 = vrot.lane.b32.xlu0 %v3579_v24, %s7528_s17  ;;  %7355 = vset.pattern.permute.xlu1 %v12204_v5  ;;  %v3839_v5 = vrot.slane %v3755_v51, %v11967_v18  ;;  %s7535_s17 = smov 108  }
0x12e6   : > { %v3842_v3 = vmul.f32 %v3839_v5, %v9692_v62 }
0x12e8   : > { %3620 = vrot.lane.b32.xlu0 %v3614_v42, %s7520_s18 }
0x12ec   : > { %3624 = vrot.lane.b32.xlu0 %v3616_v33, %s7520_s18  ;;  %v3865_v33 = vrot.slane %v3753_v56, %v7844_v41 }
0x12ee   : > { %v3874_v7 = vmul.f32 %v3865_v33, %v9703_v60 }
0x12f0   : > { %3654 = vrot.lane.b32.xlu0 %v3648_v30, %s7520_s18 }
0x12f4   : > { %3658 = vrot.lane.b32.xlu0 %v3650_v20, %s7520_s18  ;;  %v3873_v20 = vrot.slane %v3755_v51, %v7844_v41 }
0x12f6   : > { %v3876_v62 = vmul.f32 %v3873_v20, %v9703_v60 }
0x12f8   : > { %3688 = vrot.lane.b32.xlu0 %v3682_v16, %s7520_s18 }
0x12fc   : > { %3692 = vrot.lane.b32.xlu0 %v3684_v54, %s7520_s18 }
0x12fe   : > { %v9748_v14 = vpop.permute.xlu1 %3182  ;;  %v9750_v0 = vpop.permute.xlu0 %3186 }
0x12ff   : > { %12205 = vst [vmem:[#allocation28_spill] sm:$0xff] %v9750_v0 }
0x1300   : > { %3722 = vrot.lane.b32.xlu0 %v3716_v46, %s7520_s18 }
0x1302   : > { %v9756_v44 = vpop.permute.xlu1 %3184  ;;  %v9758_v40 = vpop.permute.xlu0 %3216 }
0x1304   : > { %3726 = vrot.lane.b32.xlu0 %v3718_v4, %s7520_s18  ;;  %s7553_s18 = smov 93  }
0x1306   : > { %v9764_v26 = vpop.permute.xlu1 %3218  ;;  %v9766_v52 = vpop.permute.xlu0 %3220 }
0x1307   : > { %12206 = vst [vmem:[#allocation29_spill] sm:$0xff] %v9766_v52 }
0x1308   : > { %3778 = vrot.lane.b32.xlu0 %v3772_v27, %s12201_s30 }
0x130a   : > { %v9771_v34 = vpop.permute.xlu1 %3252  ;;  %v9773_v17 = vpop.permute.xlu0 %3250 }
0x130c   : > { %3782 = vrot.lane.b32.xlu0 %v3774_v37, %s12201_s30 }
0x130e   : > { %v9778_v19 = vpop.permute.xlu1 %3286  ;;  %v9780_v32 = vpop.permute.xlu0 %3254 }
0x130f   : > { %12207 = vst [vmem:[#allocation30_spill] sm:$0xff] %v9780_v32 }
0x1310   : > { %3812 = vrot.lane.b32.xlu0 %v3806_v15, %s12201_s30 }
0x1312   : > { %v9785_v49 = vpop.permute.xlu1 %3323  ;;  %v9787_v55 = vpop.permute.xlu0 %3284 }
0x1314   : > { %3816 = vrot.lane.b32.xlu0 %v3808_v2, %s12201_s30 }
0x1316   : > { %v9792_v24 = vpop.permute.xlu1 %3357  ;;  %v9794_v29 = vpop.permute.xlu0 %3288 }
0x1317   : > { %12208 = vst [vmem:[#allocation35_spill] sm:$0xff] %v9794_v29 }
0x1318   : > { %3846 = vrot.lane.b32.xlu0 %v3840_v61, %s12201_s30 }
0x131a   : > { %v9799_v42 = vpop.permute.xlu1 %3391  ;;  %v9801_v21 = vpop.permute.xlu0 %3321 }
0x131c   : > { %3850 = vrot.lane.b32.xlu0 %v3842_v3, %s12201_s30 }
0x131e   : > { %v9806_v30 = vpop.permute.xlu1 %3425  ;;  %v9808_v31 = vpop.permute.xlu0 %3325 }
0x131f   : > { %12209 = vst [vmem:[#allocation32_spill] sm:$0xff] %v9808_v31 }
0x1320   : > { %3880 = vrot.lane.b32.xlu0 %v3874_v7, %s12201_s30 }
0x1322   : > { %v9813_v12 = vpop.permute.xlu1 %3482  ;;  %v9815_v16 = vpop.permute.xlu0 %3355 }
0x1324   : > { %3884 = vrot.lane.b32.xlu0 %v3876_v62, %s12201_s30  ;;  %v9868_v62 = vmul.f32 %v9741_v43, %v9552_v53  ;;  %s12290_s30 = smov 33  }
0x1326   : > { %v9818_v57 = vpop.permute.xlu1 %3517  ;;  %v9820_v54 = vpop.permute.xlu0 %3359  ;;  %v3910_v28 = vrot.slane %v9868_v62, %v12186_v36 }
0x1327   : > { %12210 = vst [vmem:[#allocation38_spill] sm:$0xff] %v9820_v54 }
0x1328   : > { %3894 = vrot.lane.b32.xlu0 %v12211_v35, %s7470_s29  ;;  %s7529_s29 = smov 111  }
0x132a   : > { %v9824_v46 = vpop.permute.xlu1 %3551  ;;  %v9826_v56 = vpop.permute.xlu0 %3389 }
0x132e   : > { %v9828_v25 = vpop.permute.xlu1 %3585  ;;  %v9830_v60 = vpop.permute.xlu0 %3393 }
0x132f   : > { %12212 = vst [vmem:[#allocation49_spill] sm:$0xff] %v9830_v60 }
0x1332   : > { %v9832_v4 = vpop.permute.xlu1 %3622  ;;  %v9834_v6 = vpop.permute.xlu0 %3423 }
0x1336   : > { %v9836_v51 = vpop.permute.xlu0 %3427  ;;  %v9838_v27 = vpop.permute.xlu1 %3656 }
0x1337   : > { %12213 = vst [vmem:[#allocation39_spill] sm:$0xff] %v9836_v51 }
0x133a   : > { %v9840_v39 = vpop.permute.xlu0 %3480  ;;  %v9842_v37 = vpop.permute.xlu1 %3690 }
0x133e   : > { %v9844_v47 = vpop.permute.xlu0 %3484  ;;  %v9848_v63 = vpop.permute.xlu1 %3724 }
0x133f   : > { %12214 = vst [vmem:[#allocation50_spill] sm:$0xff] %v9844_v47 }
0x1342   : > { %v9846_v15 = vpop.permute.xlu0 %3515  ;;  %v9852_v10 = vpop.permute.xlu1 %3780 }
0x1346   : > { %v9850_v2 = vpop.permute.xlu0 %3519  ;;  %v9858_v3 = vpop.permute.xlu1 %3814 }
0x1347   : > { %12215 = vst [vmem:[#allocation45_spill] sm:$0xff] %v9850_v2 }
0x134a   : > { %v9854_v61 = vpop.permute.xlu0 %3549  ;;  %v9862_v7 = vpop.permute.xlu1 %3848 }
0x134e   : > { %v9856_v5 = vpop.permute.xlu0 %3553  ;;  %v9872_v23 = vpop.permute.xlu1 %3882 }
0x134f   : > { %12216 = vst [vmem:[#allocation40_spill] sm:$0xff] %v9856_v5  ;;  %12218 = vst [vmem:[#allocation52_spill] sm:$0xff] %v9872_v23 }
0x1352   : > { %v9860_v33 = vpop.permute.xlu0 %3583 }
0x1356   : > { %v9864_v20 = vpop.permute.xlu0 %3587 }
0x1357   : > { %12217 = vst [vmem:[#allocation51_spill] sm:$0xff] %v9864_v20 }
0x135a   : > { %v9870_v35 = vpop.permute.xlu0 %3620 }
0x135e   : > { %v9874_v1 = vpop.permute.xlu0 %3624 }
0x135f   : > { %12219 = vst [vmem:[#allocation54_spill] sm:$0xff] %v9874_v1  ;;  %v3905_v5 = vpop.permute.xlu1 %3904 }
0x1360   : > { %v3919_v2 = vmul.f32 %v3910_v28, %v3905_v5 }
0x1362   : > { %3925 = vrot.lane.b32.xlu0 %v3919_v2, %s7529_s29  ;;  %v9879_v47 = vpop.permute.xlu0 %3654 }
0x1366   : > { %v9881_v20 = vpop.permute.xlu0 %3658 }
0x1367   : > { %12220 = vst [vmem:[#allocation46_spill] sm:$0xff] %v9881_v20 }
0x136a   : > { %v9883_v51 = vpop.permute.xlu0 %3688 }
0x136e   : > { %v9885_v60 = vpop.permute.xlu0 %3692 }
0x136f   : > { %12221 = vst [vmem:[#allocation53_spill] sm:$0xff] %v9885_v60 }
0x1372   : > { %v9887_v54 = vpop.permute.xlu0 %3722 }
0x1376   : > { %v9889_v31 = vpop.permute.xlu0 %3726 }
0x1377   : > { %12222 = vst [vmem:[#allocation58_spill] sm:$0xff] %v9889_v31 }
0x137a   : > { %v9891_v1 = vpop.permute.xlu0 %3778 }
0x137e   : > { %v9893_v29 = vpop.permute.xlu0 %3782 }
0x137f   : > { %12223 = vst [vmem:[#allocation59_spill] sm:$0xff] %v9893_v29 }
0x1382   : > { %v9895_v28 = vpop.permute.xlu0 %3812 }
0x1386   : > { %v9897_v32 = vpop.permute.xlu0 %3816 }
0x1387   : > { %12224 = vst [vmem:[#allocation60_spill] sm:$0xff] %v9897_v32 }
0x138a   : > { %v9899_v2 = vpop.permute.xlu0 %3846 }
0x138e   : > { %v9901_v52 = vpop.permute.xlu0 %3850 }
0x138f   : > { %12225 = vst [vmem:[#allocation64_spill] sm:$0xff] %v9901_v52 }
0x1392   : > { %v9903_v20 = vpop.permute.xlu0 %3880 }
0x1393   : > { %12226 = vst [vmem:[#allocation61_spill] sm:$0xff] %v9903_v20 }
0x1396   : > { %v9905_v0 = vpop.permute.xlu0 %3884 }
0x1397   : > { %12227 = vst [vmem:[#allocation70_spill] sm:$0xff] %v9905_v0  ;;  %v9918_v0 = vld [vmem:[%s11607_s6] sm:$0xff] }
0x139a   : > { %v3895_v60 = vpop.permute.xlu0 %3894 }
0x139b   : > { %v3896_v31 = vsel %vm422_vm0, %v9741_v43, %v3895_v60  ;;  %v3902_v13 = vmul.f32 %v3895_v60, %v9546_v22  ;;  %v12228_v43 = vmov 26   ;;  %v3945_v60 = vrot.slane %v9868_v62, %v12182_v58 }
0x139c   : > { %v3901_v29 = vmul.f32 %v3896_v31, %v9549_v59  ;;  %vm4191_vm0 = vcmask 154624  }
0x139d   : > { %v3918_v50 = vrot.slane %v3902_v13, %v12186_v36 }
0x139e   : > { %v3914_v32 = vrot.slane %v3901_v29, %v12186_v36 }
0x139f   : > { %v3921_v48 = vmul.f32 %v3918_v50, %v3905_v5  ;;  %v3949_v50 = vrot.slane %v3901_v29, %v12182_v58 }
0x13a0   : > { %v3920_v38 = vmul.f32 %v3914_v32, %v3905_v5 }
0x13a1   : > { %3929 = vrot.lane.b32.xlu0 %v3921_v48, %s7529_s29 }
0x13a2   : > { %3927 = vrot.lane.b32.xlu1 %v3920_v38, %s7529_s29  ;;  %v3953_v38 = vrot.slane %v3902_v13, %v12182_v58 }
0x13a6   : > { %3939 = vperm.xlu1 %7355, %v9918_v0  }
0x13aa   : > { %7356 = vset.pattern.permute.xlu1 %v12228_v43  ;;  %v12230_v43 = vmov 27  }
0x1414   : > { %v9922_v31 = vpop.permute.xlu1 %3927 }
0x1415   : > { %12229 = vst [vmem:[#allocation65_spill] sm:$0xff] %v9922_v31  ;;  %v3979_v31 = vrot.slane %v9868_v62, %v11967_v18 }
0x1425   : > { %v3940_v32 = vpop.permute.xlu1 %3939 }
0x1426   : > { %v3954_v48 = vmul.f32 %v3945_v60, %v3940_v32  ;;  %v3955_v5 = vmul.f32 %v3949_v50, %v3940_v32  ;;  %v3956_v52 = vmul.f32 %v3953_v38, %v3940_v32  ;;  %v3983_v60 = vrot.slane %v3901_v29, %v11967_v18 }
0x1427   : > { %v4013_v38 = vrot.slane %v9868_v62, %v7844_v41  ;;  %v12236_v62 = vld [vmem:[#allocation5_spill] sm:$0xff] }
0x1428   : > { %3962 = vrot.lane.b32.xlu1 %v3955_v5, %s7529_s29  ;;  %3960 = vrot.lane.b32.xlu0 %v3954_v48, %s7529_s29  ;;  %v3987_v5 = vrot.slane %v3902_v13, %v11967_v18 }
0x142c   : > { %3973 = vperm.xlu1 %7356, %v9918_v0   ;;  %3964 = vrot.lane.b32.xlu0 %v3956_v52, %s7529_s29  ;;  %v12232_v52 = vmov 28  }
0x1430   : > { %7357 = vset.pattern.permute.xlu1 %v12230_v43 }
0x149a   : > { %v9933_v45 = vpop.permute.xlu1 %3962 }
0x149b   : > { %12231 = vst [vmem:[#allocation71_spill] sm:$0xff] %v9933_v45 }
0x14ab   : > { %v3974_v50 = vpop.permute.xlu1 %3973 }
0x14ac   : > { %v3988_v20 = vmul.f32 %v3979_v31, %v3974_v50  ;;  %v3989_v23 = vmul.f32 %v3983_v60, %v3974_v50  ;;  %v3990_v32 = vmul.f32 %v3987_v5, %v3974_v50  ;;  %v4017_v31 = vrot.slane %v3901_v29, %v7844_v41  ;;  %v12235_v50 = vld [vmem:[#allocation4_spill] sm:$0xff]  ;;  %v9959_v5 = vpop.permute.xlu0 %3925 }
0x14ad   : > { %v12237_v29 = vmov 29   ;;  %12238 = vst [vmem:[#allocation75_spill] sm:$0xff] %v9959_v5 }
0x14ae   : > { %3996 = vrot.lane.b32.xlu1 %v3989_v23, %s7529_s29  ;;  %3994 = vrot.lane.b32.xlu0 %v3988_v20, %s7529_s29  ;;  %v4021_v23 = vrot.slane %v3902_v13, %v7844_v41 }
0x14b0   : > { %v9961_v13 = vpop.permute.xlu0 %3929 }
0x14b1   : > { %12239 = vst [vmem:[#allocation73_spill] sm:$0xff] %v9961_v13 }
0x14b2   : > { %4007 = vperm.xlu1 %7357, %v9918_v0   ;;  %3998 = vrot.lane.b32.xlu0 %v3990_v32, %s7529_s29 }
0x14b6   : > { %7358 = vset.pattern.permute.xlu1 %v12232_v52 }
0x1520   : > { %v9944_v48 = vpop.permute.xlu1 %3996 }
0x1521   : > { %12233 = vst [vmem:[#allocation72_spill] sm:$0xff] %v9944_v48 }
0x1531   : > { %v4008_v43 = vpop.permute.xlu1 %4007 }
0x1532   : > { %v4022_v60 = vmul.f32 %v4013_v38, %v4008_v43  ;;  %v4023_v45 = vmul.f32 %v4017_v31, %v4008_v43  ;;  %v4024_v20 = vmul.f32 %v4021_v23, %v4008_v43 }
0x1534   : > { %4030 = vrot.lane.b32.xlu1 %v4023_v45, %s7529_s29  ;;  %4028 = vrot.lane.b32.xlu0 %v4022_v60, %s7529_s29  ;;  %v9963_v45 = vpop.permute.xlu0 %3960 }
0x1535   : > { %12240 = vst [vmem:[#allocation74_spill] sm:$0xff] %v9963_v45 }
0x1538   : > { %4040 = vrot.lane.b32.xlu1 %v12235_v50, %s12234_s14  ;;  %4032 = vrot.lane.b32.xlu0 %v4024_v20, %s7529_s29  ;;  %v9965_v32 = vpop.permute.xlu0 %3964  ;;  %s7549_s29 = smov 35  }
0x1539   : > { %12241 = vst [vmem:[#allocation79_spill] sm:$0xff] %v9965_v32 }
0x153c   : > { %4052 = vperm.xlu1 %7358, %v9918_v0   ;;  %4042 = vrot.lane.b32.xlu0 %v12236_v62, %s12234_s14  ;;  %v9967_v52 = vpop.permute.xlu0 %3994  ;;  %s7587_s14 = smov 76  }
0x153d   : > { %12242 = vst [vmem:[#allocation82_spill] sm:$0xff] %v9967_v52 }
0x1540   : > { %7359 = vset.pattern.permute.xlu1 %v12237_v29  ;;  %v9969_v38 = vpop.permute.xlu0 %3998 }
0x1541   : > { %12243 = vst [vmem:[#allocation80_spill] sm:$0xff] %v9969_v38 }
0x15a6   : > { %v9971_v31 = vpop.permute.xlu0 %4028  ;;  %v9975_v60 = vpop.permute.xlu1 %4030 }
0x15a7   : > { %12244 = vst [vmem:[#allocation83_spill] sm:$0xff] %v9971_v31  ;;  %12246 = vst [vmem:[#allocation81_spill] sm:$0xff] %v9975_v60 }
0x15aa   : > { %v9973_v43 = vpop.permute.xlu0 %4032  ;;  %v4041_v20 = vpop.permute.xlu1 %4040 }
0x15ab   : > { %12245 = vst [vmem:[#allocation84_spill] sm:$0xff] %v9973_v43  ;;  %v4048_v62 = vmul.f32 %v4041_v20, %v9552_v53 }
0x15ad   : > { %v4058_v13 = vrot.slane %v4048_v62, %v12186_v36 }
0x15ae   : > { %v4043_v23 = vpop.permute.xlu0 %4042 }
0x15af   : > { %v4044_v50 = vsel %vm1107_vm4, %v4041_v20, %v4043_v23  ;;  %v4050_v32 = vmul.f32 %v4043_v23, %v9546_v22  ;;  %v12248_v20 = vmov 30   ;;  %vm4850_vm4 = vcmask 285696  }
0x15b0   : > { %v4049_v29 = vmul.f32 %v4044_v50, %v9549_v59  ;;  %v4092_v50 = vrot.slane %v4048_v62, %v12182_v58 }
0x15b1   : > { %v4066_v43 = vrot.slane %v4050_v32, %v12186_v36 }
0x15b2   : > { %v4062_v38 = vrot.slane %v4049_v29, %v12186_v36 }
0x15bb   : > { %v4053_v52 = vpop.permute.xlu1 %4052 }
0x15bc   : > { %v4067_v31 = vmul.f32 %v4058_v13, %v4053_v52  ;;  %v4068_v48 = vmul.f32 %v4062_v38, %v4053_v52  ;;  %v4069_v60 = vmul.f32 %v4066_v43, %v4053_v52  ;;  %v4096_v13 = vrot.slane %v4049_v29, %v12182_v58 }
0x15bd   : > { %v12250_v52 = vmov 31  }
0x15be   : > { %4073 = vrot.lane.b32.xlu0 %v4067_v31, %s12247_s16  ;;  %4075 = vrot.lane.b32.xlu1 %v4068_v48, %s12247_s16  ;;  %v4100_v31 = vrot.slane %v4050_v32, %v12182_v58 }
0x15c2   : > { %4077 = vrot.lane.b32.xlu0 %v4069_v60, %s12247_s16  ;;  %4086 = vperm.xlu1 %7359, %v9918_v0   ;;  %v4126_v60 = vrot.slane %v4048_v62, %v11967_v18 }
0x15c6   : > { %7360 = vset.pattern.permute.xlu1 %v12248_v20  ;;  %v4130_v20 = vrot.slane %v4049_v29, %v11967_v18 }
0x1630   : > { %v9989_v23 = vpop.permute.xlu1 %4075 }
0x1631   : > { %12249 = vst [vmem:[#allocation85_spill] sm:$0xff] %v9989_v23 }
0x1641   : > { %v4087_v38 = vpop.permute.xlu1 %4086 }
0x1642   : > { %v4101_v45 = vmul.f32 %v4092_v50, %v4087_v38  ;;  %v4102_v5 = vmul.f32 %v4096_v13, %v4087_v38  ;;  %v4103_v48 = vmul.f32 %v4100_v31, %v4087_v38  ;;  %v12252_v38 = vmov 32  }
0x1644   : > { %4109 = vrot.lane.b32.xlu1 %v4102_v5, %s12247_s16  ;;  %4107 = vrot.lane.b32.xlu0 %v4101_v45, %s12247_s16  ;;  %v4134_v5 = vrot.slane %v4050_v32, %v11967_v18 }
0x1648   : > { %4120 = vperm.xlu1 %7360, %v9918_v0   ;;  %4111 = vrot.lane.b32.xlu0 %v4103_v48, %s12247_s16  ;;  %v4160_v48 = vrot.slane %v4048_v62, %v7844_v41  ;;  %v12255_v62 = vld [vmem:[#allocation6_spill] sm:$0xff] }
0x164c   : > { %7361 = vset.pattern.permute.xlu1 %v12250_v52  ;;  %v4164_v52 = vrot.slane %v4049_v29, %v7844_v41  ;;  %v12256_v29 = vmov 33  }
0x16b6   : > { %v9999_v43 = vpop.permute.xlu1 %4109 }
0x16b7   : > { %12251 = vst [vmem:[#allocation86_spill] sm:$0xff] %v9999_v43 }
0x16c7   : > { %v4121_v50 = vpop.permute.xlu1 %4120 }
0x16c8   : > { %v4135_v13 = vmul.f32 %v4126_v60, %v4121_v50  ;;  %v4136_v23 = vmul.f32 %v4130_v20, %v4121_v50  ;;  %v4137_v45 = vmul.f32 %v4134_v5, %v4121_v50  ;;  %v10021_v5 = vpop.permute.xlu0 %4073 }
0x16c9   : > { %12257 = vst [vmem:[#allocation87_spill] sm:$0xff] %v10021_v5 }
0x16ca   : > { %4143 = vrot.lane.b32.xlu1 %v4136_v23, %s12247_s16  ;;  %4141 = vrot.lane.b32.xlu0 %v4135_v13, %s12247_s16  ;;  %v4168_v23 = vrot.slane %v4050_v32, %v7844_v41  ;;  %v12254_v13 = vld [vmem:[#allocation9_spill] sm:$0xff] }
0x16ce   : > { %4154 = vperm.xlu1 %7361, %v9918_v0   ;;  %4145 = vrot.lane.b32.xlu0 %v4137_v45, %s12247_s16  ;;  %v10023_v45 = vpop.permute.xlu0 %4077 }
0x16cf   : > { %12258 = vst [vmem:[#allocation88_spill] sm:$0xff] %v10023_v45 }
0x16d2   : > { %7362 = vset.pattern.permute.xlu1 %v12252_v38  ;;  %v10025_v32 = vpop.permute.xlu0 %4107 }
0x16d3   : > { %12259 = vst [vmem:[#allocation93_spill] sm:$0xff] %v10025_v32 }
0x173c   : > { %v10009_v31 = vpop.permute.xlu1 %4143 }
0x173d   : > { %12253 = vst [vmem:[#allocation89_spill] sm:$0xff] %v10009_v31 }
0x174d   : > { %v4155_v60 = vpop.permute.xlu1 %4154 }
0x174e   : > { %v4169_v20 = vmul.f32 %v4160_v48, %v4155_v60  ;;  %v4170_v43 = vmul.f32 %v4164_v52, %v4155_v60  ;;  %v4171_v50 = vmul.f32 %v4168_v23, %v4155_v60 }
0x1750   : > { %4177 = vrot.lane.b32.xlu1 %v4170_v43, %s12247_s16  ;;  %4175 = vrot.lane.b32.xlu0 %v4169_v20, %s12247_s16  ;;  %v10027_v43 = vpop.permute.xlu0 %4111 }
0x1751   : > { %12260 = vst [vmem:[#allocation97_spill] sm:$0xff] %v10027_v43 }
0x1754   : > { %4187 = vrot.lane.b32.xlu1 %v12254_v13, %s7530_s26  ;;  %4179 = vrot.lane.b32.xlu0 %v4171_v50, %s12247_s16  ;;  %v10029_v38 = vpop.permute.xlu0 %4141 }
0x1755   : > { %12261 = vst [vmem:[#allocation98_spill] sm:$0xff] %v10029_v38 }
0x1758   : > { %4200 = vperm.xlu1 %7362, %v9918_v0   ;;  %4189 = vrot.lane.b32.xlu0 %v12255_v62, %s7530_s26  ;;  %v10031_v48 = vpop.permute.xlu0 %4145 }
0x1759   : > { %12262 = vst [vmem:[#allocation3_spill] sm:$0xff] %v10031_v48 }
0x175c   : > { %7363 = vset.pattern.permute.xlu1 %v12256_v29 }
0x17c2   : > { %v10033_v52 = vpop.permute.xlu0 %4175  ;;  %v10037_v20 = vpop.permute.xlu1 %4177 }
0x17c3   : > { %12263 = vst [vmem:[#allocation94_spill] sm:$0xff] %v10033_v52  ;;  %12265 = vst [vmem:[#allocation62_spill] sm:$0xff] %v10037_v20 }
0x17c6   : > { %v10035_v60 = vpop.permute.xlu0 %4179  ;;  %v4188_v50 = vpop.permute.xlu1 %4187 }
0x17c7   : > { %12264 = vst [vmem:[#allocation2_spill] sm:$0xff] %v10035_v60  ;;  %v4196_v62 = vmul.f32 %v4188_v50, %v9552_v53 }
0x17c9   : > { %v4206_v45 = vrot.slane %v4196_v62, %v12186_v36 }
0x17ca   : > { %v4190_v23 = vpop.permute.xlu0 %4189 }
0x17cb   : > { %v4192_v13 = vsel %vm4191_vm0, %v4188_v50, %v4190_v23  ;;  %v4198_v43 = vmul.f32 %v4190_v23, %v9546_v22  ;;  %v12266_v23 = vmov 34   ;;  %vm3486_vm0 = vcmask 1022976  }
0x17cc   : > { %v4197_v29 = vmul.f32 %v4192_v13, %v9549_v59  ;;  %v4241_v13 = vrot.slane %v4196_v62, %v12182_v58 }
0x17cd   : > { %v4214_v60 = vrot.slane %v4198_v43, %v12186_v36 }
0x17ce   : > { %v4210_v48 = vrot.slane %v4197_v29, %v12186_v36 }
0x17d7   : > { %v4201_v38 = vpop.permute.xlu1 %4200 }
0x17d8   : > { %v4215_v52 = vmul.f32 %v4206_v45, %v4201_v38  ;;  %v4216_v31 = vmul.f32 %v4210_v48, %v4201_v38  ;;  %v4217_v20 = vmul.f32 %v4214_v60, %v4201_v38  ;;  %v4245_v45 = vrot.slane %v4197_v29, %v12182_v58 }
0x17d9   : > { %v12268_v38 = vmov 35  }
0x17da   : > { %4221 = vrot.lane.b32.xlu0 %v4215_v52, %s7531_s19  ;;  %4223 = vrot.lane.b32.xlu1 %v4216_v31, %s7531_s19  ;;  %v4249_v52 = vrot.slane %v4198_v43, %v12182_v58 }
0x17de   : > { %4225 = vrot.lane.b32.xlu0 %v4217_v20, %s7531_s19  ;;  %4235 = vperm.xlu1 %7363, %v9918_v0   ;;  %v4275_v20 = vrot.slane %v4196_v62, %v11967_v18 }
0x17e2   : > { %7364 = vset.pattern.permute.xlu1 %v12266_v23  ;;  %v4279_v23 = vrot.slane %v4197_v29, %v11967_v18 }
0x184c   : > { %v10050_v50 = vpop.permute.xlu1 %4223 }
0x184d   : > { %12267 = vst [vmem:[#allocation23_spill] sm:$0xff] %v10050_v50 }
0x185d   : > { %v4236_v48 = vpop.permute.xlu1 %4235 }
0x185e   : > { %v4250_v32 = vmul.f32 %v4241_v13, %v4236_v48  ;;  %v4251_v5 = vmul.f32 %v4245_v45, %v4236_v48  ;;  %v4252_v31 = vmul.f32 %v4249_v52, %v4236_v48  ;;  %v7532_v48 = vmov 36  }
0x1860   : > { %4258 = vrot.lane.b32.xlu1 %v4251_v5, %s7531_s19  ;;  %4256 = vrot.lane.b32.xlu0 %v4250_v32, %s7531_s19  ;;  %v4283_v5 = vrot.slane %v4198_v43, %v11967_v18 }
0x1864   : > { %4269 = vperm.xlu1 %7364, %v9918_v0   ;;  %4260 = vrot.lane.b32.xlu0 %v4252_v31, %s7531_s19  ;;  %v4309_v31 = vrot.slane %v4196_v62, %v7844_v41 }
0x1868   : > { %7365 = vset.pattern.permute.xlu1 %v12268_v38  ;;  %v4313_v38 = vrot.slane %v4197_v29, %v7844_v41  ;;  %v7534_v29 = vmov 37  }
0x18d2   : > { %v10060_v60 = vpop.permute.xlu1 %4258 }
0x18d3   : > { %12269 = vst [vmem:[#allocation17_spill] sm:$0xff] %v10060_v60 }
0x18e3   : > { %v4270_v13 = vpop.permute.xlu1 %4269 }
0x18e4   : > { %v4284_v45 = vmul.f32 %v4275_v20, %v4270_v13  ;;  %v4285_v50 = vmul.f32 %v4279_v23, %v4270_v13  ;;  %v4286_v32 = vmul.f32 %v4283_v5, %v4270_v13  ;;  %v4317_v13 = vrot.slane %v4198_v43, %v7844_v41 }
0x18e6   : > { %4292 = vrot.lane.b32.xlu1 %v4285_v50, %s7531_s19  ;;  %4290 = vrot.lane.b32.xlu0 %v4284_v45, %s7531_s19  ;;  %v7095_v50 = vld [vmem:[%s11601_s0 + $0x23] ss:$8 sm:$0x3] }
0x18e7   : > { %v4342_v5 = vrot.slane %v7095_v50, %v12186_v36  ;;  %v4346_v62 = vrot.slane %v7095_v50, %v12182_v58 }
0x18ea   : > { %4303 = vperm.xlu1 %7365, %v9918_v0   ;;  %4294 = vrot.lane.b32.xlu0 %v4286_v32, %s7531_s19 }
0x18ee   : > { %7366 = vset.pattern.permute.xlu1 %v7532_v48  ;;  %v10083_v48 = vpop.permute.xlu0 %4221 }
0x18ef   : > { %12271 = vst [vmem:[#allocation24_spill] sm:$0xff] %v10083_v48 }
0x18f2   : > { %v10085_v43 = vpop.permute.xlu0 %4225 }
0x18f3   : > { %12272 = vst [vmem:[#allocation22_spill] sm:$0xff] %v10085_v43 }
0x1958   : > { %v10069_v52 = vpop.permute.xlu1 %4292 }
0x1959   : > { %12270 = vst [vmem:[#allocation16_spill] sm:$0xff] %v10069_v52 }
0x1969   : > { %v4304_v20 = vpop.permute.xlu1 %4303 }
0x196a   : > { %v4318_v23 = vmul.f32 %v4309_v31, %v4304_v20  ;;  %v4319_v45 = vmul.f32 %v4313_v38, %v4304_v20  ;;  %v4320_v32 = vmul.f32 %v4317_v13, %v4304_v20  ;;  %v10087_v31 = vpop.permute.xlu0 %4256 }
0x196b   : > { %12273 = vst [vmem:[#allocation18_spill] sm:$0xff] %v10087_v31 }
0x196c   : > { %4326 = vrot.lane.b32.xlu1 %v4319_v45, %s7531_s19  ;;  %4324 = vrot.lane.b32.xlu0 %v4318_v23, %s7531_s19 }
0x196e   : > { %v10089_v38 = vpop.permute.xlu0 %4260 }
0x196f   : > { %12274 = vst [vmem:[#allocation63_spill] sm:$0xff] %v10089_v38 }
0x1970   : > { %4347 = vrot.lane.b32.xlu1 %v4342_v5, %s7533_s24  ;;  %4328 = vrot.lane.b32.xlu0 %v4320_v32, %s7531_s19  ;;  %s7561_s19 = smov 48  }
0x1972   : > { %v10091_v20 = vpop.permute.xlu0 %4290 }
0x1973   : > { %12275 = vst [vmem:[#allocation4_spill] sm:$0xff] %v10091_v20 }
0x1974   : > { %4360 = vperm.xlu1 %7366, %v9918_v0   ;;  %4349 = vrot.lane.b32.xlu0 %v4346_v62, %s7533_s24  ;;  %s7573_s24 = smov 50  }
0x1976   : > { %v10093_v23 = vpop.permute.xlu0 %4294 }
0x1977   : > { %12276 = vst [vmem:[#allocation5_spill] sm:$0xff] %v10093_v23 }
0x1978   : > { %7367 = vset.pattern.permute.xlu1 %v7534_v29 }
0x19de   : > { %v10095_v45 = vpop.permute.xlu0 %4324  ;;  %v10099_v13 = vpop.permute.xlu1 %4326 }
0x19df   : > { %12277 = vst [vmem:[#allocation9_spill] sm:$0xff] %v10095_v45  ;;  %12279 = vst [vmem:[#allocation100_spill] sm:$0xff] %v10099_v13 }
0x19e2   : > { %v10097_v50 = vpop.permute.xlu0 %4328  ;;  %v4348_v32 = vpop.permute.xlu1 %4347 }
0x19e3   : > { %12278 = vst [vmem:[#allocation6_spill] sm:$0xff] %v10097_v50  ;;  %v4356_v29 = vmul.f32 %v4348_v32, %v9552_v53 }
0x19e5   : > { %v4366_v20 = vrot.slane %v4356_v29, %v12186_v36 }
0x19e6   : > { %v4350_v5 = vpop.permute.xlu0 %4349 }
0x19e7   : > { %v4352_v62 = vsel %vm4351_vm3, %v4348_v32, %v4350_v5  ;;  %v4358_v38 = vmul.f32 %v4350_v5, %v9546_v22  ;;  %v7536_v5 = vmov 38   ;;  %vm3931_vm3 = vcmask 908288  }
0x19e8   : > { %v4357_v43 = vmul.f32 %v4352_v62, %v9549_v59  ;;  %v4401_v62 = vrot.slane %v4356_v29, %v12182_v58 }
0x19e9   : > { %v4374_v50 = vrot.slane %v4358_v38, %v12186_v36 }
0x19ea   : > { %v4370_v23 = vrot.slane %v4357_v43, %v12186_v36 }
0x19f3   : > { %v4361_v52 = vpop.permute.xlu1 %4360 }
0x19f4   : > { %v4375_v45 = vmul.f32 %v4366_v20, %v4361_v52  ;;  %v4376_v31 = vmul.f32 %v4370_v23, %v4361_v52  ;;  %v4377_v13 = vmul.f32 %v4374_v50, %v4361_v52  ;;  %v4405_v20 = vrot.slane %v4357_v43, %v12182_v58 }
0x19f6   : > { %4381 = vrot.lane.b32.xlu0 %v4375_v45, %s7535_s17  ;;  %4383 = vrot.lane.b32.xlu1 %v4376_v31, %s7535_s17  ;;  %v4409_v45 = vrot.slane %v4358_v38, %v12182_v58  ;;  %v7537_v31 = vmov 39  }
0x19fa   : > { %4385 = vrot.lane.b32.xlu0 %v4377_v13, %s7535_s17  ;;  %4395 = vperm.xlu1 %7367, %v9918_v0   ;;  %v4435_v13 = vrot.slane %v4356_v29, %v11967_v18 }
0x19fe   : > { %7368 = vset.pattern.permute.xlu1 %v7536_v5  ;;  %v4439_v5 = vrot.slane %v4357_v43, %v11967_v18 }
0x1a68   : > { %v10111_v32 = vpop.permute.xlu1 %4383 }
0x1a69   : > { %12280 = vst [vmem:[#allocation101_spill] sm:$0xff] %v10111_v32 }
0x1a79   : > { %v4396_v23 = vpop.permute.xlu1 %4395 }
0x1a7a   : > { %v4410_v60 = vmul.f32 %v4401_v62, %v4396_v23  ;;  %v4411_v48 = vmul.f32 %v4405_v20, %v4396_v23  ;;  %v4412_v52 = vmul.f32 %v4409_v45, %v4396_v23  ;;  %v7538_v23 = vmov 40  }
0x1a7c   : > { %4418 = vrot.lane.b32.xlu1 %v4411_v48, %s7535_s17  ;;  %4416 = vrot.lane.b32.xlu0 %v4410_v60, %s7535_s17  ;;  %v4443_v48 = vrot.slane %v4358_v38, %v11967_v18 }
0x1a80   : > { %4429 = vperm.xlu1 %7368, %v9918_v0   ;;  %4420 = vrot.lane.b32.xlu0 %v4412_v52, %s7535_s17  ;;  %v4469_v52 = vrot.slane %v4356_v29, %v7844_v41 }
0x1a84   : > { %7369 = vset.pattern.permute.xlu1 %v7537_v31  ;;  %v4473_v31 = vrot.slane %v4357_v43, %v7844_v41  ;;  %v12284_v43 = vld [vmem:[#allocation26_spill] sm:$0xff] }
0x1aee   : > { %v10120_v50 = vpop.permute.xlu1 %4418 }
0x1aef   : > { %12281 = vst [vmem:[#allocation102_spill] sm:$0xff] %v10120_v50 }
0x1aff   : > { %v4430_v62 = vpop.permute.xlu1 %4429 }
0x1b00   : > { %v4444_v20 = vmul.f32 %v4435_v13, %v4430_v62  ;;  %v4445_v32 = vmul.f32 %v4439_v5, %v4430_v62  ;;  %v4446_v60 = vmul.f32 %v4443_v48, %v4430_v62  ;;  %v12283_v48 = vld [vmem:[#allocation19_spill] sm:$0xff] }
0x1b01   : > { %v4496_v29 = vmul.f32 %v9552_v53, %v12283_v48  ;;  %v7540_v48 = vmov 42  }
0x1b02   : > { %4452 = vrot.lane.b32.xlu1 %v4445_v32, %s7535_s17  ;;  %4450 = vrot.lane.b32.xlu0 %v4444_v20, %s7535_s17  ;;  %v4477_v32 = vrot.slane %v4358_v38, %v7844_v41  ;;  %v7539_v20 = vmov 41   ;;  %v12286_v38 = vld [vmem:[#allocation25_spill] sm:$0xff] }
0x1b06   : > { %4463 = vperm.xlu1 %7369, %v9918_v0   ;;  %4454 = vrot.lane.b32.xlu0 %v4446_v60, %s7535_s17  ;;  %v4497_v60 = vmul.f32 %v9549_v59, %v12284_v43 }
0x1b0a   : > { %7370 = vset.pattern.permute.xlu1 %v7538_v23 }
0x1b74   : > { %v10129_v45 = vpop.permute.xlu1 %4452 }
0x1b75   : > { %12282 = vst [vmem:[#allocation103_spill] sm:$0xff] %v10129_v45 }
0x1b85   : > { %v4464_v13 = vpop.permute.xlu1 %4463 }
0x1b86   : > { %v4478_v5 = vmul.f32 %v4469_v52, %v4464_v13  ;;  %v4479_v50 = vmul.f32 %v4473_v31, %v4464_v13  ;;  %v4480_v62 = vmul.f32 %v4477_v32, %v4464_v13  ;;  %v4506_v52 = vrot.slane %v4496_v29, %v12186_v36 }
0x1b87   : > { %v4510_v31 = vrot.slane %v4497_v60, %v12186_v36 }
0x1b88   : > { %4486 = vrot.lane.b32.xlu1 %v4479_v50, %s7535_s17  ;;  %4484 = vrot.lane.b32.xlu0 %v4478_v5, %s7535_s17  ;;  %v4498_v50 = vmul.f32 %v9546_v22, %v12286_v38  ;;  %v4540_v38 = vrot.slane %v4496_v29, %v12182_v58 }
0x1b8c   : > { %4500 = vperm.xlu1 %7370, %v9918_v0   ;;  %4488 = vrot.lane.b32.xlu0 %v4480_v62, %s7535_s17  ;;  %v4514_v62 = vrot.slane %v4498_v50, %v12186_v36  ;;  %s7575_s17 = smov 78  }
0x1b90   : > { %7371 = vset.pattern.permute.xlu1 %v7539_v20 }
0x1bfa   : > { %v10142_v23 = vpop.permute.xlu1 %4486 }
0x1bfb   : > { %12285 = vst [vmem:[#allocation19_spill] sm:$0xff] %v10142_v23 }
0x1c0b   : > { %v4501_v13 = vpop.permute.xlu1 %4500 }
0x1c0c   : > { %v4515_v5 = vmul.f32 %v4506_v52, %v4501_v13  ;;  %v4516_v32 = vmul.f32 %v4510_v31, %v4501_v13  ;;  %v4517_v20 = vmul.f32 %v4514_v62, %v4501_v13  ;;  %v4544_v52 = vrot.slane %v4497_v60, %v12182_v58 }
0x1c0e   : > { %4523 = vrot.lane.b32.xlu1 %v4516_v32, %s7502_s20  ;;  %4521 = vrot.lane.b32.xlu0 %v4515_v5, %s7502_s20  ;;  %v4548_v32 = vrot.slane %v4498_v50, %v12182_v58  ;;  %v7541_v5 = vmov 43  }
0x1c12   : > { %4534 = vperm.xlu1 %7371, %v9918_v0   ;;  %4525 = vrot.lane.b32.xlu0 %v4517_v20, %s7502_s20  ;;  %v4574_v20 = vrot.slane %v4496_v29, %v11967_v18 }
0x1c16   : > { %7372 = vset.pattern.permute.xlu1 %v7540_v48  ;;  %v4578_v48 = vrot.slane %v4497_v60, %v11967_v18 }
0x1c80   : > { %v10153_v43 = vpop.permute.xlu1 %4523 }
0x1c81   : > { %12287 = vst [vmem:[#allocation26_spill] sm:$0xff] %v10153_v43 }
0x1c91   : > { %v4535_v31 = vpop.permute.xlu1 %4534 }
0x1c92   : > { %v4549_v23 = vmul.f32 %v4540_v38, %v4535_v31  ;;  %v4550_v45 = vmul.f32 %v4544_v52, %v4535_v31  ;;  %v4551_v13 = vmul.f32 %v4548_v32, %v4535_v31  ;;  %v7542_v31 = vmov 44  }
0x1c94   : > { %4557 = vrot.lane.b32.xlu1 %v4550_v45, %s7502_s20  ;;  %4555 = vrot.lane.b32.xlu0 %v4549_v23, %s7502_s20  ;;  %v4582_v45 = vrot.slane %v4498_v50, %v11967_v18 }
0x1c98   : > { %4568 = vperm.xlu1 %7372, %v9918_v0   ;;  %4559 = vrot.lane.b32.xlu0 %v4551_v13, %s7502_s20  ;;  %v4608_v13 = vrot.slane %v4496_v29, %v7844_v41  ;;  %v12292_v29 = vld [vmem:[#allocation7_spill] sm:$0xff] }
0x1c9c   : > { %7373 = vset.pattern.permute.xlu1 %v7541_v5  ;;  %v4612_v5 = vrot.slane %v4497_v60, %v7844_v41  ;;  %v7543_v60 = vmov 45  }
0x1d06   : > { %v10162_v62 = vpop.permute.xlu1 %4557 }
0x1d07   : > { %12288 = vst [vmem:[#allocation25_spill] sm:$0xff] %v10162_v62 }
0x1d17   : > { %v4569_v38 = vpop.permute.xlu1 %4568 }
0x1d18   : > { %v4583_v52 = vmul.f32 %v4574_v20, %v4569_v38  ;;  %v4584_v43 = vmul.f32 %v4578_v48, %v4569_v38  ;;  %v4585_v23 = vmul.f32 %v4582_v45, %v4569_v38  ;;  %v10184_v45 = vpop.permute.xlu0 %4381 }
0x1d1a   : > { %4591 = vrot.lane.b32.xlu1 %v4584_v43, %s7502_s20  ;;  %4589 = vrot.lane.b32.xlu0 %v4583_v52, %s7502_s20  ;;  %v4616_v43 = vrot.slane %v4498_v50, %v7844_v41  ;;  %v12291_v52 = vld [vmem:[#allocation10_spill] sm:$0xff] }
0x1d1b   : > { %12293 = vst [vmem:[#allocation10_spill] sm:$0xff] %v10184_v45 }
0x1d1c   : > { %v10186_v50 = vpop.permute.xlu0 %4385 }
0x1d1d   : > { %12294 = vst [vmem:[#allocation7_spill] sm:$0xff] %v10186_v50 }
0x1d1e   : > { %4602 = vperm.xlu1 %7373, %v9918_v0   ;;  %4593 = vrot.lane.b32.xlu0 %v4585_v23, %s7502_s20 }
0x1d22   : > { %7374 = vset.pattern.permute.xlu1 %v7542_v31 }
0x1d8c   : > { %v10171_v32 = vpop.permute.xlu1 %4591 }
0x1d8d   : > { %12289 = vst [vmem:[#allocation104_spill] sm:$0xff] %v10171_v32 }
0x1d9d   : > { %v4603_v20 = vpop.permute.xlu1 %4602 }
0x1d9e   : > { %v4617_v48 = vmul.f32 %v4608_v13, %v4603_v20  ;;  %v4618_v62 = vmul.f32 %v4612_v5, %v4603_v20  ;;  %v4619_v38 = vmul.f32 %v4616_v43, %v4603_v20 }
0x1da0   : > { %4625 = vrot.lane.b32.xlu1 %v4618_v62, %s7502_s20  ;;  %4623 = vrot.lane.b32.xlu0 %v4617_v48, %s7502_s20  ;;  %v10188_v62 = vpop.permute.xlu0 %4416 }
0x1da1   : > { %12295 = vst [vmem:[#allocation105_spill] sm:$0xff] %v10188_v62 }
0x1da4   : > { %4635 = vrot.lane.b32.xlu1 %v12291_v52, %s12290_s30  ;;  %4627 = vrot.lane.b32.xlu0 %v4619_v38, %s7502_s20  ;;  %v10190_v23 = vpop.permute.xlu0 %4420  ;;  %s12310_s20 = smov 95  }
0x1da5   : > { %12296 = vst [vmem:[#allocation106_spill] sm:$0xff] %v10190_v23 }
0x1da8   : > { %4647 = vperm.xlu1 %7374, %v9918_v0   ;;  %4637 = vrot.lane.b32.xlu0 %v12292_v29, %s12290_s30  ;;  %v10192_v31 = vpop.permute.xlu0 %4450  ;;  %s7579_s30 = smov 51  }
0x1da9   : > { %12297 = vst [vmem:[#allocation107_spill] sm:$0xff] %v10192_v31 }
0x1dac   : > { %7375 = vset.pattern.permute.xlu1 %v7543_v60  ;;  %v10194_v13 = vpop.permute.xlu0 %4454 }
0x1dad   : > { %12298 = vst [vmem:[#allocation108_spill] sm:$0xff] %v10194_v13 }
0x1db0   : > { %v10196_v5 = vpop.permute.xlu0 %4484 }
0x1db1   : > { %12299 = vst [vmem:[#allocation109_spill] sm:$0xff] %v10196_v5 }
0x1db4   : > { %v10198_v20 = vpop.permute.xlu0 %4488 }
0x1db5   : > { %12300 = vst [vmem:[#allocation110_spill] sm:$0xff] %v10198_v20 }
0x1db8   : > { %v10200_v48 = vpop.permute.xlu0 %4521 }
0x1db9   : > { %12301 = vst [vmem:[#allocation111_spill] sm:$0xff] %v10200_v48 }
0x1dbc   : > { %v10202_v43 = vpop.permute.xlu0 %4525 }
0x1dbd   : > { %12302 = vst [vmem:[#allocation112_spill] sm:$0xff] %v10202_v43 }
0x1dc0   : > { %v10204_v38 = vpop.permute.xlu0 %4555 }
0x1dc1   : > { %12303 = vst [vmem:[#allocation113_spill] sm:$0xff] %v10204_v38 }
0x1dc4   : > { %v10206_v52 = vpop.permute.xlu0 %4559 }
0x1dc5   : > { %12304 = vst [vmem:[#allocation114_spill] sm:$0xff] %v10206_v52 }
0x1dc8   : > { %v10208_v29 = vpop.permute.xlu0 %4589 }
0x1dc9   : > { %12305 = vst [vmem:[#allocation115_spill] sm:$0xff] %v10208_v29 }
0x1dcc   : > { %v10210_v60 = vpop.permute.xlu0 %4593 }
0x1dcd   : > { %12306 = vst [vmem:[#allocation116_spill] sm:$0xff] %v10210_v60 }
0x1e12   : > { %v10212_v23 = vpop.permute.xlu0 %4623  ;;  %v10216_v13 = vpop.permute.xlu1 %4625 }
0x1e13   : > { %12307 = vst [vmem:[#allocation117_spill] sm:$0xff] %v10212_v23  ;;  %12309 = vst [vmem:[#allocation119_spill] sm:$0xff] %v10216_v13 }
0x1e16   : > { %v10214_v50 = vpop.permute.xlu0 %4627  ;;  %v4636_v20 = vpop.permute.xlu1 %4635 }
0x1e17   : > { %12308 = vst [vmem:[#allocation118_spill] sm:$0xff] %v10214_v50  ;;  %v4643_v43 = vmul.f32 %v4636_v20, %v9552_v53 }
0x1e19   : > { %v4653_v29 = vrot.slane %v4643_v43, %v12186_v36 }
0x1e1a   : > { %v4638_v32 = vpop.permute.xlu0 %4637 }
0x1e1b   : > { %v4639_v48 = vsel %vm1427_vm6, %v4636_v20, %v4638_v32  ;;  %v4645_v52 = vmul.f32 %v4638_v32, %v9546_v22  ;;  %v7544_v20 = vmov 46   ;;  %vm5149_vm6 = vcmask 392192  }
0x1e1c   : > { %v4644_v38 = vmul.f32 %v4639_v48, %v9549_v59  ;;  %v4687_v48 = vrot.slane %v4643_v43, %v12182_v58 }
0x1e1d   : > { %v4661_v50 = vrot.slane %v4645_v52, %v12186_v36 }
0x1e1e   : > { %v4657_v60 = vrot.slane %v4644_v38, %v12186_v36 }
0x1e27   : > { %v4648_v5 = vpop.permute.xlu1 %4647 }
0x1e28   : > { %v4662_v23 = vmul.f32 %v4653_v29, %v4648_v5  ;;  %v4663_v31 = vmul.f32 %v4657_v60, %v4648_v5  ;;  %v4664_v13 = vmul.f32 %v4661_v50, %v4648_v5  ;;  %v4691_v29 = vrot.slane %v4644_v38, %v12182_v58 }
0x1e29   : > { %v4721_v5 = vrot.slane %v4643_v43, %v11967_v18 }
0x1e2a   : > { %4668 = vrot.lane.b32.xlu0 %v4662_v23, %s12310_s20  ;;  %4670 = vrot.lane.b32.xlu1 %v4663_v31, %s12310_s20  ;;  %v4695_v23 = vrot.slane %v4645_v52, %v12182_v58  ;;  %v7545_v31 = vmov 47  }
0x1e2e   : > { %4672 = vrot.lane.b32.xlu0 %v4664_v13, %s12310_s20  ;;  %4681 = vperm.xlu1 %7375, %v9918_v0  }
0x1e32   : > { %7376 = vset.pattern.permute.xlu1 %v7544_v20  ;;  %v4725_v20 = vrot.slane %v4644_v38, %v11967_v18 }
0x1e9c   : > { %v10229_v32 = vpop.permute.xlu1 %4670 }
0x1e9d   : > { %12311 = vst [vmem:[#allocation120_spill] sm:$0xff] %v10229_v32 }
0x1ead   : > { %v4682_v60 = vpop.permute.xlu1 %4681 }
0x1eae   : > { %v4696_v62 = vmul.f32 %v4687_v48, %v4682_v60  ;;  %v4697_v45 = vmul.f32 %v4691_v29, %v4682_v60  ;;  %v4698_v50 = vmul.f32 %v4695_v23, %v4682_v60  ;;  %v7546_v60 = vmov 48  }
0x1eaf   : > { %v7547_v23 = vmov 49  }
0x1eb0   : > { %4704 = vrot.lane.b32.xlu1 %v4697_v45, %s12310_s20  ;;  %4702 = vrot.lane.b32.xlu0 %v4696_v62, %s12310_s20  ;;  %v4729_v45 = vrot.slane %v4645_v52, %v11967_v18 }
0x1eb1   : > { %7379 = vset.pattern.permute.xlu0 %v7547_v23 }
0x1eb4   : > { %4715 = vperm.xlu1 %7376, %v9918_v0   ;;  %4706 = vrot.lane.b32.xlu0 %v4698_v50, %s12310_s20 }
0x1eb8   : > { %7377 = vset.pattern.permute.xlu1 %v7545_v31  ;;  %v4755_v31 = vrot.slane %v4643_v43, %v7844_v41  ;;  %v12314_v43 = vld [vmem:[#allocation8_spill] sm:$0xff] }
0x1f22   : > { %v10238_v13 = vpop.permute.xlu1 %4704 }
0x1f23   : > { %12312 = vst [vmem:[#allocation121_spill] sm:$0xff] %v10238_v13 }
0x1f33   : > { %v4716_v48 = vpop.permute.xlu1 %4715 }
0x1f34   : > { %v4730_v29 = vmul.f32 %v4721_v5, %v4716_v48  ;;  %v4731_v32 = vmul.f32 %v4725_v20, %v4716_v48  ;;  %v4732_v62 = vmul.f32 %v4729_v45, %v4716_v48  ;;  %v4759_v5 = vrot.slane %v4644_v38, %v7844_v41 }
0x1f35   : > { %v7548_v45 = vmov 50   ;;  %v7550_v38 = vmov 51  }
0x1f36   : > { %4738 = vrot.lane.b32.xlu1 %v4731_v32, %s12310_s20  ;;  %4736 = vrot.lane.b32.xlu0 %v4730_v29, %s12310_s20  ;;  %v4763_v29 = vrot.slane %v4645_v52, %v7844_v41  ;;  %v7551_v52 = vmov 52  }
0x1f3a   : > { %4749 = vperm.xlu1 %7377, %v9918_v0   ;;  %4740 = vrot.lane.b32.xlu0 %v4732_v62, %s12310_s20  ;;  %v7552_v62 = vmov 53  }
0x1f3e   : > { %7378 = vset.pattern.permute.xlu1 %v7546_v60  ;;  %v10262_v60 = vpop.permute.xlu0 %4668 }
0x1f3f   : > { %12316 = vst [vmem:[#allocation8_spill] sm:$0xff] %v10262_v60 }
0x1f42   : > { %v10264_v23 = vpop.permute.xlu0 %4672 }
0x1fa8   : > { %v10247_v50 = vpop.permute.xlu1 %4738 }
0x1fa9   : > { %12313 = vst [vmem:[#allocation122_spill] sm:$0xff] %v10247_v50 }
0x1fb9   : > { %v4750_v20 = vpop.permute.xlu1 %4749 }
0x1fba   : > { %v4764_v13 = vmul.f32 %v4755_v31, %v4750_v20  ;;  %v4765_v32 = vmul.f32 %v4759_v5, %v4750_v20  ;;  %v4766_v48 = vmul.f32 %v4763_v29, %v4750_v20  ;;  %v10266_v31 = vpop.permute.xlu0 %4702 }
0x1fbb   : > { %12318 = vst [vmem:[#allocation123_spill] sm:$0xff] %v10266_v31 }
0x1fbc   : > { %4772 = vrot.lane.b32.xlu1 %v4765_v32, %s12310_s20  ;;  %4770 = vrot.lane.b32.xlu0 %v4764_v13, %s12310_s20  ;;  %v12315_v13 = vld [vmem:[#allocation11_spill] sm:$0xff] }
0x1fbd   : > { %12317 = vst [vmem:[#allocation11_spill] sm:$0xff] %v10264_v23 }
0x1fbe   : > { %v10268_v5 = vpop.permute.xlu0 %4706 }
0x1fbf   : > { %12319 = vst [vmem:[#allocation124_spill] sm:$0xff] %v10268_v5 }
0x1fc0   : > { %4783 = vperm.xlu1 %7378, %v9918_v0   ;;  %4774 = vrot.lane.b32.xlu0 %v4766_v48, %s12310_s20  ;;  %s7581_s20 = smov 77  }
0x1fc2   : > { %v10270_v20 = vpop.permute.xlu0 %4736 }
0x1fc3   : > { %12320 = vst [vmem:[#allocation125_spill] sm:$0xff] %v10270_v20 }
0x1fc4   : > { %7380 = vset.pattern.permute.xlu1 %v7548_v45  ;;  %4799 = vperm.xlu0 %7379, %v9918_v0  }
0x1fc5   : > { %4815 = vperm.xlu1 %7380, %v9918_v0  }
0x1fc6   : > { %v10272_v32 = vpop.permute.xlu0 %4740 }
0x1fc7   : > { %12321 = vst [vmem:[#allocation126_spill] sm:$0xff] %v10272_v32 }
0x1fc8   : > { %4846 = vrot.lane.b32.xlu0 %v12314_v43, %s7549_s29 }
0x1fc9   : > { %7381 = vset.pattern.permute.xlu1 %v7550_v38  ;;  %7382 = vset.pattern.permute.xlu0 %v7551_v52 }
0x1fca   : > { %4831 = vperm.xlu1 %7381, %v9918_v0  }
0x1fcc   : > { %4859 = vperm.xlu0 %7382, %v9918_v0  }
0x1fce   : > { %4848 = vrot.lane.b32.xlu1 %v12315_v13, %s7549_s29 }
0x1fcf   : > { %7383 = vset.pattern.permute.xlu1 %v7552_v62 }
0x202e   : > { %v10274_v29 = vpop.permute.xlu0 %4770  ;;  %v10276_v48 = vpop.permute.xlu1 %4772 }
0x202f   : > { %12322 = vst [vmem:[#allocation127_spill] sm:$0xff] %v10274_v29  ;;  %12323 = vst [vmem:[#allocation128_spill] sm:$0xff] %v10276_v48 }
0x2032   : > { %v10278_v45 = vpop.permute.xlu0 %4774 }
0x2033   : > { %12324 = vst [vmem:[#allocation129_spill] sm:$0xff] %v10278_v45 }
0x203f   : > { %v10280_v43 = vpop.permute.xlu1 %4783 }
0x2040   : > { %12325 = vst [vmem:[#allocation130_spill] sm:$0xff] %v10280_v43 }
0x2043   : > { %v10282_v38 = vpop.permute.xlu0 %4799 }
0x2044   : > { %12326 = vst [vmem:[#allocation131_spill] sm:$0xff] %v10282_v38  ;;  %v10284_v52 = vpop.permute.xlu1 %4815 }
0x2045   : > { %12327 = vst [vmem:[#allocation132_spill] sm:$0xff] %v10284_v52 }
0x2047   : > { %v4847_v13 = vpop.permute.xlu0 %4846 }
0x2048   : > { %v4855_v62 = vmul.f32 %v4847_v13, %v9552_v53 }
0x2049   : > { %v10287_v5 = vpop.permute.xlu1 %4831 }
0x204a   : > { %12328 = vst [vmem:[#allocation133_spill] sm:$0xff] %v10287_v5  ;;  %v4865_v23 = vrot.slane %v4855_v62, %v12186_v36 }
0x204b   : > { %v4860_v32 = vpop.permute.xlu0 %4859 }
0x204c   : > { %v4874_v29 = vmul.f32 %v4865_v23, %v4860_v32  ;;  %v7554_v23 = vmov 54  }
0x204d   : > { %v4849_v20 = vpop.permute.xlu1 %4848 }
0x204e   : > { %v4851_v48 = vsel %vm4850_vm4, %v4847_v13, %v4849_v20  ;;  %v4857_v45 = vmul.f32 %v4849_v20, %v9546_v22  ;;  %4880 = vrot.lane.b32.xlu1 %v4874_v29, %s7553_s18  ;;  %v4900_v29 = vrot.slane %v4855_v62, %v12182_v58  ;;  %vm4227_vm4 = vcmask 891904  }
0x204f   : > { %v4856_v38 = vmul.f32 %v4851_v48, %v9549_v59 }
0x2050   : > { %v4873_v52 = vrot.slane %v4857_v45, %v12186_v36 }
0x2051   : > { %v4869_v43 = vrot.slane %v4856_v38, %v12186_v36  ;;  %v4904_v48 = vrot.slane %v4856_v38, %v12182_v58 }
0x2052   : > { %v4876_v50 = vmul.f32 %v4873_v52, %v4860_v32 }
0x2053   : > { %v4875_v5 = vmul.f32 %v4869_v43, %v4860_v32  ;;  %v4908_v32 = vrot.slane %v4857_v45, %v12182_v58 }
0x2054   : > { %4884 = vrot.lane.b32.xlu0 %v4876_v50, %s7553_s18 }
0x2055   : > { %4882 = vrot.lane.b32.xlu1 %v4875_v5, %s7553_s18  ;;  %v7555_v5 = vmov 55  }
0x2059   : > { %4894 = vperm.xlu1 %7383, %v9918_v0  }
0x205d   : > { %7384 = vset.pattern.permute.xlu1 %v7554_v23  ;;  %v4934_v23 = vrot.slane %v4855_v62, %v11967_v18 }
0x20c0   : > { %v10298_v20 = vpop.permute.xlu1 %4880 }
0x20c1   : > { %12329 = vst [vmem:[#allocation134_spill] sm:$0xff] %v10298_v20 }
0x20c7   : > { %v10300_v13 = vpop.permute.xlu1 %4882 }
0x20c8   : > { %12330 = vst [vmem:[#allocation135_spill] sm:$0xff] %v10300_v13 }
0x20d8   : > { %v4895_v31 = vpop.permute.xlu1 %4894 }
0x20d9   : > { %v4909_v60 = vmul.f32 %v4900_v29, %v4895_v31  ;;  %v4910_v52 = vmul.f32 %v4904_v48, %v4895_v31  ;;  %v4911_v50 = vmul.f32 %v4908_v32, %v4895_v31  ;;  %v4938_v29 = vrot.slane %v4856_v38, %v11967_v18 }
0x20da   : > { %v7556_v31 = vmov 56  }
0x20db   : > { %4917 = vrot.lane.b32.xlu1 %v4910_v52, %s7553_s18  ;;  %4915 = vrot.lane.b32.xlu0 %v4909_v60, %s7553_s18  ;;  %v4942_v52 = vrot.slane %v4857_v45, %v11967_v18 }
0x20df   : > { %4928 = vperm.xlu1 %7384, %v9918_v0   ;;  %4919 = vrot.lane.b32.xlu0 %v4911_v50, %s7553_s18  ;;  %v4968_v50 = vrot.slane %v4855_v62, %v7844_v41 }
0x20e3   : > { %7385 = vset.pattern.permute.xlu1 %v7555_v5  ;;  %v4972_v5 = vrot.slane %v4856_v38, %v7844_v41  ;;  %v12334_v38 = vld [vmem:[#allocation31_spill] sm:$0xff] }
0x214d   : > { %v10309_v43 = vpop.permute.xlu1 %4917 }
0x214e   : > { %12331 = vst [vmem:[#allocation136_spill] sm:$0xff] %v10309_v43 }
0x215e   : > { %v4929_v48 = vpop.permute.xlu1 %4928 }
0x215f   : > { %v4943_v20 = vmul.f32 %v4934_v23, %v4929_v48  ;;  %v4944_v13 = vmul.f32 %v4938_v29, %v4929_v48  ;;  %v4945_v60 = vmul.f32 %v4942_v52, %v4929_v48  ;;  %v7557_v48 = vmov 57   ;;  %v12333_v52 = vld [vmem:[#allocation27_spill] sm:$0xff] }
0x2160   : > { %v4995_v62 = vmul.f32 %v9552_v53, %v12333_v52  ;;  %v7558_v52 = vmov 58  }
0x2161   : > { %4951 = vrot.lane.b32.xlu1 %v4944_v13, %s7553_s18  ;;  %4949 = vrot.lane.b32.xlu0 %v4943_v20, %s7553_s18  ;;  %v4976_v13 = vrot.slane %v4857_v45, %v7844_v41  ;;  %v12336_v45 = vld [vmem:[#allocation36_spill] sm:$0xff] }
0x2165   : > { %4962 = vperm.xlu1 %7385, %v9918_v0   ;;  %4953 = vrot.lane.b32.xlu0 %v4945_v60, %s7553_s18  ;;  %v4996_v60 = vmul.f32 %v9549_v59, %v12334_v38 }
0x2169   : > { %7386 = vset.pattern.permute.xlu1 %v7556_v31 }
0x21d3   : > { %v10318_v32 = vpop.permute.xlu1 %4951 }
0x21d4   : > { %12332 = vst [vmem:[#allocation137_spill] sm:$0xff] %v10318_v32 }
0x21e4   : > { %v4963_v23 = vpop.permute.xlu1 %4962 }
0x21e5   : > { %v4977_v29 = vmul.f32 %v4968_v50, %v4963_v23  ;;  %v4978_v43 = vmul.f32 %v4972_v5, %v4963_v23  ;;  %v4979_v20 = vmul.f32 %v4976_v13, %v4963_v23  ;;  %v5005_v50 = vrot.slane %v4995_v62, %v12186_v36 }
0x21e6   : > { %v5009_v5 = vrot.slane %v4996_v60, %v12186_v36 }
0x21e7   : > { %4985 = vrot.lane.b32.xlu1 %v4978_v43, %s7553_s18  ;;  %4983 = vrot.lane.b32.xlu0 %v4977_v29, %s7553_s18  ;;  %v4997_v43 = vmul.f32 %v9546_v22, %v12336_v45  ;;  %v5039_v45 = vrot.slane %v4995_v62, %v12182_v58 }
0x21eb   : > { %4999 = vperm.xlu1 %7386, %v9918_v0   ;;  %4987 = vrot.lane.b32.xlu0 %v4979_v20, %s7553_s18  ;;  %v5013_v20 = vrot.slane %v4997_v43, %v12186_v36 }
0x21ef   : > { %7387 = vset.pattern.permute.xlu1 %v7557_v48 }
0x2259   : > { %v10331_v31 = vpop.permute.xlu1 %4985 }
0x225a   : > { %12335 = vst [vmem:[#allocation27_spill] sm:$0xff] %v10331_v31 }
0x226a   : > { %v5000_v23 = vpop.permute.xlu1 %4999 }
0x226b   : > { %v5014_v29 = vmul.f32 %v5005_v50, %v5000_v23  ;;  %v5015_v13 = vmul.f32 %v5009_v5, %v5000_v23  ;;  %v5016_v48 = vmul.f32 %v5013_v20, %v5000_v23  ;;  %v5043_v50 = vrot.slane %v4996_v60, %v12182_v58  ;;  %v10352_v23 = vld [vmem:[%s11607_s6] sm:$0xff] }
0x226d   : > { %5022 = vrot.lane.b32.xlu1 %v5015_v13, %s7521_s27  ;;  %5020 = vrot.lane.b32.xlu0 %v5014_v29, %s7521_s27  ;;  %v5047_v13 = vrot.slane %v4997_v43, %v12182_v58  ;;  %v7559_v29 = vmov 59  }
0x2271   : > { %5033 = vperm.xlu1 %7387, %v9918_v0   ;;  %5024 = vrot.lane.b32.xlu0 %v5016_v48, %s7521_s27  ;;  %v5073_v48 = vrot.slane %v4995_v62, %v11967_v18 }
0x2275   : > { %7388 = vset.pattern.permute.xlu1 %v7558_v52 }
0x22df   : > { %v10342_v38 = vpop.permute.xlu1 %5022 }
0x22e0   : > { %12337 = vst [vmem:[#allocation31_spill] sm:$0xff] %v10342_v38 }
0x22f0   : > { %v5034_v5 = vpop.permute.xlu1 %5033 }
0x22f1   : > { %v5048_v31 = vmul.f32 %v5039_v45, %v5034_v5  ;;  %v5049_v32 = vmul.f32 %v5043_v50, %v5034_v5  ;;  %v5050_v0 = vmul.f32 %v5047_v13, %v5034_v5  ;;  %v5081_v50 = vrot.slane %v4997_v43, %v11967_v18 }
0x22f2   : > { %v7560_v13 = vmov 60  }
0x22f3   : > { %5056 = vrot.lane.b32.xlu1 %v5049_v32, %s7521_s27  ;;  %5054 = vrot.lane.b32.xlu0 %v5048_v31, %s7521_s27  ;;  %v5077_v32 = vrot.slane %v4996_v60, %v11967_v18 }
0x22f7   : > { %5067 = vperm.xlu1 %7388, %v10352_v23   ;;  %5058 = vrot.lane.b32.xlu0 %v5050_v0, %s7521_s27 }
0x22fb   : > { %7389 = vset.pattern.permute.xlu1 %v7559_v29  ;;  %v5107_v29 = vrot.slane %v4995_v62, %v7844_v41 }
0x2365   : > { %v10356_v20 = vpop.permute.xlu1 %5056 }
0x2366   : > { %12338 = vst [vmem:[#allocation36_spill] sm:$0xff] %v10356_v20 }
0x2376   : > { %v5068_v52 = vpop.permute.xlu1 %5067 }
0x2377   : > { %v5082_v31 = vmul.f32 %v5073_v48, %v5068_v52  ;;  %v5083_v45 = vmul.f32 %v5077_v32, %v5068_v52  ;;  %v5084_v5 = vmul.f32 %v5081_v50, %v5068_v52  ;;  %v5111_v48 = vrot.slane %v4996_v60, %v7844_v41 }
0x2378   : > { %v5115_v52 = vrot.slane %v4997_v43, %v7844_v41  ;;  %v7562_v60 = vmov 61  }
0x2379   : > { %5090 = vrot.lane.b32.xlu1 %v5083_v45, %s7521_s27  ;;  %5088 = vrot.lane.b32.xlu0 %v5082_v31, %s7521_s27  ;;  %v7096_v45 = vld [vmem:[%s11601_s0 + $0x24] ss:$8 sm:$0x3] }
0x237a   : > { %v5140_v50 = vrot.slane %v7096_v45, %v12186_v36  ;;  %v5144_v62 = vrot.slane %v7096_v45, %v12182_v58 }
0x237d   : > { %5101 = vperm.xlu1 %7389, %v10352_v23   ;;  %5092 = vrot.lane.b32.xlu0 %v5084_v5, %s7521_s27 }
0x2381   : > { %7390 = vset.pattern.permute.xlu1 %v7560_v13  ;;  %v10379_v13 = vpop.permute.xlu0 %4884 }
0x2382   : > { %12340 = vst [vmem:[#allocation139_spill] sm:$0xff] %v10379_v13 }
0x2385   : > { %v10381_v43 = vpop.permute.xlu0 %4915 }
0x2386   : > { %12341 = vst [vmem:[#allocation140_spill] sm:$0xff] %v10381_v43 }
0x23eb   : > { %v10365_v0 = vpop.permute.xlu1 %5090 }
0x23ec   : > { %12339 = vst [vmem:[#allocation138_spill] sm:$0xff] %v10365_v0 }
0x23fc   : > { %v5102_v32 = vpop.permute.xlu1 %5101 }
0x23fd   : > { %v5116_v20 = vmul.f32 %v5107_v29, %v5102_v32  ;;  %v5117_v31 = vmul.f32 %v5111_v48, %v5102_v32  ;;  %v5118_v5 = vmul.f32 %v5115_v52, %v5102_v32  ;;  %v10383_v29 = vpop.permute.xlu0 %4919 }
0x23fe   : > { %12342 = vst [vmem:[#allocation141_spill] sm:$0xff] %v10383_v29 }
0x23ff   : > { %5124 = vrot.lane.b32.xlu1 %v5117_v31, %s7521_s27  ;;  %5122 = vrot.lane.b32.xlu0 %v5116_v20, %s7521_s27 }
0x2401   : > { %v10385_v20 = vpop.permute.xlu0 %4949 }
0x2402   : > { %12343 = vst [vmem:[#allocation142_spill] sm:$0xff] %v10385_v20 }
0x2403   : > { %5145 = vrot.lane.b32.xlu1 %v5140_v50, %s7561_s19  ;;  %5126 = vrot.lane.b32.xlu0 %v5118_v5, %s7521_s27  ;;  %s7563_s27 = smov 80  }
0x2405   : > { %v10387_v48 = vpop.permute.xlu0 %4953 }
0x2406   : > { %12344 = vst [vmem:[#allocation143_spill] sm:$0xff] %v10387_v48 }
0x2407   : > { %5158 = vperm.xlu1 %7390, %v10352_v23   ;;  %5147 = vrot.lane.b32.xlu0 %v5144_v62, %s7561_s19 }
0x2409   : > { %v10389_v32 = vpop.permute.xlu0 %4983 }
0x240a   : > { %12345 = vst [vmem:[#allocation144_spill] sm:$0xff] %v10389_v32 }
0x240b   : > { %7391 = vset.pattern.permute.xlu1 %v7562_v60 }
0x240d   : > { %v10391_v31 = vpop.permute.xlu0 %4987 }
0x240e   : > { %12346 = vst [vmem:[#allocation145_spill] sm:$0xff] %v10391_v31 }
0x2411   : > { %v10393_v45 = vpop.permute.xlu0 %5020 }
0x2412   : > { %12347 = vst [vmem:[#allocation146_spill] sm:$0xff] %v10393_v45 }
0x2415   : > { %v10395_v52 = vpop.permute.xlu0 %5024 }
0x2416   : > { %12348 = vst [vmem:[#allocation147_spill] sm:$0xff] %v10395_v52 }
0x2419   : > { %v10397_v50 = vpop.permute.xlu0 %5054 }
0x241a   : > { %12349 = vst [vmem:[#allocation148_spill] sm:$0xff] %v10397_v50 }
0x241d   : > { %v10399_v5 = vpop.permute.xlu0 %5058 }
0x241e   : > { %12350 = vst [vmem:[#allocation149_spill] sm:$0xff] %v10399_v5 }
0x2421   : > { %v10401_v62 = vpop.permute.xlu0 %5088 }
0x2422   : > { %12351 = vst [vmem:[#allocation150_spill] sm:$0xff] %v10401_v62 }
0x2425   : > { %v10403_v60 = vpop.permute.xlu0 %5092 }
0x2426   : > { %12352 = vst [vmem:[#allocation151_spill] sm:$0xff] %v10403_v60 }
0x2471   : > { %v10405_v29 = vpop.permute.xlu0 %5122  ;;  %v10409_v48 = vpop.permute.xlu1 %5124 }
0x2472   : > { %12353 = vst [vmem:[#allocation152_spill] sm:$0xff] %v10405_v29  ;;  %12355 = vst [vmem:[#allocation154_spill] sm:$0xff] %v10409_v48 }
0x2475   : > { %v10407_v13 = vpop.permute.xlu0 %5126  ;;  %v5146_v0 = vpop.permute.xlu1 %5145 }
0x2476   : > { %12354 = vst [vmem:[#allocation153_spill] sm:$0xff] %v10407_v13  ;;  %v5154_v52 = vmul.f32 %v5146_v0, %v9552_v53 }
0x2478   : > { %v5164_v62 = vrot.slane %v5154_v52, %v12186_v36 }
0x2479   : > { %v5148_v31 = vpop.permute.xlu0 %5147 }
0x247a   : > { %v5150_v45 = vsel %vm5149_vm6, %v5146_v0, %v5148_v31  ;;  %v5156_v5 = vmul.f32 %v5148_v31, %v9546_v22  ;;  %v7564_v0 = vmov 62   ;;  %vm4387_vm6 = vcmask 883712  }
0x247b   : > { %v5155_v50 = vmul.f32 %v5150_v45, %v9549_v59  ;;  %v5199_v45 = vrot.slane %v5154_v52, %v12182_v58 }
0x247c   : > { %v5172_v13 = vrot.slane %v5156_v5, %v12186_v36 }
0x247d   : > { %v5168_v60 = vrot.slane %v5155_v50, %v12186_v36 }
0x2486   : > { %v5159_v38 = vpop.permute.xlu1 %5158 }
0x2487   : > { %v5173_v29 = vmul.f32 %v5164_v62, %v5159_v38  ;;  %v5174_v32 = vmul.f32 %v5168_v60, %v5159_v38  ;;  %v5175_v48 = vmul.f32 %v5172_v13, %v5159_v38  ;;  %v5203_v62 = vrot.slane %v5155_v50, %v12182_v58 }
0x2488   : > { %v7565_v13 = vmov 63  }
0x2489   : > { %5179 = vrot.lane.b32.xlu0 %v5173_v29, %s7563_s27  ;;  %5181 = vrot.lane.b32.xlu1 %v5174_v32, %s7563_s27  ;;  %v5207_v29 = vrot.slane %v5156_v5, %v12182_v58  ;;  %v5233_v32 = vrot.slane %v5154_v52, %v11967_v18 }
0x248d   : > { %5183 = vrot.lane.b32.xlu0 %v5175_v48, %s7563_s27  ;;  %5193 = vperm.xlu1 %7391, %v10352_v23  }
0x2491   : > { %7392 = vset.pattern.permute.xlu1 %v7564_v0  ;;  %v5237_v0 = vrot.slane %v5155_v50, %v11967_v18 }
0x24fb   : > { %v10421_v31 = vpop.permute.xlu1 %5181 }
0x24fc   : > { %12356 = vst [vmem:[#allocation155_spill] sm:$0xff] %v10421_v31 }
0x250c   : > { %v5194_v60 = vpop.permute.xlu1 %5193 }
0x250d   : > { %v5208_v20 = vmul.f32 %v5199_v45, %v5194_v60  ;;  %v5209_v43 = vmul.f32 %v5203_v62, %v5194_v60  ;;  %v5210_v38 = vmul.f32 %v5207_v29, %v5194_v60  ;;  %v7566_v60 = vmov 64  }
0x250f   : > { %5216 = vrot.lane.b32.xlu1 %v5209_v43, %s7563_s27  ;;  %5214 = vrot.lane.b32.xlu0 %v5208_v20, %s7563_s27  ;;  %v5241_v43 = vrot.slane %v5156_v5, %v11967_v18 }
0x2513   : > { %5227 = vperm.xlu1 %7392, %v10352_v23   ;;  %5218 = vrot.lane.b32.xlu0 %v5210_v38, %s7563_s27  ;;  %v5267_v38 = vrot.slane %v5154_v52, %v7844_v41  ;;  %v12360_v52 = vld [vmem:[#allocation21_spill] sm:$0xff] }
0x2517   : > { %7393 = vset.pattern.permute.xlu1 %v7565_v13  ;;  %v5271_v13 = vrot.slane %v5155_v50, %v7844_v41  ;;  %v7568_v50 = vmov 65  }
0x2581   : > { %v10430_v48 = vpop.permute.xlu1 %5216 }
0x2582   : > { %12357 = vst [vmem:[#allocation156_spill] sm:$0xff] %v10430_v48 }
0x2592   : > { %v5228_v45 = vpop.permute.xlu1 %5227 }
0x2593   : > { %v5242_v62 = vmul.f32 %v5233_v32, %v5228_v45  ;;  %v5243_v31 = vmul.f32 %v5237_v0, %v5228_v45  ;;  %v5244_v20 = vmul.f32 %v5241_v43, %v5228_v45  ;;  %v10450_v43 = vpop.permute.xlu0 %5179 }
0x2595   : > { %5250 = vrot.lane.b32.xlu1 %v5243_v31, %s7563_s27  ;;  %5248 = vrot.lane.b32.xlu0 %v5242_v62, %s7563_s27  ;;  %v5275_v31 = vrot.slane %v5156_v5, %v7844_v41  ;;  %v12359_v62 = vld [vmem:[#allocation20_spill] sm:$0xff] }
0x2596   : > { %12361 = vst [vmem:[#allocation20_spill] sm:$0xff] %v10450_v43 }
0x2599   : > { %5261 = vperm.xlu1 %7393, %v10352_v23   ;;  %5252 = vrot.lane.b32.xlu0 %v5244_v20, %s7563_s27  ;;  %v10452_v20 = vpop.permute.xlu0 %5183 }
0x259a   : > { %12362 = vst [vmem:[#allocation21_spill] sm:$0xff] %v10452_v20 }
0x259d   : > { %7394 = vset.pattern.permute.xlu1 %v7566_v60  ;;  %v10454_v5 = vpop.permute.xlu0 %5214 }
0x259e   : > { %12363 = vst [vmem:[#allocation158_spill] sm:$0xff] %v10454_v5 }
0x2607   : > { %v10439_v29 = vpop.permute.xlu1 %5250 }
0x2608   : > { %12358 = vst [vmem:[#allocation157_spill] sm:$0xff] %v10439_v29 }
0x2618   : > { %v5262_v32 = vpop.permute.xlu1 %5261 }
0x2619   : > { %v5276_v0 = vmul.f32 %v5267_v38, %v5262_v32  ;;  %v5277_v48 = vmul.f32 %v5271_v13, %v5262_v32  ;;  %v5278_v45 = vmul.f32 %v5275_v31, %v5262_v32 }
0x261b   : > { %5284 = vrot.lane.b32.xlu1 %v5277_v48, %s7563_s27  ;;  %5282 = vrot.lane.b32.xlu0 %v5276_v0, %s7563_s27  ;;  %v10456_v48 = vpop.permute.xlu0 %5218 }
0x261c   : > { %12364 = vst [vmem:[#allocation159_spill] sm:$0xff] %v10456_v48 }
0x261f   : > { %5294 = vrot.lane.b32.xlu1 %v12359_v62, %s7567_s28  ;;  %5286 = vrot.lane.b32.xlu0 %v5278_v45, %s7563_s27  ;;  %v10458_v60 = vpop.permute.xlu0 %5248 }
0x2620   : > { %12365 = vst [vmem:[#allocation160_spill] sm:$0xff] %v10458_v60 }
0x2623   : > { %5307 = vperm.xlu1 %7394, %v10352_v23   ;;  %5296 = vrot.lane.b32.xlu0 %v12360_v52, %s7567_s28  ;;  %v10460_v38 = vpop.permute.xlu0 %5252  ;;  %s7595_s28 = smov 65  }
0x2624   : > { %12366 = vst [vmem:[#allocation161_spill] sm:$0xff] %v10460_v38 }
0x2627   : > { %7395 = vset.pattern.permute.xlu1 %v7568_v50 }
0x268d   : > { %v10462_v13 = vpop.permute.xlu0 %5282  ;;  %v10466_v0 = vpop.permute.xlu1 %5284 }
0x268e   : > { %12367 = vst [vmem:[#allocation162_spill] sm:$0xff] %v10462_v13  ;;  %12369 = vst [vmem:[#allocation164_spill] sm:$0xff] %v10466_v0 }
0x2691   : > { %v10464_v32 = vpop.permute.xlu0 %5286  ;;  %v5295_v45 = vpop.permute.xlu1 %5294 }
0x2692   : > { %12368 = vst [vmem:[#allocation163_spill] sm:$0xff] %v10464_v32  ;;  %v5303_v52 = vmul.f32 %v5295_v45, %v9552_v53 }
0x2694   : > { %v5313_v20 = vrot.slane %v5303_v52, %v12186_v36 }
0x2695   : > { %v5297_v31 = vpop.permute.xlu0 %5296 }
0x2696   : > { %v5299_v62 = vsel %vm5298_vm7, %v5295_v45, %v5297_v31  ;;  %v5305_v48 = vmul.f32 %v5297_v31, %v9546_v22  ;;  %v7570_v31 = vmov 66   ;;  %vm12461_vm7 = vcmask 777216  }
0x2697   : > { %v5304_v50 = vmul.f32 %v5299_v62, %v9549_v59  ;;  %v5348_v62 = vrot.slane %v5303_v52, %v12182_v58 }
0x2698   : > { %v5321_v32 = vrot.slane %v5305_v48, %v12186_v36 }
0x2699   : > { %v5317_v38 = vrot.slane %v5304_v50, %v12186_v36 }
0x26a2   : > { %v5308_v60 = vpop.permute.xlu1 %5307 }
0x26a3   : > { %v5322_v13 = vmul.f32 %v5313_v20, %v5308_v60  ;;  %v5323_v29 = vmul.f32 %v5317_v38, %v5308_v60  ;;  %v5324_v0 = vmul.f32 %v5321_v32, %v5308_v60  ;;  %v5352_v20 = vrot.slane %v5304_v50, %v12182_v58 }
0x26a4   : > { %v7571_v60 = vmov 67  }
0x26a5   : > { %5328 = vrot.lane.b32.xlu0 %v5322_v13, %s7569_s23  ;;  %5330 = vrot.lane.b32.xlu1 %v5323_v29, %s7569_s23  ;;  %v5356_v13 = vrot.slane %v5305_v48, %v12182_v58 }
0x26a9   : > { %5332 = vrot.lane.b32.xlu0 %v5324_v0, %s7569_s23  ;;  %5342 = vperm.xlu1 %7395, %v10352_v23   ;;  %v5382_v0 = vrot.slane %v5303_v52, %v11967_v18 }
0x26ad   : > { %7396 = vset.pattern.permute.xlu1 %v7570_v31  ;;  %v5386_v31 = vrot.slane %v5304_v50, %v11967_v18 }
0x2717   : > { %v10478_v45 = vpop.permute.xlu1 %5330 }
0x2718   : > { %12370 = vst [vmem:[#allocation165_spill] sm:$0xff] %v10478_v45 }
0x2728   : > { %v5343_v38 = vpop.permute.xlu1 %5342 }
0x2729   : > { %v5357_v5 = vmul.f32 %v5348_v62, %v5343_v38  ;;  %v5358_v43 = vmul.f32 %v5352_v20, %v5343_v38  ;;  %v5359_v29 = vmul.f32 %v5356_v13, %v5343_v38  ;;  %v7572_v38 = vmov 68  }
0x272b   : > { %5365 = vrot.lane.b32.xlu1 %v5358_v43, %s7569_s23  ;;  %5363 = vrot.lane.b32.xlu0 %v5357_v5, %s7569_s23  ;;  %v5390_v43 = vrot.slane %v5305_v48, %v11967_v18 }
0x272f   : > { %5376 = vperm.xlu1 %7396, %v10352_v23   ;;  %5367 = vrot.lane.b32.xlu0 %v5359_v29, %s7569_s23  ;;  %v5416_v29 = vrot.slane %v5303_v52, %v7844_v41  ;;  %v12374_v52 = vld [vmem:[#allocation34_spill] sm:$0xff] }
0x2733   : > { %7397 = vset.pattern.permute.xlu1 %v7571_v60  ;;  %v5420_v60 = vrot.slane %v5304_v50, %v7844_v41  ;;  %v7574_v50 = vmov 69  }
0x279d   : > { %v10487_v32 = vpop.permute.xlu1 %5365 }
0x279e   : > { %12371 = vst [vmem:[#allocation166_spill] sm:$0xff] %v10487_v32 }
0x27ae   : > { %v5377_v62 = vpop.permute.xlu1 %5376 }
0x27af   : > { %v5391_v20 = vmul.f32 %v5382_v0, %v5377_v62  ;;  %v5392_v45 = vmul.f32 %v5386_v31, %v5377_v62  ;;  %v5393_v5 = vmul.f32 %v5390_v43, %v5377_v62  ;;  %v10507_v43 = vpop.permute.xlu0 %5328 }
0x27b1   : > { %5399 = vrot.lane.b32.xlu1 %v5392_v45, %s7569_s23  ;;  %5397 = vrot.lane.b32.xlu0 %v5391_v20, %s7569_s23  ;;  %v5424_v45 = vrot.slane %v5305_v48, %v7844_v41  ;;  %v12373_v20 = vld [vmem:[#allocation33_spill] sm:$0xff] }
0x27b2   : > { %12375 = vst [vmem:[#allocation33_spill] sm:$0xff] %v10507_v43 }
0x27b5   : > { %5410 = vperm.xlu1 %7397, %v10352_v23   ;;  %5401 = vrot.lane.b32.xlu0 %v5393_v5, %s7569_s23  ;;  %v10509_v5 = vpop.permute.xlu0 %5332 }
0x27b6   : > { %12376 = vst [vmem:[#allocation34_spill] sm:$0xff] %v10509_v5 }
0x27b9   : > { %7398 = vset.pattern.permute.xlu1 %v7572_v38  ;;  %v10511_v48 = vpop.permute.xlu0 %5363 }
0x27ba   : > { %12377 = vst [vmem:[#allocation168_spill] sm:$0xff] %v10511_v48 }
0x2823   : > { %v10496_v13 = vpop.permute.xlu1 %5399 }
0x2824   : > { %12372 = vst [vmem:[#allocation167_spill] sm:$0xff] %v10496_v13 }
0x2834   : > { %v5411_v0 = vpop.permute.xlu1 %5410 }
0x2835   : > { %v5425_v31 = vmul.f32 %v5416_v29, %v5411_v0  ;;  %v5426_v32 = vmul.f32 %v5420_v60, %v5411_v0  ;;  %v5427_v62 = vmul.f32 %v5424_v45, %v5411_v0 }
0x2837   : > { %5433 = vrot.lane.b32.xlu1 %v5426_v32, %s7569_s23  ;;  %5431 = vrot.lane.b32.xlu0 %v5425_v31, %s7569_s23  ;;  %v10513_v32 = vpop.permute.xlu0 %5367 }
0x2838   : > { %12378 = vst [vmem:[#allocation169_spill] sm:$0xff] %v10513_v32 }
0x283b   : > { %5443 = vrot.lane.b32.xlu1 %v12373_v20, %s7573_s24  ;;  %5435 = vrot.lane.b32.xlu0 %v5427_v62, %s7569_s23  ;;  %v10515_v38 = vpop.permute.xlu0 %5397  ;;  %s12681_s23 = smov 62  }
0x283c   : > { %12379 = vst [vmem:[#allocation170_spill] sm:$0xff] %v10515_v38 }
0x283f   : > { %5456 = vperm.xlu1 %7398, %v10352_v23   ;;  %5445 = vrot.lane.b32.xlu0 %v12374_v52, %s7573_s24  ;;  %v10517_v29 = vpop.permute.xlu0 %5401 }
0x2840   : > { %12380 = vst [vmem:[#allocation171_spill] sm:$0xff] %v10517_v29 }
0x2843   : > { %7399 = vset.pattern.permute.xlu1 %v7574_v50 }
0x28a9   : > { %v10519_v60 = vpop.permute.xlu0 %5431  ;;  %v10523_v31 = vpop.permute.xlu1 %5433 }
0x28aa   : > { %12381 = vst [vmem:[#allocation172_spill] sm:$0xff] %v10519_v60  ;;  %12383 = vst [vmem:[#allocation174_spill] sm:$0xff] %v10523_v31 }
0x28ad   : > { %v10521_v0 = vpop.permute.xlu0 %5435  ;;  %v5444_v62 = vpop.permute.xlu1 %5443 }
0x28ae   : > { %12382 = vst [vmem:[#allocation173_spill] sm:$0xff] %v10521_v0  ;;  %v5452_v52 = vmul.f32 %v5444_v62, %v9552_v53 }
0x28b0   : > { %v5462_v5 = vrot.slane %v5452_v52, %v12186_v36 }
0x28b1   : > { %v5446_v45 = vpop.permute.xlu0 %5445 }
0x28b2   : > { %v5448_v20 = vsel %vm5447_vm13, %v5444_v62, %v5446_v45  ;;  %v5454_v32 = vmul.f32 %v5446_v45, %v9546_v22  ;;  %v7576_v45 = vmov 70   ;;  %vm12464_vm13 = vmmov %vm12461_vm7 }
0x28b3   : > { %v5453_v50 = vmul.f32 %v5448_v20, %v9549_v59  ;;  %v5497_v20 = vrot.slane %v5452_v52, %v12182_v58 }
0x28b4   : > { %v5470_v0 = vrot.slane %v5454_v32, %v12186_v36 }
0x28b5   : > { %v5466_v29 = vrot.slane %v5453_v50, %v12186_v36 }
0x28be   : > { %v5457_v38 = vpop.permute.xlu1 %5456 }
0x28bf   : > { %v5471_v60 = vmul.f32 %v5462_v5, %v5457_v38  ;;  %v5472_v13 = vmul.f32 %v5466_v29, %v5457_v38  ;;  %v5473_v31 = vmul.f32 %v5470_v0, %v5457_v38  ;;  %v5501_v5 = vrot.slane %v5453_v50, %v12182_v58 }
0x28c0   : > { %v7577_v38 = vmov 71  }
0x28c1   : > { %5477 = vrot.lane.b32.xlu0 %v5471_v60, %s7575_s17  ;;  %5479 = vrot.lane.b32.xlu1 %v5472_v13, %s7575_s17  ;;  %v5505_v60 = vrot.slane %v5454_v32, %v12182_v58 }
0x28c5   : > { %5481 = vrot.lane.b32.xlu0 %v5473_v31, %s7575_s17  ;;  %5491 = vperm.xlu1 %7399, %v10352_v23   ;;  %v5531_v31 = vrot.slane %v5452_v52, %v11967_v18 }
0x28c9   : > { %7400 = vset.pattern.permute.xlu1 %v7576_v45  ;;  %v5535_v45 = vrot.slane %v5453_v50, %v11967_v18 }
0x2933   : > { %v10535_v62 = vpop.permute.xlu1 %5479 }
0x2934   : > { %12384 = vst [vmem:[#allocation175_spill] sm:$0xff] %v10535_v62 }
0x2944   : > { %v5492_v29 = vpop.permute.xlu1 %5491 }
0x2945   : > { %v5506_v48 = vmul.f32 %v5497_v20, %v5492_v29  ;;  %v5507_v43 = vmul.f32 %v5501_v5, %v5492_v29  ;;  %v5508_v13 = vmul.f32 %v5505_v60, %v5492_v29  ;;  %v7578_v29 = vmov 72  }
0x2947   : > { %5514 = vrot.lane.b32.xlu1 %v5507_v43, %s7575_s17  ;;  %5512 = vrot.lane.b32.xlu0 %v5506_v48, %s7575_s17  ;;  %v5539_v43 = vrot.slane %v5454_v32, %v11967_v18 }
0x294b   : > { %5525 = vperm.xlu1 %7400, %v10352_v23   ;;  %5516 = vrot.lane.b32.xlu0 %v5508_v13, %s7575_s17  ;;  %v5565_v13 = vrot.slane %v5452_v52, %v7844_v41  ;;  %v12388_v52 = vld [vmem:[#allocation48_spill] sm:$0xff] }
0x294f   : > { %7401 = vset.pattern.permute.xlu1 %v7577_v38  ;;  %v5569_v38 = vrot.slane %v5453_v50, %v7844_v41  ;;  %v7580_v50 = vmov 73  }
0x29b9   : > { %v10544_v0 = vpop.permute.xlu1 %5514 }
0x29ba   : > { %12385 = vst [vmem:[#allocation176_spill] sm:$0xff] %v10544_v0 }
0x29ca   : > { %v5526_v20 = vpop.permute.xlu1 %5525 }
0x29cb   : > { %v5540_v5 = vmul.f32 %v5531_v31, %v5526_v20  ;;  %v5541_v62 = vmul.f32 %v5535_v45, %v5526_v20  ;;  %v5542_v48 = vmul.f32 %v5539_v43, %v5526_v20  ;;  %v10564_v43 = vpop.permute.xlu0 %5477 }
0x29cd   : > { %5548 = vrot.lane.b32.xlu1 %v5541_v62, %s7575_s17  ;;  %5546 = vrot.lane.b32.xlu0 %v5540_v5, %s7575_s17  ;;  %v5573_v62 = vrot.slane %v5454_v32, %v7844_v41  ;;  %v12387_v5 = vld [vmem:[#allocation47_spill] sm:$0xff] }
0x29ce   : > { %12389 = vst [vmem:[#allocation47_spill] sm:$0xff] %v10564_v43 }
0x29d1   : > { %5559 = vperm.xlu1 %7401, %v10352_v23   ;;  %5550 = vrot.lane.b32.xlu0 %v5542_v48, %s7575_s17  ;;  %v10566_v48 = vpop.permute.xlu0 %5481 }
0x29d2   : > { %12390 = vst [vmem:[#allocation48_spill] sm:$0xff] %v10566_v48 }
0x29d5   : > { %7402 = vset.pattern.permute.xlu1 %v7578_v29  ;;  %v10568_v32 = vpop.permute.xlu0 %5512 }
0x29d6   : > { %12391 = vst [vmem:[#allocation178_spill] sm:$0xff] %v10568_v32 }
0x2a3f   : > { %v10553_v60 = vpop.permute.xlu1 %5548 }
0x2a40   : > { %12386 = vst [vmem:[#allocation177_spill] sm:$0xff] %v10553_v60 }
0x2a50   : > { %v5560_v31 = vpop.permute.xlu1 %5559 }
0x2a51   : > { %v5574_v45 = vmul.f32 %v5565_v13, %v5560_v31  ;;  %v5575_v0 = vmul.f32 %v5569_v38, %v5560_v31  ;;  %v5576_v20 = vmul.f32 %v5573_v62, %v5560_v31 }
0x2a53   : > { %5582 = vrot.lane.b32.xlu1 %v5575_v0, %s7575_s17  ;;  %5580 = vrot.lane.b32.xlu0 %v5574_v45, %s7575_s17  ;;  %v10570_v0 = vpop.permute.xlu0 %5516 }
0x2a54   : > { %12392 = vst [vmem:[#allocation179_spill] sm:$0xff] %v10570_v0 }
0x2a57   : > { %5592 = vrot.lane.b32.xlu1 %v12387_v5, %s7579_s30  ;;  %5584 = vrot.lane.b32.xlu0 %v5576_v20, %s7575_s17  ;;  %v10572_v29 = vpop.permute.xlu0 %5546 }
0x2a58   : > { %12393 = vst [vmem:[#allocation180_spill] sm:$0xff] %v10572_v29 }
0x2a5b   : > { %5605 = vperm.xlu1 %7402, %v10352_v23   ;;  %5594 = vrot.lane.b32.xlu0 %v12388_v52, %s7579_s30  ;;  %v10574_v13 = vpop.permute.xlu0 %5550  ;;  %s7605_s30 = smov 67  }
0x2a5c   : > { %12394 = vst [vmem:[#allocation181_spill] sm:$0xff] %v10574_v13 }
0x2a5f   : > { %7403 = vset.pattern.permute.xlu1 %v7580_v50 }
0x2ac5   : > { %v10576_v38 = vpop.permute.xlu0 %5580  ;;  %v10580_v45 = vpop.permute.xlu1 %5582 }
0x2ac6   : > { %12395 = vst [vmem:[#allocation182_spill] sm:$0xff] %v10576_v38  ;;  %12397 = vst [vmem:[#allocation184_spill] sm:$0xff] %v10580_v45 }
0x2ac9   : > { %v10578_v31 = vpop.permute.xlu0 %5584  ;;  %v5593_v20 = vpop.permute.xlu1 %5592 }
0x2aca   : > { %12396 = vst [vmem:[#allocation183_spill] sm:$0xff] %v10578_v31  ;;  %v5601_v52 = vmul.f32 %v5593_v20, %v9552_v53 }
0x2acc   : > { %v5611_v48 = vrot.slane %v5601_v52, %v12186_v36 }
0x2acd   : > { %v5595_v62 = vpop.permute.xlu0 %5594 }
0x2ace   : > { %v5597_v5 = vsel %vm5596_vm14, %v5593_v20, %v5595_v62  ;;  %v5603_v0 = vmul.f32 %v5595_v62, %v9546_v22  ;;  %v7582_v62 = vmov 74   ;;  %vm12467_vm14 = vmmov %vm12461_vm7 }
0x2acf   : > { %v5602_v50 = vmul.f32 %v5597_v5, %v9549_v59  ;;  %v5646_v5 = vrot.slane %v5601_v52, %v12182_v58 }
0x2ad0   : > { %v5619_v31 = vrot.slane %v5603_v0, %v12186_v36 }
0x2ad1   : > { %v5615_v13 = vrot.slane %v5602_v50, %v12186_v36 }
0x2ada   : > { %v5606_v29 = vpop.permute.xlu1 %5605 }
0x2adb   : > { %v5620_v38 = vmul.f32 %v5611_v48, %v5606_v29  ;;  %v5621_v60 = vmul.f32 %v5615_v13, %v5606_v29  ;;  %v5622_v45 = vmul.f32 %v5619_v31, %v5606_v29  ;;  %v5650_v48 = vrot.slane %v5602_v50, %v12182_v58 }
0x2adc   : > { %v7583_v29 = vmov 75  }
0x2add   : > { %5626 = vrot.lane.b32.xlu0 %v5620_v38, %s7581_s20  ;;  %5628 = vrot.lane.b32.xlu1 %v5621_v60, %s7581_s20  ;;  %v5654_v38 = vrot.slane %v5603_v0, %v12182_v58 }
0x2ae1   : > { %5630 = vrot.lane.b32.xlu0 %v5622_v45, %s7581_s20  ;;  %5640 = vperm.xlu1 %7403, %v10352_v23   ;;  %v5680_v45 = vrot.slane %v5601_v52, %v11967_v18 }
0x2ae5   : > { %7404 = vset.pattern.permute.xlu1 %v7582_v62  ;;  %v5684_v62 = vrot.slane %v5602_v50, %v11967_v18 }
0x2b4f   : > { %v10592_v20 = vpop.permute.xlu1 %5628 }
0x2b50   : > { %12398 = vst [vmem:[#allocation185_spill] sm:$0xff] %v10592_v20 }
0x2b60   : > { %v5641_v13 = vpop.permute.xlu1 %5640 }
0x2b61   : > { %v5655_v32 = vmul.f32 %v5646_v5, %v5641_v13  ;;  %v5656_v43 = vmul.f32 %v5650_v48, %v5641_v13  ;;  %v5657_v60 = vmul.f32 %v5654_v38, %v5641_v13  ;;  %v7584_v13 = vmov 76  }
0x2b63   : > { %5663 = vrot.lane.b32.xlu1 %v5656_v43, %s7581_s20  ;;  %5661 = vrot.lane.b32.xlu0 %v5655_v32, %s7581_s20  ;;  %v5688_v43 = vrot.slane %v5603_v0, %v11967_v18 }
0x2b67   : > { %5674 = vperm.xlu1 %7404, %v10352_v23   ;;  %5665 = vrot.lane.b32.xlu0 %v5657_v60, %s7581_s20  ;;  %v5714_v60 = vrot.slane %v5601_v52, %v7844_v41 }
0x2b6b   : > { %7405 = vset.pattern.permute.xlu1 %v7583_v29  ;;  %v5718_v29 = vrot.slane %v5602_v50, %v7844_v41  ;;  %v7586_v50 = vmov 77  }
0x2bd5   : > { %v10601_v31 = vpop.permute.xlu1 %5663 }
0x2bd6   : > { %12399 = vst [vmem:[#allocation186_spill] sm:$0xff] %v10601_v31 }
0x2be6   : > { %v5675_v5 = vpop.permute.xlu1 %5674 }
0x2be7   : > { %v5689_v48 = vmul.f32 %v5680_v45, %v5675_v5  ;;  %v5690_v20 = vmul.f32 %v5684_v62, %v5675_v5  ;;  %v5691_v32 = vmul.f32 %v5688_v43, %v5675_v5  ;;  %v5722_v5 = vrot.slane %v5603_v0, %v7844_v41 }
0x2be9   : > { %5697 = vrot.lane.b32.xlu1 %v5690_v20, %s7581_s20  ;;  %5695 = vrot.lane.b32.xlu0 %v5689_v48, %s7581_s20  ;;  %v7097_v20 = vld [vmem:[%s11601_s0 + $0x25] ss:$8 sm:$0x3] }
0x2bea   : > { %v5747_v43 = vrot.slane %v7097_v20, %v12186_v36  ;;  %v5751_v52 = vrot.slane %v7097_v20, %v12182_v58 }
0x2bed   : > { %5708 = vperm.xlu1 %7405, %v10352_v23   ;;  %5699 = vrot.lane.b32.xlu0 %v5691_v32, %s7581_s20 }
0x2bf1   : > { %7406 = vset.pattern.permute.xlu1 %v7584_v13  ;;  %v10624_v13 = vpop.permute.xlu0 %5626 }
0x2bf2   : > { %12401 = vst [vmem:[#allocation188_spill] sm:$0xff] %v10624_v13 }
0x2bf5   : > { %v10626_v0 = vpop.permute.xlu0 %5630 }
0x2bf6   : > { %12402 = vst [vmem:[#allocation189_spill] sm:$0xff] %v10626_v0 }
0x2c5b   : > { %v10610_v38 = vpop.permute.xlu1 %5697 }
0x2c5c   : > { %12400 = vst [vmem:[#allocation187_spill] sm:$0xff] %v10610_v38 }
0x2c6c   : > { %v5709_v45 = vpop.permute.xlu1 %5708 }
0x2c6d   : > { %v5723_v62 = vmul.f32 %v5714_v60, %v5709_v45  ;;  %v5724_v48 = vmul.f32 %v5718_v29, %v5709_v45  ;;  %v5725_v32 = vmul.f32 %v5722_v5, %v5709_v45  ;;  %v10628_v60 = vpop.permute.xlu0 %5661 }
0x2c6e   : > { %12403 = vst [vmem:[#allocation190_spill] sm:$0xff] %v10628_v60 }
0x2c6f   : > { %5731 = vrot.lane.b32.xlu1 %v5724_v48, %s7581_s20  ;;  %5729 = vrot.lane.b32.xlu0 %v5723_v62, %s7581_s20 }
0x2c71   : > { %v10630_v29 = vpop.permute.xlu0 %5665 }
0x2c72   : > { %12404 = vst [vmem:[#allocation191_spill] sm:$0xff] %v10630_v29 }
0x2c73   : > { %5752 = vrot.lane.b32.xlu1 %v5747_v43, %s7585_s13  ;;  %5733 = vrot.lane.b32.xlu0 %v5725_v32, %s7581_s20  ;;  %s7613_s20 = smov 61  }
0x2c75   : > { %v10632_v45 = vpop.permute.xlu0 %5695 }
0x2c76   : > { %12405 = vst [vmem:[#allocation192_spill] sm:$0xff] %v10632_v45 }
0x2c77   : > { %5765 = vperm.xlu1 %7406, %v10352_v23   ;;  %5754 = vrot.lane.b32.xlu0 %v5751_v52, %s7585_s13 }
0x2c79   : > { %v10634_v62 = vpop.permute.xlu0 %5699 }
0x2c7a   : > { %12406 = vst [vmem:[#allocation193_spill] sm:$0xff] %v10634_v62 }
0x2c7b   : > { %7407 = vset.pattern.permute.xlu1 %v7586_v50 }
0x2ce1   : > { %v10636_v48 = vpop.permute.xlu0 %5729  ;;  %v10640_v5 = vpop.permute.xlu1 %5731 }
0x2ce2   : > { %12407 = vst [vmem:[#allocation194_spill] sm:$0xff] %v10636_v48  ;;  %12409 = vst [vmem:[#allocation196_spill] sm:$0xff] %v10640_v5 }
0x2ce5   : > { %v10638_v20 = vpop.permute.xlu0 %5733  ;;  %v5753_v32 = vpop.permute.xlu1 %5752 }
0x2ce6   : > { %12408 = vst [vmem:[#allocation195_spill] sm:$0xff] %v10638_v20  ;;  %v5761_v50 = vmul.f32 %v5753_v32, %v9552_v53 }
0x2ce8   : > { %v5771_v45 = vrot.slane %v5761_v50, %v12186_v36 }
0x2ce9   : > { %v5755_v43 = vpop.permute.xlu0 %5754 }
0x2cea   : > { %v5757_v52 = vsel %vm5756_vm1, %v5753_v32, %v5755_v43  ;;  %v5763_v29 = vmul.f32 %v5755_v43, %v9546_v22  ;;  %v7588_v43 = vmov 78   ;;  %vm12472_vm1 = vmmov %vm12461_vm7 }
0x2ceb   : > { %v5762_v0 = vmul.f32 %v5757_v52, %v9549_v59  ;;  %v5806_v52 = vrot.slane %v5761_v50, %v12182_v58 }
0x2cec   : > { %v5779_v20 = vrot.slane %v5763_v29, %v12186_v36 }
0x2ced   : > { %v5775_v62 = vrot.slane %v5762_v0, %v12186_v36 }
0x2cf6   : > { %v5766_v38 = vpop.permute.xlu1 %5765 }
0x2cf7   : > { %v5780_v48 = vmul.f32 %v5771_v45, %v5766_v38  ;;  %v5781_v60 = vmul.f32 %v5775_v62, %v5766_v38  ;;  %v5782_v5 = vmul.f32 %v5779_v20, %v5766_v38  ;;  %v5810_v45 = vrot.slane %v5762_v0, %v12182_v58 }
0x2cf9   : > { %5786 = vrot.lane.b32.xlu0 %v5780_v48, %s7587_s14  ;;  %5788 = vrot.lane.b32.xlu1 %v5781_v60, %s7587_s14  ;;  %v5814_v48 = vrot.slane %v5763_v29, %v12182_v58  ;;  %v7589_v60 = vmov 79  }
0x2cfd   : > { %5790 = vrot.lane.b32.xlu0 %v5782_v5, %s7587_s14  ;;  %5800 = vperm.xlu1 %7407, %v10352_v23   ;;  %v5840_v5 = vrot.slane %v5761_v50, %v11967_v18 }
0x2d01   : > { %7408 = vset.pattern.permute.xlu1 %v7588_v43  ;;  %v5844_v43 = vrot.slane %v5762_v0, %v11967_v18 }
0x2d6b   : > { %v10652_v32 = vpop.permute.xlu1 %5788 }
0x2d6c   : > { %12410 = vst [vmem:[#allocation197_spill] sm:$0xff] %v10652_v32 }
0x2d7c   : > { %v5801_v62 = vpop.permute.xlu1 %5800 }
0x2d7d   : > { %v5815_v31 = vmul.f32 %v5806_v52, %v5801_v62  ;;  %v5816_v13 = vmul.f32 %v5810_v45, %v5801_v62  ;;  %v5817_v38 = vmul.f32 %v5814_v48, %v5801_v62  ;;  %v7590_v62 = vmov 80  }
0x2d7f   : > { %5823 = vrot.lane.b32.xlu1 %v5816_v13, %s7587_s14  ;;  %5821 = vrot.lane.b32.xlu0 %v5815_v31, %s7587_s14  ;;  %v5848_v13 = vrot.slane %v5763_v29, %v11967_v18 }
0x2d83   : > { %5834 = vperm.xlu1 %7408, %v10352_v23   ;;  %5825 = vrot.lane.b32.xlu0 %v5817_v38, %s7587_s14  ;;  %v5874_v38 = vrot.slane %v5761_v50, %v7844_v41 }
0x2d87   : > { %7409 = vset.pattern.permute.xlu1 %v7589_v60  ;;  %v5878_v60 = vrot.slane %v5762_v0, %v7844_v41 }
0x2df1   : > { %v10661_v20 = vpop.permute.xlu1 %5823 }
0x2df2   : > { %12411 = vst [vmem:[#allocation198_spill] sm:$0xff] %v10661_v20 }
0x2e02   : > { %v5835_v52 = vpop.permute.xlu1 %5834 }
0x2e03   : > { %v5849_v45 = vmul.f32 %v5840_v5, %v5835_v52  ;;  %v5850_v32 = vmul.f32 %v5844_v43, %v5835_v52  ;;  %v5851_v31 = vmul.f32 %v5848_v13, %v5835_v52  ;;  %v12412_v13 = vld [vmem:[#allocation95_spill] sm:$0xff] }
0x2e04   : > { %v3071_v50 = vmul.f32 %v9552_v53, %v12412_v13 }
0x2e05   : > { %5857 = vrot.lane.b32.xlu1 %v5850_v32, %s7587_s14  ;;  %5855 = vrot.lane.b32.xlu0 %v5849_v45, %s7587_s14  ;;  %v5882_v32 = vrot.slane %v5763_v29, %v7844_v41  ;;  %v7591_v45 = vmov 81  }
0x2e06   : > { %v3081_v0 = vrot.slane %v3071_v50, %v12186_v36 }
0x2e09   : > { %5868 = vperm.xlu1 %7409, %v10352_v23   ;;  %5859 = vrot.lane.b32.xlu0 %v5851_v31, %s7587_s14  ;;  %v3097_v31 = vrot.slane %v3071_v50, %v12182_v58 }
0x2e0d   : > { %7410 = vset.pattern.permute.xlu1 %v7590_v62  ;;  %v12413_v62 = vld [vmem:[#allocation99_spill] sm:$0xff] }
0x2e0e   : > { %v3086_v29 = vmul.f32 %v3081_v0, %v12413_v62  ;;  %v3222_v0 = vsel %vm559_vm8, %v9758_v40, %v9764_v26  ;;  %v3361_v40 = vsel %vm719_vm9, %v9815_v16, %v9792_v24  ;;  %v3521_v16 = vsel %vm3486_vm0, %v9846_v15, %v9818_v57 }
0x2e0f   : > { %v3660_v15 = vsel %vm2062_vm2, %v9879_v47, %v9838_v27  ;;  %v12415_v47 = vld [vmem:[#allocation56_spill] sm:$0xff] }
0x2e77   : > { %v10670_v48 = vpop.permute.xlu1 %5857 }
0x2e88   : > { %v5869_v5 = vpop.permute.xlu1 %5868 }
0x2e89   : > { %v5883_v43 = vmul.f32 %v5874_v38, %v5869_v5  ;;  %v5884_v20 = vmul.f32 %v5878_v60, %v5869_v5  ;;  %v5885_v52 = vmul.f32 %v5882_v32, %v5869_v5  ;;  %v3113_v38 = vrot.slane %v3071_v50, %v11967_v18 }
0x2e8b   : > { %5891 = vrot.lane.b32.xlu1 %v5884_v20, %s7587_s14  ;;  %5889 = vrot.lane.b32.xlu0 %v5883_v43, %s7587_s14  ;;  %v3102_v20 = vmul.f32 %v3097_v31, %v9503_v8  ;;  %v3118_v5 = vmul.f32 %v3113_v38, %v9508_v11  ;;  %v3129_v43 = vrot.slane %v3071_v50, %v7844_v41 }
0x2e8c   : > { %v3290_v50 = vsel %vm559_vm8, %v9787_v55, %v9778_v19  ;;  %v3429_v55 = vsel %vm719_vm9, %v9834_v6, %v9806_v30  ;;  %v3589_v6 = vsel %vm3486_vm0, %v9860_v33, %v9828_v25  ;;  %v3728_v33 = vsel %vm2062_vm2, %v9887_v54, %v9848_v63 }
0x2e8d   : > { %v3104_v60 = vadd.f32 %v3102_v20, %v3086_v29  ;;  %v3256_v29 = vsel %vm559_vm8, %v9773_v17, %v9771_v34  ;;  %v3395_v17 = vsel %vm719_vm9, %v9826_v56, %v9799_v42  ;;  %v3555_v56 = vsel %vm3486_vm0, %v9854_v61, %v9824_v46 }
0x2e8e   : > { %v3694_v61 = vsel %vm2062_vm2, %v9883_v51, %v9842_v37  ;;  %v3818_v51 = vsel %vm879_vm10, %v9895_v28, %v9858_v3  ;;  %v12417_v28 = vld [vmem:[#allocation52_spill] sm:$0xff] }
0x2e8f   : > { %5905 = vperm.xlu1 %7410, %v10352_v23   ;;  %5893 = vrot.lane.b32.xlu0 %v5885_v52, %s7587_s14  ;;  %v3120_v32 = vadd.f32 %v3118_v5, %v3104_v60  ;;  %v3134_v52 = vmul.f32 %v3129_v43, %v9537_v9 }
0x2e91   : > { %v3136_v13 = vadd.f32 %v3134_v52, %v3120_v32 }
0x2e93   : > { %7411 = vset.pattern.permute.xlu1 %v7591_v45  ;;  %v3188_v45 = vsel %vm559_vm8, %v9748_v14, %v9756_v44  ;;  %v3327_v14 = vsel %vm719_vm9, %v9801_v21, %v9785_v49  ;;  %v3487_v21 = vsel %vm3486_vm0, %v9840_v39, %v9813_v12  ;;  %v3626_v39 = vsel %vm2062_vm2, %v9870_v35, %v9832_v4 }
0x2e94   : > { %v3192_v31 = vadd.f32 %v3188_v45, %v3136_v13  ;;  %v3784_v35 = vsel %vm879_vm10, %v9891_v1, %v9852_v10  ;;  %v3852_v1 = vsel %vm879_vm10, %v9899_v2, %v9862_v7 }
0x2e96   : > { %v3226_v20 = vadd.f32 %v3222_v0, %v3192_v31 }
0x2e98   : > { %v3260_v38 = vadd.f32 %v3256_v29, %v3226_v20 }
0x2e9a   : > { %v3294_v60 = vadd.f32 %v3290_v50, %v3260_v38 }
0x2e9c   : > { %v3331_v5 = vadd.f32 %v3327_v14, %v3294_v60  ;;  %v12414_v14 = vld [vmem:[#allocation55_spill] sm:$0xff] }
0x2e9d   : > { %v10742_v60 = vmul.f32 %v9552_v53, %v12414_v14  ;;  %v12448_v53 = vld [vmem:[#allocation107_spill] sm:$0xff] }
0x2e9e   : > { %v3365_v43 = vadd.f32 %v3361_v40, %v3331_v5  ;;  %v10746_v40 = vmul.f32 %v9549_v59, %v12415_v47 }
0x2ea0   : > { %v3399_v32 = vadd.f32 %v3395_v17, %v3365_v43  ;;  %v12416_v17 = vld [vmem:[#allocation57_spill] sm:$0xff] }
0x2ea1   : > { %v10758_v43 = vmul.f32 %v9546_v22, %v12416_v17  ;;  %v12446_v22 = vld [vmem:[#allocation105_spill] sm:$0xff] }
0x2ea2   : > { %v3433_v52 = vadd.f32 %v3429_v55, %v3399_v32  ;;  %v5911_v32 = vrot.slane %v10742_v60, %v12186_v36 }
0x2ea4   : > { %v3491_v45 = vadd.f32 %v3487_v21, %v3433_v52  ;;  %v5915_v21 = vrot.slane %v10746_v40, %v12186_v36  ;;  %v12418_v52 = vld [vmem:[#allocation61_spill] sm:$0xff] }
0x2ea6   : > { %v3525_v13 = vadd.f32 %v3521_v16, %v3491_v45  ;;  %v3886_v16 = vsel %vm879_vm10, %v12418_v52, %v12417_v28 }
0x2ea8   : > { %v3559_v0 = vadd.f32 %v3555_v56, %v3525_v13 }
0x2eaa   : > { %v3593_v31 = vadd.f32 %v3589_v6, %v3559_v0  ;;  %v12419_v6 = vld [vmem:[#allocation65_spill] sm:$0xff]  ;;  %v12420_v0 = vld [vmem:[#allocation75_spill] sm:$0xff] }
0x2eac   : > { %v3630_v29 = vadd.f32 %v3626_v39, %v3593_v31  ;;  %v3932_v39 = vsel %vm3931_vm3, %v12420_v0, %v12419_v6  ;;  %v12432_v0 = vld [vmem:[#allocation98_spill] sm:$0xff] }
0x2eae   : > { %v3664_v20 = vadd.f32 %v3660_v15, %v3630_v29  ;;  %v5919_v15 = vrot.slane %v10758_v43, %v12186_v36  ;;  %v12421_v29 = vld [vmem:[#allocation71_spill] sm:$0xff] }
0x2eb0   : > { %v3698_v50 = vadd.f32 %v3694_v61, %v3664_v20  ;;  %v12422_v61 = vld [vmem:[#allocation74_spill] sm:$0xff] }
0x2eb1   : > { %v3966_v20 = vsel %vm3931_vm3, %v12422_v61, %v12421_v29  ;;  %v12434_v61 = vld [vmem:[#allocation94_spill] sm:$0xff] }
0x2eb2   : > { %v3732_v38 = vadd.f32 %v3728_v33, %v3698_v50 }
0x2eb4   : > { %v3788_v54 = vadd.f32 %v3784_v35, %v3732_v38  ;;  %v12423_v35 = vld [vmem:[#allocation72_spill] sm:$0xff]  ;;  %v12424_v38 = vld [vmem:[#allocation82_spill] sm:$0xff] }
0x2eb5   : > { %v4000_v14 = vsel %vm3931_vm3, %v12424_v38, %v12423_v35  ;;  %v12436_v38 = vld [vmem:[#allocation24_spill] sm:$0xff] }
0x2eb6   : > { %v3822_v55 = vadd.f32 %v3818_v51, %v3788_v54  ;;  %v12425_v51 = vld [vmem:[#allocation81_spill] sm:$0xff]  ;;  %v12426_v54 = vld [vmem:[#allocation83_spill] sm:$0xff] }
0x2eb8   : > { %v3856_v56 = vadd.f32 %v3852_v1, %v3822_v55  ;;  %v4034_v1 = vsel %vm3931_vm3, %v12426_v54, %v12425_v51  ;;  %v12427_v55 = vld [vmem:[#allocation85_spill] sm:$0xff] }
0x2eb9   : > { %v12437_v54 = vld [vmem:[#allocation17_spill] sm:$0xff] }
0x2eba   : > { %v3890_v31 = vadd.f32 %v3886_v16, %v3856_v56  ;;  %v7592_v16 = vmov 82   ;;  %v12430_v56 = vld [vmem:[#allocation93_spill] sm:$0xff] }
0x2ebc   : > { %v3936_v33 = vadd.f32 %v3932_v39, %v3890_v31 }
0x2ebe   : > { %v3970_v47 = vadd.f32 %v3966_v20, %v3936_v33 }
0x2ec0   : > { %v4004_v17 = vadd.f32 %v4000_v14, %v3970_v47 }
0x2ec2   : > { %v4038_v52 = vadd.f32 %v4034_v1, %v4004_v17  ;;  %v12438_v1 = vld [vmem:[#allocation18_spill] sm:$0xff] }
0x2ec3   : > { %v4262_v17 = vsel %vm4227_vm4, %v12438_v1, %v12437_v54  ;;  %v12447_v1 = vld [vmem:[#allocation103_spill] sm:$0xff] }
0x2efd   : > { %v10751_v5 = vpop.permute.xlu1 %5891 }
0x2f0e   : > { %v5906_v45 = vpop.permute.xlu1 %5905 }
0x2f0f   : > { %v5920_v13 = vmul.f32 %v5911_v32, %v5906_v45  ;;  %v5921_v2 = vmul.f32 %v5915_v21, %v5906_v45  ;;  %v5922_v50 = vmul.f32 %v5919_v15, %v5906_v45  ;;  %v12428_v32 = vld [vmem:[#allocation87_spill] sm:$0xff]  ;;  %v12429_v45 = vld [vmem:[#allocation86_spill] sm:$0xff] }
0x2f10   : > { %v4079_v21 = vsel %vm1143_vm11, %v12428_v32, %v12427_v55  ;;  %v12433_v15 = vld [vmem:[#allocation62_spill] sm:$0xff] }
0x2f11   : > { %5928 = vrot.lane.b32.xlu1 %v5921_v2, %s7522_s15  ;;  %5926 = vrot.lane.b32.xlu0 %v5920_v13, %s7522_s15  ;;  %v4113_v13 = vsel %vm1143_vm11, %v12430_v56, %v12429_v45  ;;  %v4083_v2 = vadd.f32 %v4079_v21, %v4038_v52  ;;  %v4181_v20 = vsel %vm1143_vm11, %v12434_v61, %v12433_v15  ;;  %v12439_v21 = vld [vmem:[#allocation16_spill] sm:$0xff]  ;;  %v12444_v61 = vld [vmem:[#allocation10_spill] sm:$0xff] }
0x2f12   : > { %v12440_v52 = vld [vmem:[#allocation4_spill] sm:$0xff] }
0x2f13   : > { %v4117_v31 = vadd.f32 %v4113_v13, %v4083_v2  ;;  %v12441_v13 = vld [vmem:[#allocation100_spill] sm:$0xff]  ;;  %v12442_v2 = vld [vmem:[#allocation9_spill] sm:$0xff] }
0x2f15   : > { %5939 = vperm.xlu1 %7411, %v10352_v23   ;;  %5930 = vrot.lane.b32.xlu0 %v5922_v50, %s7522_s15  ;;  %v12431_v23 = vld [vmem:[#allocation89_spill] sm:$0xff]  ;;  %v12435_v50 = vld [vmem:[#allocation23_spill] sm:$0xff] }
0x2f16   : > { %v4147_v39 = vsel %vm1143_vm11, %v12432_v0, %v12431_v23  ;;  %v4228_v14 = vsel %vm4227_vm4, %v12436_v38, %v12435_v50  ;;  %v4330_v0 = vsel %vm4227_vm4, %v12442_v2, %v12441_v13  ;;  %v12445_v38 = vld [vmem:[#allocation102_spill] sm:$0xff]  ;;  %v12452_v13 = vld [vmem:[#allocation111_spill] sm:$0xff]  ;;  %v12477_v50 = vld [vmem:[#allocation69_spill] sm:$0xff] }
0x2f17   : > { %v4151_v33 = vadd.f32 %v4147_v39, %v4117_v31  ;;  %v12443_v31 = vld [vmem:[#allocation101_spill] sm:$0xff] }
0x2f19   : > { %7412 = vset.pattern.permute.xlu1 %v7592_v16  ;;  %v4185_v47 = vadd.f32 %v4181_v20, %v4151_v33  ;;  %v4296_v16 = vsel %vm4227_vm4, %v12440_v52, %v12439_v21  ;;  %v4388_v20 = vsel %vm4387_vm6, %v12444_v61, %v12443_v31  ;;  %v12449_v52 = vld [vmem:[#allocation19_spill] sm:$0xff]  ;;  %v12450_v21 = vld [vmem:[#allocation109_spill] sm:$0xff] }
0x2f1a   : > { %v4490_v2 = vsel %vm4387_vm6, %v12450_v21, %v12449_v52  ;;  %v12454_v31 = vld [vmem:[#allocation113_spill] sm:$0xff]  ;;  %v12460_v52 = vld [vmem:[#allocation8_spill] sm:$0xff] }
0x2f1b   : > { %v4232_v32 = vadd.f32 %v4228_v14, %v4185_v47  ;;  %v4422_v14 = vsel %vm4387_vm6, %v12446_v22, %v12445_v38  ;;  %v12456_v38 = vld [vmem:[#allocation115_spill] sm:$0xff] }
0x2f1d   : > { %v4266_v56 = vadd.f32 %v4262_v17, %v4232_v32  ;;  %v4456_v17 = vsel %vm4387_vm6, %v12448_v53, %v12447_v1  ;;  %v12458_v1 = vld [vmem:[#allocation117_spill] sm:$0xff] }
0x2f1f   : > { %v4300_v39 = vadd.f32 %v4296_v16, %v4266_v56  ;;  %v12451_v56 = vld [vmem:[#allocation26_spill] sm:$0xff] }
0x2f20   : > { %v4527_v61 = vsel %vm1303_vm12, %v12452_v13, %v12451_v56  ;;  %v12463_v56 = vld [vmem:[#allocation123_spill] sm:$0xff] }
0x2f21   : > { %v4334_v33 = vadd.f32 %v4330_v0, %v4300_v39  ;;  %v12453_v39 = vld [vmem:[#allocation25_spill] sm:$0xff] }
0x2f22   : > { %v4561_v22 = vsel %vm1303_vm12, %v12454_v31, %v12453_v39  ;;  %v12466_v39 = vld [vmem:[#allocation125_spill] sm:$0xff] }
0x2f23   : > { %v4392_v47 = vadd.f32 %v4388_v20, %v4334_v33  ;;  %v12455_v33 = vld [vmem:[#allocation104_spill] sm:$0xff] }
0x2f24   : > { %v4595_v53 = vsel %vm1303_vm12, %v12456_v38, %v12455_v33 }
0x2f25   : > { %v4426_v32 = vadd.f32 %v4422_v14, %v4392_v47  ;;  %v12457_v47 = vld [vmem:[#allocation119_spill] sm:$0xff] }
0x2f26   : > { %v4629_v21 = vsel %vm1303_vm12, %v12458_v1, %v12457_v47  ;;  %v12470_v1 = vld [vmem:[#allocation128_spill] sm:$0xff]  ;;  %v12473_v47 = vld [vmem:[#allocation67_spill] sm:$0xff] }
0x2f27   : > { %v4460_v16 = vadd.f32 %v4456_v17, %v4426_v32  ;;  %v12459_v32 = vld [vmem:[#allocation120_spill] sm:$0xff] }
0x2f28   : > { %v4674_v13 = vsel %vm12461_vm7, %v12460_v52, %v12459_v32  ;;  %vm4886_vm7 = vcmask 760832  }
0x2f29   : > { %v4494_v0 = vadd.f32 %v4490_v2, %v4460_v16  ;;  %v12462_v16 = vld [vmem:[#allocation121_spill] sm:$0xff] }
0x2f2a   : > { %v4708_v31 = vsel %vm12464_vm13, %v12463_v56, %v12462_v16  ;;  %v12476_v16 = vld [vmem:[#allocation68_spill] sm:$0xff]  ;;  %vm5185_vm13 = vcmask 654336  }
0x2f2b   : > { %v4531_v20 = vadd.f32 %v4527_v61, %v4494_v0  ;;  %v12465_v0 = vld [vmem:[#allocation122_spill] sm:$0xff] }
0x2f2c   : > { %v4742_v38 = vsel %vm12467_vm14, %v12466_v39, %v12465_v0  ;;  %vm11884_vm14 = vcmask 646144  }
0x2f2d   : > { %v4565_v14 = vadd.f32 %v4561_v22, %v4531_v20  ;;  %v12468_v22 = vld [vmem:[#allocation66_spill] sm:$0xff]  ;;  %v12469_v20 = vld [vmem:[#allocation15_spill] sm:$0xff] }
0x2f2e   : > { %v4789_v33 = vrot.slane %v12469_v20, %v12468_v22  ;;  %v4805_v52 = vrot.slane %v12469_v20, %v12473_v47  ;;  %v4821_v39 = vrot.slane %v12469_v20, %v12476_v16  ;;  %v12478_v22 = vld [vmem:[#allocation132_spill] sm:$0xff] }
0x2f2f   : > { %v4599_v17 = vadd.f32 %v4595_v53, %v4565_v14  ;;  %v12471_v53 = vld [vmem:[#allocation127_spill] sm:$0xff] }
0x2f30   : > { %v4776_v14 = vsel %vm12472_vm1, %v12471_v53, %v12470_v1  ;;  %v4826_v15 = vmul.f32 %v4821_v39, %v12478_v22  ;;  %v12479_v53 = vld [vmem:[#allocation133_spill] sm:$0xff]  ;;  %v12486_v39 = vld [vmem:[#allocation27_spill] sm:$0xff]  ;;  %vm5483_vm1 = vcmask 637952  }
0x2f31   : > { %v4633_v2 = vadd.f32 %v4629_v21, %v4599_v17  ;;  %v12474_v17 = vld [vmem:[#allocation130_spill] sm:$0xff] }
0x2f32   : > { %v4794_v32 = vmul.f32 %v4789_v33, %v12474_v17 }
0x2f33   : > { %v4678_v61 = vadd.f32 %v4674_v13, %v4633_v2  ;;  %v12475_v13 = vld [vmem:[#allocation131_spill] sm:$0xff] }
0x2f34   : > { %v4810_v2 = vmul.f32 %v4805_v52, %v12475_v13  ;;  %v12482_v52 = vld [vmem:[#allocation136_spill] sm:$0xff]  ;;  %v12485_v13 = vld [vmem:[#allocation142_spill] sm:$0xff] }
0x2f35   : > { %v4712_v54 = vadd.f32 %v4708_v31, %v4678_v61  ;;  %v4837_v31 = vrot.slane %v12469_v20, %v12477_v50  ;;  %v12487_v20 = vld [vmem:[#allocation144_spill] sm:$0xff]  ;;  %v12524_v50 = vld [vmem:[#allocation186_spill] sm:$0xff] }
0x2f37   : > { %v4746_v21 = vadd.f32 %v4742_v38, %v4712_v54  ;;  %v4842_v1 = vmul.f32 %v4837_v31, %v12479_v53  ;;  %v12480_v54 = vld [vmem:[#allocation135_spill] sm:$0xff]  ;;  %v12481_v38 = vld [vmem:[#allocation134_spill] sm:$0xff]  ;;  %v4989_v31 = vsel %vm4886_vm7, %v12487_v20, %v12486_v39  ;;  %v12497_v39 = vld [vmem:[#allocation20_spill] sm:$0xff] }
0x2f38   : > { %v4887_v33 = vsel %vm4886_vm7, %v12481_v38, %v12480_v54  ;;  %v12489_v53 = vld [vmem:[#allocation146_spill] sm:$0xff]  ;;  %v12491_v54 = vld [vmem:[#allocation148_spill] sm:$0xff] }
0x2f39   : > { %v4780_v56 = vadd.f32 %v4776_v14, %v4746_v21  ;;  %v12483_v21 = vld [vmem:[#allocation140_spill] sm:$0xff] }
0x2f3a   : > { %v4921_v16 = vsel %vm4886_vm7, %v12483_v21, %v12482_v52  ;;  %v12493_v52 = vld [vmem:[#allocation150_spill] sm:$0xff] }
0x2f3b   : > { %v4796_v0 = vadd.f32 %v4794_v32, %v4780_v56  ;;  %v12484_v56 = vld [vmem:[#allocation137_spill] sm:$0xff] }
0x2f3d   : > { %v4812_v61 = vadd.f32 %v4810_v2, %v4796_v0  ;;  %v4955_v0 = vsel %vm4886_vm7, %v12485_v13, %v12484_v56  ;;  %v12495_v56 = vld [vmem:[#allocation152_spill] sm:$0xff] }
0x2f3f   : > { %v4828_v47 = vadd.f32 %v4826_v15, %v4812_v61  ;;  %v12488_v61 = vld [vmem:[#allocation31_spill] sm:$0xff] }
0x2f40   : > { %v5026_v38 = vsel %vm2444_vm5, %v12489_v53, %v12488_v61  ;;  %v12498_v61 = vld [vmem:[#allocation156_spill] sm:$0xff] }
0x2f41   : > { %v4844_v14 = vadd.f32 %v4842_v1, %v4828_v47  ;;  %v12490_v1 = vld [vmem:[#allocation36_spill] sm:$0xff] }
0x2f42   : > { %v5060_v21 = vsel %vm2444_vm5, %v12491_v54, %v12490_v1  ;;  %v12499_v54 = vld [vmem:[#allocation158_spill] sm:$0xff]  ;;  %v12500_v1 = vld [vmem:[#allocation157_spill] sm:$0xff] }
0x2f43   : > { %v4891_v32 = vadd.f32 %v4887_v33, %v4844_v14  ;;  %v12492_v14 = vld [vmem:[#allocation138_spill] sm:$0xff] }
0x2f44   : > { %v5094_v13 = vsel %vm2444_vm5, %v12493_v52, %v12492_v14  ;;  %v12501_v52 = vld [vmem:[#allocation160_spill] sm:$0xff] }
0x2f45   : > { %v4925_v2 = vadd.f32 %v4921_v16, %v4891_v32  ;;  %v12494_v32 = vld [vmem:[#allocation154_spill] sm:$0xff]  ;;  %v12502_v14 = vld [vmem:[#allocation164_spill] sm:$0xff] }
0x2f46   : > { %v5128_v20 = vsel %vm2444_vm5, %v12495_v56, %v12494_v32  ;;  %v12503_v56 = vld [vmem:[#allocation162_spill] sm:$0xff] }
0x2f47   : > { %v4959_v15 = vadd.f32 %v4955_v0, %v4925_v2  ;;  %v12496_v2 = vld [vmem:[#allocation155_spill] sm:$0xff] }
0x2f48   : > { %v5186_v53 = vsel %vm5185_vm13, %v12497_v39, %v12496_v2  ;;  %v12505_v39 = vld [vmem:[#allocation165_spill] sm:$0xff] }
0x2f49   : > { %v4993_v47 = vadd.f32 %v4989_v31, %v4959_v15  ;;  %v5787_v15 = vpop.permute.xlu0 %5786 }
0x2f4b   : > { %v5030_v33 = vadd.f32 %v5026_v38, %v4993_v47  ;;  %v5220_v38 = vsel %vm5185_vm13, %v12499_v54, %v12498_v61  ;;  %v12507_v54 = vld [vmem:[#allocation166_spill] sm:$0xff] }
0x2f4d   : > { %v5064_v16 = vadd.f32 %v5060_v21, %v5030_v33  ;;  %v5254_v21 = vsel %vm5185_vm13, %v12501_v52, %v12500_v1  ;;  %v10893_v32 = vpop.permute.xlu0 %5790 }
0x2f4e   : > { %12504 = vst [vmem:[#allocation95_spill] sm:$0xff] %v10893_v32 }
0x2f4f   : > { %v5098_v0 = vadd.f32 %v5094_v13, %v5064_v16  ;;  %v5288_v13 = vsel %vm5185_vm13, %v12503_v56, %v12502_v14  ;;  %v12513_v14 = vld [vmem:[#allocation175_spill] sm:$0xff] }
0x2f51   : > { %v5132_v31 = vadd.f32 %v5128_v20, %v5098_v0  ;;  %v12506_v20 = vld [vmem:[#allocation33_spill] sm:$0xff]  ;;  %v5822_v52 = vpop.permute.xlu0 %5821 }
0x2f52   : > { %v5335_v0 = vsel %vm11884_vm14, %v12506_v20, %v12505_v39  ;;  %v12514_v20 = vld [vmem:[#allocation47_spill] sm:$0xff] }
0x2f53   : > { %v5190_v47 = vadd.f32 %v5186_v53, %v5132_v31  ;;  %v12508_v53 = vld [vmem:[#allocation168_spill] sm:$0xff] }
0x2f54   : > { %v5369_v31 = vsel %vm11884_vm14, %v12508_v53, %v12507_v54 }
0x2f55   : > { %v5224_v33 = vadd.f32 %v5220_v38, %v5190_v47  ;;  %v12509_v38 = vld [vmem:[#allocation167_spill] sm:$0xff]  ;;  %v12510_v47 = vld [vmem:[#allocation170_spill] sm:$0xff]  ;;  %v10910_v39 = vpop.permute.xlu0 %5825 }
0x2f56   : > { %v5403_v1 = vsel %vm11884_vm14, %v12510_v47, %v12509_v38  ;;  %12515 = vst [vmem:[#allocation99_spill] sm:$0xff] %v10910_v39  ;;  %v12518_v47 = vld [vmem:[#allocation177_spill] sm:$0xff] }
0x2f57   : > { %v5258_v16 = vadd.f32 %v5254_v21, %v5224_v33  ;;  %v12511_v21 = vld [vmem:[#allocation174_spill] sm:$0xff]  ;;  %v12512_v33 = vld [vmem:[#allocation172_spill] sm:$0xff] }
0x2f58   : > { %v5437_v56 = vsel %vm11884_vm14, %v12512_v33, %v12511_v21  ;;  %vm5792_vm14 = vcmask 621568  }
0x2f59   : > { %v5292_v2 = vadd.f32 %v5288_v13, %v5258_v16  ;;  %v5484_v13 = vsel %vm5483_vm1, %v12514_v20, %v12513_v14  ;;  %v5856_v33 = vpop.permute.xlu0 %5855 }
0x2f5b   : > { %v5339_v61 = vadd.f32 %v5335_v0, %v5292_v2  ;;  %v12516_v2 = vld [vmem:[#allocation176_spill] sm:$0xff]  ;;  %v12517_v0 = vld [vmem:[#allocation178_spill] sm:$0xff] }
0x2f5c   : > { %v5518_v53 = vsel %vm5483_vm1, %v12517_v0, %v12516_v2  ;;  %v12525_v0 = vld [vmem:[#allocation190_spill] sm:$0xff] }
0x2f5d   : > { %v5373_v22 = vadd.f32 %v5369_v31, %v5339_v61  ;;  %v12519_v61 = vld [vmem:[#allocation180_spill] sm:$0xff]  ;;  %v10927_v2 = vpop.permute.xlu0 %5859 }
0x2f5e   : > { %v5552_v31 = vsel %vm5483_vm1, %v12519_v61, %v12518_v47  ;;  %12526 = vst [vmem:[#allocation55_spill] sm:$0xff] %v10927_v2  ;;  %v5861_v2 = vsel %vm5792_vm14, %v5856_v33, %v10670_v48  ;;  %v5949_v33 = vrot.slane %v10746_v40, %v12182_v58 }
0x2f5f   : > { %v5407_v32 = vadd.f32 %v5403_v1, %v5373_v22  ;;  %v12520_v22 = vld [vmem:[#allocation184_spill] sm:$0xff]  ;;  %v12521_v1 = vld [vmem:[#allocation182_spill] sm:$0xff] }
0x2f60   : > { %v5586_v21 = vsel %vm5483_vm1, %v12521_v1, %v12520_v22  ;;  %v12529_v1 = vld [vmem:[#allocation196_spill] sm:$0xff] }
0x2f61   : > { %v5441_v16 = vadd.f32 %v5437_v56, %v5407_v32  ;;  %v12522_v32 = vld [vmem:[#allocation185_spill] sm:$0xff]  ;;  %v12523_v56 = vld [vmem:[#allocation188_spill] sm:$0xff] }
0x2f62   : > { %v5633_v39 = vsel %vm11885_vm15, %v12523_v56, %v12522_v32  ;;  %v5890_v56 = vpop.permute.xlu0 %5889 }
0x2f63   : > { %v5488_v54 = vadd.f32 %v5484_v13, %v5441_v16  ;;  %v5667_v13 = vsel %vm11885_vm15, %v12525_v0, %v12524_v50  ;;  %v12532_v0 = vld [vmem:[#allocation198_spill] sm:$0xff] }
0x2f65   : > { %v5522_v38 = vadd.f32 %v5518_v53, %v5488_v54  ;;  %v12527_v54 = vld [vmem:[#allocation187_spill] sm:$0xff]  ;;  %v12528_v53 = vld [vmem:[#allocation192_spill] sm:$0xff] }
0x2f66   : > { %v5701_v61 = vsel %vm11885_vm15, %v12528_v53, %v12527_v54 }
0x2f67   : > { %v5556_v20 = vadd.f32 %v5552_v31, %v5522_v38  ;;  %v12530_v38 = vld [vmem:[#allocation194_spill] sm:$0xff] }
0x2f68   : > { %v5735_v31 = vsel %vm11885_vm15, %v12530_v38, %v12529_v1  ;;  %vm12534_vm15 = vcmask 523264  }
0x2f69   : > { %v5590_v14 = vadd.f32 %v5586_v21, %v5556_v20  ;;  %v12531_v21 = vld [vmem:[#allocation197_spill] sm:$0xff] }
0x2f6a   : > { %v5793_v20 = vsel %vm5792_vm14, %v5787_v15, %v12531_v21 }
0x2f6b   : > { %v5637_v16 = vadd.f32 %v5633_v39, %v5590_v14  ;;  %v5827_v14 = vsel %vm5792_vm14, %v5822_v52, %v12532_v0  ;;  %v5945_v52 = vrot.slane %v10742_v60, %v12182_v58 }
0x2f6d   : > { %v5671_v47 = vadd.f32 %v5667_v13, %v5637_v16  ;;  %v10941_v13 = vpop.permute.xlu0 %5893  ;;  %v5895_v16 = vsel %vm5792_vm14, %v5890_v56, %v10751_v5 }
0x2f6f   : > { %v5705_v22 = vadd.f32 %v5701_v61, %v5671_v47 }
0x2f71   : > { %v5739_v32 = vadd.f32 %v5735_v31, %v5705_v22 }
0x2f73   : > { %v5797_v39 = vadd.f32 %v5793_v20, %v5739_v32 }
0x2f75   : > { %v5831_v53 = vadd.f32 %v5827_v14, %v5797_v39  ;;  %v7593_v14 = vmov 83  }
0x2f77   : > { %v5865_v38 = vadd.f32 %v5861_v2, %v5831_v53  ;;  %v5953_v2 = vrot.slane %v10758_v43, %v12182_v58 }
0x2f79   : > { %v5899_v47 = vadd.f32 %v5895_v16, %v5865_v38 }
0x2f83   : > { %v10945_v61 = vpop.permute.xlu1 %5928  ;;  %v5927_v1 = vpop.permute.xlu0 %5926 }
0x2f84   : > { %12533 = vst [vmem:[#allocation56_spill] sm:$0xff] %v10945_v61  ;;  %v5932_v15 = vsel %vm12534_vm15, %v5927_v1, %v10945_v61  ;;  %v10960_v1 = vld [vmem:[%s11607_s6] sm:$0xff]  ;;  %v12538_v61 = vld [vmem:[#allocation29_spill] sm:$0xff] }
0x2f85   : > { %v5936_v22 = vadd.f32 %v5932_v15, %v5899_v47  ;;  %v5979_v15 = vrot.slane %v10742_v60, %v11967_v18 }
0x2f87   : > { %v10964_v39 = vpop.permute.xlu0 %5930 }
0x2f94   : > { %v5940_v32 = vpop.permute.xlu1 %5939 }
0x2f95   : > { %v5954_v31 = vmul.f32 %v5945_v52, %v5940_v32  ;;  %v5955_v20 = vmul.f32 %v5949_v33, %v5940_v32  ;;  %v5956_v56 = vmul.f32 %v5953_v2, %v5940_v32  ;;  %v5983_v52 = vrot.slane %v10746_v40, %v11967_v18 }
0x2f97   : > { %5962 = vrot.lane.b32.xlu1 %v5955_v20, %s7522_s15  ;;  %5960 = vrot.lane.b32.xlu0 %v5954_v31, %s7522_s15  ;;  %v5987_v20 = vrot.slane %v10758_v43, %v11967_v18 }
0x2f9b   : > { %5973 = vperm.xlu1 %7412, %v10960_v1   ;;  %5964 = vrot.lane.b32.xlu0 %v5956_v56, %s7522_s15  ;;  %v12536_v56 = vld [vmem:[#allocation96_spill] sm:$0xff] }
0x2f9f   : > { %7413 = vset.pattern.permute.xlu1 %v7593_v14  ;;  %v3072_v14 = vmul.f32 %v9549_v59, %v12536_v56 }
0x3009   : > { %v10966_v53 = vpop.permute.xlu1 %5962  ;;  %v5961_v16 = vpop.permute.xlu0 %5960 }
0x300a   : > { %12535 = vst [vmem:[#allocation57_spill] sm:$0xff] %v10966_v53  ;;  %v5966_v38 = vsel %vm12534_vm15, %v5961_v16, %v10966_v53  ;;  %v3085_v16 = vrot.slane %v3072_v14, %v12186_v36  ;;  %v12537_v53 = vld [vmem:[#allocation28_spill] sm:$0xff] }
0x300b   : > { %v5970_v47 = vadd.f32 %v5966_v38, %v5936_v22  ;;  %v7594_v22 = vmov 84   ;;  %v3101_v38 = vrot.slane %v3072_v14, %v12182_v58  ;;  %v3189_v56 = vsel %vm559_vm8, %v9756_v44, %v12537_v53 }
0x301a   : > { %v5974_v33 = vpop.permute.xlu1 %5973 }
0x301b   : > { %v5988_v32 = vmul.f32 %v5979_v15, %v5974_v33  ;;  %v5989_v31 = vmul.f32 %v5983_v52, %v5974_v33  ;;  %v5990_v2 = vmul.f32 %v5987_v20, %v5974_v33  ;;  %v3087_v15 = vmul.f32 %v3085_v16, %v12413_v62  ;;  %v12539_v16 = vld [vmem:[#allocation30_spill] sm:$0xff] }
0x301c   : > { %v3103_v52 = vmul.f32 %v3101_v38, %v9503_v8  ;;  %v3133_v20 = vrot.slane %v3072_v14, %v7844_v41  ;;  %v3223_v62 = vsel %vm559_vm8, %v9764_v26, %v12538_v61  ;;  %v3257_v38 = vsel %vm559_vm8, %v9771_v34, %v12539_v16  ;;  %v12543_v61 = vld [vmem:[#allocation49_spill] sm:$0xff]  ;;  %v12547_v16 = vld [vmem:[#allocation40_spill] sm:$0xff] }
0x301d   : > { %5996 = vrot.lane.b32.xlu1 %v5989_v31, %s7522_s15  ;;  %5994 = vrot.lane.b32.xlu0 %v5988_v32, %s7522_s15  ;;  %v3117_v32 = vrot.slane %v3072_v14, %v11967_v18  ;;  %v3396_v34 = vsel %vm719_vm9, %v9799_v42, %v12543_v61  ;;  %v3556_v42 = vsel %vm3486_vm0, %v9824_v46, %v12547_v16  ;;  %v12551_v46 = vld [vmem:[#allocation46_spill] sm:$0xff]  ;;  %v12558_v16 = vld [vmem:[#allocation73_spill] sm:$0xff] }
0x301e   : > { %v3105_v33 = vadd.f32 %v3103_v52, %v3087_v15  ;;  %v12540_v15 = vld [vmem:[#allocation35_spill] sm:$0xff]  ;;  %v12541_v52 = vld [vmem:[#allocation32_spill] sm:$0xff] }
0x301f   : > { %v3119_v31 = vmul.f32 %v3117_v32, %v9508_v11  ;;  %v3291_v14 = vsel %vm559_vm8, %v9778_v19, %v12540_v15  ;;  %v3328_v44 = vsel %vm719_vm9, %v9785_v49, %v12541_v52  ;;  %v12542_v32 = vld [vmem:[#allocation38_spill] sm:$0xff]  ;;  %vm12550_vm8 = vmmov %vm12534_vm15 }
0x3020   : > { %v3362_v26 = vsel %vm719_vm9, %v9792_v24, %v12542_v32  ;;  %v3661_v32 = vsel %vm2062_vm2, %v9838_v27, %v12551_v46 }
0x3021   : > { %6007 = vperm.xlu1 %7413, %v10960_v1   ;;  %5998 = vrot.lane.b32.xlu0 %v5990_v2, %s7522_s15  ;;  %v3121_v2 = vadd.f32 %v3119_v31, %v3105_v33  ;;  %v12544_v31 = vld [vmem:[#allocation39_spill] sm:$0xff] }
0x3022   : > { %v3430_v19 = vsel %vm719_vm9, %v9806_v30, %v12544_v31  ;;  %v12554_v31 = vld [vmem:[#allocation59_spill] sm:$0xff]  ;;  %vm12593_vm9 = vcmask 777216  }
0x3025   : > { %7414 = vset.pattern.permute.xlu1 %v7594_v22  ;;  %v3135_v22 = vmul.f32 %v3133_v20, %v9537_v9 }
0x3027   : > { %v3137_v59 = vadd.f32 %v3135_v22, %v3121_v2  ;;  %v12545_v2 = vld [vmem:[#allocation50_spill] sm:$0xff] }
0x3028   : > { %v3488_v49 = vsel %vm3486_vm0, %v9813_v12, %v12545_v2 }
0x3029   : > { %v3193_v8 = vadd.f32 %v3189_v56, %v3137_v59  ;;  %v12546_v56 = vld [vmem:[#allocation45_spill] sm:$0xff] }
0x302a   : > { %v3522_v24 = vsel %vm3486_vm0, %v9818_v57, %v12546_v56  ;;  %v12557_v56 = vld [vmem:[#allocation70_spill] sm:$0xff] }
0x302b   : > { %v3227_v11 = vadd.f32 %v3223_v62, %v3193_v8  ;;  %v11020_v8 = vpop.permute.xlu0 %5964 }
0x302d   : > { %v3261_v9 = vadd.f32 %v3257_v38, %v3227_v11  ;;  %v12548_v11 = vld [vmem:[#allocation51_spill] sm:$0xff] }
0x302e   : > { %v3590_v30 = vsel %vm3486_vm0, %v9828_v25, %v12548_v11  ;;  %v12552_v25 = vld [vmem:[#allocation53_spill] sm:$0xff] }
0x302f   : > { %v3295_v53 = vadd.f32 %v3291_v14, %v3261_v9  ;;  %v12549_v9 = vld [vmem:[#allocation54_spill] sm:$0xff] }
0x3030   : > { %v3627_v57 = vsel %vm2062_vm2, %v9832_v4, %v12549_v9 }
0x3031   : > { %v3332_v59 = vadd.f32 %v3328_v44, %v3295_v53 }
0x3033   : > { %v3366_v33 = vadd.f32 %v3362_v26, %v3332_v59  ;;  %v3695_v59 = vsel %vm2062_vm2, %v9842_v37, %v12552_v25 }
0x3035   : > { %v3400_v20 = vadd.f32 %v3396_v34, %v3366_v33  ;;  %v12553_v34 = vld [vmem:[#allocation58_spill] sm:$0xff] }
0x3036   : > { %v3729_v4 = vsel %vm2062_vm2, %v9848_v63, %v12553_v34  ;;  %v3887_v63 = vsel %vm879_vm10, %v12417_v28, %v12557_v56  ;;  %v12559_v28 = vld [vmem:[#allocation79_spill] sm:$0xff]  ;;  %vm12637_vm2 = vcmask 646144  }
0x3037   : > { %v3434_v22 = vadd.f32 %v3430_v19, %v3400_v20  ;;  %v12555_v20 = vld [vmem:[#allocation60_spill] sm:$0xff]  ;;  %vm12643_vm0 = vmmov %vm12637_vm2 }
0x3038   : > { %v3819_v27 = vsel %vm879_vm10, %v9858_v3, %v12555_v20  ;;  %v3933_v3 = vsel %vm3931_vm3, %v12419_v6, %v12558_v16  ;;  %v12567_v20 = vld [vmem:[#allocation22_spill] sm:$0xff]  ;;  %v12574_v16 = vld [vmem:[#allocation100_spill] sm:$0xff] }
0x3039   : > { %v3492_v62 = vadd.f32 %v3488_v49, %v3434_v22  ;;  %v12556_v49 = vld [vmem:[#allocation64_spill] sm:$0xff] }
0x303a   : > { %v3853_v37 = vsel %vm879_vm10, %v9862_v7, %v12556_v49  ;;  %v7098_v7 = vld [vmem:[%s11601_s0 + $0x26] ss:$8 sm:$0x3] }
0x303b   : > { %v3526_v38 = vadd.f32 %v3522_v24, %v3492_v62  ;;  %v6013_v62 = vrot.slane %v10742_v60, %v7844_v41  ;;  %v6046_v6 = vrot.slane %v7098_v7, %v12186_v36  ;;  %v12569_v49 = vld [vmem:[#allocation63_spill] sm:$0xff] }
0x303d   : > { %v3560_v15 = vadd.f32 %v3556_v42, %v3526_v38 }
0x303f   : > { %v3594_v44 = vadd.f32 %v3590_v30, %v3560_v15  ;;  %v3967_v15 = vsel %vm3931_vm3, %v12421_v29, %v12559_v28  ;;  %v12577_v28 = vld [vmem:[#allocation106_spill] sm:$0xff] }
0x3041   : > { %v3631_v26 = vadd.f32 %v3627_v57, %v3594_v44  ;;  %v12561_v44 = vld [vmem:[#allocation84_spill] sm:$0xff] }
0x3042   : > { %v4035_v29 = vsel %vm3931_vm3, %v12425_v51, %v12561_v44  ;;  %v12564_v51 = vld [vmem:[#allocation3_spill] sm:$0xff] }
0x3043   : > { %v3665_v61 = vadd.f32 %v3661_v32, %v3631_v26  ;;  %v12562_v32 = vld [vmem:[#allocation88_spill] sm:$0xff]  ;;  %v4148_v34 = vsel %vm1143_vm11, %v12431_v23, %v12564_v51  ;;  %v12582_v44 = vld [vmem:[#allocation19_spill] sm:$0xff] }
0x3044   : > { %v4080_v26 = vsel %vm1143_vm11, %v12427_v55, %v12562_v32  ;;  %v7596_v55 = vmov 85   ;;  %v12572_v23 = vld [vmem:[#allocation16_spill] sm:$0xff]  ;;  %v12584_v32 = vld [vmem:[#allocation26_spill] sm:$0xff] }
0x3045   : > { %v3699_v33 = vadd.f32 %v3695_v59, %v3665_v61  ;;  %v12563_v59 = vld [vmem:[#allocation97_spill] sm:$0xff] }
0x3047   : > { %v3733_v19 = vadd.f32 %v3729_v4, %v3699_v33  ;;  %v12565_v33 = vld [vmem:[#allocation2_spill] sm:$0xff] }
0x308f   : > { %v11028_v14 = vpop.permute.xlu1 %5996  ;;  %v5995_v12 = vpop.permute.xlu0 %5994 }
0x3090   : > { %v6000_v52 = vsel %vm12550_vm8, %v5995_v12, %v11028_v14  ;;  %v12560_v12 = vld [vmem:[#allocation80_spill] sm:$0xff] }
0x3091   : > { %v11035_v53 = vadd.f32 %v6000_v52, %v5970_v47  ;;  %v3785_v47 = vsel %vm879_vm10, %v9852_v10, %v12554_v31  ;;  %v6017_v10 = vrot.slane %v10746_v40, %v7844_v41  ;;  %v6021_v40 = vrot.slane %v10758_v43, %v7844_v41  ;;  %v12566_v31 = vld [vmem:[#allocation62_spill] sm:$0xff]  ;;  %vm12596_vm10 = vmmov %vm12593_vm9 }
0x3092   : > { %v3789_v2 = vadd.f32 %v3785_v47, %v3733_v19  ;;  %v4001_v9 = vsel %vm3931_vm3, %v12423_v35, %v12560_v12  ;;  %v6050_v43 = vrot.slane %v7098_v7, %v12182_v58  ;;  %v4114_v35 = vsel %vm1143_vm11, %v12429_v45, %v12563_v59  ;;  %v12575_v7 = vld [vmem:[#allocation7_spill] sm:$0xff]  ;;  %v12585_v59 = vld [vmem:[#allocation114_spill] sm:$0xff]  ;;  %vm12646_vm3 = vmmov %vm12643_vm0 }
0x3093   : > { %v4182_v47 = vsel %vm1143_vm11, %v12566_v31, %v12565_v33  ;;  %v12580_v12 = vld [vmem:[#allocation103_spill] sm:$0xff]  ;;  %vm12599_vm11 = vmmov %vm12593_vm9 }
0x3094   : > { %v3823_v22 = vadd.f32 %v3819_v27, %v3789_v2  ;;  %v12568_v27 = vld [vmem:[#allocation23_spill] sm:$0xff] }
0x3095   : > { %v4229_v45 = vsel %vm4227_vm4, %v12568_v27, %v12567_v20  ;;  %v12591_v27 = vld [vmem:[#allocation11_spill] sm:$0xff] }
0x3096   : > { %v3857_v24 = vadd.f32 %v3853_v37, %v3823_v22  ;;  %v12570_v37 = vld [vmem:[#allocation17_spill] sm:$0xff] }
0x3097   : > { %v4263_v22 = vsel %vm4227_vm4, %v12570_v37, %v12569_v49  ;;  %v12594_v37 = vld [vmem:[#allocation124_spill] sm:$0xff] }
0x3098   : > { %v3891_v38 = vadd.f32 %v3887_v63, %v3857_v24  ;;  %v12571_v63 = vld [vmem:[#allocation5_spill] sm:$0xff] }
0x3099   : > { %v4297_v24 = vsel %vm4227_vm4, %v12572_v23, %v12571_v63  ;;  %v12597_v23 = vld [vmem:[#allocation126_spill] sm:$0xff] }
0x309a   : > { %v3937_v60 = vadd.f32 %v3933_v3, %v3891_v38  ;;  %v12576_v38 = vld [vmem:[#allocation101_spill] sm:$0xff] }
0x309c   : > { %v3971_v57 = vadd.f32 %v3967_v15, %v3937_v60  ;;  %v12578_v15 = vld [vmem:[#allocation102_spill] sm:$0xff] }
0x309d   : > { %v4423_v60 = vsel %vm4387_vm6, %v12578_v15, %v12577_v28 }
0x309e   : > { %v4005_v46 = vadd.f32 %v4001_v9, %v3971_v57 }
0x30a0   : > { %v6008_v42 = vpop.permute.xlu1 %6007  ;;  %v4039_v25 = vadd.f32 %v4035_v29, %v4005_v46 }
0x30a1   : > { %v6022_v11 = vmul.f32 %v6013_v62, %v6008_v42  ;;  %v6023_v30 = vmul.f32 %v6017_v10, %v6008_v42  ;;  %v6024_v52 = vmul.f32 %v6021_v40, %v6008_v42  ;;  %v12573_v10 = vld [vmem:[#allocation6_spill] sm:$0xff] }
0x30a2   : > { %v4084_v61 = vadd.f32 %v4080_v26, %v4039_v25  ;;  %v4331_v3 = vsel %vm4227_vm4, %v12574_v16, %v12573_v10  ;;  %v12600_v10 = vld [vmem:[#allocation66_spill] sm:$0xff]  ;;  %vm12657_vm4 = vcmask 629760  }
0x30a3   : > { %6030 = vrot.lane.b32.xlu1 %v6023_v30, %s7522_s15  ;;  %6028 = vrot.lane.b32.xlu0 %v6022_v11, %s7522_s15  ;;  %v4389_v11 = vsel %vm4387_vm6, %v12576_v38, %v12575_v7  ;;  %v12601_v16 = vld [vmem:[#allocation14_spill] sm:$0xff]  ;;  %v12602_v7 = vld [vmem:[#allocation129_spill] sm:$0xff]  ;;  %v12603_v38 = vld [vmem:[#allocation128_spill] sm:$0xff] }
0x30a4   : > { %v4118_v4 = vadd.f32 %v4114_v35, %v4084_v61  ;;  %v12586_v35 = vld [vmem:[#allocation25_spill] sm:$0xff] }
0x30a5   : > { %v4562_v61 = vsel %vm1303_vm12, %v12586_v35, %v12585_v59  ;;  %v12611_v35 = vld [vmem:[#allocation139_spill] sm:$0xff] }
0x30a6   : > { %v4152_v19 = vadd.f32 %v4148_v34, %v4118_v4  ;;  %v12587_v34 = vld [vmem:[#allocation116_spill] sm:$0xff] }
0x30a7   : > { %6051 = vrot.lane.b32.xlu1 %v6046_v6, %s7595_s28  ;;  %6032 = vrot.lane.b32.xlu0 %v6024_v52, %s7522_s15  ;;  %v12579_v6 = vld [vmem:[#allocation108_spill] sm:$0xff]  ;;  %v12581_v52 = vld [vmem:[#allocation110_spill] sm:$0xff]  ;;  %s7597_s15 = smov 63  }
0x30a8   : > { %v4186_v2 = vadd.f32 %v4182_v47, %v4152_v19  ;;  %v4457_v9 = vsel %vm4387_vm6, %v12580_v12, %v12579_v6  ;;  %v4491_v29 = vsel %vm4387_vm6, %v12582_v44, %v12581_v52  ;;  %v12588_v4 = vld [vmem:[#allocation104_spill] sm:$0xff]  ;;  %v12589_v47 = vld [vmem:[#allocation118_spill] sm:$0xff]  ;;  %v12590_v19 = vld [vmem:[#allocation119_spill] sm:$0xff] }
0x30a9   : > { %v4596_v33 = vsel %vm1303_vm12, %v12588_v4, %v12587_v34  ;;  %v12606_v6 = vld [vmem:[#allocation131_spill] sm:$0xff]  ;;  %v12608_v44 = vld [vmem:[#allocation69_spill] sm:$0xff]  ;;  %v12614_v4 = vld [vmem:[#allocation136_spill] sm:$0xff] }
0x30aa   : > { %v4233_v56 = vadd.f32 %v4229_v45, %v4186_v2  ;;  %v12592_v45 = vld [vmem:[#allocation120_spill] sm:$0xff]  ;;  %v12613_v34 = vld [vmem:[#allocation141_spill] sm:$0xff]  ;;  %vm12659_vm6 = vmmov %vm12657_vm4 }
0x30ab   : > { %6064 = vperm.xlu1 %7414, %v10960_v1   ;;  %6053 = vrot.lane.b32.xlu0 %v6050_v43, %s7595_s28  ;;  %v12583_v43 = vld [vmem:[#allocation112_spill] sm:$0xff]  ;;  %v4675_v2 = vsel %vm12593_vm9, %v12592_v45, %v12591_v27  ;;  %v12617_v27 = vld [vmem:[#allocation145_spill] sm:$0xff]  ;;  %v12618_v45 = vld [vmem:[#allocation27_spill] sm:$0xff] }
0x30ac   : > { %v4267_v62 = vadd.f32 %v4263_v22, %v4233_v56  ;;  %v4528_v26 = vsel %vm1303_vm12, %v12584_v32, %v12583_v43  ;;  %v12595_v22 = vld [vmem:[#allocation121_spill] sm:$0xff]  ;;  %v12609_v43 = vld [vmem:[#allocation132_spill] sm:$0xff] }
0x30ad   : > { %v4709_v56 = vsel %vm12596_vm10, %v12595_v22, %v12594_v37  ;;  %v12619_v37 = vld [vmem:[#allocation147_spill] sm:$0xff]  ;;  %vm6055_vm10 = vcmask 531456  }
0x30ae   : > { %v4301_v42 = vadd.f32 %v4297_v24, %v4267_v62  ;;  %v12598_v24 = vld [vmem:[#allocation122_spill] sm:$0xff]  ;;  %v12620_v22 = vld [vmem:[#allocation31_spill] sm:$0xff] }
0x30af   : > { %7415 = vset.pattern.permute.xlu1 %v7596_v55  ;;  %v4630_v55 = vsel %vm1303_vm12, %v12590_v19, %v12589_v47  ;;  %v4743_v62 = vsel %vm12599_vm11, %v12598_v24, %v12597_v23  ;;  %vm12604_vm12 = vmmov %vm12593_vm9  ;;  %v12615_v47 = vld [vmem:[#allocation143_spill] sm:$0xff]  ;;  %v12616_v19 = vld [vmem:[#allocation137_spill] sm:$0xff]  ;;  %vm6091_vm11 = vcmask 515072  }
0x30b0   : > { %v4335_v30 = vadd.f32 %v4331_v3, %v4301_v42  ;;  %v4793_v3 = vrot.slane %v12601_v16, %v12600_v10  ;;  %v12621_v23 = vld [vmem:[#allocation149_spill] sm:$0xff]  ;;  %v12622_v24 = vld [vmem:[#allocation36_spill] sm:$0xff] }
0x30b2   : > { %v4393_v40 = vadd.f32 %v4389_v11, %v4335_v30  ;;  %v4777_v11 = vsel %vm12604_vm12, %v12603_v38, %v12602_v7  ;;  %v12605_v30 = vld [vmem:[#allocation67_spill] sm:$0xff]  ;;  %v12624_v7 = vld [vmem:[#allocation138_spill] sm:$0xff]  ;;  %vm12682_vm12 = vcmask 506880  }
0x30b3   : > { %v4809_v28 = vrot.slane %v12601_v16, %v12605_v30 }
0x30b4   : > { %v4427_v57 = vadd.f32 %v4423_v60, %v4393_v40  ;;  %v4795_v60 = vmul.f32 %v4793_v3, %v12474_v17 }
0x30b5   : > { %v4811_v12 = vmul.f32 %v4809_v28, %v12606_v6  ;;  %v12625_v28 = vld [vmem:[#allocation153_spill] sm:$0xff] }
0x30b6   : > { %v4461_v46 = vadd.f32 %v4457_v9, %v4427_v57  ;;  %v12607_v9 = vld [vmem:[#allocation68_spill] sm:$0xff]  ;;  %v12627_v6 = vld [vmem:[#allocation21_spill] sm:$0xff] }
0x30b7   : > { %v4825_v57 = vrot.slane %v12601_v16, %v12607_v9 }
0x30b8   : > { %v4495_v25 = vadd.f32 %v4491_v29, %v4461_v46  ;;  %v4841_v29 = vrot.slane %v12601_v16, %v12608_v44 }
0x30b9   : > { %v4827_v32 = vmul.f32 %v4825_v57, %v12609_v43 }
0x30ba   : > { %v4532_v51 = vadd.f32 %v4528_v26, %v4495_v25  ;;  %v12610_v26 = vld [vmem:[#allocation133_spill] sm:$0xff] }
0x30bb   : > { %v4843_v25 = vmul.f32 %v4841_v29, %v12610_v26  ;;  %v12629_v29 = vld [vmem:[#allocation159_spill] sm:$0xff]  ;;  %v12631_v26 = vld [vmem:[#allocation161_spill] sm:$0xff] }
0x30bc   : > { %v4566_v31 = vadd.f32 %v4562_v61, %v4532_v51  ;;  %v12612_v61 = vld [vmem:[#allocation135_spill] sm:$0xff] }
0x30bd   : > { %v4888_v17 = vsel %vm4886_vm7, %v12612_v61, %v12611_v35  ;;  %v12633_v61 = vld [vmem:[#allocation163_spill] sm:$0xff] }
0x30be   : > { %v4600_v20 = vadd.f32 %v4596_v33, %v4566_v31  ;;  %v4922_v33 = vsel %vm4886_vm7, %v12614_v4, %v12613_v34  ;;  %v12635_v4 = vld [vmem:[#allocation34_spill] sm:$0xff] }
0x30c0   : > { %v4634_v49 = vadd.f32 %v4630_v55, %v4600_v20  ;;  %v4956_v55 = vsel %vm4886_vm7, %v12616_v19, %v12615_v47  ;;  %v12638_v19 = vld [vmem:[#allocation169_spill] sm:$0xff] }
0x30c2   : > { %v4679_v63 = vadd.f32 %v4675_v2, %v4634_v49  ;;  %v4990_v2 = vsel %vm4886_vm7, %v12618_v45, %v12617_v27  ;;  %v12641_v45 = vld [vmem:[#allocation171_spill] sm:$0xff]  ;;  %vm12661_vm7 = vmmov %vm12657_vm4 }
0x30c4   : > { %v4713_v42 = vadd.f32 %v4709_v56, %v4679_v63  ;;  %v5027_v56 = vsel %vm2444_vm5, %v12620_v22, %v12619_v37  ;;  %v12644_v22 = vld [vmem:[#allocation173_spill] sm:$0xff] }
0x30c6   : > { %v4747_v15 = vadd.f32 %v4743_v62, %v4713_v42  ;;  %v5061_v62 = vsel %vm2444_vm5, %v12622_v24, %v12621_v23  ;;  %v12623_v42 = vld [vmem:[#allocation151_spill] sm:$0xff]  ;;  %v12647_v24 = vld [vmem:[#allocation48_spill] sm:$0xff] }
0x30c7   : > { %v5095_v38 = vsel %vm2444_vm5, %v12624_v7, %v12623_v42  ;;  %v12649_v7 = vld [vmem:[#allocation179_spill] sm:$0xff] }
0x30c8   : > { %v4781_v40 = vadd.f32 %v4777_v11, %v4747_v15  ;;  %v12626_v15 = vld [vmem:[#allocation154_spill] sm:$0xff] }
0x30ca   : > { %v4797_v52 = vadd.f32 %v4795_v60, %v4781_v40  ;;  %v5129_v60 = vsel %vm2444_vm5, %v12626_v15, %v12625_v28  ;;  %vm12640_vm5 = vmmov %vm12637_vm2  ;;  %v12651_v15 = vld [vmem:[#allocation181_spill] sm:$0xff] }
0x30cc   : > { %v4813_v46 = vadd.f32 %v4811_v12, %v4797_v52  ;;  %v12628_v12 = vld [vmem:[#allocation155_spill] sm:$0xff] }
0x30cd   : > { %v5187_v57 = vsel %vm5185_vm13, %v12628_v12, %v12627_v6  ;;  %v12653_v12 = vld [vmem:[#allocation183_spill] sm:$0xff] }
0x30ce   : > { %v4829_v59 = vadd.f32 %v4827_v32, %v4813_v46  ;;  %v12630_v46 = vld [vmem:[#allocation156_spill] sm:$0xff] }
0x30cf   : > { %v5221_v43 = vsel %vm5185_vm13, %v12630_v46, %v12629_v29  ;;  %v12655_v46 = vld [vmem:[#allocation189_spill] sm:$0xff] }
0x30d0   : > { %v4845_v51 = vadd.f32 %v4843_v25, %v4829_v59  ;;  %v12632_v25 = vld [vmem:[#allocation157_spill] sm:$0xff] }
0x30d1   : > { %v5255_v59 = vsel %vm5185_vm13, %v12632_v25, %v12631_v26  ;;  %v12658_v25 = vld [vmem:[#allocation191_spill] sm:$0xff] }
0x30d2   : > { %v4892_v31 = vadd.f32 %v4888_v17, %v4845_v51  ;;  %v12634_v17 = vld [vmem:[#allocation164_spill] sm:$0xff] }
0x30d3   : > { %v5289_v51 = vsel %vm5185_vm13, %v12634_v17, %v12633_v61  ;;  %v12660_v61 = vld [vmem:[#allocation193_spill] sm:$0xff]  ;;  %vm12664_vm13 = vmmov %vm12657_vm4 }
0x30d4   : > { %v4926_v20 = vadd.f32 %v4922_v33, %v4892_v31  ;;  %v12636_v33 = vld [vmem:[#allocation165_spill] sm:$0xff]  ;;  %v5702_v17 = vsel %vm12661_vm7, %v12527_v54, %v12660_v61  ;;  %vm6354_vm7 = vcmask 547840  }
0x30d5   : > { %v5336_v31 = vsel %vm12637_vm2, %v12636_v33, %v12635_v4  ;;  %v12663_v4 = vld [vmem:[#allocation196_spill] sm:$0xff]  ;;  %vm12683_vm2 = vmmov %vm12682_vm12 }
0x30d6   : > { %v4960_v49 = vadd.f32 %v4956_v55, %v4926_v20  ;;  %v12639_v55 = vld [vmem:[#allocation166_spill] sm:$0xff] }
0x30d7   : > { %v5370_v20 = vsel %vm12640_vm5, %v12639_v55, %v12638_v19  ;;  %vm12684_vm5 = vmmov %vm12683_vm2 }
0x30d8   : > { %v4994_v63 = vadd.f32 %v4990_v2, %v4960_v49  ;;  %v12642_v2 = vld [vmem:[#allocation167_spill] sm:$0xff] }
0x30d9   : > { %v5404_v49 = vsel %vm12643_vm0, %v12642_v2, %v12641_v45  ;;  %v12667_v45 = vld [vmem:[#allocation55_spill] sm:$0xff]  ;;  %vm12685_vm0 = vmmov %vm12683_vm2 }
0x30da   : > { %v5031_v3 = vadd.f32 %v5027_v56, %v4994_v63  ;;  %v12645_v56 = vld [vmem:[#allocation174_spill] sm:$0xff]  ;;  %v5862_v54 = vsel %vm5792_vm14, %v10670_v48, %v12667_v45 }
0x30db   : > { %v5438_v63 = vsel %vm12646_vm3, %v12645_v56, %v12644_v22  ;;  %v5999_v22 = vpop.permute.xlu0 %5998  ;;  %v12668_v56 = vld [vmem:[#allocation56_spill] sm:$0xff]  ;;  %vm12687_vm3 = vmmov %vm12685_vm0 }
0x30dc   : > { %v5065_v11 = vadd.f32 %v5061_v62, %v5031_v3  ;;  %v12648_v62 = vld [vmem:[#allocation175_spill] sm:$0xff] }
0x30dd   : > { %v5485_v3 = vsel %vm5483_vm1, %v12648_v62, %v12647_v24 }
0x30de   : > { %v5099_v40 = vadd.f32 %v5095_v38, %v5065_v11  ;;  %v12650_v38 = vld [vmem:[#allocation176_spill] sm:$0xff] }
0x30df   : > { %v5519_v11 = vsel %vm5483_vm1, %v12650_v38, %v12649_v7 }
0x30e0   : > { %v5133_v52 = vadd.f32 %v5129_v60, %v5099_v40  ;;  %v12652_v60 = vld [vmem:[#allocation177_spill] sm:$0xff] }
0x30e1   : > { %v5553_v40 = vsel %vm5483_vm1, %v12652_v60, %v12651_v15  ;;  %v12675_v60 = vld [vmem:[#allocation44_spill] sm:$0xff] }
0x30e2   : > { %v5191_v32 = vadd.f32 %v5187_v57, %v5133_v52  ;;  %v12654_v57 = vld [vmem:[#allocation184_spill] sm:$0xff] }
0x30e3   : > { %v5587_v52 = vsel %vm5483_vm1, %v12654_v57, %v12653_v12  ;;  %vm12669_vm1 = vmmov %vm12550_vm8 }
0x30e4   : > { %v5225_v35 = vadd.f32 %v5221_v43, %v5191_v32  ;;  %v12656_v43 = vld [vmem:[#allocation185_spill] sm:$0xff]  ;;  %vm12671_vm15 = vmmov %vm12669_vm1 }
0x30e5   : > { %v5634_v32 = vsel %vm12657_vm4, %v12656_v43, %v12655_v46  ;;  %vm12672_vm8 = vmmov %vm12669_vm1 }
0x30e6   : > { %v5259_v34 = vadd.f32 %v5255_v59, %v5225_v35  ;;  %v5668_v59 = vsel %vm12659_vm6, %v12524_v50, %v12658_v25  ;;  %v6001_v48 = vsel %vm12672_vm8, %v11028_v14, %v5999_v22  ;;  %vm12673_vm9 = vmmov %vm12669_vm1  ;;  %v12677_v14 = vld [vmem:[#allocation37_spill] sm:$0xff]  ;;  %v7598_v25 = vmov 86  }
0x30e7   : > { %vm12688_vm4 = vmmov %vm12685_vm0 }
0x30e8   : > { %v5293_v47 = vadd.f32 %v5289_v51, %v5259_v34  ;;  %v12662_v34 = vld [vmem:[#allocation195_spill] sm:$0xff]  ;;  %vm12689_vm6 = vmmov %vm12685_vm0 }
0x30e9   : > { %v5736_v33 = vsel %vm12664_vm13, %v12663_v4, %v12662_v34  ;;  %vm6390_vm13 = vcmask 498688  }
0x30ea   : > { %v5340_v27 = vadd.f32 %v5336_v31, %v5293_v47  ;;  %v12665_v47 = vld [vmem:[#allocation95_spill] sm:$0xff] }
0x30eb   : > { %v5794_v19 = vsel %vm5792_vm14, %v12531_v21, %v12665_v47  ;;  %v5933_v21 = vsel %vm12669_vm1, %v12668_v56, %v10964_v39 }
0x30ec   : > { %v5374_v37 = vadd.f32 %v5370_v20, %v5340_v27  ;;  %v12666_v20 = vld [vmem:[#allocation99_spill] sm:$0xff] }
0x30ed   : > { %v5828_v50 = vsel %vm5792_vm14, %v12532_v0, %v12666_v20 }
0x30ee   : > { %v5408_v23 = vadd.f32 %v5404_v49, %v5374_v37  ;;  %v5896_v49 = vsel %vm5792_vm14, %v10751_v5, %v10941_v13  ;;  %vm12674_vm14 = vmmov %vm12669_vm1 }
0x30ef   : > { %vm12708_vm1 = vmmov %vm12685_vm0 }
0x30f0   : > { %v5442_v42 = vadd.f32 %v5438_v63, %v5408_v23  ;;  %v12670_v23 = vld [vmem:[#allocation57_spill] sm:$0xff] }
0x30f1   : > { %v5967_v0 = vsel %vm12671_vm15, %v12670_v23, %v11020_v8  ;;  %vm12711_vm15 = vcmask 490496  }
0x30f2   : > { %v5489_v28 = vadd.f32 %v5485_v3, %v5442_v42 }
0x30f4   : > { %v5523_v6 = vadd.f32 %v5519_v11, %v5489_v28 }
0x30f6   : > { %v5557_v29 = vadd.f32 %v5553_v40, %v5523_v6  ;;  %v12676_v6 = vld [vmem:[#allocation42_spill] sm:$0xff] }
0x30f8   : > { %v5591_v26 = vadd.f32 %v5587_v52, %v5557_v29 }
0x30fa   : > { %v5638_v35 = vadd.f32 %v5634_v32, %v5591_v26 }
0x30fc   : > { %v5672_v51 = vadd.f32 %v5668_v59, %v5638_v35 }
0x30fe   : > { %v5706_v31 = vadd.f32 %v5702_v17, %v5672_v51 }
0x3100   : > { %v5740_v55 = vadd.f32 %v5736_v33, %v5706_v31 }
0x3102   : > { %v5798_v27 = vadd.f32 %v5794_v19, %v5740_v55 }
0x3104   : > { %v5832_v2 = vadd.f32 %v5828_v50, %v5798_v27  ;;  %v7599_v27 = vmov 87  }
0x3106   : > { %v5866_v37 = vadd.f32 %v5862_v54, %v5832_v2 }
0x3108   : > { %v5900_v63 = vadd.f32 %v5896_v49, %v5866_v37 }
0x310a   : > { %v5937_v24 = vadd.f32 %v5933_v21, %v5900_v63 }
0x310c   : > { %v5971_v5 = vadd.f32 %v5967_v0, %v5937_v24 }
0x310e   : > { %v6005_v7 = vadd.f32 %v6001_v48, %v5971_v5  ;;  %v7600_v48 = vmov 88  }
0x3115   : > { %v6031_v62 = vpop.permute.xlu1 %6030  ;;  %v6029_v3 = vpop.permute.xlu0 %6028 }
0x3116   : > { %v6034_v42 = vsel %vm12673_vm9, %v6029_v3, %v6031_v62 }
0x3117   : > { %v6038_v13 = vadd.f32 %v6034_v42, %v11035_v53 }
0x3119   : > { %v6033_v38 = vpop.permute.xlu0 %6032  ;;  %v6052_v15 = vpop.permute.xlu1 %6051 }
0x311a   : > { %v6035_v39 = vsel %vm12674_vm14, %v6031_v62, %v6033_v38  ;;  %v11253_v40 = vmul.f32 %v6052_v15, %v12675_v60  ;;  %vm12712_vm14 = vmmov %vm12711_vm15 }
0x311b   : > { %v6039_v11 = vadd.f32 %v6035_v39, %v6005_v7 }
0x311c   : > { %v6070_v53 = vrot.slane %v11253_v40, %v12186_v36  ;;  %v6105_v33 = vrot.slane %v11253_v40, %v12182_v58  ;;  %v6139_v21 = vrot.slane %v11253_v40, %v11967_v18 }
0x311d   : > { %v6054_v28 = vpop.permute.xlu0 %6053 }
0x311e   : > { %v6056_v8 = vsel %vm6055_vm10, %v6052_v15, %v6054_v28  ;;  %v11259_v57 = vmul.f32 %v6054_v28, %v12677_v14  ;;  %v6173_v28 = vrot.slane %v11253_v40, %v7844_v41  ;;  %vm12713_vm10 = vmmov %vm12712_vm14 }
0x311f   : > { %v11256_v12 = vmul.f32 %v6056_v8, %v12676_v6 }
0x3120   : > { %v6078_v32 = vrot.slane %v11259_v57, %v12186_v36  ;;  %v6113_v20 = vrot.slane %v11259_v57, %v12182_v58  ;;  %v6147_v62 = vrot.slane %v11259_v57, %v11967_v18 }
0x3121   : > { %v6074_v52 = vrot.slane %v11256_v12, %v12186_v36  ;;  %v6109_v31 = vrot.slane %v11256_v12, %v12182_v58  ;;  %v6143_v63 = vrot.slane %v11256_v12, %v11967_v18  ;;  %v6177_v15 = vrot.slane %v11256_v12, %v7844_v41 }
0x312a   : > { %v6065_v29 = vpop.permute.xlu1 %6064 }
0x312b   : > { %v6079_v46 = vmul.f32 %v6070_v53, %v6065_v29  ;;  %v6080_v43 = vmul.f32 %v6074_v52, %v6065_v29  ;;  %v6081_v26 = vmul.f32 %v6078_v32, %v6065_v29  ;;  %v6181_v29 = vrot.slane %v11259_v57, %v7844_v41 }
0x312d   : > { %6085 = vrot.lane.b32.xlu0 %v6079_v46, %s7597_s15  ;;  %6087 = vrot.lane.b32.xlu1 %v6080_v43, %s7597_s15  ;;  %v7601_v43 = vmov 89  }
0x3131   : > { %6089 = vrot.lane.b32.xlu0 %v6081_v26, %s7597_s15  ;;  %6099 = vperm.xlu1 %7415, %v10960_v1  }
0x3135   : > { %7416 = vset.pattern.permute.xlu1 %v7598_v25 }
0x319f   : > { %v6088_v59 = vpop.permute.xlu1 %6087  ;;  %v6086_v35 = vpop.permute.xlu0 %6085 }
0x31a0   : > { %v6092_v61 = vsel %vm6091_vm11, %v6086_v35, %v6088_v59  ;;  %v12678_v35 = vld [vmem:[#allocation77_spill] sm:$0xff] }
0x31a1   : > { %v6096_v17 = vadd.f32 %v6092_v61, %v6038_v13  ;;  %v11311_v61 = vmul.f32 %v12675_v60, %v12678_v35  ;;  %v12686_v35 = vmov 0  }
0x31a3   : > { %v6090_v51 = vpop.permute.xlu0 %6089 }
0x31a4   : > { %v6093_v34 = vsel %vm6091_vm11, %v6088_v59, %v6090_v51 }
0x31a5   : > { %v6097_v4 = vadd.f32 %v6093_v34, %v6039_v11  ;;  %v12680_v34 = vld [vmem:[#allocation76_spill] sm:$0xff] }
0x31b0   : > { %v6100_v47 = vpop.permute.xlu1 %6099 }
0x31b1   : > { %v6114_v19 = vmul.f32 %v6105_v33, %v6100_v47  ;;  %v6115_v55 = vmul.f32 %v6109_v31, %v6100_v47  ;;  %v6116_v50 = vmul.f32 %v6113_v20, %v6100_v47  ;;  %v6210_v33 = vrot.slane %v11311_v61, %v12186_v36 }
0x31b3   : > { %6122 = vrot.lane.b32.xlu1 %v6115_v55, %s7597_s15  ;;  %6120 = vrot.lane.b32.xlu0 %v6114_v19, %s7597_s15 }
0x31b7   : > { %6133 = vperm.xlu1 %7416, %v10960_v1   ;;  %6124 = vrot.lane.b32.xlu0 %v6116_v50, %s7597_s15 }
0x31bb   : > { %7417 = vset.pattern.permute.xlu1 %v7599_v27  ;;  %v7602_v27 = vmov 90  }
0x3225   : > { %v6123_v45 = vpop.permute.xlu1 %6122  ;;  %v6121_v54 = vpop.permute.xlu0 %6120 }
0x3226   : > { %v6126_v2 = vsel %vm6091_vm11, %v6121_v54, %v6123_v45 }
0x3227   : > { %v6130_v49 = vadd.f32 %v6126_v2, %v6096_v17  ;;  %v12679_v17 = vld [vmem:[#allocation78_spill] sm:$0xff] }
0x3228   : > { %v11315_v51 = vmul.f32 %v12676_v6, %v12679_v17 }
0x3229   : > { %v6125_v37 = vpop.permute.xlu0 %6124 }
0x322a   : > { %v6127_v22 = vsel %vm6091_vm11, %v6123_v45, %v6125_v37  ;;  %v6214_v31 = vrot.slane %v11315_v51, %v12186_v36 }
0x322b   : > { %v6131_v56 = vadd.f32 %v6127_v22, %v6097_v4  ;;  %v11319_v4 = vmul.f32 %v12677_v14, %v12680_v34 }
0x322d   : > { %v6218_v20 = vrot.slane %v11319_v4, %v12186_v36 }
0x3236   : > { %v6134_v23 = vpop.permute.xlu1 %6133 }
0x3237   : > { %v6148_v0 = vmul.f32 %v6139_v21, %v6134_v23  ;;  %v6149_v24 = vmul.f32 %v6143_v63, %v6134_v23  ;;  %v6150_v3 = vmul.f32 %v6147_v62, %v6134_v23  ;;  %v6244_v21 = vrot.slane %v11311_v61, %v12182_v58 }
0x3238   : > { %v6248_v63 = vrot.slane %v11315_v51, %v12182_v58  ;;  %v6252_v62 = vrot.slane %v11319_v4, %v12182_v58 }
0x3239   : > { %6156 = vrot.lane.b32.xlu1 %v6149_v24, %s7597_s15  ;;  %6154 = vrot.lane.b32.xlu0 %v6148_v0, %s7597_s15 }
0x323d   : > { %6167 = vperm.xlu1 %7417, %v10960_v1   ;;  %6158 = vrot.lane.b32.xlu0 %v6150_v3, %s7597_s15 }
0x3241   : > { %7418 = vset.pattern.permute.xlu1 %v7600_v48  ;;  %v7603_v48 = vmov 91  }
0x32ab   : > { %v6157_v42 = vpop.permute.xlu1 %6156  ;;  %v6155_v5 = vpop.permute.xlu0 %6154 }
0x32ac   : > { %v6160_v13 = vsel %vm6091_vm11, %v6155_v5, %v6157_v42 }
0x32ad   : > { %v6164_v7 = vadd.f32 %v6160_v13, %v6130_v49 }
0x32af   : > { %v6159_v38 = vpop.permute.xlu0 %6158 }
0x32b0   : > { %v6161_v39 = vsel %vm6091_vm11, %v6157_v42, %v6159_v38 }
0x32b1   : > { %v6165_v11 = vadd.f32 %v6161_v39, %v6131_v56 }
0x32bc   : > { %v6168_v8 = vpop.permute.xlu1 %6167 }
0x32bd   : > { %v6182_v53 = vmul.f32 %v6173_v28, %v6168_v8  ;;  %v6183_v52 = vmul.f32 %v6177_v15, %v6168_v8  ;;  %v6184_v46 = vmul.f32 %v6181_v29, %v6168_v8  ;;  %v6278_v28 = vrot.slane %v11311_v61, %v11967_v18 }
0x32be   : > { %v6282_v15 = vrot.slane %v11315_v51, %v11967_v18  ;;  %v6286_v29 = vrot.slane %v11319_v4, %v11967_v18 }
0x32bf   : > { %6190 = vrot.lane.b32.xlu1 %v6183_v52, %s7597_s15  ;;  %6188 = vrot.lane.b32.xlu0 %v6182_v53, %s7597_s15 }
0x32c3   : > { %6204 = vperm.xlu1 %7418, %v10960_v1   ;;  %6192 = vrot.lane.b32.xlu0 %v6184_v46, %s7597_s15  ;;  %s12722_s15 = sshll.u32 %s12724_s22, 3 }
0x32c4   : > { %s413_s17 = scalar_lea.vmem %s11613_s12, %s12722_s15 }
0x32c7   : > { %7419 = vset.pattern.permute.xlu1 %v7601_v43  ;;  %v7099_v43 = vld [vmem:[%s11601_s0 + $0x27] ss:$8 sm:$0x3] }
0x3331   : > { %v6191_v40 = vpop.permute.xlu1 %6190  ;;  %v6189_v32 = vpop.permute.xlu0 %6188 }
0x3332   : > { %v6194_v12 = vsel %vm6091_vm11, %v6189_v32, %v6191_v40  ;;  %v6349_v32 = vrot.slane %v7099_v43, %v12182_v58 }
0x3333   : > { %v6198_v26 = vadd.f32 %v6194_v12, %v6164_v7  ;;  %v7606_v12 = vmov 94  }
0x3335   : > { %v6193_v25 = vpop.permute.xlu0 %6192 }
0x3336   : > { %v6195_v59 = vsel %vm6091_vm11, %v6191_v40, %v6193_v25  ;;  %v7604_v40 = vmov 92   ;;  %v7608_v25 = vmov 95   ;;  %vm12714_vm11 = vmmov %vm12713_vm10 }
0x3337   : > { %v6199_v57 = vadd.f32 %v6195_v59, %v6165_v11  ;;  %v7609_v59 = vmov 97  }
0x3342   : > { %v6205_v47 = vpop.permute.xlu1 %6204 }
0x3343   : > { %v6219_v19 = vmul.f32 %v6210_v33, %v6205_v47  ;;  %v6220_v55 = vmul.f32 %v6214_v31, %v6205_v47  ;;  %v6221_v50 = vmul.f32 %v6218_v20, %v6205_v47  ;;  %v6312_v20 = vrot.slane %v11311_v61, %v7844_v41 }
0x3344   : > { %v7611_v61 = vmov 96  }
0x3345   : > { %6227 = vrot.lane.b32.xlu1 %v6220_v55, %s12681_s23  ;;  %6225 = vrot.lane.b32.xlu0 %v6219_v19, %s12681_s23 }
0x3349   : > { %6238 = vperm.xlu1 %7419, %v10960_v1   ;;  %6229 = vrot.lane.b32.xlu0 %v6221_v50, %s12681_s23  ;;  %v6316_v50 = vrot.slane %v11315_v51, %v7844_v41  ;;  %v7612_v51 = vmov 99  }
0x334d   : > { %7420 = vset.pattern.permute.xlu1 %v7602_v27 }
0x33b7   : > { %v6228_v45 = vpop.permute.xlu1 %6227  ;;  %v6226_v54 = vpop.permute.xlu0 %6225 }
0x33b8   : > { %v6231_v2 = vsel %vm12682_vm12, %v6226_v54, %v6228_v45  ;;  %vm12715_vm12 = vmmov %vm12713_vm10 }
0x33b9   : > { %v6235_v49 = vadd.f32 %v6231_v2, %v6198_v26  ;;  %v7607_v26 = vmov 93   ;;  %v6320_v2 = vrot.slane %v11319_v4, %v7844_v41 }
0x33ba   : > { %7423 = vset.pattern.permute.xlu0 %v7607_v26 }
0x33bb   : > { %v6230_v37 = vpop.permute.xlu0 %6229 }
0x33bc   : > { %v6232_v22 = vsel %vm12683_vm2, %v6228_v45, %v6230_v37  ;;  %vm12716_vm2 = vmmov %vm12713_vm10 }
0x33bd   : > { %v6236_v56 = vadd.f32 %v6232_v22, %v6199_v57  ;;  %v7610_v57 = vmov 98  }
0x33c8   : > { %v6239_v23 = vpop.permute.xlu1 %6238 }
0x33c9   : > { %v6253_v0 = vmul.f32 %v6244_v21, %v6239_v23  ;;  %v6254_v24 = vmul.f32 %v6248_v63, %v6239_v23  ;;  %v6255_v3 = vmul.f32 %v6252_v62, %v6239_v23 }
0x33cb   : > { %6261 = vrot.lane.b32.xlu1 %v6254_v24, %s12681_s23  ;;  %6259 = vrot.lane.b32.xlu0 %v6253_v0, %s12681_s23 }
0x33cf   : > { %6272 = vperm.xlu1 %7420, %v10960_v1   ;;  %6263 = vrot.lane.b32.xlu0 %v6255_v3, %s12681_s23 }
0x33d3   : > { %7421 = vset.pattern.permute.xlu1 %v7603_v48 }
0x343d   : > { %v6262_v42 = vpop.permute.xlu1 %6261  ;;  %v6260_v5 = vpop.permute.xlu0 %6259 }
0x343e   : > { %v6265_v13 = vsel %vm12684_vm5, %v6260_v5, %v6262_v42  ;;  %vm12717_vm5 = vmmov %vm12716_vm2 }
0x343f   : > { %v6269_v7 = vadd.f32 %v6265_v13, %v6235_v49  ;;  %v6345_v49 = vrot.slane %v7099_v43, %v12186_v36 }
0x3441   : > { %v6264_v38 = vpop.permute.xlu0 %6263 }
0x3442   : > { %v6266_v39 = vsel %vm12685_vm0, %v6262_v42, %v6264_v38 }
0x3443   : > { %v6270_v11 = vadd.f32 %v6266_v39, %v6236_v56 }
0x344e   : > { %v6273_v8 = vpop.permute.xlu1 %6272 }
0x344f   : > { %v6287_v53 = vmul.f32 %v6278_v28, %v6273_v8  ;;  %v6288_v52 = vmul.f32 %v6282_v15, %v6273_v8  ;;  %v6289_v46 = vmul.f32 %v6286_v29, %v6273_v8 }
0x3451   : > { %6295 = vrot.lane.b32.xlu1 %v6288_v52, %s12681_s23  ;;  %6293 = vrot.lane.b32.xlu0 %v6287_v53, %s12681_s23 }
0x3455   : > { %6306 = vperm.xlu1 %7421, %v10960_v1   ;;  %6297 = vrot.lane.b32.xlu0 %v6289_v46, %s12681_s23 }
0x3459   : > { %7422 = vset.pattern.permute.xlu1 %v7604_v40 }
0x345a   : > { %6363 = vperm.xlu1 %7422, %v10960_v1  }
0x345e   : > { %6352 = vrot.lane.b32.xlu1 %v6349_v32, %s7605_s30 }
0x345f   : > { %7424 = vset.pattern.permute.xlu1 %v7606_v12 }
0x3462   : > { %6432 = vperm.xlu1 %7424, %v10960_v1  }
0x3466   : > { %7425 = vset.pattern.permute.xlu1 %v7608_v25 }
0x3467   : > { %6466 = vperm.xlu1 %7425, %v10960_v1  }
0x346b   : > { %7427 = vset.pattern.permute.xlu1 %v7609_v59 }
0x346c   : > { %6537 = vperm.xlu1 %7427, %v10960_v1  }
0x3470   : > { %7428 = vset.pattern.permute.xlu1 %v7610_v57 }
0x3471   : > { %6571 = vperm.xlu1 %7428, %v10960_v1  }
0x3475   : > { %7430 = vset.pattern.permute.xlu1 %v12686_v35 }
0x34c3   : > { %v6296_v17 = vpop.permute.xlu1 %6295  ;;  %v6294_v34 = vpop.permute.xlu0 %6293 }
0x34c4   : > { %v6299_v33 = vsel %vm12687_vm3, %v6294_v34, %v6296_v17  ;;  %vm12721_vm3 = vmmov %vm12716_vm2 }
0x34c5   : > { %v6303_v31 = vadd.f32 %v6299_v33, %v6269_v7  ;;  %v12690_v33 = vld [vmem:[#allocation91_spill] sm:$0xff] }
0x34c7   : > { %v6298_v47 = vpop.permute.xlu0 %6297 }
0x34c8   : > { %v6300_v19 = vsel %vm12688_vm4, %v6296_v17, %v6298_v47 }
0x34c9   : > { %v11368_v55 = vadd.f32 %v6300_v19, %v6270_v11 }
0x34d4   : > { %v6307_v27 = vpop.permute.xlu1 %6306 }
0x34d5   : > { %v6321_v45 = vmul.f32 %v6312_v20, %v6307_v27  ;;  %v6322_v54 = vmul.f32 %v6316_v50, %v6307_v27  ;;  %v6323_v37 = vmul.f32 %v6320_v2, %v6307_v27  ;;  %v12691_v20 = vld [vmem:[#allocation92_spill] sm:$0xff] }
0x34d6   : > { %v6500_v50 = vmul.f32 %v12676_v6, %v12691_v20 }
0x34d7   : > { %6329 = vrot.lane.b32.xlu1 %v6322_v54, %s12681_s23  ;;  %6327 = vrot.lane.b32.xlu0 %v6321_v45, %s12681_s23  ;;  %v12692_v54 = vld [vmem:[#allocation90_spill] sm:$0xff] }
0x34d8   : > { %v6501_v2 = vmul.f32 %v12677_v14, %v12692_v54 }
0x34d9   : > { %v6364_v4 = vpop.permute.xlu1 %6363 }
0x34db   : > { %6331 = vrot.lane.b32.xlu1 %v6323_v37, %s12681_s23  ;;  %6350 = vrot.lane.b32.xlu0 %v6345_v49, %s7605_s30 }
0x34dd   : > { %v6353_v22 = vpop.permute.xlu1 %6352 }
0x34de   : > { %v6361_v48 = vmul.f32 %v6353_v22, %v12677_v14 }
0x34df   : > { %6398 = vperm.xlu0 %7423, %v10960_v1  }
0x34e0   : > { %v6377_v11 = vrot.slane %v6361_v48, %v12186_v36  ;;  %v6412_v40 = vrot.slane %v6361_v48, %v12182_v58  ;;  %v6446_v32 = vrot.slane %v6361_v48, %v11967_v18  ;;  %v6480_v45 = vrot.slane %v6361_v48, %v7844_v41 }
0x34e1   : > { %v6433_v56 = vpop.permute.xlu1 %6432 }
0x34e2   : > { %v6380_v15 = vmul.f32 %v6377_v11, %v6364_v4  ;;  %v6449_v59 = vmul.f32 %v6446_v32, %v6433_v56  ;;  %v6615_v11 = vrot.slane %v6500_v50, %v7844_v41  ;;  %v12697_v32 = vmov 7  }
0x34e3   : > { %7426 = vset.pattern.permute.xlu0 %v7611_v61  ;;  %v6513_v61 = vrot.slane %v6500_v50, %v12186_v36 }
0x34e4   : > { %6503 = vperm.xlu0 %7426, %v10960_v1  }
0x34e6   : > { %v6467_v21 = vpop.permute.xlu1 %6466 }
0x34e8   : > { %7429 = vset.pattern.permute.xlu0 %v7612_v51  ;;  %v6517_v51 = vrot.slane %v6501_v2, %v12186_v36 }
0x34e9   : > { %6605 = vperm.xlu0 %7429, %v10960_v1  }
0x34eb   : > { %v11385_v63 = vpop.permute.xlu1 %6537 }
0x34ed   : > { %7431 = vset.pattern.permute.xlu0 %v12686_v35 }
0x34f0   : > { %v11387_v23 = vpop.permute.xlu1 %6571 }
0x3549   : > { %v11389_v0 = vpop.permute.xlu1 %6329  ;;  %v6328_v24 = vpop.permute.xlu0 %6327 }
0x354a   : > { %v6333_v62 = vsel %vm12689_vm6, %v6328_v24, %v11389_v0  ;;  %v6551_v24 = vrot.slane %v6501_v2, %v12182_v58 }
0x354b   : > { %v11393_v3 = vadd.f32 %v6333_v62, %v6303_v31  ;;  %v6499_v31 = vmul.f32 %v12675_v60, %v12690_v33  ;;  %v12704_v33 = vmov 10  }
0x354d   : > { %v6351_v1 = vpop.permute.xlu0 %6350  ;;  %v6509_v49 = vrot.slane %v6499_v31, %v12186_v36  ;;  %v6543_v14 = vrot.slane %v6499_v31, %v12182_v58  ;;  %v6577_v62 = vrot.slane %v6499_v31, %v11967_v18  ;;  %v6332_v20 = vpop.permute.xlu1 %6331 }
0x354e   : > { %v6355_v42 = vsel %vm6354_vm7, %v6351_v1, %v6353_v22  ;;  %v6359_v5 = vmul.f32 %v6351_v1, %v12675_v60  ;;  %v6483_v60 = vmul.f32 %v6480_v45, %v6467_v21  ;;  %v6547_v22 = vrot.slane %v6500_v50, %v12182_v58 }
0x354f   : > { %v6360_v13 = vmul.f32 %v6355_v42, %v12676_v6  ;;  %v6554_v1 = vmul.f32 %v6551_v24, %v11385_v63  ;;  %v6586_v48 = vmul.f32 %v6577_v62, %v11387_v23  ;;  %v6581_v42 = vrot.slane %v6500_v50, %v11967_v18 }
0x3550   : > { %v6369_v7 = vrot.slane %v6359_v5, %v12186_v36  ;;  %v6404_v8 = vrot.slane %v6359_v5, %v12182_v58  ;;  %v6438_v43 = vrot.slane %v6359_v5, %v11967_v18  ;;  %v6472_v34 = vrot.slane %v6359_v5, %v7844_v41  ;;  %v6638_v5 = vld [vmem:[%s11608_s7] sm:$0xff] }
0x3551   : > { %v6373_v38 = vrot.slane %v6360_v13, %v12186_v36  ;;  %v6408_v53 = vrot.slane %v6360_v13, %v12182_v58  ;;  %v6442_v25 = vrot.slane %v6360_v13, %v11967_v18  ;;  %v6476_v17 = vrot.slane %v6360_v13, %v7844_v41 }
0x3552   : > { %v6378_v39 = vmul.f32 %v6369_v7, %v6364_v4  ;;  %v6447_v26 = vmul.f32 %v6438_v43, %v6433_v56  ;;  %v6481_v19 = vmul.f32 %v6472_v34, %v6467_v21  ;;  %v6587_v13 = vmul.f32 %v6581_v42, %v11387_v23  ;;  %v6728_v34 = vld [vmem:[%s11610_s9] sm:$0xf] }
0x3553   : > { %v6379_v28 = vmul.f32 %v6373_v38, %v6364_v4  ;;  %v6448_v57 = vmul.f32 %v6442_v25, %v6433_v56  ;;  %v6482_v47 = vmul.f32 %v6476_v17, %v6467_v21  ;;  %v6552_v56 = vmul.f32 %v6543_v14, %v11385_v63 }
0x3554   : > { %6384 = vrot.lane.b32.xlu0 %v6378_v39, %s7613_s20  ;;  %v6553_v21 = vmul.f32 %v6547_v22, %v11385_v63  ;;  %v6585_v7 = vrot.slane %v6501_v2, %v11967_v18  ;;  %v6742_v63 = vld [vmem:[%s11611_s10] sm:$0xf]  ;;  %v12695_v43 = vmov 2   ;;  %v12700_v25 = vmov 12  }
0x3555   : > { %6386 = vrot.lane.b32.xlu1 %v6379_v28, %s7613_s20  ;;  %v12693_v28 = vmov 1   ;;  %v12703_v17 = vmov 8   ;;  %v12707_v50 = vmov 14   ;;  %v6334_v42 = vsel %vm12708_vm1, %v11389_v0, %v6332_v20 }
0x3556   : > { %v6588_v38 = vmul.f32 %v6585_v7, %v11387_v23  ;;  %v6619_v23 = vrot.slane %v6501_v2, %v7844_v41 }
0x3558   : > { %6388 = vrot.lane.b32.xlu0 %v6380_v15, %s7613_s20 }
0x355e   : > { %v6399_v52 = vpop.permute.xlu0 %6398 }
0x355f   : > { %v6413_v29 = vmul.f32 %v6404_v8, %v6399_v52  ;;  %v6414_v46 = vmul.f32 %v6408_v53, %v6399_v52  ;;  %v6415_v12 = vmul.f32 %v6412_v40, %v6399_v52  ;;  %v6611_v8 = vrot.slane %v6499_v31, %v7844_v41  ;;  %v6662_v53 = vld [vmem:[%s11609_s8] sm:$0xf] }
0x3560   : > { %v12696_v40 = vmov 4   ;;  %v12705_v31 = vmov 11  }
0x3561   : > { %6421 = vrot.lane.b32.xlu0 %v6414_v46, %s7613_s20  ;;  %6419 = vrot.lane.b32.xlu1 %v6413_v29, %s7613_s20  ;;  %v12694_v29 = vmov 3  }
0x3563   : > { %v6504_v27 = vpop.permute.xlu0 %6503 }
0x3564   : > { %v6518_v37 = vmul.f32 %v6509_v49, %v6504_v27  ;;  %v6519_v6 = vmul.f32 %v6513_v61, %v6504_v27  ;;  %v6520_v4 = vmul.f32 %v6517_v51, %v6504_v27  ;;  %v6743_v27 = vld [vmem:[%s11612_s11] sm:$0xf] }
0x3565   : > { %6453 = vrot.lane.b32.xlu0 %v6447_v26, %s7613_s20  ;;  %6423 = vrot.lane.b32.xlu1 %v6415_v12, %s7613_s20  ;;  %v12698_v12 = vmov 9   ;;  %v12699_v26 = vmov 5  }
0x3568   : > { %v6606_v39 = vpop.permute.xlu0 %6605 }
0x3569   : > { %6457 = vrot.lane.b32.xlu0 %v6449_v59, %s7613_s20  ;;  %6455 = vrot.lane.b32.xlu1 %v6448_v57, %s7613_s20  ;;  %v6621_v15 = vmul.f32 %v6615_v11, %v6606_v39  ;;  %v6620_v52 = vmul.f32 %v6611_v8, %v6606_v39  ;;  %v6622_v46 = vmul.f32 %v6619_v23, %v6606_v39  ;;  %v12701_v59 = vmov 6  }
0x356a   : > { %v12702_v57 = vmov 15   ;;  %v6338_v11 = vadd.f32 %v6334_v42, %v11368_v55 }
0x356d   : > { %6489 = vrot.lane.b32.xlu0 %v6482_v47, %s7613_s20  ;;  %6487 = vrot.lane.b32.xlu1 %v6481_v19, %s7613_s20  ;;  %v12706_v47 = vmov 13  }
0x3571   : > { %6491 = vrot.lane.b32.xlu1 %v6483_v60, %s7613_s20  ;;  %6524 = vrot.lane.b32.xlu0 %v6518_v37, %s7526_s25 }
0x3575   : > { %6526 = vrot.lane.b32.xlu1 %v6519_v6, %s7526_s25  ;;  %6528 = vrot.lane.b32.xlu0 %v6520_v4, %s7526_s25 }
0x3579   : > { %6558 = vrot.lane.b32.xlu1 %v6552_v56, %s7526_s25  ;;  %6560 = vrot.lane.b32.xlu0 %v6553_v21, %s7526_s25 }
0x357d   : > { %6562 = vrot.lane.b32.xlu1 %v6554_v1, %s7526_s25  ;;  %6592 = vrot.lane.b32.xlu0 %v6586_v48, %s7526_s25 }
0x3581   : > { %6641 = vperm.xlu1 %7430, %v6638_v5   ;;  %6594 = vrot.lane.b32.xlu0 %v6587_v13, %s7526_s25 }
0x3585   : > { %6596 = vrot.lane.b32.xlu1 %v6588_v38, %s7526_s25  ;;  %6746 = vperm.xlu0 %7431, %v6742_v63  }
0x3586   : > { %7432 = vset.pattern.permute.xlu1 %v12693_v28 }
0x3589   : > { %6762 = vperm.xlu1 %7432, %v6742_v63   ;;  %6628 = vrot.lane.b32.xlu0 %v6621_v15, %s7526_s25 }
0x358d   : > { %6665 = vperm.xlu0 %7431, %v6662_v53   ;;  %6626 = vrot.lane.b32.xlu1 %v6620_v52, %s7526_s25 }
0x358e   : > { %7433 = vset.pattern.permute.xlu1 %v12694_v29 }
0x3591   : > { %7435 = vset.pattern.permute.xlu0 %v12695_v43  ;;  %6630 = vrot.lane.b32.xlu1 %v6622_v46, %s7526_s25  ;;  %v12710_v46 = vld [vmem:[#allocation13_spill] sm:$0xff] }
0x3592   : > { %6778 = vperm.xlu0 %7435, %v6742_v63   ;;  %v1743_v43 = vmul.f32 0.05, %v12710_v46  ;;  %vm1741_vm9 = vcmp.ge.f32.partialorder %v12710_v46, 0.0 }
0x3595   : > { %6794 = vperm.xlu1 %7433, %v6742_v63  }
0x3596   : > { %6697 = vperm.xlu0 %7435, %v6662_v53  }
0x3599   : > { %7434 = vset.pattern.permute.xlu1 %v12696_v40 }
0x359a   : > { %7440 = vset.pattern.permute.xlu0 %v12697_v32  ;;  %6810 = vperm.xlu1 %7434, %v6742_v63  }
0x359b   : > { %6858 = vperm.xlu0 %7440, %v6742_v63  }
0x359e   : > { %7436 = vset.pattern.permute.xlu1 %v12693_v28 }
0x359f   : > { %7443 = vset.pattern.permute.xlu0 %v12698_v12  ;;  %6681 = vperm.xlu1 %7436, %v6662_v53  }
0x35a0   : > { %6890 = vperm.xlu0 %7443, %v6742_v63  }
0x35a3   : > { %7437 = vset.pattern.permute.xlu1 %v12699_v26 }
0x35a4   : > { %6826 = vperm.xlu1 %7437, %v6742_v63   ;;  %7446 = vset.pattern.permute.xlu0 %v12700_v25 }
0x35a5   : > { %6938 = vperm.xlu0 %7446, %v6742_v63  }
0x35a8   : > { %7438 = vset.pattern.permute.xlu1 %v12701_v59 }
0x35a9   : > { %6842 = vperm.xlu1 %7438, %v6742_v63   ;;  %7449 = vset.pattern.permute.xlu0 %v12702_v57 }
0x35aa   : > { %6986 = vperm.xlu0 %7449, %v6742_v63  }
0x35ad   : > { %7439 = vset.pattern.permute.xlu1 %v12694_v29  ;;  %v12709_v29 = vld [vmem:[#allocation12_spill] sm:$0xff] }
0x35ae   : > { %6713 = vperm.xlu1 %7439, %v6662_v53   ;;  %7451 = vset.pattern.permute.xlu0 %v12686_v35  ;;  %vm1740_vm8 = vcmp.ge.f32.partialorder %v12709_v29, 0.0 }
0x35b2   : > { %7441 = vset.pattern.permute.xlu1 %v12703_v17 }
0x35b3   : > { %6874 = vperm.xlu1 %7441, %v6742_v63  }
0x35b7   : > { %7442 = vset.pattern.permute.xlu1 %v12686_v35 }
0x35b8   : > { %6731 = vperm.xlu1 %7442, %v6728_v34  }
0x35bc   : > { %7444 = vset.pattern.permute.xlu1 %v12704_v33 }
0x35bd   : > { %6906 = vperm.xlu1 %7444, %v6742_v63  }
0x35c1   : > { %7445 = vset.pattern.permute.xlu1 %v12705_v31 }
0x35c2   : > { %6922 = vperm.xlu1 %7445, %v6742_v63  }
0x35c6   : > { %7447 = vset.pattern.permute.xlu1 %v12706_v47  ;;  %v6385_v19 = vpop.permute.xlu0 %6384 }
0x35c7   : > { %6954 = vperm.xlu1 %7447, %v6742_v63   ;;  %v6387_v45 = vpop.permute.xlu1 %6386 }
0x35ca   : > { %v6389_v54 = vpop.permute.xlu0 %6388 }
0x35cb   : > { %7448 = vset.pattern.permute.xlu1 %v12707_v50  ;;  %v6392_v38 = vsel %vm6390_vm13, %v6387_v45, %v6389_v54 }
0x35cc   : > { %6970 = vperm.xlu1 %7448, %v6742_v63   ;;  %v6396_v53 = vadd.f32 %v6392_v38, %v6338_v11 }
0x35d0   : > { %7450 = vset.pattern.permute.xlu1 %v12686_v35  ;;  %v6391_v35 = vsel %vm6390_vm13, %v6385_v19, %v6387_v45  ;;  %v1745_v19 = vsel %vm1741_vm9, %v12710_v46, %v1743_v43 }
0x35d1   : > { %7003 = vperm.xlu1 %7450, %v6743_v27   ;;  %v6395_v13 = vadd.f32 %v6391_v35, %v11393_v3  ;;  %v1742_v3 = vmul.f32 0.05, %v12709_v29 }
0x35d3   : > { %v6420_v2 = vpop.permute.xlu1 %6419  ;;  %v6422_v49 = vpop.permute.xlu0 %6421  ;;  %v1744_v47 = vsel %vm1740_vm8, %v12709_v29, %v1742_v3 }
0x35d4   : > { %v6425_v5 = vsel %vm6390_vm13, %v6420_v2, %v6422_v49  ;;  %v6752_v2 = vrot.slane %v1744_v47, %v12186_v36  ;;  %v6800_v46 = vrot.slane %v1744_v47, %v7844_v41 }
0x35d5   : > { %v6429_v28 = vadd.f32 %v6425_v5, %v6395_v13 }
0x35d7   : > { %v6454_v60 = vpop.permute.xlu0 %6453  ;;  %v6424_v37 = vpop.permute.xlu1 %6423 }
0x35d8   : > { %v6426_v15 = vsel %vm6390_vm13, %v6422_v49, %v6424_v37  ;;  %v6756_v49 = vrot.slane %v1745_v19, %v12186_v36 }
0x35d9   : > { %v6430_v12 = vadd.f32 %v6426_v15, %v6396_v53 }
0x35db   : > { %v6458_v61 = vpop.permute.xlu0 %6457  ;;  %v6456_v51 = vpop.permute.xlu1 %6455 }
0x35dc   : > { %v6459_v39 = vsel %vm6390_vm13, %v6454_v60, %v6456_v51  ;;  %v6460_v40 = vsel %vm6390_vm13, %v6456_v51, %v6458_v61  ;;  %v6768_v51 = vrot.slane %v1744_v47, %v12182_v58 }
0x35dd   : > { %v6463_v0 = vadd.f32 %v6459_v39, %v6429_v28  ;;  %v6464_v59 = vadd.f32 %v6460_v40, %v6430_v12  ;;  %v6653_v12 = vmul.f32 2.0, %v12601_v16 }
0x35df   : > { %v6490_v6 = vpop.permute.xlu0 %6489  ;;  %v6488_v4 = vpop.permute.xlu1 %6487 }
0x35e0   : > { %v6493_v8 = vsel %vm6390_vm13, %v6488_v4, %v6490_v6 }
0x35e1   : > { %v6497_v26 = vadd.f32 %v6493_v8, %v6463_v0 }
0x35e3   : > { %v6525_v14 = vpop.permute.xlu0 %6524  ;;  %v6492_v22 = vpop.permute.xlu1 %6491 }
0x35e4   : > { %v6494_v55 = vsel %vm6390_vm13, %v6490_v6, %v6492_v22  ;;  %v6772_v6 = vrot.slane %v1745_v19, %v12182_v58 }
0x35e5   : > { %v6498_v20 = vadd.f32 %v6494_v55, %v6464_v59 }
0x35e7   : > { %v6529_v56 = vpop.permute.xlu0 %6528  ;;  %v6527_v21 = vpop.permute.xlu1 %6526 }
0x35e8   : > { %v6530_v32 = vsel %vm12711_vm15, %v6525_v14, %v6527_v21  ;;  %v6531_v33 = vsel %vm12713_vm10, %v6527_v21, %v6529_v56  ;;  %v6784_v56 = vrot.slane %v1744_v47, %v11967_v18  ;;  %v6788_v21 = vrot.slane %v1745_v19, %v11967_v18 }
0x35e9   : > { %v6534_v57 = vadd.f32 %v6530_v32, %v6497_v26  ;;  %v6535_v45 = vadd.f32 %v6531_v33, %v6498_v20  ;;  %v6804_v32 = vrot.slane %v1745_v19, %v7844_v41 }
0x35eb   : > { %v6561_v24 = vpop.permute.xlu0 %6560  ;;  %v6559_v62 = vpop.permute.xlu1 %6558 }
0x35ec   : > { %v6564_v25 = vsel %vm12712_vm14, %v6559_v62, %v6561_v24 }
0x35ed   : > { %v6568_v50 = vadd.f32 %v6564_v25, %v6534_v57 }
0x35ef   : > { %v6593_v1 = vpop.permute.xlu0 %6592  ;;  %v6563_v48 = vpop.permute.xlu1 %6562 }
0x35f0   : > { %v6565_v27 = vsel %vm12715_vm12, %v6561_v24, %v6563_v48  ;;  %v12718_v24 = vld [vmem:[#allocation43_spill] sm:$0xff] }
0x35f1   : > { %v6569_v14 = vadd.f32 %v6565_v27, %v6535_v45  ;;  %v3042_v62 = vmul.f32 0.05, %v12718_v24  ;;  %vm3040_vm0 = vcmp.ge.f32.partialorder %v12718_v24, 0.0 }
0x35f3   : > { %v6595_v7 = vpop.permute.xlu0 %6594  ;;  %v3044_v55 = vsel %vm3040_vm0, %v12718_v24, %v3042_v62 }
0x35f4   : > { %v6598_v31 = vsel %vm12714_vm11, %v6593_v1, %v6595_v7  ;;  %v12719_v1 = vld [vmem:[#allocation41_spill] sm:$0xff]  ;;  %v6848_v24 = vrot.slane %v3044_v55, %v11967_v18 }
0x35f5   : > { %v6602_v54 = vadd.f32 %v6598_v31, %v6568_v50  ;;  %v3043_v48 = vmul.f32 0.05, %v12719_v1  ;;  %vm3041_vm4 = vcmp.ge.f32.partialorder %v12719_v1, 0.0 }
0x35f7   : > { %v3045_v25 = vsel %vm3041_vm4, %v12719_v1, %v3043_v48  ;;  %v6864_v1 = vrot.slane %v3044_v55, %v7844_v41 }
0x35f8   : > { %v6820_v33 = vrot.slane %v3045_v25, %v12186_v36  ;;  %v6852_v62 = vrot.slane %v3045_v25, %v11967_v18  ;;  %v6868_v48 = vrot.slane %v3045_v25, %v7844_v41 }
0x3600   : > { %v11498_v63 = vpop.permute.xlu1 %6641 }
0x3604   : > { %v6597_v52 = vpop.permute.xlu1 %6596  ;;  %v6747_v23 = vpop.permute.xlu0 %6746 }
0x3605   : > { %v6599_v61 = vsel %vm12716_vm2, %v6595_v7, %v6597_v52  ;;  %v12720_v7 = vld [vmem:[#allocation15_spill] sm:$0xff]  ;;  %v6757_v11 = vmul.f32 %v6752_v2, %v6747_v23  ;;  %v6758_v28 = vmul.f32 %v6756_v49, %v6747_v23  ;;  %v6832_v2 = vrot.slane %v3044_v55, %v12182_v58 }
0x3606   : > { %v6603_v42 = vadd.f32 %v6599_v61, %v6569_v14  ;;  %v6652_v38 = vmul.f32 2.0, %v12720_v7  ;;  %v6836_v49 = vrot.slane %v3045_v25, %v12182_v58 }
0x3608   : > { %v6763_v17 = vpop.permute.xlu1 %6762  ;;  %v6629_v34 = vpop.permute.xlu0 %6628 }
0x3609   : > { %v6773_v35 = vmul.f32 %v6768_v51, %v6763_v17  ;;  %v6774_v5 = vmul.f32 %v6772_v6, %v6763_v17 }
0x360b   : > { %v6775_v3 = vadd.f32 %v6773_v35, %v6757_v11  ;;  %v6776_v43 = vadd.f32 %v6774_v5, %v6758_v28 }
0x360c   : > { %v6627_v60 = vpop.permute.xlu1 %6626  ;;  %v11520_v37 = vpop.permute.xlu0 %6665 }
0x360d   : > { %v6632_v4 = vsel %vm12717_vm5, %v6627_v60, %v6629_v34 }
0x360e   : > { %v6636_v22 = vadd.f32 %v6632_v4, %v6602_v54 }
0x3610   : > { %v11532_v13 = vadd.f32 %v11498_v63, %v6636_v22  ;;  %v6631_v39 = vpop.permute.xlu1 %6630 }
0x3611   : > { %v6633_v15 = vsel %vm12721_vm3, %v6629_v34, %v6631_v39  ;;  %v6779_v8 = vpop.permute.xlu0 %6778 }
0x3612   : > { %v6654_v53 = vadd.f32 %v6652_v38, %v11532_v13  ;;  %v6637_v0 = vadd.f32 %v6633_v15, %v6603_v42  ;;  %v6789_v52 = vmul.f32 %v6784_v56, %v6779_v8  ;;  %v6790_v29 = vmul.f32 %v6788_v21, %v6779_v8 }
0x3613   : > { %vm6646_vm13 = vcmp.ge.f32.partialorder %v11532_v13, 0.0  ;;  %v6648_v42 = vmul.f32 0.05, %v11532_v13 }
0x3614   : > { %v11540_v40 = vadd.f32 %v11498_v63, %v6637_v0  ;;  %v6795_v23 = vpop.permute.xlu1 %6794  ;;  %v6791_v26 = vadd.f32 %v6789_v52, %v6775_v3  ;;  %v6792_v59 = vadd.f32 %v6790_v29, %v6776_v43  ;;  %v6816_v63 = vrot.slane %v3044_v55, %v12186_v36 }
0x3615   : > { %v6805_v57 = vmul.f32 %v6800_v46, %v6795_v23  ;;  %v6806_v17 = vmul.f32 %v6804_v32, %v6795_v23  ;;  %v6698_v54 = vpop.permute.xlu0 %6697  ;;  %v6658_v60 = vmul.f32 0.05, %v6654_v53  ;;  %vm6656_vm6 = vcmp.ge.f32.partialorder %v6654_v53, 0.0 }
0x3616   : > { %v6655_v34 = vadd.f32 %v6653_v12, %v11540_v40  ;;  %vm6647_vm1 = vcmp.ge.f32.partialorder %v11540_v40, 0.0  ;;  %v6649_v7 = vmul.f32 0.05, %v11540_v40  ;;  %v6650_v32 = vsel %vm6646_vm13, %v11532_v13, %v6648_v42 }
0x3617   : > { %v6807_v47 = vadd.f32 %v6805_v57, %v6791_v26  ;;  %v6808_v19 = vadd.f32 %v6806_v17, %v6792_v59  ;;  %v6660_v56 = vsel %vm6656_vm6, %v6654_v53, %v6658_v60  ;;  %v6880_v13 = vrot.slane %v6650_v32, %v12186_v36 }
0x3618   : > { %v6659_v61 = vmul.f32 0.05, %v6655_v34  ;;  %vm6657_vm7 = vcmp.ge.f32.partialorder %v6655_v34, 0.0  ;;  %v6671_v11 = vrot.slane %v6660_v56, %v12600_v10  ;;  %v6687_v15 = vrot.slane %v6660_v56, %v12605_v30 }
0x3619   : > { %v6811_v31 = vpop.permute.xlu1 %6810  ;;  %v6703_v43 = vrot.slane %v6660_v56, %v12607_v9  ;;  %v6651_v25 = vsel %vm6647_vm1, %v11540_v40, %v6649_v7  ;;  %v6719_v17 = vrot.slane %v6660_v56, %v12608_v44 }
0x361a   : > { %v6821_v16 = vmul.f32 %v6816_v63, %v6811_v31  ;;  %v6822_v20 = vmul.f32 %v6820_v33, %v6811_v31  ;;  %v6661_v21 = vsel %vm6657_vm7, %v6655_v34, %v6659_v61  ;;  %v6859_v35 = vpop.permute.xlu0 %6858  ;;  %v6884_v63 = vrot.slane %v6651_v25, %v12186_v36 }
0x361b   : > { %v6675_v28 = vrot.slane %v6661_v21, %v12600_v10  ;;  %v6691_v8 = vrot.slane %v6661_v21, %v12605_v30  ;;  %v6869_v53 = vmul.f32 %v6864_v1, %v6859_v35  ;;  %v6870_v0 = vmul.f32 %v6868_v48, %v6859_v35 }
0x361c   : > { %v6823_v50 = vadd.f32 %v6821_v16, %v6807_v47  ;;  %v6824_v27 = vadd.f32 %v6822_v20, %v6808_v19  ;;  %v6676_v10 = vmul.f32 %v6671_v11, %v11520_v37  ;;  %v6707_v55 = vrot.slane %v6661_v21, %v12607_v9 }
0x361d   : > { %v6677_v30 = vmul.f32 %v6675_v28, %v11520_v37  ;;  %v6723_v34 = vrot.slane %v6661_v21, %v12608_v44  ;;  %v6708_v33 = vmul.f32 %v6703_v43, %v6698_v54  ;;  %v6896_v16 = vrot.slane %v6650_v32, %v12182_v58 }
0x361e   : > { %v6682_v45 = vpop.permute.xlu1 %6681  ;;  %v6709_v31 = vmul.f32 %v6707_v55, %v6698_v54  ;;  %v6900_v40 = vrot.slane %v6651_v25, %v12182_v58  ;;  %v6928_v28 = vrot.slane %v6650_v32, %v7844_v41 }
0x361f   : > { %v6692_v3 = vmul.f32 %v6687_v15, %v6682_v45  ;;  %v6693_v46 = vmul.f32 %v6691_v8, %v6682_v45  ;;  %v6891_v47 = vpop.permute.xlu0 %6890  ;;  %v6932_v15 = vrot.slane %v6651_v25, %v7844_v41 }
0x3620   : > { %v6902_v44 = vmul.f32 %v6900_v40, %v6891_v47 }
0x3621   : > { %v6694_v59 = vadd.f32 %v6692_v3, %v6676_v10  ;;  %v6695_v57 = vadd.f32 %v6693_v46, %v6677_v30 }
0x3623   : > { %v6827_v51 = vpop.permute.xlu1 %6826  ;;  %v6711_v45 = vadd.f32 %v6709_v31, %v6695_v57 }
0x3624   : > { %v6837_v6 = vmul.f32 %v6832_v2, %v6827_v51  ;;  %v6838_v4 = vmul.f32 %v6836_v49, %v6827_v51  ;;  %v6901_v2 = vmul.f32 %v6896_v16, %v6891_v47 }
0x3626   : > { %v6839_v14 = vadd.f32 %v6837_v6, %v6823_v50  ;;  %v6840_v22 = vadd.f32 %v6838_v4, %v6824_v27  ;;  %v6710_v27 = vadd.f32 %v6708_v33, %v6694_v59 }
0x3628   : > { %v6843_v5 = vpop.permute.xlu1 %6842 }
0x3629   : > { %v6853_v38 = vmul.f32 %v6848_v24, %v6843_v5  ;;  %v6854_v39 = vmul.f32 %v6852_v62, %v6843_v5  ;;  %v6912_v24 = vrot.slane %v6650_v32, %v11967_v18  ;;  %v6916_v62 = vrot.slane %v6651_v25, %v11967_v18 }
0x362b   : > { %v6855_v52 = vadd.f32 %v6853_v38, %v6839_v14  ;;  %v6856_v29 = vadd.f32 %v6854_v39, %v6840_v22 }
0x362d   : > { %v6714_v23 = vpop.permute.xlu1 %6713  ;;  %v6871_v12 = vadd.f32 %v6869_v53, %v6855_v52  ;;  %v6872_v26 = vadd.f32 %v6870_v0, %v6856_v29  ;;  %v6939_v52 = vpop.permute.xlu0 %6938 }
0x362e   : > { %v6724_v9 = vmul.f32 %v6719_v17, %v6714_v23  ;;  %v6725_v19 = vmul.f32 %v6723_v34, %v6714_v23 }
0x3630   : > { %v6726_v61 = vadd.f32 %v6724_v9, %v6710_v27  ;;  %v6727_v51 = vadd.f32 %v6725_v19, %v6711_v45 }
0x3632   : > { %v6875_v37 = vpop.permute.xlu1 %6874 }
0x3633   : > { %v6885_v20 = vmul.f32 %v6880_v13, %v6875_v37  ;;  %v6886_v50 = vmul.f32 %v6884_v63, %v6875_v37  ;;  %v6987_v13 = vpop.permute.xlu0 %6986 }
0x3635   : > { %v6887_v49 = vadd.f32 %v6885_v20, %v6871_v12  ;;  %v6888_v60 = vadd.f32 %v6886_v50, %v6872_v26 }
0x3637   : > { %v6732_v6 = vpop.permute.xlu1 %6731  ;;  %v6903_v54 = vadd.f32 %v6901_v2, %v6887_v49  ;;  %v6904_v4 = vadd.f32 %v6902_v44, %v6888_v60 }
0x3638   : > { %v6734_v14 = vadd.f32 %v6732_v6, %v6726_v61  ;;  %v6735_v22 = vadd.f32 %v6732_v6, %v6727_v51 }
0x363a   : > { %vm6736_vm15 = vcmp.ge.f32.partialorder %v6734_v14, 0.0  ;;  %vm6737_vm8 = vcmp.ge.f32.partialorder %v6735_v22, 0.0  ;;  %v6738_v56 = vmul.f32 0.05, %v6734_v14  ;;  %v6739_v21 = vmul.f32 0.05, %v6735_v22 }
0x363c   : > { %v6907_v1 = vpop.permute.xlu1 %6906  ;;  %v6740_v48 = vsel %vm6736_vm15, %v6734_v14, %v6738_v56  ;;  %v6741_v35 = vsel %vm6737_vm8, %v6735_v22, %v6739_v21 }
0x363d   : > { %v6917_v42 = vmul.f32 %v6912_v24, %v6907_v1  ;;  %v6918_v5 = vmul.f32 %v6916_v62, %v6907_v1  ;;  %v6944_v39 = vrot.slane %v6740_v48, %v12186_v36  ;;  %v6948_v11 = vrot.slane %v6741_v35, %v12186_v36 }
0x363e   : > { %v6960_v23 = vrot.slane %v6740_v48, %v12182_v58  ;;  %v6964_v12 = vrot.slane %v6741_v35, %v12182_v58  ;;  %v6992_v25 = vrot.slane %v6740_v48, %v7844_v41  ;;  %v6996_v57 = vrot.slane %v6741_v35, %v7844_v41 }
0x363f   : > { %v6919_v7 = vadd.f32 %v6917_v42, %v6903_v54  ;;  %v6920_v38 = vadd.f32 %v6918_v5, %v6904_v4  ;;  %v6949_v29 = vmul.f32 %v6944_v39, %v6939_v52  ;;  %v6950_v3 = vmul.f32 %v6948_v11, %v6939_v52 }
0x3640   : > { %v6976_v17 = vrot.slane %v6740_v48, %v11967_v18  ;;  %v6980_v34 = vrot.slane %v6741_v35, %v11967_v18  ;;  %v6997_v31 = vmul.f32 %v6992_v25, %v6987_v13  ;;  %v6998_v47 = vmul.f32 %v6996_v57, %v6987_v13 }
0x3641   : > { %v6923_v8 = vpop.permute.xlu1 %6922 }
0x3642   : > { %v6933_v53 = vmul.f32 %v6928_v28, %v6923_v8  ;;  %v6934_v0 = vmul.f32 %v6932_v15, %v6923_v8 }
0x3644   : > { %v6935_v46 = vadd.f32 %v6933_v53, %v6919_v7  ;;  %v6936_v43 = vadd.f32 %v6934_v0, %v6920_v38 }
0x3646   : > { %v6955_v26 = vpop.permute.xlu1 %6954  ;;  %v6951_v10 = vadd.f32 %v6949_v29, %v6935_v46  ;;  %v6952_v55 = vadd.f32 %v6950_v3, %v6936_v43 }
0x3647   : > { %v6965_v36 = vmul.f32 %v6960_v23, %v6955_v26  ;;  %v6966_v30 = vmul.f32 %v6964_v12, %v6955_v26 }
0x3649   : > { %v6967_v32 = vadd.f32 %v6965_v36, %v6951_v10  ;;  %v6968_v59 = vadd.f32 %v6966_v30, %v6952_v55 }
0x364b   : > { %v6971_v63 = vpop.permute.xlu1 %6970 }
0x364c   : > { %v6981_v33 = vmul.f32 %v6976_v17, %v6971_v63  ;;  %v6982_v58 = vmul.f32 %v6980_v34, %v6971_v63 }
0x364e   : > { %v6983_v9 = vadd.f32 %v6981_v33, %v6967_v32  ;;  %v6984_v19 = vadd.f32 %v6982_v58, %v6968_v59 }
0x3650   : > { %v7004_v37 = vpop.permute.xlu1 %7003  ;;  %v6999_v16 = vadd.f32 %v6997_v31, %v6983_v9  ;;  %v7000_v40 = vadd.f32 %v6998_v47, %v6984_v19 }
0x3652   : > { %v7006_v20 = vadd.f32 %v7004_v37, %v6999_v16  ;;  %v7007_v50 = vadd.f32 %v7004_v37, %v7000_v40 }
0x3654   : > { %v7010_v41 = vcombine.low %v7006_v20, %v7007_v50 }
0x3656   : > { %7012 = vst [vmem:[%s413_s17] sm:$0xff] %v7010_v41 }
0x3657 PF: > { %s22_s21 = sadd.s32 1, %s7465_s21  }
0x3658   : > { %p19_p4 = scmp.ge.s32.totalorder %s22_s21, 4  }
0x365a   :  { %21 = sbr.rel (!%p19_p4) target bundleno = 1 (0x1), region = 121 }

</bundles_post_ra>
